<compile_context>
chip_gen: v5e
topology: v5e:2x2
jax: 0.10.0
libtpu: 0.0.40
codegen_flags: <defaults>
</compile_context>

<pallas_src>
import functools

import jax
import jax.numpy as jnp
from jax.experimental import pallas as pl
from jax.experimental.pallas import tpu as pltpu

BN_EPS = 1e-5

# Worst-case per-call VMEM is ~10 MiB (layer4 conv2 weights, double buffered); 32 MiB
# is within the scoped limit / physical VMEM on v5e, v6e and v7x.
_CP = pltpu.CompilerParams(
    dimension_semantics=("arbitrary",),
    vmem_limit_bytes=32 * 1024 * 1024,
)


def _full_spec(shape):
    """Whole array as a single VMEM block (grid has one step)."""
    return pl.BlockSpec(tuple(shape), lambda i: (0,) * len(shape))


# ---------------------------------------------------------------------------
# Pallas kernels
# ---------------------------------------------------------------------------
def _bn_act(y, gamma, beta, res, relu):
    """Exact (two-pass) batch-norm + optional residual + optional ReLU, all in f32."""
    mean = jnp.mean(y, axis=0, keepdims=True)
    d = y - mean
    var = jnp.mean(d * d, axis=0, keepdims=True)          # biased var, like PyTorch fwd
    out = d * (gamma * jax.lax.rsqrt(var + BN_EPS)) + beta
    if res is not None:
        out = out + res.astype(jnp.float32)
    if relu:
        out = jnp.maximum(out, 0.0)
    return out


def _gemm_bn_kernel(*refs, relu, add_res):
    """y = patches @ w (bf16 MXU, f32 acc) -> BN -> [+res] -> [ReLU] -> bf16 store."""
    p_ref, w_ref, g_ref, b_ref = refs[:4]
    res_ref = refs[4] if add_res else None
    out_ref = refs[-1]
    y = jnp.dot(p_ref[...], w_ref[...], preferred_element_type=jnp.float32)
    out = _bn_act(y, g_ref[...], b_ref[...],
                  res_ref[...] if add_res else None, relu)
    out_ref[...] = out.astype(out_ref.dtype)


def _conv_taps_bn_kernel(*refs, taps, n, ho, wo, relu, add_res):
    """Conv as in-kernel sum over taps of (M,Cin)@(Cin,Cout) matmuls, fused with BN.

    refs = view_0..view_{P-1} (NHWC bf16), w (T,Cin,Cout) bf16, gamma (1,C), beta (1,C),
           [res (M,C) bf16], out (M,C) bf16.   `taps[t] = (view_idx, h_off, w_off)`.
    """
    num_views = max(t[0] for t in taps) + 1
    views = refs[:num_views]
    w_ref, g_ref, b_ref = refs[num_views:num_views + 3]
    res_ref = refs[num_views + 3] if add_res else None
    out_ref = refs[-1]

    m = n * ho * wo
    cout = out_ref.shape[-1]
    acc = jnp.zeros((m, cout), jnp.float32)
    for t, (vi, a0, b0) in enumerate(taps):
        tap = views[vi][:, a0:a0 + ho, b0:b0 + wo, :]       # (n, ho, wo, cin) bf16
        tap2 = tap.reshape(m, tap.shape[-1])                # wo % 8 == 0 -> layout-safe
        acc = acc + jnp.dot(tap2, w_ref[t], preferred_element_type=jnp.float32)

    out = _bn_act(acc, g_ref[...], b_ref[...],
                  res_ref[...] if add_res else None, relu)
    out_ref[...] = out.astype(out_ref.dtype)


def _maxpool_taps_kernel(*refs, taps, n, ho, wo):
    """Running elementwise max over the 3x3/stride-2 window taps, formed in-kernel."""
    num_views = max(t[0] for t in taps) + 1
    views = refs[:num_views]
    out_ref = refs[-1]
    m = n * ho * wo
    c = out_ref.shape[-1]
    acc = None
    for vi, a0, b0 in taps:
        tap = views[vi][:, a0:a0 + ho, b0:b0 + wo, :].reshape(m, c)
        acc = tap if acc is None else jnp.maximum(acc, tap)
    out_ref[...] = acc


# ---------------------------------------------------------------------------
# JAX-side glue: tap/parity decomposition (no HBM duplication)
# ---------------------------------------------------------------------------
def _build_tap_views(xp, kh, kw, stride, ho, wo):
    """Decompose a spatially padded NHWC tensor into views + static tap offsets so that
    conv tap (i, j) == views[v][:, a0:a0+ho, b0:b0+wo, :].

    stride == 1: a single view (the padded input itself).
    stride == 2: up to four parity views xp[:, pi::2, pj::2, :] -- a rearrangement of
    the input (total bytes == input bytes), unlike full im2col.
    """
    taps = []
    if stride == 1:
        for i in range(kh):
            for j in range(kw):
                taps.append((0, i, j))
        return [xp], taps

    assert stride == 2
    view_ids, order = {}, []
    for i in range(kh):
        for j in range(kw):
            key = (i % 2, j % 2)
            if key not in view_ids:
                view_ids[key] = len(order)
                order.append(key)
            taps.append((view_ids[key], i // 2, j // 2))

    views = []
    for vi, (pi, pj) in enumerate(order):
        v = xp[:, pi::2, pj::2, :]
        req_h = max(a0 + ho for t, a0, _ in taps if t == vi)
        req_w = max(b0 + wo for t, _, b0 in taps if t == vi)
        ph = max(0, req_h - v.shape[1])
        pw = max(0, req_w - v.shape[2])
        if ph or pw:                      # defensive; never triggers at these shapes
            v = jnp.pad(v, ((0, 0), (0, ph), (0, pw), (0, 0)))
        views.append(v)
    return views, taps


# ---------------------------------------------------------------------------
# Layer wrappers
# ---------------------------------------------------------------------------
def conv_bn_act(x, w, gamma, beta, *, stride, padding, relu=True, residual=None):
    """Fused Conv2d(bias=False)+BN(train)[+residual][+ReLU].

    x: (N,H,W,Cin) bf16 NHWC; w: (KH,KW,Cin,Cout) f32; returns (N,Ho,Wo,Cout) bf16.
    """
    N, H, W, Cin = x.shape
    KH, KW, _, Cout = w.shape
    Ho = (H + 2 * padding - KH) // stride + 1
    Wo = (W + 2 * padding - KW) // stride + 1
    M = N * Ho * Wo

    g = gamma.reshape(1, Cout).astype(jnp.float32)
    b = beta.reshape(1, Cout).astype(jnp.float32)
    add_res = residual is not None
    res2d = residual.reshape(M, Cout) if add_res else None        # bf16, free reshape

    xp = x if padding == 0 else jnp.pad(
        x, ((0, 0), (padding, padding), (padding, padding), (0, 0)))

    if Wo % 8 == 0 and Cin % 128 == 0:
        # Zero-duplication path: parity views + in-kernel tap matmuls.
        views, taps = _build_tap_views(xp, KH, KW, stride, Ho, Wo)
        wk = w.reshape(KH * KW, Cin, Cout).astype(jnp.bfloat16)
        args = list(views) + [wk, g, b] + ([res2d] if add_res else [])
        kern = functools.partial(_conv_taps_bn_kernel, taps=tuple(taps),
                                 n=N, ho=Ho, wo=Wo, relu=relu, add_res=add_res)
    else:
        # Stem (Cin=3) and tiny late layers (Wo in {2,4}): JAX im2col -> single GEMM.
        cols = [xp[:, i:i + stride * Ho:stride, j:j + stride * Wo:stride, :]
                for i in range(KH) for j in range(KW)]
        patches = (cols[0] if len(cols) == 1
                   else jnp.concatenate(cols, axis=-1)).reshape(M, KH * KW * Cin)
        wk = w.reshape(KH * KW * Cin, Cout).astype(jnp.bfloat16)
        args = [patches, wk, g, b] + ([res2d] if add_res else [])
        kern = functools.partial(_gemm_bn_kernel, relu=relu, add_res=add_res)

    out = pl.pallas_call(
        kern,
        grid=(1,),
        in_specs=[_full_spec(a.shape) for a in args],
        out_specs=_full_spec((M, Cout)),
        out_shape=jax.ShapeDtypeStruct((M, Cout), jnp.bfloat16),
        compiler_params=_CP,
    )(*args)
    return out.reshape(N, Ho, Wo, Cout)


def maxpool_3x3_s2_p1(x):
    """nn.MaxPool2d(kernel_size=3, stride=2, padding=1) on NHWC bf16 (post-ReLU)."""
    N, H, W, C = x.shape
    Ho = (H + 2 - 3) // 2 + 1
    Wo = (W + 2 - 3) // 2 + 1
    neg = float(jnp.finfo(jnp.bfloat16).min)   # input >= 0, so this matches -inf pad
    xp = jnp.pad(x, ((0, 0), (1, 1), (1, 1), (0, 0)), constant_values=neg)
    views, taps = _build_tap_views(xp, 3, 3, 2, Ho, Wo)
    out = pl.pallas_call(
        functools.partial(_maxpool_taps_kernel, taps=tuple(taps), n=N, ho=Ho, wo=Wo),
        grid=(1,),
        in_specs=[_full_spec(v.shape) for v in views],
        out_specs=_full_spec((N * Ho * Wo, C)),
        out_shape=jax.ShapeDtypeStruct((N * Ho * Wo, C), x.dtype),
        compiler_params=_CP,
    )(*views)
    return out.reshape(N, Ho, Wo, C)


def adaptive_avgpool_1x1(x):
    """nn.AdaptiveAvgPool2d((1,1)) in plain JAX (moves ~KBs; a kernel launch costs more)."""
    return jnp.mean(x.astype(jnp.float32), axis=(1, 2))[:, :, None, None]   # (N,C,1,1)


# ---------------------------------------------------------------------------
# FidResNet (BasicBlock) construction + forward
# ---------------------------------------------------------------------------
def _kaiming_conv(key, kh, kw, cin, cout):
    # nn.init.kaiming_normal_(mode='fan_out', nonlinearity='relu')
    fan_out = cout * kh * kw
    std = (2.0 / fan_out) ** 0.5
    return jax.random.normal(key, (kh, kw, cin, cout), jnp.float32) * std


def _stored(c):
    # Pad 64-channel stages to 128 stored channels for lane-dense (128-lane) stores.
    return max(c, 128)


def _pad_channels(w, cin_s, cout_s):
    kh, kw, cin, cout = w.shape
    return jnp.pad(w, ((0, 0), (0, 0), (0, cin_s - cin), (0, cout_s - cout)))


def init_fid_resnet_params(key, layers=(1, 1, 1, 1)):
    keys = iter(jax.random.split(key, 64))
    c1s = _stored(64)
    params = {
        "conv1": _pad_channels(_kaiming_conv(next(keys), 7, 7, 3, 64), 3, c1s),
        "bn1": (jnp.ones(c1s, jnp.float32), jnp.zeros(c1s, jnp.float32)),
        "layers": [],
        "real_planes": (64, 128, 256, 512),
    }
    inplanes_r, inplanes_s = 64, c1s
    for planes, nblocks, lstride in zip((64, 128, 256, 512), layers, (1, 2, 2, 2)):
        planes_s = _stored(planes)
        blocks = []
        for bi in range(nblocks):
            stride = lstride if bi == 0 else 1
            blk = {
                "stride": stride,
                "w1": _pad_channels(_kaiming_conv(next(keys), 3, 3, inplanes_r, planes),
                                    inplanes_s, planes_s),
                "bn1": (jnp.ones(planes_s, jnp.float32), jnp.zeros(planes_s, jnp.float32)),
                "w2": _pad_channels(_kaiming_conv(next(keys), 3, 3, planes, planes),
                                    planes_s, planes_s),
                "bn2": (jnp.ones(planes_s, jnp.float32), jnp.zeros(planes_s, jnp.float32)),
            }
            if stride != 1 or inplanes_r != planes:          # BasicBlock.expansion == 1
                blk["wd"] = _pad_channels(
                    _kaiming_conv(next(keys), 1, 1, inplanes_r, planes),
                    inplanes_s, planes_s)
                blk["bnd"] = (jnp.ones(planes_s, jnp.float32),
                              jnp.zeros(planes_s, jnp.float32))
            blocks.append(blk)
            inplanes_r, inplanes_s = planes, planes_s
        params["layers"].append(blocks)
    return params


def basic_block_forward(x, blk):
    s = blk["stride"]
    out = conv_bn_act(x, blk["w1"], *blk["bn1"], stride=s, padding=1, relu=True)
    if "wd" in blk:
        identity = conv_bn_act(x, blk["wd"], *blk["bnd"], stride=s, padding=0, relu=False)
    else:
        identity = x
    # conv2 -> bn2 -> (+identity) -> relu, all fused into one kernel.
    out = conv_bn_act(out, blk["w2"], *blk["bn2"], stride=1, padding=1,
                      relu=True, residual=identity)
    return out


def _feat_nchw(x, real_c):
    """Drop lane-padding channels, return NCHW f32 feature map."""
    return jnp.transpose(x[..., :real_c], (0, 3, 1, 2)).astype(jnp.float32)


def fid_resnet_forward(params, x_nchw, output_blocks=(3,)):
    """Mirrors FidResNet._forward_impl (including its quirky block-index checks)."""
    x = jnp.transpose(x_nchw.astype(jnp.float32), (0, 2, 3, 1)).astype(jnp.bfloat16)
    x = conv_bn_act(x, params["conv1"], *params["bn1"], stride=2, padding=3, relu=True)
    x = maxpool_3x3_s2_p1(x)

    real = params["real_planes"]
    outp = []
    for blk in params["layers"][0]:          # layer1
        x = basic_block_forward(x, blk)
    if 0 in output_blocks:
        outp.append(_feat_nchw(x, real[0]))
    for blk in params["layers"][1]:          # layer2
        x = basic_block_forward(x, blk)
    if 1 in output_blocks:
        outp.append(_feat_nchw(x, real[1]))
    for blk in params["layers"][2]:          # layer3
        x = basic_block_forward(x, blk)
    if 3 in output_blocks:                   # (sic) matches the reference code
        outp.append(_feat_nchw(x, real[2]))
    for blk in params["layers"][3]:          # layer4
        x = basic_block_forward(x, blk)
    pooled = adaptive_avgpool_1x1(x[..., :real[3]])   # (N, C, 1, 1)
    if 4 in output_blocks:
        outp.append(pooled)
    return outp


if __name__ == "__main__":
    key = jax.random.PRNGKey(0)
    kp, kx = jax.random.split(key)

    params = init_fid_resnet_params(kp, layers=(1, 1, 1, 1))
    x = jax.random.normal(kx, (2, 3, 64, 64), jnp.float32)   # NCHW, 3-channel input

    outs = fid_resnet_forward(params, x)      # default output_blocks=(3,)
    outs = jax.block_until_ready(outs)

    assert len(outs) == 1
    assert outs[0].shape == (2, 256, 4, 4), outs[0].shape
    assert bool(jnp.all(jnp.isfinite(outs[0])))
    print("KERNEL_OK")
</pallas_src>

<mosaic_0001>
module attributes {stable_mosaic.version = 11 : i64} {
  func.func @_gemm_bn_kernel(%arg0: i32, %arg1: memref<2048x147xbf16, #tpu.memory_space<vmem>>, %arg2: memref<147x128xbf16, #tpu.memory_space<vmem>>, %arg3: memref<1x128xf32, #tpu.memory_space<vmem>>, %arg4: memref<1x128xf32, #tpu.memory_space<vmem>>, %arg5: memref<2048x128xbf16, #tpu.memory_space<vmem>>) attributes {dimension_semantics = [#tpu.dimension_semantics<arbitrary>], iteration_bounds = array<i64: 1>, scalar_prefetch = 0 : i64, scratch_operands = 0 : i64, tpu.core_type = #tpu.core_type<tc>, window_params = [{pipeline_mode = #tpu.pipeline_mode<synchronous>, transform_indices = @transform_0, window_bounds = array<i64: 2048, 147>}, {pipeline_mode = #tpu.pipeline_mode<synchronous>, transform_indices = @transform_1, window_bounds = array<i64: 147, 128>}, {pipeline_mode = #tpu.pipeline_mode<synchronous>, transform_indices = @transform_2, window_bounds = array<i64: 1, 128>}, {pipeline_mode = #tpu.pipeline_mode<synchronous>, transform_indices = @transform_3, window_bounds = array<i64: 1, 128>}, {pipeline_mode = #tpu.pipeline_mode<synchronous>, transform_indices = @transform_4, window_bounds = array<i64: 2048, 128>}]} {
    %c0 = arith.constant 0 : index
    %c0_0 = arith.constant 0 : index
    %0 = vector.load %arg1[%c0, %c0_0] : memref<2048x147xbf16, #tpu.memory_space<vmem>>, vector<2048x147xbf16>
    %c0_1 = arith.constant 0 : index
    %c0_2 = arith.constant 0 : index
    %1 = vector.load %arg2[%c0_1, %c0_2] : memref<147x128xbf16, #tpu.memory_space<vmem>>, vector<147x128xbf16>
    %cst = arith.constant dense<0.000000e+00> : vector<2048x128xf32>
    %2 = tpu.matmul %0, %1, %cst {dimension_numbers = #tpu.dot_dimension_numbers<[1], [0], [0], [1], [0, 0, 1, 1], [], []>} : vector<2048x147xbf16>, vector<147x128xbf16>, vector<2048x128xf32> -> vector<2048x128xf32>
    %c0_3 = arith.constant 0 : index
    %c0_4 = arith.constant 0 : index
    %3 = vector.load %arg3[%c0_3, %c0_4] : memref<1x128xf32, #tpu.memory_space<vmem>>, vector<1x128xf32>
    %c0_5 = arith.constant 0 : index
    %c0_6 = arith.constant 0 : index
    %4 = vector.load %arg4[%c0_5, %c0_6] : memref<1x128xf32, #tpu.memory_space<vmem>>, vector<1x128xf32>
    %cst_7 = arith.constant dense<0.000000e+00> : vector<128xf32>
    %5 = vector.multi_reduction <add>, %2, %cst_7 [0] : vector<2048x128xf32> to vector<128xf32>
    %6 = vector.shape_cast %5 : vector<128xf32> to vector<1x128xf32>
    %cst_8 = arith.constant 2.048000e+03 : f32
    %7 = vector.broadcast %cst_8 : f32 to vector<1x128xf32>
    %8 = arith.divf %6, %7 : vector<1x128xf32>
    %9 = vector.broadcast %8 : vector<1x128xf32> to vector<2048x128xf32>
    %10 = arith.subf %2, %9 : vector<2048x128xf32>
    %11 = arith.mulf %10, %10 : vector<2048x128xf32>
    %cst_9 = arith.constant dense<0.000000e+00> : vector<128xf32>
    %12 = vector.multi_reduction <add>, %11, %cst_9 [0] : vector<2048x128xf32> to vector<128xf32>
    %13 = vector.shape_cast %12 : vector<128xf32> to vector<1x128xf32>
    %cst_10 = arith.constant 2.048000e+03 : f32
    %14 = vector.broadcast %cst_10 : f32 to vector<1x128xf32>
    %15 = arith.divf %13, %14 : vector<1x128xf32>
    %cst_11 = arith.constant 9.99999974E-6 : f32
    %16 = vector.broadcast %cst_11 : f32 to vector<1x128xf32>
    %17 = arith.addf %15, %16 : vector<1x128xf32>
    %18 = math.rsqrt %17 : vector<1x128xf32>
    %19 = arith.mulf %3, %18 : vector<1x128xf32>
    %20 = vector.broadcast %19 : vector<1x128xf32> to vector<2048x128xf32>
    %21 = arith.mulf %10, %20 : vector<2048x128xf32>
    %22 = vector.broadcast %4 : vector<1x128xf32> to vector<2048x128xf32>
    %23 = arith.addf %21, %22 : vector<2048x128xf32>
    %cst_12 = arith.constant 0.000000e+00 : f32
    %24 = vector.broadcast %cst_12 : f32 to vector<2048x128xf32>
    %25 = arith.maximumf %23, %24 : vector<2048x128xf32>
    %26 = arith.truncf %25 : vector<2048x128xf32> to vector<2048x128xbf16>
    %c0_13 = arith.constant 0 : index
    %c0_14 = arith.constant 0 : index
    %27 = vector.load %arg5[%c0_13, %c0_14] : memref<2048x128xbf16, #tpu.memory_space<vmem>>, vector<2048x128xbf16>
    tpu.vector_store %arg5[%c0_13, %c0_14], %26 {strides = array<i32>} : memref<2048x128xbf16, #tpu.memory_space<vmem>>, vector<2048x128xbf16>,
    return
  }
  func.func @transform_0(%arg0: i32) -> (i32, i32) {
    %c0_i32 = arith.constant 0 : i32
    %c0_i32_0 = arith.constant 0 : i32
    %c0_i32_1 = arith.constant 0 : i32
    return %c0_i32, %c0_i32_0 : i32, i32
  }
  func.func @transform_1(%arg0: i32) -> (i32, i32) {
    %c0_i32 = arith.constant 0 : i32
    %c0_i32_0 = arith.constant 0 : i32
    %c0_i32_1 = arith.constant 0 : i32
    return %c0_i32, %c0_i32_0 : i32, i32
  }
  func.func @transform_2(%arg0: i32) -> (i32, i32) {
    %c0_i32 = arith.constant 0 : i32
    %c0_i32_0 = arith.constant 0 : i32
    %c0_i32_1 = arith.constant 0 : i32
    return %c0_i32, %c0_i32_0 : i32, i32
  }
  func.func @transform_3(%arg0: i32) -> (i32, i32) {
    %c0_i32 = arith.constant 0 : i32
    %c0_i32_0 = arith.constant 0 : i32
    %c0_i32_1 = arith.constant 0 : i32
    return %c0_i32, %c0_i32_0 : i32, i32
  }
  func.func @transform_4(%arg0: i32) -> (i32, i32) {
    %c0_i32 = arith.constant 0 : i32
    %c0_i32_0 = arith.constant 0 : i32
    %c0_i32_1 = arith.constant 0 : i32
    return %c0_i32, %c0_i32_0 : i32, i32
  }
}

</mosaic_0001>

<bundles_post_ra>
// kernel: tpu_custom_call.1
= control target key start
LH: loop header
LB: loop body
LE: loop exit
PB: predicated region body
PF: predicated region fallthrough
CT: control target
= control target key end

     0   :  { %vm1888_vm0 = vcmask 1040384   ;;  %vm1889_vm1 = vcmask 1041408   ;;  %v7821_v4 = vmov 65535   ;;  %s14170_s0 = inlined_call_operand.vmem [shape: bf16[2048,147], index: 0, kind: input, shape index: {}]   ;;  %s14171_s1 = inlined_call_operand.vmem [shape: bf16[147,128], index: 1, kind: input, shape index: {}]   ;;  %s14172_s2 = inlined_call_operand.vmem [shape: f32[1,128], index: 2, kind: input, shape index: {}]   ;;  %s14173_s3 = inlined_call_operand.vmem [shape: f32[1,128], index: 3, kind: input, shape index: {}]   ;;  %s14174_s4 = inlined_call_operand.hbm [shape: bf16[2048,128], index: 4, kind: output, shape index: {}]  }
   0x1   :  { %v7005_v0 = vld [vmem:[%s14171_s1 + $0x38] sm:$0xff]  ;;  %v293_v1 = vld [vmem:[%s14171_s1 + $0x48] sm:$0x3]  ;;  %v7004_v3 = vld [vmem:[%s14171_s1 + $0x30] sm:$0xff]  ;;  %v1890_v5 = vsel %vm1888_vm0, 4294967295, %v7821_v4 }
   0x2   :  { %v1483_v2 = vunpack.c.l.b16 %v293_v1  ;;  %1895 = vmatpush.bf16.msra.mxu0 %v7005_v0  ;;  %7774 = vmatpush.bf16.msra.mxu2 %v7005_v0  ;;  %v1891_v7 = vsel %vm1889_vm1, %v1890_v5, 0  ;;  %v7003_v9 = vld [vmem:[%s14171_s1 + $0x28] sm:$0xff] }
   0x4   :  { %v1493_v6 = vpack.c.b16 %v1483_v2, %v1483_v2 }
   0x6   :  { %v1893_v8 = vand.u32 %v1891_v7, %v1493_v6  ;;  %1896 = vmatpush.bf16.msra.mxu0 %v7004_v3  ;;  %7775 = vmatpush.bf16.msra.mxu2 %v7004_v3 }
   0x7   :  { %9 = vsyncpa [#allocation3], 0  ;;  %v7006_v10 = vld [vmem:[%s14171_s1 + $0x40] sm:$0xff]  ;;  %v5558_v12 = vld [vmem:[%s14170_s0 + $0x8] sm:$0xf0]  ;;  %vm1503_vm2 = vcmask 154624  }
   0x8   :  { %2550 = vmatpush.bf16.msra.mxu1 %v1893_v8  ;;  %v6742_v11 = vld [vmem:[%s14170_s0 + $0x4] sm:$0xf]  ;;  %7782 = vmatpush.bf16.msra.mxu3 %v1893_v8  ;;  %v7001_v15 = vld [vmem:[%s14171_s1 + $0x18] sm:$0xff]  ;;  %v7000_v16 = vld [vmem:[%s14171_s1 + $0x10] sm:$0xff]  ;;  %s5542_s14 = sshll.u32 %s14174_s4, 4  ;;  %s7824_s15 = smov 64   ;;  %s5543_s14 = int_to_ptr.hbm [resolvable:$true] %s5542_s14 }
   0x9   :  { %v5561_v13 = vor.u32 %v6742_v11, %v5558_v12  ;;  %v7002_v14 = vld [vmem:[%s14171_s1 + $0x20] sm:$0xff]  ;;  %v6999_v17 = vld [vmem:[%s14171_s1 + $0x8] sm:$0xff]  ;;  %v6744_v18 = vld [vmem:[%s14170_s0 + $0x14] sm:$0xf]  ;;  %s7825_s16 = smov 4  }
   0xa   :  { %1897 = vmatpush.bf16.msra.mxu0 %v7003_v9  ;;  %7776 = vmatpush.bf16.msra.mxu2 %v7003_v9  ;;  %v5566_v19 = vld [vmem:[%s14170_s0 + $0x18] sm:$0xf0]  ;;  %v6998_v21 = vld [vmem:[%s14171_s1] sm:$0xff]  ;;  %v6743_v23 = vld [vmem:[%s14170_s0 + $0x4] sm:$0xf0] }
   0xb   :  { %v5569_v20 = vor.u32 %v6744_v18, %v5566_v19  ;;  %v5556_v22 = vld [vmem:[%s14170_s0] sm:$0xf]  ;;  %v6746_v25 = vld [vmem:[%s14170_s0 + $0x24] sm:$0xf]  ;;  %v5574_v26 = vld [vmem:[%s14170_s0 + $0x28] sm:$0xf0] }
   0xc   :  { %2551 = vmatpush.bf16.msra.mxu1 %v7006_v10  ;;  %7783 = vmatpush.bf16.msra.mxu3 %v7006_v10  ;;  %v5557_v24 = vor.u32 %v6743_v23, %v5556_v22  ;;  %v5577_v27 = vor.u32 %v6746_v25, %v5574_v26  ;;  %v5564_v28 = vld [vmem:[%s14170_s0 + $0x10] sm:$0xf]  ;;  %v6745_v29 = vld [vmem:[%s14170_s0 + $0x14] sm:$0xf0]  ;;  %v6748_v31 = vld [vmem:[%s14170_s0 + $0x34] sm:$0xf] }
   0xd   :  { %v5565_v30 = vor.u32 %v6745_v29, %v5564_v28  ;;  %v5582_v32 = vld [vmem:[%s14170_s0 + $0x38] sm:$0xf0]  ;;  %v5572_v34 = vld [vmem:[%s14170_s0 + $0x20] sm:$0xf]  ;;  %v6747_v35 = vld [vmem:[%s14170_s0 + $0x24] sm:$0xf0] }
   0xe   :  { %1898 = vmatpush.bf16.msra.mxu0 %v7002_v14  ;;  %7777 = vmatpush.bf16.msra.mxu2 %v7002_v14  ;;  %v5585_v33 = vor.u32 %v6748_v31, %v5582_v32  ;;  %v5573_v36 = vor.u32 %v6747_v35, %v5572_v34  ;;  %v6750_v37 = vld [vmem:[%s14170_s0 + $0x44] sm:$0xf]  ;;  %v5590_v38 = vld [vmem:[%s14170_s0 + $0x48] sm:$0xf0]  ;;  %v5580_v40 = vld [vmem:[%s14170_s0 + $0x30] sm:$0xf] }
   0xf   :  { %6614 = vmatmul.msk.bf16.vlgmr.msra.gmra.mxu1 %vm1503_vm2, %v5561_v13  ;;  %v5593_v39 = vor.u32 %v6750_v37, %v5590_v38  ;;  %v6749_v41 = vld [vmem:[%s14170_s0 + $0x34] sm:$0xf0]  ;;  %v6752_v43 = vld [vmem:[%s14170_s0 + $0x54] sm:$0xf]  ;;  %v5598_v44 = vld [vmem:[%s14170_s0 + $0x58] sm:$0xf0] }
  0x10   :  { %v5581_v42 = vor.u32 %v6749_v41, %v5580_v40  ;;  %v5601_v45 = vor.u32 %v6752_v43, %v5598_v44  ;;  %v5588_v46 = vld [vmem:[%s14170_s0 + $0x40] sm:$0xf]  ;;  %v6751_v47 = vld [vmem:[%s14170_s0 + $0x44] sm:$0xf0]  ;;  %v6754_v49 = vld [vmem:[%s14170_s0 + $0x64] sm:$0xf] }
  0x11   :  { %v5589_v48 = vor.u32 %v6751_v47, %v5588_v46  ;;  %v5606_v50 = vld [vmem:[%s14170_s0 + $0x68] sm:$0xf0]  ;;  %v5596_v52 = vld [vmem:[%s14170_s0 + $0x50] sm:$0xf]  ;;  %v6753_v53 = vld [vmem:[%s14170_s0 + $0x54] sm:$0xf0] }
  0x12   :  { %1899 = vmatpush.bf16.msra.mxu0 %v7001_v15  ;;  %7778 = vmatpush.bf16.msra.mxu2 %v7001_v15  ;;  %v5609_v51 = vor.u32 %v6754_v49, %v5606_v50  ;;  %v5597_v54 = vor.u32 %v6753_v53, %v5596_v52  ;;  %v6756_v55 = vld [vmem:[%s14170_s0 + $0x74] sm:$0xf]  ;;  %v5614_v56 = vld [vmem:[%s14170_s0 + $0x78] sm:$0xf0]  ;;  %v5604_v58 = vld [vmem:[%s14170_s0 + $0x60] sm:$0xf] }
  0x13   :  { %v5617_v57 = vor.u32 %v6756_v55, %v5614_v56  ;;  %v6755_v59 = vld [vmem:[%s14170_s0 + $0x64] sm:$0xf0]  ;;  %v6758_v61 = vld [vmem:[%s14170_s0 + $0x84] sm:$0xf]  ;;  %v5622_v62 = vld [vmem:[%s14170_s0 + $0x88] sm:$0xf0] }
  0x14   :  { %v5605_v60 = vor.u32 %v6755_v59, %v5604_v58  ;;  %v5625_v63 = vor.u32 %v6758_v61, %v5622_v62  ;;  %v5612_v0 = vld [vmem:[%s14170_s0 + $0x70] sm:$0xf]  ;;  %v6757_v1 = vld [vmem:[%s14170_s0 + $0x74] sm:$0xf0]  ;;  %v6760_v5 = vld [vmem:[%s14170_s0 + $0x94] sm:$0xf] }
  0x15   :  { %v5613_v3 = vor.u32 %v6757_v1, %v5612_v0  ;;  %v5630_v6 = vld [vmem:[%s14170_s0 + $0x98] sm:$0xf0]  ;;  %v5620_v8 = vld [vmem:[%s14170_s0 + $0x80] sm:$0xf]  ;;  %v6759_v9 = vld [vmem:[%s14170_s0 + $0x84] sm:$0xf0] }
  0x16   :  { %1900 = vmatpush.bf16.msra.mxu0 %v7000_v16  ;;  %7779 = vmatpush.bf16.msra.mxu2 %v7000_v16  ;;  %v5633_v7 = vor.u32 %v6760_v5, %v5630_v6  ;;  %v5621_v11 = vor.u32 %v6759_v9, %v5620_v8  ;;  %v5638_v18 = vld [vmem:[%s14170_s0 + $0xa8] sm:$0xf0]  ;;  %v6764_v29 = vld [vmem:[%s14170_s0 + $0xb4] sm:$0xf]  ;;  %v5636_v32 = vld [vmem:[%s14170_s0 + $0xa0] sm:$0xf] }
  0x17   :  { %v6766_v41 = vld [vmem:[%s14170_s0 + $0xc4] sm:$0xf]  ;;  %v5644_v44 = vld [vmem:[%s14170_s0 + $0xb0] sm:$0xf]  ;;  %v6768_v53 = vld [vmem:[%s14170_s0 + $0xd4] sm:$0xf] }
  0x18   :  { %v5652_v56 = vld [vmem:[%s14170_s0 + $0xc0] sm:$0xf]  ;;  %v6770_v1 = vld [vmem:[%s14170_s0 + $0xe4] sm:$0xf]  ;;  %v6769_v5 = vld [vmem:[%s14170_s0 + $0xd4] sm:$0xf0] }
  0x1a   :  { %1901 = vmatpush.bf16.msra.mxu0 %v6999_v17  ;;  %7780 = vmatpush.bf16.msra.mxu2 %v6999_v17  ;;  %v6762_v17 = vld [vmem:[%s14170_s0 + $0xa4] sm:$0xf] }
  0x1b   :  { %v5641_v19 = vor.u32 %v6762_v17, %v5638_v18  ;;  %v6772_v18 = vld [vmem:[%s14170_s0 + $0xf4] sm:$0xf] }
  0x1e   :  { %1902 = vmatpush.bf16.msra.mxu0 %v6998_v21  ;;  %7781 = vmatpush.bf16.msra.mxu2 %v6998_v21  ;;  %v6761_v21 = vld [vmem:[%s14170_s0 + $0x94] sm:$0xf0] }
  0x1f   :  { %6615 = vmatmul.msk.bf16.gmra.mxu1 %vm1503_vm2, %v5569_v20  ;;  %v5628_v20 = vld [vmem:[%s14170_s0 + $0x90] sm:$0xf] }
  0x20   :  { %v5629_v23 = vor.u32 %v6761_v21, %v5628_v20  ;;  %v5668_v21 = vld [vmem:[%s14170_s0 + $0xe0] sm:$0xf] }
  0x21   :  { %1903 = vmatmul.bf16.vlgmr.msra.gmra.mxu0 %v5557_v24 }
  0x2f   :  { %6616 = vmatmul.msk.bf16.gmra.mxu1 %vm1503_vm2, %v5577_v27 }
  0x31   :  { %1908 = vmatmul.bf16.gmra.mxu0 %v5565_v30  ;;  %v5646_v30 = vld [vmem:[%s14170_s0 + $0xb8] sm:$0xf0] }
  0x32   :  { %v5649_v31 = vor.u32 %v6764_v29, %v5646_v30  ;;  %v6076_v29 = vld [vmem:[%s14170_s0 + $0x410] sm:$0xf]  ;;  %v6873_v30 = vld [vmem:[%s14170_s0 + $0x414] sm:$0xf0] }
  0x3f   :  { %6617 = vmatmul.msk.bf16.gmra.mxu1 %vm1503_vm2, %v5585_v33  ;;  %v6763_v33 = vld [vmem:[%s14170_s0 + $0xa4] sm:$0xf0] }
  0x40   :  { %v5637_v35 = vor.u32 %v6763_v33, %v5636_v32  ;;  %v6077_v32 = vor.u32 %v6873_v30, %v6076_v29  ;;  %v6078_v33 = vld [vmem:[%s14170_s0 + $0x418] sm:$0xf0] }
  0x41   :  { %1913 = vmatmul.bf16.gmra.mxu0 %v5573_v36 }
  0x4f   :  { %6618 = vmatmul.msk.bf16.gmra.mxu1 %vm1503_vm2, %v5593_v39 }
  0x51   :  { %1918 = vmatmul.bf16.gmra.mxu0 %v5581_v42  ;;  %v5654_v42 = vld [vmem:[%s14170_s0 + $0xc8] sm:$0xf0] }
  0x52   :  { %v5657_v43 = vor.u32 %v6766_v41, %v5654_v42  ;;  %v5686_v41 = vld [vmem:[%s14170_s0 + $0x108] sm:$0xf0] }
  0x5f   :  { %6619 = vmatmul.msk.bf16.gmra.mxu1 %vm1503_vm2, %v5601_v45  ;;  %v6765_v45 = vld [vmem:[%s14170_s0 + $0xb4] sm:$0xf0] }
  0x60   :  { %v5645_v47 = vor.u32 %v6765_v45, %v5644_v44  ;;  %v6773_v44 = vld [vmem:[%s14170_s0 + $0xf4] sm:$0xf0] }
  0x61   :  { %1923 = vmatmul.bf16.gmra.mxu0 %v5589_v48 }
  0x6f   :  { %6620 = vmatmul.msk.bf16.gmra.mxu1 %vm1503_vm2, %v5609_v51 }
  0x71   :  { %1928 = vmatmul.bf16.gmra.mxu0 %v5597_v54  ;;  %v5662_v54 = vld [vmem:[%s14170_s0 + $0xd8] sm:$0xf0] }
  0x72   :  { %v5665_v55 = vor.u32 %v6768_v53, %v5662_v54  ;;  %v6874_v53 = vld [vmem:[%s14170_s0 + $0x424] sm:$0xf] }
  0x7f   :  { %6621 = vmatmul.msk.bf16.gmra.mxu1 %vm1503_vm2, %v5617_v57  ;;  %v6767_v57 = vld [vmem:[%s14170_s0 + $0xc4] sm:$0xf0] }
  0x80   :  { %v5653_v59 = vor.u32 %v6767_v57, %v5652_v56 }
  0x81   :  { %1933 = vmatmul.bf16.gmra.mxu0 %v5605_v60 }
  0x8c   :  { %v2553_v2 = vpop.f32.mrf.mxu1 }
  0x8f   :  { %6622 = vmatmul.msk.bf16.gmra.mxu1 %vm1503_vm2, %v5625_v63 }
  0x91   :  { %1938 = vmatmul.bf16.gmra.mxu0 %v5613_v3 }
  0x94   :  { %v2555_v4 = vpop.f32.mrf.mxu1 }
  0x9c   :  { %v2558_v10 = vpop.f32.mrf.mxu1 }
  0x9e   :  { %v1904_v12 = vpop.f32.mrf.mxu0 }
  0x9f   :  { %6623 = vmatmul.msk.bf16.gmra.mxu1 %vm1503_vm2, %v5633_v7  ;;  %v8005_v13 = vadd.f32 %v2553_v2, %v1904_v12  ;;  %v5670_v2 = vld [vmem:[%s14170_s0 + $0xe8] sm:$0xf0] }
  0xa0   :  { %v5673_v3 = vor.u32 %v6770_v1, %v5670_v2  ;;  %v5684_v1 = vld [vmem:[%s14170_s0 + $0x100] sm:$0xf]  ;;  %v6775_v2 = vld [vmem:[%s14170_s0 + $0x104] sm:$0xf0] }
  0xa1   :  { %14609 = vst [vmem:[#allocation5_spill] sm:$0xff] %v8005_v13  ;;  %1943 = vmatmul.bf16.gmra.mxu0 %v5621_v11  ;;  %v6871_v11 = vld [vmem:[%s14170_s0 + $0x404] sm:$0xf0] }
  0xa4   :  { %v2560_v14 = vpop.f32.mrf.mxu1 }
  0xa6   :  { %v1906_v15 = vpop.f32.mrf.mxu0 }
  0xa7   :  { %v8007_v16 = vadd.f32 %v2555_v4, %v1906_v15  ;;  %v5660_v4 = vld [vmem:[%s14170_s0 + $0xd0] sm:$0xf] }
  0xa8   :  { %v5661_v7 = vor.u32 %v6769_v5, %v5660_v4  ;;  %v5685_v4 = vor.u32 %v6775_v2, %v5684_v1 }
  0xa9   :  { %14610 = vst [vmem:[#allocation6_spill] sm:$0xff] %v8007_v16 }
  0xac   :  { %v2563_v22 = vpop.f32.mrf.mxu1 }
  0xae   :  { %v1909_v24 = vpop.f32.mrf.mxu0 }
  0xaf   :  { %6624 = vmatmul.msk.bf16.gmra.mxu1 %vm1503_vm2, %v5641_v19  ;;  %v8022_v25 = vadd.f32 %v2558_v10, %v1909_v24  ;;  %v6068_v10 = vld [vmem:[%s14170_s0 + $0x400] sm:$0xf]  ;;  %v5678_v19 = vld [vmem:[%s14170_s0 + $0xf8] sm:$0xf0] }
  0xb0   :  { %v6069_v12 = vor.u32 %v6871_v11, %v6068_v10  ;;  %v5681_v20 = vor.u32 %v6772_v18, %v5678_v19  ;;  %v6876_v10 = vld [vmem:[%s14170_s0 + $0x434] sm:$0xf] }
  0xb1   :  { %14611 = vst [vmem:[#allocation7_spill] sm:$0xff] %v8022_v25  ;;  %1948 = vmatmul.bf16.gmra.mxu0 %v5629_v23 }
  0xb2   :  { %2223 = vmatmul.bf16.vlgmr.msra.gmra.mxu2 %v6069_v12  ;;  %v6094_v12 = vld [vmem:[%s14170_s0 + $0x438] sm:$0xf0] }
  0xb4   :  { %v2565_v26 = vpop.f32.mrf.mxu1 }
  0xb6   :  { %v1911_v27 = vpop.f32.mrf.mxu0 }
  0xb7   :  { %v8024_v28 = vadd.f32 %v2560_v14, %v1911_v27 }
  0xb9   :  { %14612 = vst [vmem:[#allocation8_spill] sm:$0xff] %v8024_v28 }
  0xbc   :  { %v2568_v34 = vpop.f32.mrf.mxu1 }
  0xbe   :  { %v1914_v36 = vpop.f32.mrf.mxu0 }
  0xbf   :  { %6625 = vmatmul.msk.bf16.gmra.mxu1 %vm1503_vm2, %v5649_v31  ;;  %v8039_v37 = vadd.f32 %v2563_v22, %v1914_v36  ;;  %v6771_v22 = vld [vmem:[%s14170_s0 + $0xe4] sm:$0xf0]  ;;  %v6872_v31 = vld [vmem:[%s14170_s0 + $0x414] sm:$0xf] }
  0xc0   :  { %v5669_v24 = vor.u32 %v6771_v22, %v5668_v21  ;;  %v5702_v21 = vld [vmem:[%s14170_s0 + $0x128] sm:$0xf0] }
  0xc1   :  { %14613 = vst [vmem:[#allocation9_spill] sm:$0xff] %v8039_v37  ;;  %1953 = vmatmul.bf16.gmra.mxu0 %v5637_v35 }
  0xc2   :  { %2228 = vmatmul.bf16.gmra.mxu2 %v6077_v32  ;;  %v6100_v32 = vld [vmem:[%s14170_s0 + $0x440] sm:$0xf] }
  0xc4   :  { %v2570_v38 = vpop.f32.mrf.mxu1 }
  0xc6   :  { %v1916_v39 = vpop.f32.mrf.mxu0 }
  0xc7   :  { %v8041_v40 = vadd.f32 %v2565_v26, %v1916_v39  ;;  %v6774_v39 = vld [vmem:[%s14170_s0 + $0x104] sm:$0xf] }
  0xc8   :  { %v5689_v42 = vor.u32 %v6774_v39, %v5686_v41 }
  0xc9   :  { %14614 = vst [vmem:[#allocation10_spill] sm:$0xff] %v8041_v40 }
  0xcc   :  { %v2573_v46 = vpop.f32.mrf.mxu1 }
  0xce   :  { %v1919_v48 = vpop.f32.mrf.mxu0 }
  0xcf   :  { %6626 = vmatmul.msk.bf16.gmra.mxu1 %vm1503_vm2, %v5657_v43  ;;  %v8056_v49 = vadd.f32 %v2568_v34, %v1919_v48  ;;  %v6081_v34 = vor.u32 %v6872_v31, %v6078_v33  ;;  %v5676_v43 = vld [vmem:[%s14170_s0 + $0xf0] sm:$0xf]  ;;  %v6879_v33 = vld [vmem:[%s14170_s0 + $0x444] sm:$0xf0] }
  0xd1   :  { %14615 = vst [vmem:[#allocation11_spill] sm:$0xff] %v8056_v49  ;;  %1958 = vmatmul.bf16.gmra.mxu0 %v5645_v47  ;;  %6679 = vmatmul.msk.bf16.vlgmr.msra.gmra.mxu3 %vm1503_vm2, %v6081_v34  ;;  %v6878_v34 = vld [vmem:[%s14170_s0 + $0x444] sm:$0xf] }
  0xd4   :  { %v2575_v50 = vpop.f32.mrf.mxu1 }
  0xd6   :  { %v1921_v51 = vpop.f32.mrf.mxu0 }
  0xd7   :  { %v8058_v52 = vadd.f32 %v2570_v38, %v1921_v51  ;;  %v6875_v51 = vld [vmem:[%s14170_s0 + $0x424] sm:$0xf0] }
  0xd9   :  { %14616 = vst [vmem:[#allocation12_spill] sm:$0xff] %v8058_v52 }
  0xdc   :  { %v2578_v58 = vpop.f32.mrf.mxu1 }
  0xde   :  { %v1924_v60 = vpop.f32.mrf.mxu0 }
  0xdf   :  { %6627 = vmatmul.msk.bf16.gmra.mxu1 %vm1503_vm2, %v5665_v55  ;;  %v8073_v61 = vadd.f32 %v2573_v46, %v1924_v60  ;;  %v5677_v46 = vor.u32 %v6773_v44, %v5676_v43  ;;  %v6086_v55 = vld [vmem:[%s14170_s0 + $0x428] sm:$0xf0]  ;;  %v6776_v60 = vld [vmem:[%s14170_s0 + $0x114] sm:$0xf] }
  0xe0   :  { %v6089_v56 = vor.u32 %v6874_v53, %v6086_v55  ;;  %v6780_v44 = vld [vmem:[%s14170_s0 + $0x134] sm:$0xf] }
  0xe1   :  { %14617 = vst [vmem:[#allocation13_spill] sm:$0xff] %v8073_v61  ;;  %1963 = vmatmul.bf16.gmra.mxu0 %v5653_v59 }
  0xe2   :  { %6680 = vmatmul.msk.bf16.gmra.mxu3 %vm1503_vm2, %v6089_v56  ;;  %v6108_v56 = vld [vmem:[%s14170_s0 + $0x450] sm:$0xf] }
  0xe4   :  { %v2580_v62 = vpop.f32.mrf.mxu1 }
  0xe6   :  { %v1926_v63 = vpop.f32.mrf.mxu0 }
  0xe7   :  { %v8075_v0 = vadd.f32 %v2575_v50, %v1926_v63  ;;  %v6084_v50 = vld [vmem:[%s14170_s0 + $0x420] sm:$0xf] }
  0xe8   :  { %v6085_v54 = vor.u32 %v6875_v51, %v6084_v50  ;;  %v6779_v50 = vld [vmem:[%s14170_s0 + $0x124] sm:$0xf0] }
  0xe9   :  { %14618 = vst [vmem:[#allocation14_spill] sm:$0xff] %v8075_v0 }
  0xea   :  { %2233 = vmatmul.bf16.gmra.mxu2 %v6085_v54 }
  0xec   :  { %v2583_v6 = vpop.f32.mrf.mxu1 }
  0xee   :  { %v1929_v8 = vpop.f32.mrf.mxu0 }
  0xef   :  { %6628 = vmatmul.msk.bf16.gmra.mxu1 %vm1503_vm2, %v5673_v3  ;;  %v8090_v9 = vadd.f32 %v2578_v58, %v1929_v8  ;;  %v6877_v8 = vld [vmem:[%s14170_s0 + $0x434] sm:$0xf0] }
  0xf1   :  { %14619 = vst [vmem:[#allocation15_spill] sm:$0xff] %v8090_v9  ;;  %1968 = vmatmul.bf16.gmra.mxu0 %v5661_v7  ;;  %v6092_v7 = vld [vmem:[%s14170_s0 + $0x430] sm:$0xf] }
  0xf2   :  { %v6093_v11 = vor.u32 %v6877_v8, %v6092_v7  ;;  %v5708_v8 = vld [vmem:[%s14170_s0 + $0x130] sm:$0xf] }
  0xf4   :  { %v2585_v14 = vpop.f32.mrf.mxu1 }
  0xf6   :  { %v1931_v15 = vpop.f32.mrf.mxu0 }
  0xf7   :  { %v8098_v17 = vadd.f32 %v2580_v62, %v1931_v15  ;;  %v5694_v62 = vld [vmem:[%s14170_s0 + $0x118] sm:$0xf0] }
  0xf8   :  { %v5697_v63 = vor.u32 %v6776_v60, %v5694_v62  ;;  %v6110_v62 = vld [vmem:[%s14170_s0 + $0x458] sm:$0xf0] }
  0xf9   :  { %14620 = vst [vmem:[#allocation16_spill] sm:$0xff] %v8098_v17 }
  0xfa   :  { %2238 = vmatmul.bf16.gmra.mxu2 %v6093_v11 }
  0xfc   :  { %v2588_v23 = vpop.f32.mrf.mxu1 }
  0xfe   :  { %v1934_v26 = vpop.f32.mrf.mxu0 }
  0xff   :  { %6629 = vmatmul.msk.bf16.gmra.mxu1 %vm1503_vm2, %v5681_v20  ;;  %v8113_v27 = vadd.f32 %v2583_v6, %v1934_v26  ;;  %v6778_v20 = vld [vmem:[%s14170_s0 + $0x124] sm:$0xf] }
 0x100   :  { %v5705_v22 = vor.u32 %v6778_v20, %v5702_v21  ;;  %v6883_v20 = vld [vmem:[%s14170_s0 + $0x464] sm:$0xf0]  ;;  %v6882_v21 = vld [vmem:[%s14170_s0 + $0x464] sm:$0xf] }
 0x101   :  { %14621 = vst [vmem:[#allocation17_spill] sm:$0xff] %v8113_v27  ;;  %1973 = vmatmul.bf16.gmra.mxu0 %v5669_v24  ;;  %v6777_v24 = vld [vmem:[%s14170_s0 + $0x114] sm:$0xf0] }
 0x104   :  { %v2590_v35 = vpop.f32.mrf.mxu1 }
 0x106   :  { %v1936_v36 = vpop.f32.mrf.mxu0 }
 0x107   :  { %v8128_v38 = vadd.f32 %v2585_v14, %v1936_v36  ;;  %v6097_v14 = vor.u32 %v6876_v10, %v6094_v12  ;;  %v6102_v36 = vld [vmem:[%s14170_s0 + $0x448] sm:$0xf0]  ;;  %v6781_v10 = vld [vmem:[%s14170_s0 + $0x134] sm:$0xf0] }
 0x108   :  { %v6105_v39 = vor.u32 %v6878_v34, %v6102_v36  ;;  %v5709_v12 = vor.u32 %v6781_v10, %v5708_v8  ;;  %v6783_v36 = vld [vmem:[%s14170_s0 + $0x144] sm:$0xf0]  ;;  %v6132_v8 = vld [vmem:[%s14170_s0 + $0x480] sm:$0xf] }
 0x109   :  { %14622 = vst [vmem:[#allocation18_spill] sm:$0xff] %v8128_v38  ;;  %6681 = vmatmul.msk.bf16.gmra.mxu3 %vm1503_vm2, %v6097_v14  ;;  %v6887_v10 = vld [vmem:[%s14170_s0 + $0x484] sm:$0xf0] }
 0x10c   :  { %v2593_v45 = vpop.f32.mrf.mxu1 }
 0x10e   :  { %v1939_v47 = vpop.f32.mrf.mxu0 }
 0x10f   :  { %6630 = vmatmul.msk.bf16.gmra.mxu1 %vm1503_vm2, %v5689_v42  ;;  %v8143_v48 = vadd.f32 %v2588_v23, %v1939_v47  ;;  %v5692_v23 = vld [vmem:[%s14170_s0 + $0x110] sm:$0xf]  ;;  %v5700_v47 = vld [vmem:[%s14170_s0 + $0x120] sm:$0xf] }
 0x110   :  { %v5693_v29 = vor.u32 %v6777_v24, %v5692_v23  ;;  %v5701_v53 = vor.u32 %v6779_v50, %v5700_v47  ;;  %v6118_v23 = vld [vmem:[%s14170_s0 + $0x468] sm:$0xf0]  ;;  %v6884_v47 = vld [vmem:[%s14170_s0 + $0x474] sm:$0xf] }
 0x111   :  { %14623 = vst [vmem:[#allocation19_spill] sm:$0xff] %v8143_v48  ;;  %1978 = vmatmul.bf16.gmra.mxu0 %v5677_v46  ;;  %v6121_v24 = vor.u32 %v6882_v21, %v6118_v23 }
 0x114   :  { %v2595_v57 = vpop.f32.mrf.mxu1 }
 0x116   :  { %v1941_v58 = vpop.f32.mrf.mxu0 }
 0x117   :  { %v8158_v59 = vadd.f32 %v2590_v35, %v1941_v58  ;;  %v6101_v35 = vor.u32 %v6879_v33, %v6100_v32  ;;  %v6880_v58 = vld [vmem:[%s14170_s0 + $0x454] sm:$0xf]  ;;  %v5726_v33 = vld [vmem:[%s14170_s0 + $0x158] sm:$0xf0] }
 0x118   :  { %v6784_v32 = vld [vmem:[%s14170_s0 + $0x154] sm:$0xf] }
 0x119   :  { %14624 = vst [vmem:[#allocation20_spill] sm:$0xff] %v8158_v59  ;;  %2243 = vmatmul.bf16.gmra.mxu2 %v6101_v35  ;;  %6682 = vmatmul.msk.bf16.gmra.mxu3 %vm1503_vm2, %v6105_v39  ;;  %v5729_v34 = vor.u32 %v6784_v32, %v5726_v33  ;;  %v5716_v35 = vld [vmem:[%s14170_s0 + $0x140] sm:$0xf]  ;;  %v6787_v33 = vld [vmem:[%s14170_s0 + $0x164] sm:$0xf0] }
 0x11a   :  { %v5732_v32 = vld [vmem:[%s14170_s0 + $0x160] sm:$0xf] }
 0x11c   :  { %v2598_v3 = vpop.f32.mrf.mxu1 }
 0x11e   :  { %v1944_v5 = vpop.f32.mrf.mxu0 }
 0x11f   :  { %6631 = vmatmul.msk.bf16.gmra.mxu1 %vm1503_vm2, %v5697_v63  ;;  %v8173_v6 = vadd.f32 %v2593_v45, %v1944_v5  ;;  %v5710_v45 = vld [vmem:[%s14170_s0 + $0x138] sm:$0xf0]  ;;  %v6113_v63 = vor.u32 %v6880_v58, %v6110_v62  ;;  %v5718_v5 = vld [vmem:[%s14170_s0 + $0x148] sm:$0xf0]  ;;  %v6786_v58 = vld [vmem:[%s14170_s0 + $0x164] sm:$0xf] }
 0x120   :  { %v5713_v46 = vor.u32 %v6780_v44, %v5710_v45  ;;  %v6124_v45 = vld [vmem:[%s14170_s0 + $0x470] sm:$0xf] }
 0x121   :  { %14625 = vst [vmem:[#allocation21_spill] sm:$0xff] %v8173_v6  ;;  %1983 = vmatmul.bf16.gmra.mxu0 %v5685_v4  ;;  %v6782_v4 = vld [vmem:[%s14170_s0 + $0x144] sm:$0xf] }
 0x122   :  { %v5721_v7 = vor.u32 %v6782_v4, %v5718_v5 }
 0x124   :  { %v2600_v15 = vpop.f32.mrf.mxu1 }
 0x126   :  { %v1946_v18 = vpop.f32.mrf.mxu0 }
 0x127   :  { %v8188_v19 = vadd.f32 %v2595_v57, %v1946_v18  ;;  %v6881_v57 = vld [vmem:[%s14170_s0 + $0x454] sm:$0xf0]  ;;  %v6116_v18 = vld [vmem:[%s14170_s0 + $0x460] sm:$0xf] }
 0x128   :  { %v6109_v60 = vor.u32 %v6881_v57, %v6108_v56 }
 0x129   :  { %14626 = vst [vmem:[#allocation22_spill] sm:$0xff] %v8188_v19  ;;  %6683 = vmatmul.msk.bf16.gmra.mxu3 %vm1503_vm2, %v6113_v63  ;;  %v5724_v63 = vld [vmem:[%s14170_s0 + $0x150] sm:$0xf] }
 0x12a   :  { %2248 = vmatmul.bf16.gmra.mxu2 %v6109_v60  ;;  %v5734_v60 = vld [vmem:[%s14170_s0 + $0x168] sm:$0xf0] }
 0x12b   :  { %v5737_v62 = vor.u32 %v6786_v58, %v5734_v60  ;;  %v6790_v60 = vld [vmem:[%s14170_s0 + $0x184] sm:$0xf] }
 0x12c   :  { %v2603_v26 = vpop.f32.mrf.mxu1 }
 0x12e   :  { %v1949_v30 = vpop.f32.mrf.mxu0 }
 0x12f   :  { %6632 = vmatmul.msk.bf16.gmra.mxu1 %vm1503_vm2, %v5705_v22  ;;  %v8203_v31 = vadd.f32 %v2598_v3, %v1949_v30  ;;  %v6117_v22 = vor.u32 %v6883_v20, %v6116_v18 }
 0x131   :  { %14627 = vst [vmem:[#allocation23_spill] sm:$0xff] %v8203_v31  ;;  %1988 = vmatmul.bf16.gmra.mxu0 %v5693_v29 }
 0x134   :  { %v2605_v41 = vpop.f32.mrf.mxu1 }
 0x136   :  { %v1951_v42 = vpop.f32.mrf.mxu0 }
 0x137   :  { %v8218_v43 = vadd.f32 %v2600_v15, %v1951_v42 }
 0x139   :  { %14628 = vst [vmem:[#allocation24_spill] sm:$0xff] %v8218_v43  ;;  %6684 = vmatmul.msk.bf16.gmra.mxu3 %vm1503_vm2, %v6121_v24  ;;  %v6788_v24 = vld [vmem:[%s14170_s0 + $0x174] sm:$0xf] }
 0x13a   :  { %2253 = vmatmul.bf16.gmra.mxu2 %v6117_v22  ;;  %v8338_v22 = vpop.f32.mrf.mxu2 }
 0x13b   :  { %14636 = vst [vmem:[#allocation32_spill] sm:$0xff] %v8338_v22 }
 0x13c   :  { %v2608_v51 = vpop.f32.mrf.mxu1 }
 0x13e   :  { %v1954_v54 = vpop.f32.mrf.mxu0 }
 0x13f   :  { %6633 = vmatmul.msk.bf16.gmra.mxu1 %vm1503_vm2, %v5713_v46  ;;  %v8233_v55 = vadd.f32 %v2603_v26, %v1954_v54  ;;  %v6885_v46 = vld [vmem:[%s14170_s0 + $0x474] sm:$0xf0] }
 0x140   :  { %v6125_v50 = vor.u32 %v6885_v46, %v6124_v45  ;;  %v6889_v45 = vld [vmem:[%s14170_s0 + $0x494] sm:$0xf0]  ;;  %v6888_v46 = vld [vmem:[%s14170_s0 + $0x494] sm:$0xf] }
 0x141   :  { %14629 = vst [vmem:[#allocation25_spill] sm:$0xff] %v8233_v55  ;;  %1993 = vmatmul.bf16.gmra.mxu0 %v5701_v53 }
 0x144   :  { %v2610_v1 = vpop.f32.mrf.mxu1 }
 0x146   :  { %v1956_v2 = vpop.f32.mrf.mxu0 }
 0x147   :  { %v8248_v3 = vadd.f32 %v2605_v41, %v1956_v2  ;;  %v5717_v41 = vor.u32 %v6783_v36, %v5716_v35  ;;  %v5733_v35 = vor.u32 %v6787_v33, %v5732_v32  ;;  %v6150_v32 = vld [vmem:[%s14170_s0 + $0x4a8] sm:$0xf0] }
 0x149   :  { %14630 = vst [vmem:[#allocation26_spill] sm:$0xff] %v8248_v3 }
 0x14a   :  { %2258 = vmatmul.bf16.gmra.mxu2 %v6125_v50  ;;  %v6142_v50 = vld [vmem:[%s14170_s0 + $0x498] sm:$0xf0] }
 0x14c   :  { %v2613_v11 = vpop.f32.mrf.mxu1 }
 0x14e   :  { %v1959_v14 = vpop.f32.mrf.mxu0 }
 0x14f   :  { %6634 = vmatmul.msk.bf16.gmra.mxu1 %vm1503_vm2, %v5721_v7  ;;  %v8263_v15 = vadd.f32 %v2608_v51, %v1959_v14  ;;  %v6126_v51 = vld [vmem:[%s14170_s0 + $0x478] sm:$0xf0]  ;;  %v6134_v14 = vld [vmem:[%s14170_s0 + $0x488] sm:$0xf0] }
 0x150   :  { %v6129_v53 = vor.u32 %v6884_v47, %v6126_v51  ;;  %v6145_v51 = vor.u32 %v6888_v46, %v6142_v50  ;;  %v5758_v46 = vld [vmem:[%s14170_s0 + $0x198] sm:$0xf0] }
 0x151   :  { %14631 = vst [vmem:[#allocation27_spill] sm:$0xff] %v8263_v15  ;;  %1998 = vmatmul.bf16.gmra.mxu0 %v5709_v12  ;;  %v6133_v12 = vor.u32 %v6887_v10, %v6132_v8 }
 0x152   :  { %6685 = vmatmul.msk.bf16.gmra.mxu3 %vm1503_vm2, %v6129_v53 }
 0x154   :  { %v2615_v26 = vpop.f32.mrf.mxu1 }
 0x156   :  { %v1961_v29 = vpop.f32.mrf.mxu0 }
 0x157   :  { %v8278_v30 = vadd.f32 %v2610_v1, %v1961_v29  ;;  %v6785_v1 = vld [vmem:[%s14170_s0 + $0x154] sm:$0xf0] }
 0x158   :  { %v5725_v4 = vor.u32 %v6785_v1, %v5724_v63  ;;  %v2878_v63 = vpop.f32.mrf.mxu3 }
 0x159   :  { %14632 = vst [vmem:[#allocation28_spill] sm:$0xff] %v8278_v30 }
 0x15a   :  { %2263 = vmatmul.bf16.gmra.mxu2 %v6133_v12 }
 0x15c   :  { %v2618_v39 = vpop.f32.mrf.mxu1 }
 0x15e   :  { %v1964_v42 = vpop.f32.mrf.mxu0 }
 0x15f   :  { %6635 = vmatmul.msk.bf16.gmra.mxu1 %vm1503_vm2, %v5729_v34  ;;  %v8293_v44 = vadd.f32 %v2613_v11, %v1964_v42  ;;  %v6886_v11 = vld [vmem:[%s14170_s0 + $0x484] sm:$0xf]  ;;  %v6140_v42 = vld [vmem:[%s14170_s0 + $0x490] sm:$0xf] }
 0x160   :  { %v6137_v18 = vor.u32 %v6886_v11, %v6134_v14  ;;  %v6141_v47 = vor.u32 %v6889_v45, %v6140_v42  ;;  %v6792_v45 = vld [vmem:[%s14170_s0 + $0x194] sm:$0xf] }
 0x161   :  { %14633 = vst [vmem:[#allocation29_spill] sm:$0xff] %v8293_v44  ;;  %2003 = vmatmul.bf16.gmra.mxu0 %v5717_v41 }
 0x162   :  { %6686 = vmatmul.msk.bf16.gmra.mxu3 %vm1503_vm2, %v6137_v18  ;;  %v2880_v18 = vpop.f32.mrf.mxu3 }
 0x164   :  { %v2620_v54 = vpop.f32.mrf.mxu1 }
 0x166   :  { %v1966_v56 = vpop.f32.mrf.mxu0 }
 0x167   :  { %v8308_v57 = vadd.f32 %v2615_v26, %v1966_v56  ;;  %v5742_v26 = vld [vmem:[%s14170_s0 + $0x178] sm:$0xf0] }
 0x168   :  { %v5745_v29 = vor.u32 %v6788_v24, %v5742_v26  ;;  %v6891_v24 = vld [vmem:[%s14170_s0 + $0x4a4] sm:$0xf0]  ;;  %v6890_v26 = vld [vmem:[%s14170_s0 + $0x4a4] sm:$0xf] }
 0x169   :  { %14634 = vst [vmem:[#allocation30_spill] sm:$0xff] %v8308_v57  ;;  %v6153_v33 = vor.u32 %v6890_v26, %v6150_v32 }
 0x16a   :  { %2268 = vmatmul.bf16.gmra.mxu2 %v6141_v47  ;;  %v2883_v47 = vpop.f32.mrf.mxu3 }
 0x16c   :  { %v2623_v2 = vpop.f32.mrf.mxu1 }
 0x16e   :  { %v1969_v5 = vpop.f32.mrf.mxu0 }
 0x16f   :  { %6636 = vmatmul.msk.bf16.gmra.mxu1 %vm1503_vm2, %v5737_v62  ;;  %v8323_v7 = vadd.f32 %v2618_v39, %v1969_v5  ;;  %v8355_v39 = vpop.f32.mrf.mxu2  ;;  %v5750_v62 = vld [vmem:[%s14170_s0 + $0x188] sm:$0xf0]  ;;  %v6789_v5 = vld [vmem:[%s14170_s0 + $0x174] sm:$0xf0] }
 0x170   :  { %14638 = vst [vmem:[#allocation34_spill] sm:$0xff] %v8355_v39 }
 0x171   :  { %14635 = vst [vmem:[#allocation31_spill] sm:$0xff] %v8323_v7  ;;  %2008 = vmatmul.bf16.gmra.mxu0 %v5725_v4  ;;  %v5740_v4 = vld [vmem:[%s14170_s0 + $0x170] sm:$0xf] }
 0x172   :  { %6687 = vmatmul.msk.bf16.gmra.mxu3 %vm1503_vm2, %v6145_v51  ;;  %v5741_v10 = vor.u32 %v6789_v5, %v5740_v4  ;;  %v5761_v51 = vor.u32 %v6792_v45, %v5758_v46  ;;  %v2885_v4 = vpop.f32.mrf.mxu3 }
 0x174   :  { %v2625_v20 = vpop.f32.mrf.mxu1 }
 0x176   :  { %v1971_v21 = vpop.f32.mrf.mxu0 }
 0x177   :  { %v8340_v23 = vadd.f32 %v2620_v54, %v1971_v21  ;;  %v2229_v56 = vpop.f32.mrf.mxu2  ;;  %v6148_v21 = vld [vmem:[%s14170_s0 + $0x4a0] sm:$0xf] }
 0x178   :  { %v8380_v1 = vadd.f32 %v2878_v63, %v2229_v56 }
 0x179   :  { %14637 = vst [vmem:[#allocation33_spill] sm:$0xff] %v8340_v23 }
 0x17a   :  { %14641 = vst [vmem:[#allocation37_spill] sm:$0xff] %v8380_v1 }
 0x17c   :  { %v2628_v34 = vpop.f32.mrf.mxu1 }
 0x17e   :  { %v1974_v36 = vpop.f32.mrf.mxu0 }
 0x17f   :  { %6637 = vmatmul.msk.bf16.gmra.mxu1 %vm1503_vm2, %v5745_v29  ;;  %v8357_v41 = vadd.f32 %v2623_v2, %v1974_v36  ;;  %v5753_v2 = vor.u32 %v6790_v60, %v5750_v62  ;;  %v2231_v12 = vpop.f32.mrf.mxu2  ;;  %v6149_v29 = vor.u32 %v6891_v24, %v6148_v21 }
 0x181   :  { %14639 = vst [vmem:[#allocation35_spill] sm:$0xff] %v8357_v41  ;;  %2013 = vmatmul.bf16.gmra.mxu0 %v5733_v35  ;;  %2273 = vmatmul.bf16.gmra.mxu2 %v6149_v29 }
 0x182   :  { %6688 = vmatmul.msk.bf16.gmra.mxu3 %vm1503_vm2, %v6153_v33  ;;  %v6794_v33 = vld [vmem:[%s14170_s0 + $0x1a4] sm:$0xf] }
 0x184   :  { %v2630_v53 = vpop.f32.mrf.mxu1 }
 0x186   :  { %v1976_v54 = vpop.f32.mrf.mxu0 }
 0x187   :  { %v8372_v58 = vadd.f32 %v2625_v20, %v1976_v54  ;;  %v8391_v20 = vadd.f32 %v2880_v18, %v2231_v12  ;;  %v2234_v36 = vpop.f32.mrf.mxu2  ;;  %v5748_v54 = vld [vmem:[%s14170_s0 + $0x180] sm:$0xf]  ;;  %v6892_v12 = vld [vmem:[%s14170_s0 + $0x4b4] sm:$0xf] }
 0x188   :  { %v8414_v50 = vadd.f32 %v2883_v47, %v2234_v36  ;;  %v5756_v47 = vld [vmem:[%s14170_s0 + $0x190] sm:$0xf] }
 0x189   :  { %14640 = vst [vmem:[#allocation36_spill] sm:$0xff] %v8372_v58 }
 0x18a   :  { %14643 = vst [vmem:[#allocation39_spill] sm:$0xff] %v8391_v20 }
 0x18b   :  { %14645 = vst [vmem:[#allocation41_spill] sm:$0xff] %v8414_v50 }
 0x18c   :  { %v2633_v8 = vpop.f32.mrf.mxu1  ;;  %v2888_v36 = vpop.f32.mrf.mxu3 }
 0x18e   :  { %v1979_v11 = vpop.f32.mrf.mxu0 }
 0x18f   :  { %6638 = vmatmul.msk.bf16.gmra.mxu1 %vm1503_vm2, %v5753_v2  ;;  %v8389_v14 = vadd.f32 %v2628_v34, %v1979_v11  ;;  %v2236_v63 = vpop.f32.mrf.mxu2  ;;  %v6893_v11 = vld [vmem:[%s14170_s0 + $0x4b4] sm:$0xf0] }
 0x190   :  { %v8425_v5 = vadd.f32 %v2885_v4, %v2236_v63 }
 0x191   :  { %14642 = vst [vmem:[#allocation38_spill] sm:$0xff] %v8389_v14  ;;  %2018 = vmatmul.bf16.gmra.mxu0 %v5741_v10  ;;  %v6156_v10 = vld [vmem:[%s14170_s0 + $0x4b0] sm:$0xf] }
 0x192   :  { %14647 = vst [vmem:[#allocation43_spill] sm:$0xff] %v8425_v5  ;;  %v6157_v18 = vor.u32 %v6893_v11, %v6156_v10  ;;  %v6164_v10 = vld [vmem:[%s14170_s0 + $0x4c0] sm:$0xf]  ;;  %v6895_v11 = vld [vmem:[%s14170_s0 + $0x4c4] sm:$0xf0] }
 0x194   :  { %v2635_v34 = vpop.f32.mrf.mxu1  ;;  %2278 = vmatmul.bf16.gmra.mxu2 %v6157_v18  ;;  %v2890_v63 = vpop.f32.mrf.mxu3  ;;  %v6165_v18 = vor.u32 %v6895_v11, %v6164_v10 }
 0x196   :  { %v1981_v35 = vpop.f32.mrf.mxu0 }
 0x197   :  { %v8406_v42 = vadd.f32 %v2630_v53, %v1981_v35  ;;  %v6791_v53 = vld [vmem:[%s14170_s0 + $0x184] sm:$0xf0]  ;;  %v2239_v29 = vpop.f32.mrf.mxu2  ;;  %v5766_v35 = vld [vmem:[%s14170_s0 + $0x1a8] sm:$0xf0] }
 0x198   :  { %v5749_v60 = vor.u32 %v6791_v53, %v5748_v54  ;;  %v8448_v45 = vadd.f32 %v2888_v36, %v2239_v29  ;;  %v5769_v46 = vor.u32 %v6794_v33, %v5766_v35  ;;  %v6796_v35 = vld [vmem:[%s14170_s0 + $0x1b4] sm:$0xf]  ;;  %v5774_v36 = vld [vmem:[%s14170_s0 + $0x1b8] sm:$0xf0] }
 0x199   :  { %14644 = vst [vmem:[#allocation40_spill] sm:$0xff] %v8406_v42 }
 0x19a   :  { %14649 = vst [vmem:[#allocation45_spill] sm:$0xff] %v8448_v45 }
 0x19c   :  { %v2638_v56 = vpop.f32.mrf.mxu1 }
 0x19e   :  { %v1984_v62 = vpop.f32.mrf.mxu0 }
 0x19f   :  { %6639 = vmatmul.msk.bf16.gmra.mxu1 %vm1503_vm2, %v5761_v51  ;;  %v8423_v2 = vadd.f32 %v2633_v8, %v1984_v62  ;;  %v6158_v8 = vld [vmem:[%s14170_s0 + $0x4b8] sm:$0xf0] }
 0x1a0   :  { %v6161_v21 = vor.u32 %v6892_v12, %v6158_v8  ;;  %v6894_v12 = vld [vmem:[%s14170_s0 + $0x4c4] sm:$0xf] }
 0x1a1   :  { %14646 = vst [vmem:[#allocation42_spill] sm:$0xff] %v8423_v2  ;;  %2023 = vmatmul.bf16.gmra.mxu0 %v5749_v60  ;;  %v2241_v60 = vpop.f32.mrf.mxu2 }
 0x1a2   :  { %6689 = vmatmul.msk.bf16.gmra.mxu3 %vm1503_vm2, %v6161_v21  ;;  %v8459_v4 = vadd.f32 %v2890_v63, %v2241_v60 }
 0x1a4   :  { %v2640_v24 = vpop.f32.mrf.mxu1  ;;  %14651 = vst [vmem:[#allocation47_spill] sm:$0xff] %v8459_v4  ;;  %2283 = vmatmul.bf16.gmra.mxu2 %v6165_v18 }
 0x1a6   :  { %v1986_v26 = vpop.f32.mrf.mxu0 }
 0x1a7   :  { %v8440_v32 = vadd.f32 %v2635_v34, %v1986_v26  ;;  %v6793_v34 = vld [vmem:[%s14170_s0 + $0x194] sm:$0xf0] }
 0x1a8   :  { %v5757_v54 = vor.u32 %v6793_v34, %v5756_v47  ;;  %v5777_v34 = vor.u32 %v6796_v35, %v5774_v36 }
 0x1a9   :  { %14648 = vst [vmem:[#allocation44_spill] sm:$0xff] %v8440_v32  ;;  %v2244_v29 = vpop.f32.mrf.mxu2 }
 0x1ac   :  { %v2643_v51 = vpop.f32.mrf.mxu1 }
 0x1ae   :  { %v1989_v53 = vpop.f32.mrf.mxu0 }
 0x1af   :  { %6640 = vmatmul.msk.bf16.gmra.mxu1 %vm1503_vm2, %v5769_v46  ;;  %v8457_v62 = vadd.f32 %v2638_v56, %v1989_v53  ;;  %v6166_v56 = vld [vmem:[%s14170_s0 + $0x4c8] sm:$0xf0]  ;;  %v2893_v46 = vpop.f32.mrf.mxu3 }
 0x1b0   :  { %v6169_v8 = vor.u32 %v6894_v12, %v6166_v56  ;;  %v8482_v47 = vadd.f32 %v2893_v46, %v2244_v29  ;;  %v6172_v56 = vld [vmem:[%s14170_s0 + $0x4d0] sm:$0xf] }
 0x1b1   :  { %14650 = vst [vmem:[#allocation46_spill] sm:$0xff] %v8457_v62  ;;  %2028 = vmatmul.bf16.gmra.mxu0 %v5757_v54  ;;  %v5764_v54 = vld [vmem:[%s14170_s0 + $0x1a0] sm:$0xf]  ;;  %v2246_v10 = vpop.f32.mrf.mxu2 }
 0x1b2   :  { %6690 = vmatmul.msk.bf16.gmra.mxu3 %vm1503_vm2, %v6169_v8  ;;  %14653 = vst [vmem:[#allocation49_spill] sm:$0xff] %v8482_v47  ;;  %v6897_v8 = vld [vmem:[%s14170_s0 + $0x4d4] sm:$0xf0] }
 0x1b3   :  { %v6173_v29 = vor.u32 %v6897_v8, %v6172_v56  ;;  %v5772_v56 = vld [vmem:[%s14170_s0 + $0x1b0] sm:$0xf] }
 0x1b4   :  { %v2645_v21 = vpop.f32.mrf.mxu1 }
 0x1b5   :  { %2288 = vmatmul.bf16.gmra.mxu2 %v6173_v29 }
 0x1b6   :  { %v1991_v26 = vpop.f32.mrf.mxu0 }
 0x1b7   :  { %v8474_v33 = vadd.f32 %v2640_v24, %v1991_v26  ;;  %v6795_v24 = vld [vmem:[%s14170_s0 + $0x1a4] sm:$0xf0]  ;;  %v2895_v12 = vpop.f32.mrf.mxu3  ;;  %v6896_v26 = vld [vmem:[%s14170_s0 + $0x4d4] sm:$0xf] }
 0x1b8   :  { %v5765_v60 = vor.u32 %v6795_v24, %v5764_v54  ;;  %v8493_v18 = vadd.f32 %v2895_v12, %v2246_v10  ;;  %v6798_v24 = vld [vmem:[%s14170_s0 + $0x1c4] sm:$0xf] }
 0x1b9   :  { %14652 = vst [vmem:[#allocation48_spill] sm:$0xff] %v8474_v33 }
 0x1ba   :  { %14655 = vst [vmem:[#allocation51_spill] sm:$0xff] %v8493_v18 }
 0x1bc   :  { %v2648_v53 = vpop.f32.mrf.mxu1 }
 0x1be   :  { %v1994_v63 = vpop.f32.mrf.mxu0 }
 0x1bf   :  { %6641 = vmatmul.msk.bf16.gmra.mxu1 %vm1503_vm2, %v5777_v34  ;;  %v8491_v11 = vadd.f32 %v2643_v51, %v1994_v63  ;;  %v6174_v51 = vld [vmem:[%s14170_s0 + $0x4d8] sm:$0xf0]  ;;  %v2249_v34 = vpop.f32.mrf.mxu2  ;;  %v2898_v63 = vpop.f32.mrf.mxu3 }
 0x1c0   :  { %v6177_v35 = vor.u32 %v6896_v26, %v6174_v51  ;;  %v8516_v10 = vadd.f32 %v2898_v63, %v2249_v34  ;;  %v6898_v63 = vld [vmem:[%s14170_s0 + $0x4e4] sm:$0xf] }
 0x1c1   :  { %14654 = vst [vmem:[#allocation50_spill] sm:$0xff] %v8491_v11  ;;  %2033 = vmatmul.bf16.gmra.mxu0 %v5765_v60  ;;  %v5782_v60 = vld [vmem:[%s14170_s0 + $0x1c8] sm:$0xf0] }
 0x1c2   :  { %6691 = vmatmul.msk.bf16.gmra.mxu3 %vm1503_vm2, %v6177_v35  ;;  %14657 = vst [vmem:[#allocation53_spill] sm:$0xff] %v8516_v10  ;;  %v5785_v12 = vor.u32 %v6798_v24, %v5782_v60  ;;  %v6180_v24 = vld [vmem:[%s14170_s0 + $0x4e0] sm:$0xf]  ;;  %v6899_v60 = vld [vmem:[%s14170_s0 + $0x4e4] sm:$0xf0] }
 0x1c4   :  { %v2650_v36 = vpop.f32.mrf.mxu1 }
 0x1c6   :  { %v1996_v46 = vpop.f32.mrf.mxu0 }
 0x1c7   :  { %v8508_v54 = vadd.f32 %v2645_v21, %v1996_v46  ;;  %v6797_v21 = vld [vmem:[%s14170_s0 + $0x1b4] sm:$0xf0]  ;;  %v2251_v51 = vpop.f32.mrf.mxu2  ;;  %v2900_v46 = vpop.f32.mrf.mxu3 }
 0x1c8   :  { %v5773_v26 = vor.u32 %v6797_v21, %v5772_v56  ;;  %v8527_v34 = vadd.f32 %v2900_v46, %v2251_v51 }
 0x1c9   :  { %14656 = vst [vmem:[#allocation52_spill] sm:$0xff] %v8508_v54 }
 0x1ca   :  { %14659 = vst [vmem:[#allocation55_spill] sm:$0xff] %v8527_v34  ;;  %v6800_v34 = vld [vmem:[%s14170_s0 + $0x1d4] sm:$0xf] }
 0x1cc   :  { %v2653_v8 = vpop.f32.mrf.mxu1 }
 0x1ce   :  { %v1999_v29 = vpop.f32.mrf.mxu0 }
 0x1cf   :  { %6642 = vmatmul.msk.bf16.gmra.mxu1 %vm1503_vm2, %v5785_v12  ;;  %v8525_v35 = vadd.f32 %v2648_v53, %v1999_v29  ;;  %v6181_v12 = vor.u32 %v6899_v60, %v6180_v24  ;;  %v6182_v53 = vld [vmem:[%s14170_s0 + $0x4e8] sm:$0xf0]  ;;  %v2254_v51 = vpop.f32.mrf.mxu2  ;;  %v2903_v24 = vpop.f32.mrf.mxu3 }
 0x1d0   :  { %v6185_v56 = vor.u32 %v6898_v63, %v6182_v53  ;;  %v8550_v60 = vadd.f32 %v2903_v24, %v2254_v51  ;;  %v6900_v24 = vld [vmem:[%s14170_s0 + $0x4f4] sm:$0xf] }
 0x1d1   :  { %14658 = vst [vmem:[#allocation54_spill] sm:$0xff] %v8525_v35  ;;  %2038 = vmatmul.bf16.gmra.mxu0 %v5773_v26  ;;  %2293 = vmatmul.bf16.gmra.mxu2 %v6181_v12  ;;  %v5790_v26 = vld [vmem:[%s14170_s0 + $0x1d8] sm:$0xf0]  ;;  %v5780_v12 = vld [vmem:[%s14170_s0 + $0x1c0] sm:$0xf] }
 0x1d2   :  { %6692 = vmatmul.msk.bf16.gmra.mxu3 %vm1503_vm2, %v6185_v56  ;;  %14661 = vst [vmem:[#allocation57_spill] sm:$0xff] %v8550_v60  ;;  %v5793_v63 = vor.u32 %v6800_v34, %v5790_v26  ;;  %v6188_v34 = vld [vmem:[%s14170_s0 + $0x4f0] sm:$0xf]  ;;  %v6901_v26 = vld [vmem:[%s14170_s0 + $0x4f4] sm:$0xf0] }
 0x1d4   :  { %v2655_v21 = vpop.f32.mrf.mxu1 }
 0x1d6   :  { %v2001_v29 = vpop.f32.mrf.mxu0 }
 0x1d7   :  { %v8542_v46 = vadd.f32 %v2650_v36, %v2001_v29  ;;  %v6799_v36 = vld [vmem:[%s14170_s0 + $0x1c4] sm:$0xf0]  ;;  %v2256_v10 = vpop.f32.mrf.mxu2  ;;  %v2905_v47 = vpop.f32.mrf.mxu3 }
 0x1d8   :  { %v5781_v56 = vor.u32 %v6799_v36, %v5780_v12  ;;  %v8561_v51 = vadd.f32 %v2905_v47, %v2256_v10 }
 0x1d9   :  { %14660 = vst [vmem:[#allocation56_spill] sm:$0xff] %v8542_v46 }
 0x1da   :  { %14663 = vst [vmem:[#allocation59_spill] sm:$0xff] %v8561_v51  ;;  %v6802_v51 = vld [vmem:[%s14170_s0 + $0x1e4] sm:$0xf] }
 0x1dc   :  { %v2658_v53 = vpop.f32.mrf.mxu1 }
 0x1de   :  { %v2004_v29 = vpop.f32.mrf.mxu0 }
 0x1df   :  { %6643 = vmatmul.msk.bf16.gmra.mxu1 %vm1503_vm2, %v5793_v63  ;;  %v8559_v18 = vadd.f32 %v2653_v8, %v2004_v29  ;;  %v6189_v63 = vor.u32 %v6901_v26, %v6188_v34  ;;  %v6190_v8 = vld [vmem:[%s14170_s0 + $0x4f8] sm:$0xf0]  ;;  %v2259_v36 = vpop.f32.mrf.mxu2  ;;  %v2908_v34 = vpop.f32.mrf.mxu3 }
 0x1e0   :  { %v6193_v47 = vor.u32 %v6900_v24, %v6190_v8  ;;  %v8584_v26 = vadd.f32 %v2908_v34, %v2259_v36  ;;  %v6902_v34 = vld [vmem:[%s14170_s0 + $0x504] sm:$0xf] }
 0x1e1   :  { %14662 = vst [vmem:[#allocation58_spill] sm:$0xff] %v8559_v18  ;;  %2043 = vmatmul.bf16.gmra.mxu0 %v5781_v56  ;;  %2298 = vmatmul.bf16.gmra.mxu2 %v6189_v63  ;;  %v5798_v56 = vld [vmem:[%s14170_s0 + $0x1e8] sm:$0xf0]  ;;  %v5788_v63 = vld [vmem:[%s14170_s0 + $0x1d0] sm:$0xf] }
 0x1e2   :  { %6693 = vmatmul.msk.bf16.gmra.mxu3 %vm1503_vm2, %v6193_v47  ;;  %14665 = vst [vmem:[#allocation61_spill] sm:$0xff] %v8584_v26  ;;  %v5801_v24 = vor.u32 %v6802_v51, %v5798_v56  ;;  %v6196_v51 = vld [vmem:[%s14170_s0 + $0x500] sm:$0xf]  ;;  %v6903_v56 = vld [vmem:[%s14170_s0 + $0x504] sm:$0xf0] }
 0x1e4   :  { %v2660_v10 = vpop.f32.mrf.mxu1 }
 0x1e6   :  { %v2006_v12 = vpop.f32.mrf.mxu0 }
 0x1e7   :  { %v8576_v29 = vadd.f32 %v2655_v21, %v2006_v12  ;;  %v6801_v21 = vld [vmem:[%s14170_s0 + $0x1d4] sm:$0xf0]  ;;  %v2261_v60 = vpop.f32.mrf.mxu2  ;;  %v2910_v45 = vpop.f32.mrf.mxu3 }
 0x1e8   :  { %v5789_v47 = vor.u32 %v6801_v21, %v5788_v63  ;;  %v8595_v36 = vadd.f32 %v2910_v45, %v2261_v60 }
 0x1e9   :  { %14664 = vst [vmem:[#allocation60_spill] sm:$0xff] %v8576_v29 }
 0x1ea   :  { %14667 = vst [vmem:[#allocation63_spill] sm:$0xff] %v8595_v36  ;;  %v6804_v36 = vld [vmem:[%s14170_s0 + $0x1f4] sm:$0xf] }
 0x1ec   :  { %v2663_v8 = vpop.f32.mrf.mxu1 }
 0x1ee   :  { %v2009_v12 = vpop.f32.mrf.mxu0 }
 0x1ef   :  { %6644 = vmatmul.msk.bf16.gmra.mxu1 %vm1503_vm2, %v5801_v24  ;;  %v8593_v4 = vadd.f32 %v2658_v53, %v2009_v12  ;;  %v6197_v24 = vor.u32 %v6903_v56, %v6196_v51  ;;  %v6198_v53 = vld [vmem:[%s14170_s0 + $0x508] sm:$0xf0]  ;;  %v2264_v21 = vpop.f32.mrf.mxu2  ;;  %v2913_v51 = vpop.f32.mrf.mxu3 }
 0x1f0   :  { %v6201_v45 = vor.u32 %v6902_v34, %v6198_v53  ;;  %v8618_v56 = vadd.f32 %v2913_v51, %v2264_v21  ;;  %v6904_v51 = vld [vmem:[%s14170_s0 + $0x514] sm:$0xf] }
 0x1f1   :  { %14666 = vst [vmem:[#allocation62_spill] sm:$0xff] %v8593_v4  ;;  %2048 = vmatmul.bf16.gmra.mxu0 %v5789_v47  ;;  %2303 = vmatmul.bf16.gmra.mxu2 %v6197_v24  ;;  %v5806_v47 = vld [vmem:[%s14170_s0 + $0x1f8] sm:$0xf0]  ;;  %v5796_v24 = vld [vmem:[%s14170_s0 + $0x1e0] sm:$0xf] }
 0x1f2   :  { %6694 = vmatmul.msk.bf16.gmra.mxu3 %vm1503_vm2, %v6201_v45  ;;  %14669 = vst [vmem:[#allocation65_spill] sm:$0xff] %v8618_v56  ;;  %v5809_v34 = vor.u32 %v6804_v36, %v5806_v47  ;;  %v6204_v36 = vld [vmem:[%s14170_s0 + $0x510] sm:$0xf]  ;;  %v6905_v47 = vld [vmem:[%s14170_s0 + $0x514] sm:$0xf0] }
 0x1f4   :  { %v2665_v60 = vpop.f32.mrf.mxu1 }
 0x1f6   :  { %v2011_v63 = vpop.f32.mrf.mxu0 }
 0x1f7   :  { %v8610_v12 = vadd.f32 %v2660_v10, %v2011_v63  ;;  %v6803_v10 = vld [vmem:[%s14170_s0 + $0x1e4] sm:$0xf0]  ;;  %v2266_v26 = vpop.f32.mrf.mxu2  ;;  %v2915_v50 = vpop.f32.mrf.mxu3 }
 0x1f8   :  { %v5797_v45 = vor.u32 %v6803_v10, %v5796_v24  ;;  %v8629_v21 = vadd.f32 %v2915_v50, %v2266_v26 }
 0x1f9   :  { %14668 = vst [vmem:[#allocation64_spill] sm:$0xff] %v8610_v12 }
 0x1fa   :  { %14671 = vst [vmem:[#allocation67_spill] sm:$0xff] %v8629_v21  ;;  %v6806_v21 = vld [vmem:[%s14170_s0 + $0x204] sm:$0xf] }
 0x1fc   :  { %v2668_v53 = vpop.f32.mrf.mxu1 }
 0x1fe   :  { %v2014_v63 = vpop.f32.mrf.mxu0 }
 0x1ff   :  { %6645 = vmatmul.msk.bf16.gmra.mxu1 %vm1503_vm2, %v5809_v34  ;;  %v8627_v5 = vadd.f32 %v2663_v8, %v2014_v63  ;;  %v6205_v34 = vor.u32 %v6905_v47, %v6204_v36  ;;  %v6206_v8 = vld [vmem:[%s14170_s0 + $0x518] sm:$0xf0]  ;;  %v2269_v10 = vpop.f32.mrf.mxu2  ;;  %v2918_v36 = vpop.f32.mrf.mxu3 }
 0x200   :  { %v6209_v50 = vor.u32 %v6904_v51, %v6206_v8  ;;  %v8652_v47 = vadd.f32 %v2918_v36, %v2269_v10  ;;  %v6906_v36 = vld [vmem:[%s14170_s0 + $0x524] sm:$0xf] }
 0x201   :  { %14670 = vst [vmem:[#allocation66_spill] sm:$0xff] %v8627_v5  ;;  %2053 = vmatmul.bf16.gmra.mxu0 %v5797_v45  ;;  %2308 = vmatmul.bf16.gmra.mxu2 %v6205_v34  ;;  %v5814_v45 = vld [vmem:[%s14170_s0 + $0x208] sm:$0xf0]  ;;  %v5804_v34 = vld [vmem:[%s14170_s0 + $0x1f0] sm:$0xf] }
 0x202   :  { %6695 = vmatmul.msk.bf16.gmra.mxu3 %vm1503_vm2, %v6209_v50  ;;  %14673 = vst [vmem:[#allocation69_spill] sm:$0xff] %v8652_v47  ;;  %v5817_v51 = vor.u32 %v6806_v21, %v5814_v45  ;;  %v6212_v21 = vld [vmem:[%s14170_s0 + $0x520] sm:$0xf]  ;;  %v6907_v45 = vld [vmem:[%s14170_s0 + $0x524] sm:$0xf0] }
 0x204   :  { %v2670_v26 = vpop.f32.mrf.mxu1 }
 0x206   :  { %v2016_v24 = vpop.f32.mrf.mxu0 }
 0x207   :  { %v8644_v63 = vadd.f32 %v2665_v60, %v2016_v24  ;;  %v6805_v60 = vld [vmem:[%s14170_s0 + $0x1f4] sm:$0xf0]  ;;  %v2271_v56 = vpop.f32.mrf.mxu2  ;;  %v2920_v1 = vpop.f32.mrf.mxu3 }
 0x208   :  { %v5805_v50 = vor.u32 %v6805_v60, %v5804_v34  ;;  %v8663_v10 = vadd.f32 %v2920_v1, %v2271_v56 }
 0x209   :  { %14672 = vst [vmem:[#allocation68_spill] sm:$0xff] %v8644_v63 }
 0x20a   :  { %14675 = vst [vmem:[#allocation71_spill] sm:$0xff] %v8663_v10  ;;  %v6808_v10 = vld [vmem:[%s14170_s0 + $0x214] sm:$0xf] }
 0x20c   :  { %v2673_v8 = vpop.f32.mrf.mxu1 }
 0x20e   :  { %v2019_v24 = vpop.f32.mrf.mxu0 }
 0x20f   :  { %6646 = vmatmul.msk.bf16.gmra.mxu1 %vm1503_vm2, %v5817_v51  ;;  %v8661_v20 = vadd.f32 %v2668_v53, %v2019_v24  ;;  %v6213_v51 = vor.u32 %v6907_v45, %v6212_v21  ;;  %v6214_v53 = vld [vmem:[%s14170_s0 + $0x528] sm:$0xf0]  ;;  %v2274_v60 = vpop.f32.mrf.mxu2  ;;  %v2923_v21 = vpop.f32.mrf.mxu3 }
 0x210   :  { %v6217_v1 = vor.u32 %v6906_v36, %v6214_v53  ;;  %v8686_v45 = vadd.f32 %v2923_v21, %v2274_v60  ;;  %v6908_v21 = vld [vmem:[%s14170_s0 + $0x534] sm:$0xf] }
 0x211   :  { %14674 = vst [vmem:[#allocation70_spill] sm:$0xff] %v8661_v20  ;;  %2058 = vmatmul.bf16.gmra.mxu0 %v5805_v50  ;;  %2313 = vmatmul.bf16.gmra.mxu2 %v6213_v51  ;;  %v5822_v50 = vld [vmem:[%s14170_s0 + $0x218] sm:$0xf0]  ;;  %v5812_v51 = vld [vmem:[%s14170_s0 + $0x200] sm:$0xf] }
 0x212   :  { %6696 = vmatmul.msk.bf16.gmra.mxu3 %vm1503_vm2, %v6217_v1  ;;  %14677 = vst [vmem:[#allocation73_spill] sm:$0xff] %v8686_v45  ;;  %v5825_v36 = vor.u32 %v6808_v10, %v5822_v50  ;;  %v6220_v10 = vld [vmem:[%s14170_s0 + $0x530] sm:$0xf]  ;;  %v6909_v50 = vld [vmem:[%s14170_s0 + $0x534] sm:$0xf0] }
 0x214   :  { %v2675_v56 = vpop.f32.mrf.mxu1 }
 0x216   :  { %v2021_v34 = vpop.f32.mrf.mxu0 }
 0x217   :  { %v8678_v24 = vadd.f32 %v2670_v26, %v2021_v34  ;;  %v6807_v26 = vld [vmem:[%s14170_s0 + $0x204] sm:$0xf0]  ;;  %v2276_v47 = vpop.f32.mrf.mxu2  ;;  %v2925_v22 = vpop.f32.mrf.mxu3 }
 0x218   :  { %v5813_v1 = vor.u32 %v6807_v26, %v5812_v51  ;;  %v8697_v60 = vadd.f32 %v2925_v22, %v2276_v47 }
 0x219   :  { %14676 = vst [vmem:[#allocation72_spill] sm:$0xff] %v8678_v24 }
 0x21a   :  { %14679 = vst [vmem:[#allocation75_spill] sm:$0xff] %v8697_v60  ;;  %v6810_v60 = vld [vmem:[%s14170_s0 + $0x224] sm:$0xf] }
 0x21c   :  { %v2678_v53 = vpop.f32.mrf.mxu1 }
 0x21e   :  { %v2024_v34 = vpop.f32.mrf.mxu0 }
 0x21f   :  { %6647 = vmatmul.msk.bf16.gmra.mxu1 %vm1503_vm2, %v5825_v36  ;;  %v8695_v39 = vadd.f32 %v2673_v8, %v2024_v34  ;;  %v6221_v36 = vor.u32 %v6909_v50, %v6220_v10  ;;  %v6222_v8 = vld [vmem:[%s14170_s0 + $0x538] sm:$0xf0]  ;;  %v2279_v26 = vpop.f32.mrf.mxu2 }
 0x220   :  { %v6225_v22 = vor.u32 %v6908_v21, %v6222_v8 }
 0x221   :  { %14678 = vst [vmem:[#allocation74_spill] sm:$0xff] %v8695_v39  ;;  %2063 = vmatmul.bf16.gmra.mxu0 %v5813_v1  ;;  %2318 = vmatmul.bf16.gmra.mxu2 %v6221_v36  ;;  %v5830_v1 = vld [vmem:[%s14170_s0 + $0x228] sm:$0xf0]  ;;  %v5820_v36 = vld [vmem:[%s14170_s0 + $0x210] sm:$0xf] }
 0x222   :  { %6697 = vmatmul.msk.bf16.gmra.mxu3 %vm1503_vm2, %v6225_v22  ;;  %v5833_v21 = vor.u32 %v6810_v60, %v5830_v1  ;;  %v6228_v60 = vld [vmem:[%s14170_s0 + $0x540] sm:$0xf]  ;;  %v6911_v1 = vld [vmem:[%s14170_s0 + $0x544] sm:$0xf0] }
 0x224   :  { %v2680_v47 = vpop.f32.mrf.mxu1 }
 0x225   :  { %v2928_v10 = vpop.f32.mrf.mxu3 }
 0x226   :  { %v2026_v51 = vpop.f32.mrf.mxu0  ;;  %v8720_v50 = vadd.f32 %v2928_v10, %v2279_v26  ;;  %v6910_v10 = vld [vmem:[%s14170_s0 + $0x544] sm:$0xf] }
 0x227   :  { %v8712_v34 = vadd.f32 %v2675_v56, %v2026_v51  ;;  %v6809_v56 = vld [vmem:[%s14170_s0 + $0x214] sm:$0xf0]  ;;  %v2281_v45 = vpop.f32.mrf.mxu2 }
 0x228   :  { %14681 = vst [vmem:[#allocation77_spill] sm:$0xff] %v8720_v50  ;;  %v5821_v22 = vor.u32 %v6809_v56, %v5820_v36 }
 0x229   :  { %14680 = vst [vmem:[#allocation76_spill] sm:$0xff] %v8712_v34 }
 0x22c   :  { %v2683_v8 = vpop.f32.mrf.mxu1 }
 0x22d   :  { %v2930_v39 = vpop.f32.mrf.mxu3 }
 0x22e   :  { %v2029_v51 = vpop.f32.mrf.mxu0  ;;  %v8731_v26 = vadd.f32 %v2930_v39, %v2281_v45 }
 0x22f   :  { %6648 = vmatmul.msk.bf16.gmra.mxu1 %vm1503_vm2, %v5833_v21  ;;  %v8729_v34 = vadd.f32 %v2678_v53, %v2029_v51  ;;  %v6229_v21 = vor.u32 %v6911_v1, %v6228_v60  ;;  %v6230_v53 = vld [vmem:[%s14170_s0 + $0x548] sm:$0xf0]  ;;  %v2284_v56 = vpop.f32.mrf.mxu2 }
 0x230   :  { %14683 = vst [vmem:[#allocation79_spill] sm:$0xff] %v8731_v26  ;;  %v6233_v39 = vor.u32 %v6910_v10, %v6230_v53  ;;  %v6812_v26 = vld [vmem:[%s14170_s0 + $0x234] sm:$0xf] }
 0x231   :  { %14682 = vst [vmem:[#allocation78_spill] sm:$0xff] %v8729_v34  ;;  %2068 = vmatmul.bf16.gmra.mxu0 %v5821_v22  ;;  %2323 = vmatmul.bf16.gmra.mxu2 %v6229_v21  ;;  %v5838_v22 = vld [vmem:[%s14170_s0 + $0x238] sm:$0xf0]  ;;  %v5828_v21 = vld [vmem:[%s14170_s0 + $0x220] sm:$0xf] }
 0x232   :  { %6698 = vmatmul.msk.bf16.gmra.mxu3 %vm1503_vm2, %v6233_v39  ;;  %v5841_v10 = vor.u32 %v6812_v26, %v5838_v22  ;;  %v6236_v26 = vld [vmem:[%s14170_s0 + $0x550] sm:$0xf]  ;;  %v6913_v22 = vld [vmem:[%s14170_s0 + $0x554] sm:$0xf0] }
 0x234   :  { %v2685_v45 = vpop.f32.mrf.mxu1 }
 0x235   :  { %v2933_v60 = vpop.f32.mrf.mxu3 }
 0x236   :  { %v2031_v36 = vpop.f32.mrf.mxu0  ;;  %v8754_v1 = vadd.f32 %v2933_v60, %v2284_v56  ;;  %v6912_v60 = vld [vmem:[%s14170_s0 + $0x554] sm:$0xf] }
 0x237   :  { %v8746_v51 = vadd.f32 %v2680_v47, %v2031_v36  ;;  %v6811_v47 = vld [vmem:[%s14170_s0 + $0x224] sm:$0xf0]  ;;  %v2286_v50 = vpop.f32.mrf.mxu2 }
 0x238   :  { %14685 = vst [vmem:[#allocation81_spill] sm:$0xff] %v8754_v1  ;;  %v5829_v39 = vor.u32 %v6811_v47, %v5828_v21 }
 0x239   :  { %14684 = vst [vmem:[#allocation80_spill] sm:$0xff] %v8746_v51 }
 0x23c   :  { %v2688_v53 = vpop.f32.mrf.mxu1 }
 0x23d   :  { %v2935_v34 = vpop.f32.mrf.mxu3 }
 0x23e   :  { %v2034_v36 = vpop.f32.mrf.mxu0  ;;  %v8765_v56 = vadd.f32 %v2935_v34, %v2286_v50 }
 0x23f   :  { %6649 = vmatmul.msk.bf16.gmra.mxu1 %vm1503_vm2, %v5841_v10  ;;  %v8763_v51 = vadd.f32 %v2683_v8, %v2034_v36  ;;  %v6237_v10 = vor.u32 %v6913_v22, %v6236_v26  ;;  %v6238_v8 = vld [vmem:[%s14170_s0 + $0x558] sm:$0xf0]  ;;  %v2289_v47 = vpop.f32.mrf.mxu2 }
 0x240   :  { %14687 = vst [vmem:[#allocation83_spill] sm:$0xff] %v8765_v56  ;;  %v6241_v34 = vor.u32 %v6912_v60, %v6238_v8  ;;  %v6814_v56 = vld [vmem:[%s14170_s0 + $0x244] sm:$0xf] }
 0x241   :  { %14686 = vst [vmem:[#allocation82_spill] sm:$0xff] %v8763_v51  ;;  %2073 = vmatmul.bf16.gmra.mxu0 %v5829_v39  ;;  %2328 = vmatmul.bf16.gmra.mxu2 %v6237_v10  ;;  %v5846_v39 = vld [vmem:[%s14170_s0 + $0x248] sm:$0xf0]  ;;  %v5836_v10 = vld [vmem:[%s14170_s0 + $0x230] sm:$0xf] }
 0x242   :  { %6699 = vmatmul.msk.bf16.gmra.mxu3 %vm1503_vm2, %v6241_v34  ;;  %v5849_v60 = vor.u32 %v6814_v56, %v5846_v39  ;;  %v6244_v56 = vld [vmem:[%s14170_s0 + $0x560] sm:$0xf]  ;;  %v6915_v39 = vld [vmem:[%s14170_s0 + $0x564] sm:$0xf0] }
 0x244   :  { %v2690_v50 = vpop.f32.mrf.mxu1 }
 0x245   :  { %v2938_v26 = vpop.f32.mrf.mxu3 }
 0x246   :  { %v2036_v21 = vpop.f32.mrf.mxu0  ;;  %v8788_v22 = vadd.f32 %v2938_v26, %v2289_v47  ;;  %v6914_v26 = vld [vmem:[%s14170_s0 + $0x564] sm:$0xf] }
 0x247   :  { %v8780_v36 = vadd.f32 %v2685_v45, %v2036_v21  ;;  %v6813_v45 = vld [vmem:[%s14170_s0 + $0x234] sm:$0xf0]  ;;  %v2291_v1 = vpop.f32.mrf.mxu2 }
 0x248   :  { %14689 = vst [vmem:[#allocation85_spill] sm:$0xff] %v8788_v22  ;;  %v5837_v34 = vor.u32 %v6813_v45, %v5836_v10 }
 0x249   :  { %14688 = vst [vmem:[#allocation84_spill] sm:$0xff] %v8780_v36 }
 0x24c   :  { %v2693_v8 = vpop.f32.mrf.mxu1 }
 0x24d   :  { %v2940_v51 = vpop.f32.mrf.mxu3 }
 0x24e   :  { %v2039_v21 = vpop.f32.mrf.mxu0  ;;  %v8799_v47 = vadd.f32 %v2940_v51, %v2291_v1 }
 0x24f   :  { %6650 = vmatmul.msk.bf16.gmra.mxu1 %vm1503_vm2, %v5849_v60  ;;  %v8797_v36 = vadd.f32 %v2688_v53, %v2039_v21  ;;  %v6245_v60 = vor.u32 %v6915_v39, %v6244_v56  ;;  %v6246_v53 = vld [vmem:[%s14170_s0 + $0x568] sm:$0xf0] }
 0x250   :  { %14691 = vst [vmem:[#allocation87_spill] sm:$0xff] %v8799_v47  ;;  %v6249_v51 = vor.u32 %v6914_v26, %v6246_v53  ;;  %v6816_v47 = vld [vmem:[%s14170_s0 + $0x254] sm:$0xf] }
 0x251   :  { %14690 = vst [vmem:[#allocation86_spill] sm:$0xff] %v8797_v36  ;;  %2078 = vmatmul.bf16.gmra.mxu0 %v5837_v34  ;;  %2333 = vmatmul.bf16.gmra.mxu2 %v6245_v60  ;;  %v5854_v34 = vld [vmem:[%s14170_s0 + $0x258] sm:$0xf0]  ;;  %v5844_v60 = vld [vmem:[%s14170_s0 + $0x240] sm:$0xf] }
 0x252   :  { %6700 = vmatmul.msk.bf16.gmra.mxu3 %vm1503_vm2, %v6249_v51  ;;  %v5857_v26 = vor.u32 %v6816_v47, %v5854_v34  ;;  %v6252_v47 = vld [vmem:[%s14170_s0 + $0x570] sm:$0xf]  ;;  %v6917_v34 = vld [vmem:[%s14170_s0 + $0x574] sm:$0xf0] }
 0x254   :  { %v2695_v1 = vpop.f32.mrf.mxu1  ;;  %v2294_v45 = vpop.f32.mrf.mxu2 }
 0x255   :  { %v2943_v56 = vpop.f32.mrf.mxu3 }
 0x256   :  { %v2041_v10 = vpop.f32.mrf.mxu0  ;;  %v8822_v39 = vadd.f32 %v2943_v56, %v2294_v45  ;;  %v6916_v56 = vld [vmem:[%s14170_s0 + $0x574] sm:$0xf] }
 0x257   :  { %v8814_v21 = vadd.f32 %v2690_v50, %v2041_v10  ;;  %v6815_v50 = vld [vmem:[%s14170_s0 + $0x244] sm:$0xf0] }
 0x258   :  { %14693 = vst [vmem:[#allocation89_spill] sm:$0xff] %v8822_v39  ;;  %v5845_v51 = vor.u32 %v6815_v50, %v5844_v60 }
 0x259   :  { %14692 = vst [vmem:[#allocation88_spill] sm:$0xff] %v8814_v21 }
 0x25c   :  { %v2698_v53 = vpop.f32.mrf.mxu1  ;;  %v2296_v22 = vpop.f32.mrf.mxu2 }
 0x25d   :  { %v2945_v36 = vpop.f32.mrf.mxu3 }
 0x25e   :  { %v2044_v10 = vpop.f32.mrf.mxu0  ;;  %v8833_v45 = vadd.f32 %v2945_v36, %v2296_v22 }
 0x25f   :  { %6651 = vmatmul.msk.bf16.gmra.mxu1 %vm1503_vm2, %v5857_v26  ;;  %v8831_v21 = vadd.f32 %v2693_v8, %v2044_v10  ;;  %v6253_v26 = vor.u32 %v6917_v34, %v6252_v47  ;;  %v6254_v8 = vld [vmem:[%s14170_s0 + $0x578] sm:$0xf0] }
 0x260   :  { %14695 = vst [vmem:[#allocation91_spill] sm:$0xff] %v8833_v45  ;;  %v6257_v36 = vor.u32 %v6916_v56, %v6254_v8  ;;  %v6818_v45 = vld [vmem:[%s14170_s0 + $0x264] sm:$0xf] }
 0x261   :  { %14694 = vst [vmem:[#allocation90_spill] sm:$0xff] %v8831_v21  ;;  %2083 = vmatmul.bf16.gmra.mxu0 %v5845_v51  ;;  %2338 = vmatmul.bf16.gmra.mxu2 %v6253_v26  ;;  %v5862_v51 = vld [vmem:[%s14170_s0 + $0x268] sm:$0xf0]  ;;  %v5852_v26 = vld [vmem:[%s14170_s0 + $0x250] sm:$0xf] }
 0x262   :  { %6701 = vmatmul.msk.bf16.gmra.mxu3 %vm1503_vm2, %v6257_v36  ;;  %v5865_v56 = vor.u32 %v6818_v45, %v5862_v51  ;;  %v6260_v45 = vld [vmem:[%s14170_s0 + $0x580] sm:$0xf]  ;;  %v6919_v51 = vld [vmem:[%s14170_s0 + $0x584] sm:$0xf0] }
 0x264   :  { %v2700_v22 = vpop.f32.mrf.mxu1  ;;  %v2299_v50 = vpop.f32.mrf.mxu2 }
 0x265   :  { %v2948_v47 = vpop.f32.mrf.mxu3 }
 0x266   :  { %v2046_v60 = vpop.f32.mrf.mxu0  ;;  %v8856_v34 = vadd.f32 %v2948_v47, %v2299_v50  ;;  %v6918_v47 = vld [vmem:[%s14170_s0 + $0x584] sm:$0xf] }
 0x267   :  { %v8848_v10 = vadd.f32 %v2695_v1, %v2046_v60  ;;  %v6817_v1 = vld [vmem:[%s14170_s0 + $0x254] sm:$0xf0] }
 0x268   :  { %14697 = vst [vmem:[#allocation93_spill] sm:$0xff] %v8856_v34  ;;  %v5853_v36 = vor.u32 %v6817_v1, %v5852_v26 }
 0x269   :  { %14696 = vst [vmem:[#allocation92_spill] sm:$0xff] %v8848_v10 }
 0x26c   :  { %v2703_v8 = vpop.f32.mrf.mxu1  ;;  %v2301_v39 = vpop.f32.mrf.mxu2 }
 0x26d   :  { %v2950_v21 = vpop.f32.mrf.mxu3 }
 0x26e   :  { %v2049_v60 = vpop.f32.mrf.mxu0  ;;  %v8867_v50 = vadd.f32 %v2950_v21, %v2301_v39 }
 0x26f   :  { %6652 = vmatmul.msk.bf16.gmra.mxu1 %vm1503_vm2, %v5865_v56  ;;  %v8865_v10 = vadd.f32 %v2698_v53, %v2049_v60  ;;  %v6261_v56 = vor.u32 %v6919_v51, %v6260_v45  ;;  %v6262_v53 = vld [vmem:[%s14170_s0 + $0x588] sm:$0xf0] }
 0x270   :  { %14699 = vst [vmem:[#allocation95_spill] sm:$0xff] %v8867_v50  ;;  %v6265_v21 = vor.u32 %v6918_v47, %v6262_v53  ;;  %v6820_v50 = vld [vmem:[%s14170_s0 + $0x274] sm:$0xf] }
 0x271   :  { %14698 = vst [vmem:[#allocation94_spill] sm:$0xff] %v8865_v10  ;;  %2088 = vmatmul.bf16.gmra.mxu0 %v5853_v36  ;;  %2343 = vmatmul.bf16.gmra.mxu2 %v6261_v56  ;;  %v5870_v36 = vld [vmem:[%s14170_s0 + $0x278] sm:$0xf0]  ;;  %v5860_v56 = vld [vmem:[%s14170_s0 + $0x260] sm:$0xf] }
 0x272   :  { %6702 = vmatmul.msk.bf16.gmra.mxu3 %vm1503_vm2, %v6265_v21  ;;  %v5873_v47 = vor.u32 %v6820_v50, %v5870_v36  ;;  %v6268_v50 = vld [vmem:[%s14170_s0 + $0x590] sm:$0xf]  ;;  %v6921_v36 = vld [vmem:[%s14170_s0 + $0x594] sm:$0xf0] }
 0x274   :  { %v2705_v39 = vpop.f32.mrf.mxu1  ;;  %v2304_v1 = vpop.f32.mrf.mxu2 }
 0x275   :  { %v2953_v45 = vpop.f32.mrf.mxu3 }
 0x276   :  { %v2051_v26 = vpop.f32.mrf.mxu0  ;;  %v8890_v51 = vadd.f32 %v2953_v45, %v2304_v1  ;;  %v6920_v45 = vld [vmem:[%s14170_s0 + $0x594] sm:$0xf] }
 0x277   :  { %v8882_v60 = vadd.f32 %v2700_v22, %v2051_v26  ;;  %v6819_v22 = vld [vmem:[%s14170_s0 + $0x264] sm:$0xf0] }
 0x278   :  { %14701 = vst [vmem:[#allocation97_spill] sm:$0xff] %v8890_v51  ;;  %v5861_v21 = vor.u32 %v6819_v22, %v5860_v56 }
 0x279   :  { %14700 = vst [vmem:[#allocation96_spill] sm:$0xff] %v8882_v60 }
 0x27c   :  { %v2708_v53 = vpop.f32.mrf.mxu1  ;;  %v2306_v34 = vpop.f32.mrf.mxu2 }
 0x27d   :  { %v2955_v10 = vpop.f32.mrf.mxu3 }
 0x27e   :  { %v2054_v26 = vpop.f32.mrf.mxu0  ;;  %v8901_v1 = vadd.f32 %v2955_v10, %v2306_v34 }
 0x27f   :  { %6653 = vmatmul.msk.bf16.gmra.mxu1 %vm1503_vm2, %v5873_v47  ;;  %v8899_v60 = vadd.f32 %v2703_v8, %v2054_v26  ;;  %v6269_v47 = vor.u32 %v6921_v36, %v6268_v50  ;;  %v6270_v8 = vld [vmem:[%s14170_s0 + $0x598] sm:$0xf0] }
 0x280   :  { %14703 = vst [vmem:[#allocation99_spill] sm:$0xff] %v8901_v1  ;;  %v6273_v10 = vor.u32 %v6920_v45, %v6270_v8  ;;  %v6822_v1 = vld [vmem:[%s14170_s0 + $0x284] sm:$0xf] }
 0x281   :  { %14702 = vst [vmem:[#allocation98_spill] sm:$0xff] %v8899_v60  ;;  %2093 = vmatmul.bf16.gmra.mxu0 %v5861_v21  ;;  %2348 = vmatmul.bf16.gmra.mxu2 %v6269_v47  ;;  %v5878_v21 = vld [vmem:[%s14170_s0 + $0x288] sm:$0xf0]  ;;  %v5868_v47 = vld [vmem:[%s14170_s0 + $0x270] sm:$0xf] }
 0x282   :  { %6703 = vmatmul.msk.bf16.gmra.mxu3 %vm1503_vm2, %v6273_v10  ;;  %v5881_v45 = vor.u32 %v6822_v1, %v5878_v21  ;;  %v6276_v1 = vld [vmem:[%s14170_s0 + $0x5a0] sm:$0xf]  ;;  %v6923_v21 = vld [vmem:[%s14170_s0 + $0x5a4] sm:$0xf0] }
 0x284   :  { %v2710_v34 = vpop.f32.mrf.mxu1  ;;  %v2309_v22 = vpop.f32.mrf.mxu2 }
 0x285   :  { %v2958_v50 = vpop.f32.mrf.mxu3 }
 0x286   :  { %v2056_v56 = vpop.f32.mrf.mxu0  ;;  %v8924_v36 = vadd.f32 %v2958_v50, %v2309_v22  ;;  %v6922_v50 = vld [vmem:[%s14170_s0 + $0x5a4] sm:$0xf] }
 0x287   :  { %v8916_v26 = vadd.f32 %v2705_v39, %v2056_v56  ;;  %v6821_v39 = vld [vmem:[%s14170_s0 + $0x274] sm:$0xf0] }
 0x288   :  { %14705 = vst [vmem:[#allocation101_spill] sm:$0xff] %v8924_v36  ;;  %v5869_v10 = vor.u32 %v6821_v39, %v5868_v47 }
 0x289   :  { %14704 = vst [vmem:[#allocation100_spill] sm:$0xff] %v8916_v26 }
 0x28c   :  { %v2713_v8 = vpop.f32.mrf.mxu1  ;;  %v2311_v51 = vpop.f32.mrf.mxu2 }
 0x28d   :  { %v2960_v60 = vpop.f32.mrf.mxu3 }
 0x28e   :  { %v2059_v56 = vpop.f32.mrf.mxu0  ;;  %v8935_v22 = vadd.f32 %v2960_v60, %v2311_v51 }
 0x28f   :  { %6654 = vmatmul.msk.bf16.gmra.mxu1 %vm1503_vm2, %v5881_v45  ;;  %v8933_v26 = vadd.f32 %v2708_v53, %v2059_v56  ;;  %v6277_v45 = vor.u32 %v6923_v21, %v6276_v1  ;;  %v6278_v53 = vld [vmem:[%s14170_s0 + $0x5a8] sm:$0xf0] }
 0x290   :  { %14707 = vst [vmem:[#allocation103_spill] sm:$0xff] %v8935_v22  ;;  %v6281_v60 = vor.u32 %v6922_v50, %v6278_v53  ;;  %v6824_v22 = vld [vmem:[%s14170_s0 + $0x294] sm:$0xf] }
 0x291   :  { %14706 = vst [vmem:[#allocation102_spill] sm:$0xff] %v8933_v26  ;;  %2098 = vmatmul.bf16.gmra.mxu0 %v5869_v10  ;;  %2353 = vmatmul.bf16.gmra.mxu2 %v6277_v45  ;;  %v5886_v10 = vld [vmem:[%s14170_s0 + $0x298] sm:$0xf0]  ;;  %v5876_v45 = vld [vmem:[%s14170_s0 + $0x280] sm:$0xf] }
 0x292   :  { %6704 = vmatmul.msk.bf16.gmra.mxu3 %vm1503_vm2, %v6281_v60  ;;  %v5889_v50 = vor.u32 %v6824_v22, %v5886_v10  ;;  %v6284_v22 = vld [vmem:[%s14170_s0 + $0x5b0] sm:$0xf]  ;;  %v6925_v10 = vld [vmem:[%s14170_s0 + $0x5b4] sm:$0xf0] }
 0x294   :  { %v2715_v51 = vpop.f32.mrf.mxu1  ;;  %v2314_v39 = vpop.f32.mrf.mxu2 }
 0x295   :  { %v2963_v1 = vpop.f32.mrf.mxu3 }
 0x296   :  { %v2061_v47 = vpop.f32.mrf.mxu0  ;;  %v8958_v21 = vadd.f32 %v2963_v1, %v2314_v39  ;;  %v6924_v1 = vld [vmem:[%s14170_s0 + $0x5b4] sm:$0xf] }
 0x297   :  { %v8950_v56 = vadd.f32 %v2710_v34, %v2061_v47  ;;  %v6823_v34 = vld [vmem:[%s14170_s0 + $0x284] sm:$0xf0] }
 0x298   :  { %14709 = vst [vmem:[#allocation105_spill] sm:$0xff] %v8958_v21  ;;  %v5877_v60 = vor.u32 %v6823_v34, %v5876_v45 }
 0x299   :  { %14708 = vst [vmem:[#allocation104_spill] sm:$0xff] %v8950_v56 }
 0x29c   :  { %v2718_v53 = vpop.f32.mrf.mxu1  ;;  %v2316_v36 = vpop.f32.mrf.mxu2 }
 0x29d   :  { %v2965_v26 = vpop.f32.mrf.mxu3 }
 0x29e   :  { %v2064_v47 = vpop.f32.mrf.mxu0  ;;  %v8969_v39 = vadd.f32 %v2965_v26, %v2316_v36 }
 0x29f   :  { %6655 = vmatmul.msk.bf16.gmra.mxu1 %vm1503_vm2, %v5889_v50  ;;  %v8967_v56 = vadd.f32 %v2713_v8, %v2064_v47  ;;  %v6285_v50 = vor.u32 %v6925_v10, %v6284_v22  ;;  %v6286_v8 = vld [vmem:[%s14170_s0 + $0x5b8] sm:$0xf0] }
 0x2a0   :  { %14711 = vst [vmem:[#allocation107_spill] sm:$0xff] %v8969_v39  ;;  %v6289_v26 = vor.u32 %v6924_v1, %v6286_v8  ;;  %v6826_v39 = vld [vmem:[%s14170_s0 + $0x2a4] sm:$0xf] }
 0x2a1   :  { %14710 = vst [vmem:[#allocation106_spill] sm:$0xff] %v8967_v56  ;;  %2103 = vmatmul.bf16.gmra.mxu0 %v5877_v60  ;;  %2358 = vmatmul.bf16.gmra.mxu2 %v6285_v50  ;;  %v5894_v60 = vld [vmem:[%s14170_s0 + $0x2a8] sm:$0xf0]  ;;  %v5884_v50 = vld [vmem:[%s14170_s0 + $0x290] sm:$0xf] }
 0x2a2   :  { %6705 = vmatmul.msk.bf16.gmra.mxu3 %vm1503_vm2, %v6289_v26  ;;  %v5897_v1 = vor.u32 %v6826_v39, %v5894_v60  ;;  %v6292_v39 = vld [vmem:[%s14170_s0 + $0x5c0] sm:$0xf]  ;;  %v6927_v60 = vld [vmem:[%s14170_s0 + $0x5c4] sm:$0xf0] }
 0x2a4   :  { %v2720_v36 = vpop.f32.mrf.mxu1  ;;  %v2319_v34 = vpop.f32.mrf.mxu2 }
 0x2a5   :  { %v2968_v22 = vpop.f32.mrf.mxu3 }
 0x2a6   :  { %v2066_v45 = vpop.f32.mrf.mxu0  ;;  %v8992_v10 = vadd.f32 %v2968_v22, %v2319_v34  ;;  %v6926_v22 = vld [vmem:[%s14170_s0 + $0x5c4] sm:$0xf] }
 0x2a7   :  { %v8984_v47 = vadd.f32 %v2715_v51, %v2066_v45  ;;  %v6825_v51 = vld [vmem:[%s14170_s0 + $0x294] sm:$0xf0] }
 0x2a8   :  { %14713 = vst [vmem:[#allocation109_spill] sm:$0xff] %v8992_v10  ;;  %v5885_v26 = vor.u32 %v6825_v51, %v5884_v50 }
 0x2a9   :  { %14712 = vst [vmem:[#allocation108_spill] sm:$0xff] %v8984_v47 }
 0x2ac   :  { %v2723_v8 = vpop.f32.mrf.mxu1  ;;  %v2321_v21 = vpop.f32.mrf.mxu2 }
 0x2ad   :  { %v2970_v56 = vpop.f32.mrf.mxu3 }
 0x2ae   :  { %v2069_v45 = vpop.f32.mrf.mxu0  ;;  %v9003_v34 = vadd.f32 %v2970_v56, %v2321_v21 }
 0x2af   :  { %6656 = vmatmul.msk.bf16.gmra.mxu1 %vm1503_vm2, %v5897_v1  ;;  %v9001_v47 = vadd.f32 %v2718_v53, %v2069_v45  ;;  %v6293_v1 = vor.u32 %v6927_v60, %v6292_v39  ;;  %v6294_v53 = vld [vmem:[%s14170_s0 + $0x5c8] sm:$0xf0] }
 0x2b0   :  { %14715 = vst [vmem:[#allocation111_spill] sm:$0xff] %v9003_v34  ;;  %v6297_v56 = vor.u32 %v6926_v22, %v6294_v53  ;;  %v6828_v34 = vld [vmem:[%s14170_s0 + $0x2b4] sm:$0xf] }
 0x2b1   :  { %14714 = vst [vmem:[#allocation110_spill] sm:$0xff] %v9001_v47  ;;  %2108 = vmatmul.bf16.gmra.mxu0 %v5885_v26  ;;  %2363 = vmatmul.bf16.gmra.mxu2 %v6293_v1  ;;  %v5902_v26 = vld [vmem:[%s14170_s0 + $0x2b8] sm:$0xf0]  ;;  %v5892_v1 = vld [vmem:[%s14170_s0 + $0x2a0] sm:$0xf] }
 0x2b2   :  { %6706 = vmatmul.msk.bf16.gmra.mxu3 %vm1503_vm2, %v6297_v56  ;;  %v5905_v22 = vor.u32 %v6828_v34, %v5902_v26  ;;  %v6300_v34 = vld [vmem:[%s14170_s0 + $0x5d0] sm:$0xf]  ;;  %v6929_v26 = vld [vmem:[%s14170_s0 + $0x5d4] sm:$0xf0] }
 0x2b4   :  { %v2725_v21 = vpop.f32.mrf.mxu1  ;;  %v2324_v51 = vpop.f32.mrf.mxu2 }
 0x2b5   :  { %v2973_v39 = vpop.f32.mrf.mxu3 }
 0x2b6   :  { %v2071_v50 = vpop.f32.mrf.mxu0  ;;  %v9026_v60 = vadd.f32 %v2973_v39, %v2324_v51  ;;  %v6928_v39 = vld [vmem:[%s14170_s0 + $0x5d4] sm:$0xf] }
 0x2b7   :  { %v9018_v45 = vadd.f32 %v2720_v36, %v2071_v50  ;;  %v6827_v36 = vld [vmem:[%s14170_s0 + $0x2a4] sm:$0xf0] }
 0x2b8   :  { %14717 = vst [vmem:[#allocation113_spill] sm:$0xff] %v9026_v60  ;;  %v5893_v56 = vor.u32 %v6827_v36, %v5892_v1 }
 0x2b9   :  { %14716 = vst [vmem:[#allocation112_spill] sm:$0xff] %v9018_v45 }
 0x2bc   :  { %v2728_v53 = vpop.f32.mrf.mxu1  ;;  %v2326_v10 = vpop.f32.mrf.mxu2 }
 0x2bd   :  { %v2975_v47 = vpop.f32.mrf.mxu3 }
 0x2be   :  { %v2074_v50 = vpop.f32.mrf.mxu0  ;;  %v9037_v51 = vadd.f32 %v2975_v47, %v2326_v10 }
 0x2bf   :  { %6657 = vmatmul.msk.bf16.gmra.mxu1 %vm1503_vm2, %v5905_v22  ;;  %v9035_v45 = vadd.f32 %v2723_v8, %v2074_v50  ;;  %v6301_v22 = vor.u32 %v6929_v26, %v6300_v34  ;;  %v6302_v8 = vld [vmem:[%s14170_s0 + $0x5d8] sm:$0xf0] }
 0x2c0   :  { %14719 = vst [vmem:[#allocation115_spill] sm:$0xff] %v9037_v51  ;;  %v6305_v47 = vor.u32 %v6928_v39, %v6302_v8  ;;  %v6830_v51 = vld [vmem:[%s14170_s0 + $0x2c4] sm:$0xf] }
 0x2c1   :  { %14718 = vst [vmem:[#allocation114_spill] sm:$0xff] %v9035_v45  ;;  %2113 = vmatmul.bf16.gmra.mxu0 %v5893_v56  ;;  %2368 = vmatmul.bf16.gmra.mxu2 %v6301_v22  ;;  %v5910_v56 = vld [vmem:[%s14170_s0 + $0x2c8] sm:$0xf0]  ;;  %v5900_v22 = vld [vmem:[%s14170_s0 + $0x2b0] sm:$0xf] }
 0x2c2   :  { %6707 = vmatmul.msk.bf16.gmra.mxu3 %vm1503_vm2, %v6305_v47  ;;  %v5913_v39 = vor.u32 %v6830_v51, %v5910_v56  ;;  %v6308_v51 = vld [vmem:[%s14170_s0 + $0x5e0] sm:$0xf]  ;;  %v6931_v56 = vld [vmem:[%s14170_s0 + $0x5e4] sm:$0xf0] }
 0x2c4   :  { %v2730_v10 = vpop.f32.mrf.mxu1  ;;  %v2329_v36 = vpop.f32.mrf.mxu2 }
 0x2c5   :  { %v2978_v34 = vpop.f32.mrf.mxu3 }
 0x2c6   :  { %v2076_v1 = vpop.f32.mrf.mxu0  ;;  %v9060_v26 = vadd.f32 %v2978_v34, %v2329_v36  ;;  %v6930_v34 = vld [vmem:[%s14170_s0 + $0x5e4] sm:$0xf] }
 0x2c7   :  { %v9052_v50 = vadd.f32 %v2725_v21, %v2076_v1  ;;  %v6829_v21 = vld [vmem:[%s14170_s0 + $0x2b4] sm:$0xf0] }
 0x2c8   :  { %14721 = vst [vmem:[#allocation117_spill] sm:$0xff] %v9060_v26  ;;  %v5901_v47 = vor.u32 %v6829_v21, %v5900_v22 }
 0x2c9   :  { %14720 = vst [vmem:[#allocation116_spill] sm:$0xff] %v9052_v50 }
 0x2cc   :  { %v2733_v8 = vpop.f32.mrf.mxu1  ;;  %v2331_v60 = vpop.f32.mrf.mxu2 }
 0x2cd   :  { %v2980_v45 = vpop.f32.mrf.mxu3 }
 0x2ce   :  { %v2079_v1 = vpop.f32.mrf.mxu0  ;;  %v9071_v36 = vadd.f32 %v2980_v45, %v2331_v60 }
 0x2cf   :  { %6658 = vmatmul.msk.bf16.gmra.mxu1 %vm1503_vm2, %v5913_v39  ;;  %v9069_v50 = vadd.f32 %v2728_v53, %v2079_v1  ;;  %v6309_v39 = vor.u32 %v6931_v56, %v6308_v51  ;;  %v6310_v53 = vld [vmem:[%s14170_s0 + $0x5e8] sm:$0xf0] }
 0x2d0   :  { %14723 = vst [vmem:[#allocation119_spill] sm:$0xff] %v9071_v36  ;;  %v6313_v45 = vor.u32 %v6930_v34, %v6310_v53  ;;  %v6832_v36 = vld [vmem:[%s14170_s0 + $0x2d4] sm:$0xf] }
 0x2d1   :  { %14722 = vst [vmem:[#allocation118_spill] sm:$0xff] %v9069_v50  ;;  %2118 = vmatmul.bf16.gmra.mxu0 %v5901_v47  ;;  %2373 = vmatmul.bf16.gmra.mxu2 %v6309_v39  ;;  %v5918_v47 = vld [vmem:[%s14170_s0 + $0x2d8] sm:$0xf0]  ;;  %v5908_v39 = vld [vmem:[%s14170_s0 + $0x2c0] sm:$0xf] }
 0x2d2   :  { %6708 = vmatmul.msk.bf16.gmra.mxu3 %vm1503_vm2, %v6313_v45  ;;  %v5921_v34 = vor.u32 %v6832_v36, %v5918_v47  ;;  %v6316_v36 = vld [vmem:[%s14170_s0 + $0x5f0] sm:$0xf]  ;;  %v6933_v47 = vld [vmem:[%s14170_s0 + $0x5f4] sm:$0xf0] }
 0x2d4   :  { %v2735_v60 = vpop.f32.mrf.mxu1  ;;  %v2334_v21 = vpop.f32.mrf.mxu2 }
 0x2d5   :  { %v2983_v51 = vpop.f32.mrf.mxu3 }
 0x2d6   :  { %v2081_v22 = vpop.f32.mrf.mxu0  ;;  %v9094_v56 = vadd.f32 %v2983_v51, %v2334_v21  ;;  %v6932_v51 = vld [vmem:[%s14170_s0 + $0x5f4] sm:$0xf] }
 0x2d7   :  { %v9086_v1 = vadd.f32 %v2730_v10, %v2081_v22  ;;  %v6831_v10 = vld [vmem:[%s14170_s0 + $0x2c4] sm:$0xf0] }
 0x2d8   :  { %14725 = vst [vmem:[#allocation121_spill] sm:$0xff] %v9094_v56  ;;  %v5909_v45 = vor.u32 %v6831_v10, %v5908_v39 }
 0x2d9   :  { %14724 = vst [vmem:[#allocation120_spill] sm:$0xff] %v9086_v1 }
 0x2dc   :  { %v2738_v53 = vpop.f32.mrf.mxu1  ;;  %v2336_v26 = vpop.f32.mrf.mxu2 }
 0x2dd   :  { %v2985_v50 = vpop.f32.mrf.mxu3 }
 0x2de   :  { %v2084_v22 = vpop.f32.mrf.mxu0  ;;  %v9105_v21 = vadd.f32 %v2985_v50, %v2336_v26 }
 0x2df   :  { %6659 = vmatmul.msk.bf16.gmra.mxu1 %vm1503_vm2, %v5921_v34  ;;  %v9103_v1 = vadd.f32 %v2733_v8, %v2084_v22  ;;  %v6317_v34 = vor.u32 %v6933_v47, %v6316_v36  ;;  %v6318_v8 = vld [vmem:[%s14170_s0 + $0x5f8] sm:$0xf0] }
 0x2e0   :  { %14727 = vst [vmem:[#allocation123_spill] sm:$0xff] %v9105_v21  ;;  %v6321_v50 = vor.u32 %v6932_v51, %v6318_v8  ;;  %v6834_v21 = vld [vmem:[%s14170_s0 + $0x2e4] sm:$0xf] }
 0x2e1   :  { %14726 = vst [vmem:[#allocation122_spill] sm:$0xff] %v9103_v1  ;;  %2123 = vmatmul.bf16.gmra.mxu0 %v5909_v45  ;;  %2378 = vmatmul.bf16.gmra.mxu2 %v6317_v34  ;;  %v5926_v45 = vld [vmem:[%s14170_s0 + $0x2e8] sm:$0xf0]  ;;  %v5916_v34 = vld [vmem:[%s14170_s0 + $0x2d0] sm:$0xf] }
 0x2e2   :  { %6709 = vmatmul.msk.bf16.gmra.mxu3 %vm1503_vm2, %v6321_v50  ;;  %v5929_v51 = vor.u32 %v6834_v21, %v5926_v45  ;;  %v6324_v21 = vld [vmem:[%s14170_s0 + $0x600] sm:$0xf]  ;;  %v6935_v45 = vld [vmem:[%s14170_s0 + $0x604] sm:$0xf0] }
 0x2e4   :  { %v2740_v26 = vpop.f32.mrf.mxu1  ;;  %v2339_v10 = vpop.f32.mrf.mxu2 }
 0x2e5   :  { %v2988_v36 = vpop.f32.mrf.mxu3 }
 0x2e6   :  { %v2086_v39 = vpop.f32.mrf.mxu0  ;;  %v9128_v47 = vadd.f32 %v2988_v36, %v2339_v10  ;;  %v6934_v36 = vld [vmem:[%s14170_s0 + $0x604] sm:$0xf] }
 0x2e7   :  { %v9120_v22 = vadd.f32 %v2735_v60, %v2086_v39  ;;  %v6833_v60 = vld [vmem:[%s14170_s0 + $0x2d4] sm:$0xf0] }
 0x2e8   :  { %14729 = vst [vmem:[#allocation125_spill] sm:$0xff] %v9128_v47  ;;  %v5917_v50 = vor.u32 %v6833_v60, %v5916_v34 }
 0x2e9   :  { %14728 = vst [vmem:[#allocation124_spill] sm:$0xff] %v9120_v22 }
 0x2ec   :  { %v2743_v8 = vpop.f32.mrf.mxu1  ;;  %v2341_v56 = vpop.f32.mrf.mxu2 }
 0x2ed   :  { %v2990_v1 = vpop.f32.mrf.mxu3 }
 0x2ee   :  { %v2089_v39 = vpop.f32.mrf.mxu0  ;;  %v9139_v10 = vadd.f32 %v2990_v1, %v2341_v56 }
 0x2ef   :  { %6660 = vmatmul.msk.bf16.gmra.mxu1 %vm1503_vm2, %v5929_v51  ;;  %v9137_v22 = vadd.f32 %v2738_v53, %v2089_v39  ;;  %v6325_v51 = vor.u32 %v6935_v45, %v6324_v21  ;;  %v6326_v53 = vld [vmem:[%s14170_s0 + $0x608] sm:$0xf0] }
 0x2f0   :  { %14731 = vst [vmem:[#allocation127_spill] sm:$0xff] %v9139_v10  ;;  %v6329_v1 = vor.u32 %v6934_v36, %v6326_v53  ;;  %v6836_v10 = vld [vmem:[%s14170_s0 + $0x2f4] sm:$0xf] }
 0x2f1   :  { %14730 = vst [vmem:[#allocation126_spill] sm:$0xff] %v9137_v22  ;;  %2128 = vmatmul.bf16.gmra.mxu0 %v5917_v50  ;;  %2383 = vmatmul.bf16.gmra.mxu2 %v6325_v51  ;;  %v5934_v50 = vld [vmem:[%s14170_s0 + $0x2f8] sm:$0xf0]  ;;  %v5924_v51 = vld [vmem:[%s14170_s0 + $0x2e0] sm:$0xf] }
 0x2f2   :  { %6710 = vmatmul.msk.bf16.gmra.mxu3 %vm1503_vm2, %v6329_v1  ;;  %v5937_v36 = vor.u32 %v6836_v10, %v5934_v50  ;;  %v6332_v10 = vld [vmem:[%s14170_s0 + $0x610] sm:$0xf]  ;;  %v6937_v50 = vld [vmem:[%s14170_s0 + $0x614] sm:$0xf0] }
 0x2f4   :  { %v2745_v56 = vpop.f32.mrf.mxu1  ;;  %v2344_v60 = vpop.f32.mrf.mxu2 }
 0x2f5   :  { %v2993_v21 = vpop.f32.mrf.mxu3 }
 0x2f6   :  { %v2091_v34 = vpop.f32.mrf.mxu0  ;;  %v9162_v45 = vadd.f32 %v2993_v21, %v2344_v60  ;;  %v6936_v21 = vld [vmem:[%s14170_s0 + $0x614] sm:$0xf] }
 0x2f7   :  { %v9154_v39 = vadd.f32 %v2740_v26, %v2091_v34  ;;  %v6835_v26 = vld [vmem:[%s14170_s0 + $0x2e4] sm:$0xf0] }
 0x2f8   :  { %14733 = vst [vmem:[#allocation129_spill] sm:$0xff] %v9162_v45  ;;  %v5925_v1 = vor.u32 %v6835_v26, %v5924_v51 }
 0x2f9   :  { %14732 = vst [vmem:[#allocation128_spill] sm:$0xff] %v9154_v39 }
 0x2fc   :  { %v2748_v53 = vpop.f32.mrf.mxu1  ;;  %v2346_v47 = vpop.f32.mrf.mxu2 }
 0x2fd   :  { %v2995_v22 = vpop.f32.mrf.mxu3 }
 0x2fe   :  { %v2094_v34 = vpop.f32.mrf.mxu0  ;;  %v9173_v60 = vadd.f32 %v2995_v22, %v2346_v47 }
 0x2ff   :  { %6661 = vmatmul.msk.bf16.gmra.mxu1 %vm1503_vm2, %v5937_v36  ;;  %v9171_v39 = vadd.f32 %v2743_v8, %v2094_v34  ;;  %v6333_v36 = vor.u32 %v6937_v50, %v6332_v10  ;;  %v6334_v8 = vld [vmem:[%s14170_s0 + $0x618] sm:$0xf0] }
 0x300   :  { %14735 = vst [vmem:[#allocation131_spill] sm:$0xff] %v9173_v60  ;;  %v6337_v22 = vor.u32 %v6936_v21, %v6334_v8  ;;  %v6838_v60 = vld [vmem:[%s14170_s0 + $0x304] sm:$0xf] }
 0x301   :  { %14734 = vst [vmem:[#allocation130_spill] sm:$0xff] %v9171_v39  ;;  %2133 = vmatmul.bf16.gmra.mxu0 %v5925_v1  ;;  %2388 = vmatmul.bf16.gmra.mxu2 %v6333_v36  ;;  %v5942_v1 = vld [vmem:[%s14170_s0 + $0x308] sm:$0xf0]  ;;  %v5932_v36 = vld [vmem:[%s14170_s0 + $0x2f0] sm:$0xf] }
 0x302   :  { %6711 = vmatmul.msk.bf16.gmra.mxu3 %vm1503_vm2, %v6337_v22  ;;  %v5945_v21 = vor.u32 %v6838_v60, %v5942_v1  ;;  %v6340_v60 = vld [vmem:[%s14170_s0 + $0x620] sm:$0xf]  ;;  %v6939_v1 = vld [vmem:[%s14170_s0 + $0x624] sm:$0xf0] }
 0x304   :  { %v2750_v47 = vpop.f32.mrf.mxu1  ;;  %v2349_v26 = vpop.f32.mrf.mxu2 }
 0x305   :  { %v2998_v10 = vpop.f32.mrf.mxu3 }
 0x306   :  { %v2096_v51 = vpop.f32.mrf.mxu0  ;;  %v9196_v50 = vadd.f32 %v2998_v10, %v2349_v26  ;;  %v6938_v10 = vld [vmem:[%s14170_s0 + $0x624] sm:$0xf] }
 0x307   :  { %v9188_v34 = vadd.f32 %v2745_v56, %v2096_v51  ;;  %v6837_v56 = vld [vmem:[%s14170_s0 + $0x2f4] sm:$0xf0] }
 0x308   :  { %14737 = vst [vmem:[#allocation133_spill] sm:$0xff] %v9196_v50  ;;  %v5933_v22 = vor.u32 %v6837_v56, %v5932_v36 }
 0x309   :  { %14736 = vst [vmem:[#allocation132_spill] sm:$0xff] %v9188_v34 }
 0x30c   :  { %v2753_v8 = vpop.f32.mrf.mxu1  ;;  %v2351_v45 = vpop.f32.mrf.mxu2 }
 0x30d   :  { %v3000_v39 = vpop.f32.mrf.mxu3 }
 0x30e   :  { %v2099_v51 = vpop.f32.mrf.mxu0  ;;  %v9207_v26 = vadd.f32 %v3000_v39, %v2351_v45 }
 0x30f   :  { %6662 = vmatmul.msk.bf16.gmra.mxu1 %vm1503_vm2, %v5945_v21  ;;  %v9205_v34 = vadd.f32 %v2748_v53, %v2099_v51  ;;  %v6341_v21 = vor.u32 %v6939_v1, %v6340_v60  ;;  %v6342_v53 = vld [vmem:[%s14170_s0 + $0x628] sm:$0xf0] }
 0x310   :  { %14739 = vst [vmem:[#allocation135_spill] sm:$0xff] %v9207_v26  ;;  %v6345_v39 = vor.u32 %v6938_v10, %v6342_v53  ;;  %v6840_v26 = vld [vmem:[%s14170_s0 + $0x314] sm:$0xf] }
 0x311   :  { %14738 = vst [vmem:[#allocation134_spill] sm:$0xff] %v9205_v34  ;;  %2138 = vmatmul.bf16.gmra.mxu0 %v5933_v22  ;;  %2393 = vmatmul.bf16.gmra.mxu2 %v6341_v21  ;;  %v5950_v22 = vld [vmem:[%s14170_s0 + $0x318] sm:$0xf0]  ;;  %v5940_v21 = vld [vmem:[%s14170_s0 + $0x300] sm:$0xf] }
 0x312   :  { %6712 = vmatmul.msk.bf16.gmra.mxu3 %vm1503_vm2, %v6345_v39  ;;  %v5953_v10 = vor.u32 %v6840_v26, %v5950_v22  ;;  %v6348_v26 = vld [vmem:[%s14170_s0 + $0x630] sm:$0xf]  ;;  %v6941_v22 = vld [vmem:[%s14170_s0 + $0x634] sm:$0xf0] }
 0x314   :  { %v2755_v45 = vpop.f32.mrf.mxu1  ;;  %v2354_v56 = vpop.f32.mrf.mxu2 }
 0x315   :  { %v3003_v60 = vpop.f32.mrf.mxu3 }
 0x316   :  { %v2101_v36 = vpop.f32.mrf.mxu0  ;;  %v9230_v1 = vadd.f32 %v3003_v60, %v2354_v56  ;;  %v6940_v60 = vld [vmem:[%s14170_s0 + $0x634] sm:$0xf] }
 0x317   :  { %v9222_v51 = vadd.f32 %v2750_v47, %v2101_v36  ;;  %v6839_v47 = vld [vmem:[%s14170_s0 + $0x304] sm:$0xf0] }
 0x318   :  { %14741 = vst [vmem:[#allocation137_spill] sm:$0xff] %v9230_v1  ;;  %v5941_v39 = vor.u32 %v6839_v47, %v5940_v21 }
 0x319   :  { %14740 = vst [vmem:[#allocation136_spill] sm:$0xff] %v9222_v51 }
 0x31c   :  { %v2758_v53 = vpop.f32.mrf.mxu1  ;;  %v2356_v50 = vpop.f32.mrf.mxu2 }
 0x31d   :  { %v3005_v34 = vpop.f32.mrf.mxu3 }
 0x31e   :  { %v2104_v36 = vpop.f32.mrf.mxu0  ;;  %v9241_v56 = vadd.f32 %v3005_v34, %v2356_v50 }
 0x31f   :  { %6663 = vmatmul.msk.bf16.gmra.mxu1 %vm1503_vm2, %v5953_v10  ;;  %v9239_v51 = vadd.f32 %v2753_v8, %v2104_v36  ;;  %v6349_v10 = vor.u32 %v6941_v22, %v6348_v26  ;;  %v6350_v8 = vld [vmem:[%s14170_s0 + $0x638] sm:$0xf0] }
 0x320   :  { %14743 = vst [vmem:[#allocation139_spill] sm:$0xff] %v9241_v56  ;;  %v6353_v34 = vor.u32 %v6940_v60, %v6350_v8  ;;  %v6842_v56 = vld [vmem:[%s14170_s0 + $0x324] sm:$0xf] }
 0x321   :  { %14742 = vst [vmem:[#allocation138_spill] sm:$0xff] %v9239_v51  ;;  %2143 = vmatmul.bf16.gmra.mxu0 %v5941_v39  ;;  %2398 = vmatmul.bf16.gmra.mxu2 %v6349_v10  ;;  %v5958_v39 = vld [vmem:[%s14170_s0 + $0x328] sm:$0xf0]  ;;  %v5948_v10 = vld [vmem:[%s14170_s0 + $0x310] sm:$0xf] }
 0x322   :  { %6713 = vmatmul.msk.bf16.gmra.mxu3 %vm1503_vm2, %v6353_v34  ;;  %v5961_v60 = vor.u32 %v6842_v56, %v5958_v39  ;;  %v6356_v56 = vld [vmem:[%s14170_s0 + $0x640] sm:$0xf]  ;;  %v6943_v39 = vld [vmem:[%s14170_s0 + $0x644] sm:$0xf0] }
 0x324   :  { %v2760_v50 = vpop.f32.mrf.mxu1  ;;  %v2359_v47 = vpop.f32.mrf.mxu2 }
 0x325   :  { %v3008_v26 = vpop.f32.mrf.mxu3 }
 0x326   :  { %v2106_v21 = vpop.f32.mrf.mxu0  ;;  %v9264_v22 = vadd.f32 %v3008_v26, %v2359_v47  ;;  %v6942_v26 = vld [vmem:[%s14170_s0 + $0x644] sm:$0xf] }
 0x327   :  { %v9256_v36 = vadd.f32 %v2755_v45, %v2106_v21  ;;  %v6841_v45 = vld [vmem:[%s14170_s0 + $0x314] sm:$0xf0] }
 0x328   :  { %14745 = vst [vmem:[#allocation141_spill] sm:$0xff] %v9264_v22  ;;  %v5949_v34 = vor.u32 %v6841_v45, %v5948_v10 }
 0x329   :  { %14744 = vst [vmem:[#allocation140_spill] sm:$0xff] %v9256_v36 }
 0x32c   :  { %v2763_v8 = vpop.f32.mrf.mxu1  ;;  %v2361_v1 = vpop.f32.mrf.mxu2 }
 0x32d   :  { %v3010_v51 = vpop.f32.mrf.mxu3 }
 0x32e   :  { %v2109_v21 = vpop.f32.mrf.mxu0  ;;  %v9275_v47 = vadd.f32 %v3010_v51, %v2361_v1 }
 0x32f   :  { %6664 = vmatmul.msk.bf16.gmra.mxu1 %vm1503_vm2, %v5961_v60  ;;  %v9273_v36 = vadd.f32 %v2758_v53, %v2109_v21  ;;  %v6357_v60 = vor.u32 %v6943_v39, %v6356_v56  ;;  %v6358_v53 = vld [vmem:[%s14170_s0 + $0x648] sm:$0xf0] }
 0x330   :  { %14747 = vst [vmem:[#allocation143_spill] sm:$0xff] %v9275_v47  ;;  %v6361_v51 = vor.u32 %v6942_v26, %v6358_v53  ;;  %v6844_v47 = vld [vmem:[%s14170_s0 + $0x334] sm:$0xf] }
 0x331   :  { %14746 = vst [vmem:[#allocation142_spill] sm:$0xff] %v9273_v36  ;;  %2148 = vmatmul.bf16.gmra.mxu0 %v5949_v34  ;;  %2403 = vmatmul.bf16.gmra.mxu2 %v6357_v60  ;;  %v5966_v34 = vld [vmem:[%s14170_s0 + $0x338] sm:$0xf0]  ;;  %v5956_v60 = vld [vmem:[%s14170_s0 + $0x320] sm:$0xf] }
 0x332   :  { %6714 = vmatmul.msk.bf16.gmra.mxu3 %vm1503_vm2, %v6361_v51  ;;  %v5969_v26 = vor.u32 %v6844_v47, %v5966_v34  ;;  %v6364_v47 = vld [vmem:[%s14170_s0 + $0x650] sm:$0xf]  ;;  %v6945_v34 = vld [vmem:[%s14170_s0 + $0x654] sm:$0xf0] }
 0x334   :  { %v2765_v1 = vpop.f32.mrf.mxu1  ;;  %v2364_v45 = vpop.f32.mrf.mxu2 }
 0x335   :  { %v3013_v56 = vpop.f32.mrf.mxu3 }
 0x336   :  { %v2111_v10 = vpop.f32.mrf.mxu0  ;;  %v9298_v39 = vadd.f32 %v3013_v56, %v2364_v45  ;;  %v6944_v56 = vld [vmem:[%s14170_s0 + $0x654] sm:$0xf] }
 0x337   :  { %v9290_v21 = vadd.f32 %v2760_v50, %v2111_v10  ;;  %v6843_v50 = vld [vmem:[%s14170_s0 + $0x324] sm:$0xf0] }
 0x338   :  { %14749 = vst [vmem:[#allocation145_spill] sm:$0xff] %v9298_v39  ;;  %v5957_v51 = vor.u32 %v6843_v50, %v5956_v60 }
 0x339   :  { %14748 = vst [vmem:[#allocation144_spill] sm:$0xff] %v9290_v21 }
 0x33c   :  { %v2768_v53 = vpop.f32.mrf.mxu1  ;;  %v2366_v22 = vpop.f32.mrf.mxu2 }
 0x33d   :  { %v3015_v36 = vpop.f32.mrf.mxu3 }
 0x33e   :  { %v2114_v10 = vpop.f32.mrf.mxu0  ;;  %v9309_v45 = vadd.f32 %v3015_v36, %v2366_v22 }
 0x33f   :  { %6665 = vmatmul.msk.bf16.gmra.mxu1 %vm1503_vm2, %v5969_v26  ;;  %v9307_v21 = vadd.f32 %v2763_v8, %v2114_v10  ;;  %v6365_v26 = vor.u32 %v6945_v34, %v6364_v47  ;;  %v6366_v8 = vld [vmem:[%s14170_s0 + $0x658] sm:$0xf0] }
 0x340   :  { %14751 = vst [vmem:[#allocation147_spill] sm:$0xff] %v9309_v45  ;;  %v6369_v36 = vor.u32 %v6944_v56, %v6366_v8  ;;  %v6846_v45 = vld [vmem:[%s14170_s0 + $0x344] sm:$0xf] }
 0x341   :  { %14750 = vst [vmem:[#allocation146_spill] sm:$0xff] %v9307_v21  ;;  %2153 = vmatmul.bf16.gmra.mxu0 %v5957_v51  ;;  %2408 = vmatmul.bf16.gmra.mxu2 %v6365_v26  ;;  %v5974_v51 = vld [vmem:[%s14170_s0 + $0x348] sm:$0xf0]  ;;  %v5964_v26 = vld [vmem:[%s14170_s0 + $0x330] sm:$0xf] }
 0x342   :  { %6715 = vmatmul.msk.bf16.gmra.mxu3 %vm1503_vm2, %v6369_v36  ;;  %v5977_v56 = vor.u32 %v6846_v45, %v5974_v51  ;;  %v6372_v45 = vld [vmem:[%s14170_s0 + $0x660] sm:$0xf]  ;;  %v6947_v51 = vld [vmem:[%s14170_s0 + $0x664] sm:$0xf0] }
 0x344   :  { %v2770_v22 = vpop.f32.mrf.mxu1  ;;  %v2369_v50 = vpop.f32.mrf.mxu2 }
 0x345   :  { %v3018_v47 = vpop.f32.mrf.mxu3 }
 0x346   :  { %v2116_v60 = vpop.f32.mrf.mxu0  ;;  %v9332_v34 = vadd.f32 %v3018_v47, %v2369_v50  ;;  %v6946_v47 = vld [vmem:[%s14170_s0 + $0x664] sm:$0xf] }
 0x347   :  { %v9324_v10 = vadd.f32 %v2765_v1, %v2116_v60  ;;  %v6845_v1 = vld [vmem:[%s14170_s0 + $0x334] sm:$0xf0] }
 0x348   :  { %14753 = vst [vmem:[#allocation149_spill] sm:$0xff] %v9332_v34  ;;  %v5965_v36 = vor.u32 %v6845_v1, %v5964_v26 }
 0x349   :  { %14752 = vst [vmem:[#allocation148_spill] sm:$0xff] %v9324_v10 }
 0x34c   :  { %v2773_v8 = vpop.f32.mrf.mxu1  ;;  %v2371_v39 = vpop.f32.mrf.mxu2 }
 0x34d   :  { %v3020_v21 = vpop.f32.mrf.mxu3 }
 0x34e   :  { %v2119_v60 = vpop.f32.mrf.mxu0  ;;  %v9343_v50 = vadd.f32 %v3020_v21, %v2371_v39 }
 0x34f   :  { %6666 = vmatmul.msk.bf16.gmra.mxu1 %vm1503_vm2, %v5977_v56  ;;  %v9341_v10 = vadd.f32 %v2768_v53, %v2119_v60  ;;  %v6373_v56 = vor.u32 %v6947_v51, %v6372_v45  ;;  %v6374_v53 = vld [vmem:[%s14170_s0 + $0x668] sm:$0xf0] }
 0x350   :  { %14755 = vst [vmem:[#allocation151_spill] sm:$0xff] %v9343_v50  ;;  %v6377_v21 = vor.u32 %v6946_v47, %v6374_v53  ;;  %v6848_v50 = vld [vmem:[%s14170_s0 + $0x354] sm:$0xf] }
 0x351   :  { %14754 = vst [vmem:[#allocation150_spill] sm:$0xff] %v9341_v10  ;;  %2158 = vmatmul.bf16.gmra.mxu0 %v5965_v36  ;;  %2413 = vmatmul.bf16.gmra.mxu2 %v6373_v56  ;;  %v5982_v36 = vld [vmem:[%s14170_s0 + $0x358] sm:$0xf0]  ;;  %v5972_v56 = vld [vmem:[%s14170_s0 + $0x340] sm:$0xf] }
 0x352   :  { %6716 = vmatmul.msk.bf16.gmra.mxu3 %vm1503_vm2, %v6377_v21  ;;  %v5985_v47 = vor.u32 %v6848_v50, %v5982_v36  ;;  %v6380_v50 = vld [vmem:[%s14170_s0 + $0x670] sm:$0xf]  ;;  %v6949_v36 = vld [vmem:[%s14170_s0 + $0x674] sm:$0xf0] }
 0x354   :  { %v2775_v39 = vpop.f32.mrf.mxu1  ;;  %v2374_v1 = vpop.f32.mrf.mxu2 }
 0x355   :  { %v3023_v45 = vpop.f32.mrf.mxu3 }
 0x356   :  { %v2121_v26 = vpop.f32.mrf.mxu0  ;;  %v9366_v51 = vadd.f32 %v3023_v45, %v2374_v1  ;;  %v6948_v45 = vld [vmem:[%s14170_s0 + $0x674] sm:$0xf] }
 0x357   :  { %v9358_v60 = vadd.f32 %v2770_v22, %v2121_v26  ;;  %v6847_v22 = vld [vmem:[%s14170_s0 + $0x344] sm:$0xf0] }
 0x358   :  { %14757 = vst [vmem:[#allocation153_spill] sm:$0xff] %v9366_v51  ;;  %v5973_v21 = vor.u32 %v6847_v22, %v5972_v56 }
 0x359   :  { %14756 = vst [vmem:[#allocation152_spill] sm:$0xff] %v9358_v60 }
 0x35c   :  { %v2778_v53 = vpop.f32.mrf.mxu1  ;;  %v2376_v34 = vpop.f32.mrf.mxu2 }
 0x35d   :  { %v3025_v10 = vpop.f32.mrf.mxu3 }
 0x35e   :  { %v2124_v26 = vpop.f32.mrf.mxu0  ;;  %v9377_v1 = vadd.f32 %v3025_v10, %v2376_v34 }
 0x35f   :  { %6667 = vmatmul.msk.bf16.gmra.mxu1 %vm1503_vm2, %v5985_v47  ;;  %v9375_v60 = vadd.f32 %v2773_v8, %v2124_v26  ;;  %v6381_v47 = vor.u32 %v6949_v36, %v6380_v50  ;;  %v6382_v8 = vld [vmem:[%s14170_s0 + $0x678] sm:$0xf0] }
 0x360   :  { %14759 = vst [vmem:[#allocation155_spill] sm:$0xff] %v9377_v1  ;;  %v6385_v10 = vor.u32 %v6948_v45, %v6382_v8  ;;  %v6850_v1 = vld [vmem:[%s14170_s0 + $0x364] sm:$0xf] }
 0x361   :  { %14758 = vst [vmem:[#allocation154_spill] sm:$0xff] %v9375_v60  ;;  %2163 = vmatmul.bf16.gmra.mxu0 %v5973_v21  ;;  %2418 = vmatmul.bf16.gmra.mxu2 %v6381_v47  ;;  %v5990_v21 = vld [vmem:[%s14170_s0 + $0x368] sm:$0xf0]  ;;  %v5980_v47 = vld [vmem:[%s14170_s0 + $0x350] sm:$0xf] }
 0x362   :  { %6717 = vmatmul.msk.bf16.gmra.mxu3 %vm1503_vm2, %v6385_v10  ;;  %v5993_v45 = vor.u32 %v6850_v1, %v5990_v21  ;;  %v6388_v1 = vld [vmem:[%s14170_s0 + $0x680] sm:$0xf]  ;;  %v6951_v21 = vld [vmem:[%s14170_s0 + $0x684] sm:$0xf0] }
 0x364   :  { %v2780_v34 = vpop.f32.mrf.mxu1  ;;  %v2379_v22 = vpop.f32.mrf.mxu2 }
 0x365   :  { %v3028_v50 = vpop.f32.mrf.mxu3 }
 0x366   :  { %v2126_v56 = vpop.f32.mrf.mxu0  ;;  %v9400_v36 = vadd.f32 %v3028_v50, %v2379_v22  ;;  %v6950_v50 = vld [vmem:[%s14170_s0 + $0x684] sm:$0xf] }
 0x367   :  { %v9392_v26 = vadd.f32 %v2775_v39, %v2126_v56  ;;  %v6849_v39 = vld [vmem:[%s14170_s0 + $0x354] sm:$0xf0] }
 0x368   :  { %14761 = vst [vmem:[#allocation157_spill] sm:$0xff] %v9400_v36  ;;  %v5981_v10 = vor.u32 %v6849_v39, %v5980_v47 }
 0x369   :  { %14760 = vst [vmem:[#allocation156_spill] sm:$0xff] %v9392_v26 }
 0x36c   :  { %v2783_v8 = vpop.f32.mrf.mxu1  ;;  %v2381_v51 = vpop.f32.mrf.mxu2 }
 0x36d   :  { %v3030_v60 = vpop.f32.mrf.mxu3 }
 0x36e   :  { %v2129_v56 = vpop.f32.mrf.mxu0  ;;  %v9411_v22 = vadd.f32 %v3030_v60, %v2381_v51 }
 0x36f   :  { %6668 = vmatmul.msk.bf16.gmra.mxu1 %vm1503_vm2, %v5993_v45  ;;  %v9409_v26 = vadd.f32 %v2778_v53, %v2129_v56  ;;  %v6389_v45 = vor.u32 %v6951_v21, %v6388_v1  ;;  %v6390_v53 = vld [vmem:[%s14170_s0 + $0x688] sm:$0xf0] }
 0x370   :  { %14763 = vst [vmem:[#allocation159_spill] sm:$0xff] %v9411_v22  ;;  %v6393_v60 = vor.u32 %v6950_v50, %v6390_v53  ;;  %v6852_v22 = vld [vmem:[%s14170_s0 + $0x374] sm:$0xf] }
 0x371   :  { %14762 = vst [vmem:[#allocation158_spill] sm:$0xff] %v9409_v26  ;;  %2168 = vmatmul.bf16.gmra.mxu0 %v5981_v10  ;;  %2423 = vmatmul.bf16.gmra.mxu2 %v6389_v45  ;;  %v5998_v10 = vld [vmem:[%s14170_s0 + $0x378] sm:$0xf0]  ;;  %v5988_v45 = vld [vmem:[%s14170_s0 + $0x360] sm:$0xf] }
 0x372   :  { %6718 = vmatmul.msk.bf16.gmra.mxu3 %vm1503_vm2, %v6393_v60  ;;  %v6001_v50 = vor.u32 %v6852_v22, %v5998_v10  ;;  %v6396_v22 = vld [vmem:[%s14170_s0 + $0x690] sm:$0xf]  ;;  %v6953_v10 = vld [vmem:[%s14170_s0 + $0x694] sm:$0xf0] }
 0x374   :  { %v2785_v51 = vpop.f32.mrf.mxu1  ;;  %v2384_v39 = vpop.f32.mrf.mxu2 }
 0x375   :  { %v3033_v1 = vpop.f32.mrf.mxu3 }
 0x376   :  { %v2131_v47 = vpop.f32.mrf.mxu0  ;;  %v9434_v21 = vadd.f32 %v3033_v1, %v2384_v39  ;;  %v6952_v1 = vld [vmem:[%s14170_s0 + $0x694] sm:$0xf] }
 0x377   :  { %v9426_v56 = vadd.f32 %v2780_v34, %v2131_v47  ;;  %v6851_v34 = vld [vmem:[%s14170_s0 + $0x364] sm:$0xf0] }
 0x378   :  { %14765 = vst [vmem:[#allocation161_spill] sm:$0xff] %v9434_v21  ;;  %v5989_v60 = vor.u32 %v6851_v34, %v5988_v45 }
 0x379   :  { %14764 = vst [vmem:[#allocation160_spill] sm:$0xff] %v9426_v56 }
 0x37c   :  { %v2788_v53 = vpop.f32.mrf.mxu1  ;;  %v2386_v36 = vpop.f32.mrf.mxu2 }
 0x37d   :  { %v3035_v26 = vpop.f32.mrf.mxu3 }
 0x37e   :  { %v2134_v47 = vpop.f32.mrf.mxu0  ;;  %v9445_v39 = vadd.f32 %v3035_v26, %v2386_v36 }
 0x37f   :  { %6669 = vmatmul.msk.bf16.gmra.mxu1 %vm1503_vm2, %v6001_v50  ;;  %v9443_v56 = vadd.f32 %v2783_v8, %v2134_v47  ;;  %v6397_v50 = vor.u32 %v6953_v10, %v6396_v22  ;;  %v6398_v8 = vld [vmem:[%s14170_s0 + $0x698] sm:$0xf0] }
 0x380   :  { %14767 = vst [vmem:[#allocation163_spill] sm:$0xff] %v9445_v39  ;;  %v6401_v26 = vor.u32 %v6952_v1, %v6398_v8  ;;  %v6854_v39 = vld [vmem:[%s14170_s0 + $0x384] sm:$0xf] }
 0x381   :  { %14766 = vst [vmem:[#allocation162_spill] sm:$0xff] %v9443_v56  ;;  %2173 = vmatmul.bf16.gmra.mxu0 %v5989_v60  ;;  %2428 = vmatmul.bf16.gmra.mxu2 %v6397_v50  ;;  %v6006_v60 = vld [vmem:[%s14170_s0 + $0x388] sm:$0xf0]  ;;  %v5996_v50 = vld [vmem:[%s14170_s0 + $0x370] sm:$0xf] }
 0x382   :  { %6719 = vmatmul.msk.bf16.gmra.mxu3 %vm1503_vm2, %v6401_v26  ;;  %v6009_v1 = vor.u32 %v6854_v39, %v6006_v60  ;;  %v6404_v39 = vld [vmem:[%s14170_s0 + $0x6a0] sm:$0xf]  ;;  %v6955_v60 = vld [vmem:[%s14170_s0 + $0x6a4] sm:$0xf0] }
 0x384   :  { %v2790_v36 = vpop.f32.mrf.mxu1  ;;  %v2389_v34 = vpop.f32.mrf.mxu2 }
 0x385   :  { %v3038_v22 = vpop.f32.mrf.mxu3 }
 0x386   :  { %v2136_v45 = vpop.f32.mrf.mxu0  ;;  %v9468_v10 = vadd.f32 %v3038_v22, %v2389_v34  ;;  %v6954_v22 = vld [vmem:[%s14170_s0 + $0x6a4] sm:$0xf] }
 0x387   :  { %v9460_v47 = vadd.f32 %v2785_v51, %v2136_v45  ;;  %v6853_v51 = vld [vmem:[%s14170_s0 + $0x374] sm:$0xf0] }
 0x388   :  { %14769 = vst [vmem:[#allocation165_spill] sm:$0xff] %v9468_v10  ;;  %v5997_v26 = vor.u32 %v6853_v51, %v5996_v50 }
 0x389   :  { %14768 = vst [vmem:[#allocation164_spill] sm:$0xff] %v9460_v47 }
 0x38c   :  { %v2793_v8 = vpop.f32.mrf.mxu1  ;;  %v2391_v21 = vpop.f32.mrf.mxu2 }
 0x38d   :  { %v3040_v56 = vpop.f32.mrf.mxu3 }
 0x38e   :  { %v2139_v45 = vpop.f32.mrf.mxu0  ;;  %v9479_v34 = vadd.f32 %v3040_v56, %v2391_v21 }
 0x38f   :  { %6670 = vmatmul.msk.bf16.gmra.mxu1 %vm1503_vm2, %v6009_v1  ;;  %v9477_v47 = vadd.f32 %v2788_v53, %v2139_v45  ;;  %v6405_v1 = vor.u32 %v6955_v60, %v6404_v39  ;;  %v6406_v53 = vld [vmem:[%s14170_s0 + $0x6a8] sm:$0xf0] }
 0x390   :  { %14771 = vst [vmem:[#allocation167_spill] sm:$0xff] %v9479_v34  ;;  %v6409_v56 = vor.u32 %v6954_v22, %v6406_v53  ;;  %v6856_v34 = vld [vmem:[%s14170_s0 + $0x394] sm:$0xf] }
 0x391   :  { %14770 = vst [vmem:[#allocation166_spill] sm:$0xff] %v9477_v47  ;;  %2178 = vmatmul.bf16.gmra.mxu0 %v5997_v26  ;;  %2433 = vmatmul.bf16.gmra.mxu2 %v6405_v1  ;;  %v6014_v26 = vld [vmem:[%s14170_s0 + $0x398] sm:$0xf0]  ;;  %v6004_v1 = vld [vmem:[%s14170_s0 + $0x380] sm:$0xf] }
 0x392   :  { %6720 = vmatmul.msk.bf16.gmra.mxu3 %vm1503_vm2, %v6409_v56  ;;  %v6017_v22 = vor.u32 %v6856_v34, %v6014_v26  ;;  %v3195_v56 = vadd.f32 %v8007_v16, %v8005_v13  ;;  %v6957_v16 = vld [vmem:[%s14170_s0 + $0x6b4] sm:$0xf0] }
 0x394   :  { %v2795_v21 = vpop.f32.mrf.mxu1  ;;  %v2394_v51 = vpop.f32.mrf.mxu2 }
 0x395   :  { %v3043_v39 = vpop.f32.mrf.mxu3 }
 0x396   :  { %v2141_v50 = vpop.f32.mrf.mxu0  ;;  %v9502_v60 = vadd.f32 %v3043_v39, %v2394_v51  ;;  %v3196_v51 = vadd.f32 %v3195_v56, %v8022_v25 }
 0x397   :  { %v9494_v45 = vadd.f32 %v2790_v36, %v2141_v50  ;;  %v6855_v36 = vld [vmem:[%s14170_s0 + $0x384] sm:$0xf0] }
 0x398   :  { %14773 = vst [vmem:[#allocation169_spill] sm:$0xff] %v9502_v60  ;;  %v6005_v50 = vor.u32 %v6855_v36, %v6004_v1  ;;  %v6412_v60 = vld [vmem:[%s14170_s0 + $0x6b0] sm:$0xf]  ;;  %v3197_v1 = vadd.f32 %v3196_v51, %v8024_v28 }
 0x399   :  { %14772 = vst [vmem:[#allocation168_spill] sm:$0xff] %v9494_v45 }
 0x39a   :  { %v3198_v36 = vadd.f32 %v3197_v1, %v8039_v37 }
 0x39c   :  { %v2798_v53 = vpop.f32.mrf.mxu1  ;;  %v2396_v45 = vpop.f32.mrf.mxu2 }
 0x39d   :  { %v3045_v26 = vpop.f32.mrf.mxu3 }
 0x39e   :  { %v2144_v10 = vpop.f32.mrf.mxu0  ;;  %v9516_v39 = vadd.f32 %v3045_v26, %v2396_v45  ;;  %v3199_v26 = vadd.f32 %v3198_v36, %v8041_v40 }
 0x39f   :  { %6671 = vmatmul.msk.bf16.gmra.mxu1 %vm1503_vm2, %v6017_v22  ;;  %v9514_v34 = vadd.f32 %v2793_v8, %v2144_v10  ;;  %v6956_v22 = vld [vmem:[%s14170_s0 + $0x6b4] sm:$0xf]  ;;  %v6413_v10 = vor.u32 %v6957_v16, %v6412_v60  ;;  %v6414_v8 = vld [vmem:[%s14170_s0 + $0x6b8] sm:$0xf0]  ;;  %v6858_v16 = vld [vmem:[%s14170_s0 + $0x3a4] sm:$0xf] }
 0x3a0   :  { %14775 = vst [vmem:[#allocation171_spill] sm:$0xff] %v9516_v39  ;;  %v6417_v45 = vor.u32 %v6956_v22, %v6414_v8  ;;  %v3200_v39 = vadd.f32 %v3199_v26, %v8056_v49  ;;  %v6022_v60 = vld [vmem:[%s14170_s0 + $0x3a8] sm:$0xf0]  ;;  %v6012_v8 = vld [vmem:[%s14170_s0 + $0x390] sm:$0xf] }
 0x3a1   :  { %14774 = vst [vmem:[#allocation170_spill] sm:$0xff] %v9514_v34  ;;  %2183 = vmatmul.bf16.gmra.mxu0 %v6005_v50  ;;  %2438 = vmatmul.bf16.gmra.mxu2 %v6413_v10  ;;  %v6025_v10 = vor.u32 %v6858_v16, %v6022_v60  ;;  %v6420_v49 = vld [vmem:[%s14170_s0 + $0x6c0] sm:$0xf] }
 0x3a2   :  { %6721 = vmatmul.msk.bf16.gmra.mxu3 %vm1503_vm2, %v6417_v45  ;;  %v3201_v22 = vadd.f32 %v3200_v39, %v8058_v52 }
 0x3a4   :  { %v2800_v56 = vpop.f32.mrf.mxu1  ;;  %v2399_v13 = vpop.f32.mrf.mxu2 }
 0x3a5   :  { %v3048_v50 = vpop.f32.mrf.mxu3 }
 0x3a6   :  { %v2146_v25 = vpop.f32.mrf.mxu0  ;;  %v9544_v1 = vadd.f32 %v3048_v50, %v2399_v13 }
 0x3a7   :  { %v9535_v51 = vadd.f32 %v2795_v21, %v2146_v25  ;;  %v6857_v25 = vld [vmem:[%s14170_s0 + $0x394] sm:$0xf0]  ;;  %v3202_v21 = vadd.f32 %v3201_v22, %v8073_v61  ;;  %v6959_v22 = vld [vmem:[%s14170_s0 + $0x6c4] sm:$0xf0] }
 0x3a8   :  { %v6013_v26 = vor.u32 %v6857_v25, %v6012_v8  ;;  %v6422_v25 = vld [vmem:[%s14170_s0 + $0x6c8] sm:$0xf0] }
 0x3a9   :  { %14776 = vst [vmem:[#allocation172_spill] sm:$0xff] %v9535_v51  ;;  %v3203_v36 = vadd.f32 %v3202_v21, %v8075_v0 }
 0x3ab   :  { %v3204_v16 = vadd.f32 %v3203_v36, %v8090_v9 }
 0x3ac   :  { %v2803_v45 = vpop.f32.mrf.mxu1  ;;  %v2401_v13 = vpop.f32.mrf.mxu2 }
 0x3ad   :  { %v3050_v50 = vpop.f32.mrf.mxu3  ;;  %v3205_v8 = vadd.f32 %v3204_v16, %v8098_v17 }
 0x3ae   :  { %v2149_v39 = vpop.f32.mrf.mxu0  ;;  %v9558_v52 = vadd.f32 %v3050_v50, %v2401_v13 }
 0x3af   :  { %6672 = vmatmul.msk.bf16.gmra.mxu1 %vm1503_vm2, %v6025_v10  ;;  %v9556_v60 = vadd.f32 %v2798_v53, %v2149_v39  ;;  %v6958_v10 = vld [vmem:[%s14170_s0 + $0x6c4] sm:$0xf]  ;;  %v6421_v53 = vor.u32 %v6959_v22, %v6420_v49  ;;  %v3206_v36 = vadd.f32 %v3205_v8, %v8113_v27  ;;  %v6860_v49 = vld [vmem:[%s14170_s0 + $0x3b4] sm:$0xf] }
 0x3b0   :  { %v6425_v21 = vor.u32 %v6958_v10, %v6422_v25  ;;  %v6020_v25 = vld [vmem:[%s14170_s0 + $0x3a0] sm:$0xf] }
 0x3b1   :  { %14777 = vst [vmem:[#allocation173_spill] sm:$0xff] %v9556_v60  ;;  %2188 = vmatmul.bf16.gmra.mxu0 %v6013_v26  ;;  %2443 = vmatmul.bf16.gmra.mxu2 %v6421_v53  ;;  %v3207_v13 = vadd.f32 %v3206_v36, %v8128_v38  ;;  %v6030_v26 = vld [vmem:[%s14170_s0 + $0x3b8] sm:$0xf0] }
 0x3b2   :  { %6722 = vmatmul.msk.bf16.gmra.mxu3 %vm1503_vm2, %v6425_v21  ;;  %v6033_v53 = vor.u32 %v6860_v49, %v6030_v26 }
 0x3b3   :  { %v3208_v0 = vadd.f32 %v3207_v13, %v8143_v48  ;;  %v6428_v48 = vld [vmem:[%s14170_s0 + $0x6d0] sm:$0xf] }
 0x3b4   :  { %v2805_v39 = vpop.f32.mrf.mxu1  ;;  %v2404_v9 = vpop.f32.mrf.mxu2 }
 0x3b5   :  { %v3053_v22 = vpop.f32.mrf.mxu3  ;;  %v3209_v10 = vadd.f32 %v3208_v0, %v8158_v59 }
 0x3b6   :  { %v2151_v50 = vpop.f32.mrf.mxu0  ;;  %v9586_v8 = vadd.f32 %v3053_v22, %v2404_v9 }
 0x3b7   :  { %v9577_v16 = vadd.f32 %v2800_v56, %v2151_v50  ;;  %v6859_v56 = vld [vmem:[%s14170_s0 + $0x3a4] sm:$0xf0]  ;;  %v3210_v21 = vadd.f32 %v3209_v10, %v8173_v6  ;;  %v6961_v10 = vld [vmem:[%s14170_s0 + $0x6d4] sm:$0xf0] }
 0x3b8   :  { %v6021_v50 = vor.u32 %v6859_v56, %v6020_v25  ;;  %v6430_v56 = vld [vmem:[%s14170_s0 + $0x6d8] sm:$0xf0]  ;;  %v14821_v6 = vld [vmem:[#allocation126_spill] sm:$0xff] }
 0x3b9   :  { %14778 = vst [vmem:[#allocation174_spill] sm:$0xff] %v9577_v16  ;;  %v3211_v13 = vadd.f32 %v3210_v21, %v8188_v19 }
 0x3bb   :  { %v3212_v49 = vadd.f32 %v3211_v13, %v8203_v31 }
 0x3bc   :  { %v2808_v36 = vpop.f32.mrf.mxu1  ;;  %v2406_v9 = vpop.f32.mrf.mxu2 }
 0x3bd   :  { %v3055_v22 = vpop.f32.mrf.mxu3  ;;  %v3213_v25 = vadd.f32 %v3212_v49, %v8218_v43 }
 0x3be   :  { %v2154_v0 = vpop.f32.mrf.mxu0  ;;  %v9600_v59 = vadd.f32 %v3055_v22, %v2406_v9 }
 0x3bf   :  { %6673 = vmatmul.msk.bf16.gmra.mxu1 %vm1503_vm2, %v6033_v53  ;;  %v9598_v26 = vadd.f32 %v2803_v45, %v2154_v0  ;;  %v6960_v53 = vld [vmem:[%s14170_s0 + $0x6d4] sm:$0xf]  ;;  %v6429_v45 = vor.u32 %v6961_v10, %v6428_v48  ;;  %v3214_v13 = vadd.f32 %v3213_v25, %v8233_v55  ;;  %v6862_v48 = vld [vmem:[%s14170_s0 + $0x3c4] sm:$0xf] }
 0x3c0   :  { %v6433_v21 = vor.u32 %v6960_v53, %v6430_v56  ;;  %v6028_v56 = vld [vmem:[%s14170_s0 + $0x3b0] sm:$0xf] }
 0x3c1   :  { %14779 = vst [vmem:[#allocation175_spill] sm:$0xff] %v9598_v26  ;;  %2193 = vmatmul.bf16.gmra.mxu0 %v6021_v50  ;;  %2448 = vmatmul.bf16.gmra.mxu2 %v6429_v45  ;;  %v3215_v9 = vadd.f32 %v3214_v13, %v8248_v3  ;;  %v6038_v50 = vld [vmem:[%s14170_s0 + $0x3c8] sm:$0xf0] }
 0x3c2   :  { %6723 = vmatmul.msk.bf16.gmra.mxu3 %vm1503_vm2, %v6433_v21  ;;  %v6041_v45 = vor.u32 %v6862_v48, %v6038_v50 }
 0x3c3   :  { %v3216_v19 = vadd.f32 %v3215_v9, %v8263_v15  ;;  %v6436_v15 = vld [vmem:[%s14170_s0 + $0x6e0] sm:$0xf] }
 0x3c4   :  { %v2810_v0 = vpop.f32.mrf.mxu1  ;;  %v2409_v31 = vpop.f32.mrf.mxu2 }
 0x3c5   :  { %v3058_v10 = vpop.f32.mrf.mxu3  ;;  %v3217_v53 = vadd.f32 %v3216_v19, %v8278_v30 }
 0x3c6   :  { %v2156_v22 = vpop.f32.mrf.mxu0  ;;  %v9628_v25 = vadd.f32 %v3058_v10, %v2409_v31 }
 0x3c7   :  { %v9619_v49 = vadd.f32 %v2805_v39, %v2156_v22  ;;  %v6861_v39 = vld [vmem:[%s14170_s0 + $0x3b4] sm:$0xf0]  ;;  %v3218_v21 = vadd.f32 %v3217_v53, %v8293_v44  ;;  %v6963_v53 = vld [vmem:[%s14170_s0 + $0x6e4] sm:$0xf0] }
 0x3c8   :  { %v6029_v22 = vor.u32 %v6861_v39, %v6028_v56  ;;  %v6438_v39 = vld [vmem:[%s14170_s0 + $0x6e8] sm:$0xf0] }
 0x3c9   :  { %14780 = vst [vmem:[#allocation176_spill] sm:$0xff] %v9619_v49  ;;  %v3219_v9 = vadd.f32 %v3218_v21, %v8308_v57  ;;  %v14811_v44 = vld [vmem:[#allocation110_spill] sm:$0xff] }
 0x3cb   :  { %v3220_v48 = vadd.f32 %v3219_v9, %v8323_v7 }
 0x3cc   :  { %v2813_v13 = vpop.f32.mrf.mxu1  ;;  %v2411_v31 = vpop.f32.mrf.mxu2 }
 0x3cd   :  { %v3060_v10 = vpop.f32.mrf.mxu3  ;;  %v3221_v56 = vadd.f32 %v3220_v48, %v8340_v23 }
 0x3ce   :  { %v2159_v19 = vpop.f32.mrf.mxu0  ;;  %v9642_v30 = vadd.f32 %v3060_v10, %v2411_v31 }
 0x3cf   :  { %6674 = vmatmul.msk.bf16.gmra.mxu1 %vm1503_vm2, %v6041_v45  ;;  %v9640_v50 = vadd.f32 %v2808_v36, %v2159_v19  ;;  %v6962_v45 = vld [vmem:[%s14170_s0 + $0x6e4] sm:$0xf]  ;;  %v6437_v36 = vor.u32 %v6963_v53, %v6436_v15  ;;  %v3222_v9 = vadd.f32 %v3221_v56, %v8357_v41  ;;  %v6864_v15 = vld [vmem:[%s14170_s0 + $0x3d4] sm:$0xf] }
 0x3d0   :  { %v6441_v21 = vor.u32 %v6962_v45, %v6438_v39  ;;  %v6036_v39 = vld [vmem:[%s14170_s0 + $0x3c0] sm:$0xf] }
 0x3d1   :  { %14781 = vst [vmem:[#allocation177_spill] sm:$0xff] %v9640_v50  ;;  %2198 = vmatmul.bf16.gmra.mxu0 %v6029_v22  ;;  %2453 = vmatmul.bf16.gmra.mxu2 %v6437_v36  ;;  %v3223_v31 = vadd.f32 %v3222_v9, %v8372_v58  ;;  %v6046_v22 = vld [vmem:[%s14170_s0 + $0x3d8] sm:$0xf0]  ;;  %v14806_v58 = vld [vmem:[#allocation102_spill] sm:$0xff] }
 0x3d2   :  { %6724 = vmatmul.msk.bf16.gmra.mxu3 %vm1503_vm2, %v6441_v21  ;;  %v6049_v36 = vor.u32 %v6864_v15, %v6046_v22 }
 0x3d3   :  { %v3224_v57 = vadd.f32 %v3223_v31, %v8389_v14  ;;  %v6444_v14 = vld [vmem:[%s14170_s0 + $0x6f0] sm:$0xf] }
 0x3d4   :  { %v2815_v19 = vpop.f32.mrf.mxu1  ;;  %v2414_v7 = vpop.f32.mrf.mxu2 }
 0x3d5   :  { %v3063_v53 = vpop.f32.mrf.mxu3  ;;  %v3225_v45 = vadd.f32 %v3224_v57, %v8406_v42 }
 0x3d6   :  { %v2161_v10 = vpop.f32.mrf.mxu0  ;;  %v9670_v56 = vadd.f32 %v3063_v53, %v2414_v7 }
 0x3d7   :  { %v9661_v48 = vadd.f32 %v2810_v0, %v2161_v10  ;;  %v6863_v0 = vld [vmem:[%s14170_s0 + $0x3c4] sm:$0xf0]  ;;  %v3226_v21 = vadd.f32 %v3225_v45, %v8423_v2  ;;  %v6965_v45 = vld [vmem:[%s14170_s0 + $0x6f4] sm:$0xf0] }
 0x3d8   :  { %v6037_v10 = vor.u32 %v6863_v0, %v6036_v39  ;;  %v6446_v0 = vld [vmem:[%s14170_s0 + $0x6f8] sm:$0xf0] }
 0x3d9   :  { %14782 = vst [vmem:[#allocation178_spill] sm:$0xff] %v9661_v48  ;;  %v3227_v31 = vadd.f32 %v3226_v21, %v8440_v32 }
 0x3db   :  { %v3228_v15 = vadd.f32 %v3227_v31, %v8457_v62 }
 0x3dc   :  { %v2818_v9 = vpop.f32.mrf.mxu1  ;;  %v2416_v7 = vpop.f32.mrf.mxu2 }
 0x3dd   :  { %v3065_v53 = vpop.f32.mrf.mxu3  ;;  %v3229_v39 = vadd.f32 %v3228_v15, %v8474_v33  ;;  %v6468_v33 = vld [vmem:[%s14170_s0 + $0x720] sm:$0xf] }
 0x3de   :  { %v2164_v57 = vpop.f32.mrf.mxu0  ;;  %v9684_v42 = vadd.f32 %v3065_v53, %v2416_v7 }
 0x3df   :  { %6675 = vmatmul.msk.bf16.gmra.mxu1 %vm1503_vm2, %v6049_v36  ;;  %v9682_v22 = vadd.f32 %v2813_v13, %v2164_v57  ;;  %v6964_v36 = vld [vmem:[%s14170_s0 + $0x6f4] sm:$0xf]  ;;  %v6445_v13 = vor.u32 %v6965_v45, %v6444_v14  ;;  %v3230_v31 = vadd.f32 %v3229_v39, %v8491_v11  ;;  %v6866_v14 = vld [vmem:[%s14170_s0 + $0x3e4] sm:$0xf] }
 0x3e0   :  { %v6449_v21 = vor.u32 %v6964_v36, %v6446_v0  ;;  %v6044_v0 = vld [vmem:[%s14170_s0 + $0x3d0] sm:$0xf] }
 0x3e1   :  { %14783 = vst [vmem:[#allocation179_spill] sm:$0xff] %v9682_v22  ;;  %2203 = vmatmul.bf16.gmra.mxu0 %v6037_v10  ;;  %2458 = vmatmul.bf16.gmra.mxu2 %v6445_v13  ;;  %v3231_v7 = vadd.f32 %v3230_v31, %v8508_v54  ;;  %v6054_v10 = vld [vmem:[%s14170_s0 + $0x3e8] sm:$0xf0] }
 0x3e2   :  { %6725 = vmatmul.msk.bf16.gmra.mxu3 %vm1503_vm2, %v6449_v21  ;;  %v6057_v13 = vor.u32 %v6866_v14, %v6054_v10  ;;  %v14796_v54 = vld [vmem:[#allocation86_spill] sm:$0xff] }
 0x3e3   :  { %v3232_v32 = vadd.f32 %v3231_v7, %v8525_v35  ;;  %v6452_v35 = vld [vmem:[%s14170_s0 + $0x700] sm:$0xf] }
 0x3e4   :  { %v2820_v57 = vpop.f32.mrf.mxu1  ;;  %v2419_v62 = vpop.f32.mrf.mxu2 }
 0x3e5   :  { %v3068_v45 = vpop.f32.mrf.mxu3  ;;  %v3233_v36 = vadd.f32 %v3232_v32, %v8542_v46 }
 0x3e6   :  { %v2166_v53 = vpop.f32.mrf.mxu0  ;;  %v9712_v39 = vadd.f32 %v3068_v45, %v2419_v62 }
 0x3e7   :  { %v9703_v15 = vadd.f32 %v2815_v19, %v2166_v53  ;;  %v6865_v19 = vld [vmem:[%s14170_s0 + $0x3d4] sm:$0xf0]  ;;  %v3234_v21 = vadd.f32 %v3233_v36, %v8559_v18  ;;  %v6967_v36 = vld [vmem:[%s14170_s0 + $0x704] sm:$0xf0] }
 0x3e8   :  { %v6045_v53 = vor.u32 %v6865_v19, %v6044_v0  ;;  %v6454_v19 = vld [vmem:[%s14170_s0 + $0x708] sm:$0xf0] }
 0x3e9   :  { %14784 = vst [vmem:[#allocation180_spill] sm:$0xff] %v9703_v15  ;;  %v3235_v7 = vadd.f32 %v3234_v21, %v8576_v29 }
 0x3eb   :  { %v3236_v14 = vadd.f32 %v3235_v7, %v8593_v4 }
 0x3ec   :  { %v2823_v31 = vpop.f32.mrf.mxu1  ;;  %v2421_v62 = vpop.f32.mrf.mxu2 }
 0x3ed   :  { %v3070_v45 = vpop.f32.mrf.mxu3  ;;  %v3237_v0 = vadd.f32 %v3236_v14, %v8610_v12  ;;  %v6460_v12 = vld [vmem:[%s14170_s0 + $0x710] sm:$0xf] }
 0x3ee   :  { %v2169_v32 = vpop.f32.mrf.mxu0  ;;  %v9726_v46 = vadd.f32 %v3070_v45, %v2421_v62 }
 0x3ef   :  { %6676 = vmatmul.msk.bf16.gmra.mxu1 %vm1503_vm2, %v6057_v13  ;;  %v9724_v10 = vadd.f32 %v2818_v9, %v2169_v32  ;;  %v6966_v13 = vld [vmem:[%s14170_s0 + $0x704] sm:$0xf]  ;;  %v6453_v9 = vor.u32 %v6967_v36, %v6452_v35  ;;  %v3238_v7 = vadd.f32 %v3237_v0, %v8627_v5  ;;  %v6868_v35 = vld [vmem:[%s14170_s0 + $0x3f4] sm:$0xf] }
 0x3f0   :  { %14786 = vst [vmem:[#allocation182_spill] sm:$0xff] %v9726_v46  ;;  %v6457_v21 = vor.u32 %v6966_v13, %v6454_v19  ;;  %v6052_v19 = vld [vmem:[%s14170_s0 + $0x3e0] sm:$0xf] }
 0x3f1   :  { %14785 = vst [vmem:[#allocation181_spill] sm:$0xff] %v9724_v10  ;;  %2208 = vmatmul.bf16.gmra.mxu0 %v6045_v53  ;;  %2463 = vmatmul.bf16.gmra.mxu2 %v6453_v9  ;;  %v3239_v62 = vadd.f32 %v3238_v7, %v8644_v63  ;;  %v6062_v53 = vld [vmem:[%s14170_s0 + $0x3f8] sm:$0xf0] }
 0x3f2   :  { %6726 = vmatmul.msk.bf16.gmra.mxu3 %vm1503_vm2, %v6457_v21  ;;  %v6065_v9 = vor.u32 %v6868_v35, %v6062_v53  ;;  %v14789_v21 = vld [vmem:[#allocation74_spill] sm:$0xff] }
 0x3f3   :  { %v3240_v29 = vadd.f32 %v3239_v62, %v8661_v20 }
 0x3f4   :  { %v2825_v32 = vpop.f32.mrf.mxu1  ;;  %v2424_v4 = vpop.f32.mrf.mxu2 }
 0x3f5   :  { %v3073_v36 = vpop.f32.mrf.mxu3  ;;  %v3241_v13 = vadd.f32 %v3240_v29, %v8678_v24 }
 0x3f6   :  { %v2171_v45 = vpop.f32.mrf.mxu0  ;;  %v9754_v0 = vadd.f32 %v3073_v36, %v2424_v4  ;;  %v14791_v36 = vld [vmem:[#allocation78_spill] sm:$0xff] }
 0x3f7   :  { %v9745_v14 = vadd.f32 %v2820_v57, %v2171_v45  ;;  %v6867_v57 = vld [vmem:[%s14170_s0 + $0x3e4] sm:$0xf0]  ;;  %v3242_v7 = vadd.f32 %v3241_v13, %v14789_v21  ;;  %v14790_v45 = vld [vmem:[#allocation76_spill] sm:$0xff] }
 0x3f8   :  { %14788 = vst [vmem:[#allocation184_spill] sm:$0xff] %v9754_v0  ;;  %v6053_v63 = vor.u32 %v6867_v57, %v6052_v19  ;;  %v6969_v13 = vld [vmem:[%s14170_s0 + $0x714] sm:$0xf0] }
 0x3f9   :  { %14787 = vst [vmem:[#allocation183_spill] sm:$0xff] %v9745_v14  ;;  %v3243_v20 = vadd.f32 %v3242_v7, %v14790_v45  ;;  %v14793_v19 = vld [vmem:[#allocation80_spill] sm:$0xff]  ;;  %v14794_v7 = vld [vmem:[#allocation82_spill] sm:$0xff] }
 0x3fb   :  { %v3244_v35 = vadd.f32 %v3243_v20, %v14791_v36  ;;  %v6461_v20 = vor.u32 %v6969_v13, %v6460_v12  ;;  %v14795_v36 = vld [vmem:[#allocation84_spill] sm:$0xff]  ;;  %v6870_v12 = vld [vmem:[%s14170_s0 + $0x404] sm:$0xf] }
 0x3fc   :  { %v2828_v62 = vpop.f32.mrf.mxu1  ;;  %v2426_v4 = vpop.f32.mrf.mxu2 }
 0x3fd   :  { %v3075_v24 = vpop.f32.mrf.mxu3  ;;  %v3245_v57 = vadd.f32 %v3244_v35, %v14793_v19 }
 0x3fe   :  { %v2174_v29 = vpop.f32.mrf.mxu0  ;;  %v9768_v5 = vadd.f32 %v3075_v24, %v2426_v4  ;;  %v6462_v24 = vld [vmem:[%s14170_s0 + $0x718] sm:$0xf0] }
 0x3ff   :  { %6677 = vmatmul.msk.bf16.gmra.mxu1 %vm1503_vm2, %v6065_v9  ;;  %v9766_v53 = vadd.f32 %v2823_v31, %v2174_v29  ;;  %v6968_v9 = vld [vmem:[%s14170_s0 + $0x714] sm:$0xf]  ;;  %v3246_v29 = vadd.f32 %v3245_v57, %v14794_v7 }
 0x400   :  { %v6465_v31 = vor.u32 %v6968_v9, %v6462_v24  ;;  %v14798_v9 = vld [vmem:[#allocation88_spill] sm:$0xff] }
 0x401   :  { %14792 = vst [vmem:[#allocation185_spill] sm:$0xff] %v9766_v53  ;;  %2213 = vmatmul.bf16.gmra.mxu0 %v6053_v63  ;;  %2468 = vmatmul.bf16.gmra.mxu2 %v6461_v20  ;;  %v3247_v45 = vadd.f32 %v3246_v29, %v14795_v36  ;;  %v6070_v63 = vld [vmem:[%s14170_s0 + $0x408] sm:$0xf0] }
 0x402   :  { %6727 = vmatmul.msk.bf16.gmra.mxu3 %vm1503_vm2, %v6465_v31  ;;  %v6073_v24 = vor.u32 %v6870_v12, %v6070_v63 }
 0x403   :  { %v3248_v11 = vadd.f32 %v3247_v45, %v14796_v54  ;;  %v6060_v45 = vld [vmem:[%s14170_s0 + $0x3f0] sm:$0xf]  ;;  %v14800_v54 = vld [vmem:[#allocation92_spill] sm:$0xff] }
 0x404   :  { %v2830_v4 = vpop.f32.mrf.mxu1  ;;  %v2429_v18 = vpop.f32.mrf.mxu2 }
 0x405   :  { %v3078_v13 = vpop.f32.mrf.mxu3  ;;  %v3249_v57 = vadd.f32 %v3248_v11, %v14798_v9 }
 0x406   :  { %v2176_v21 = vpop.f32.mrf.mxu0  ;;  %v9796_v20 = vadd.f32 %v3078_v13, %v2429_v18  ;;  %v14801_v13 = vld [vmem:[#allocation94_spill] sm:$0xff] }
 0x407   :  { %v9787_v35 = vadd.f32 %v2825_v32, %v2176_v21  ;;  %v6869_v32 = vld [vmem:[%s14170_s0 + $0x3f4] sm:$0xf0]  ;;  %v14799_v21 = vld [vmem:[#allocation90_spill] sm:$0xff] }
 0x408   :  { %v3250_v31 = vadd.f32 %v3249_v57, %v14799_v21  ;;  %v6061_v7 = vor.u32 %v6869_v32, %v6060_v45  ;;  %v6971_v57 = vld [vmem:[%s14170_s0 + $0x724] sm:$0xf0]  ;;  %v14803_v45 = vld [vmem:[#allocation96_spill] sm:$0xff] }
 0x409   :  { %14797 = vst [vmem:[#allocation186_spill] sm:$0xff] %v9787_v35 }
 0x40a   :  { %v3251_v36 = vadd.f32 %v3250_v31, %v14800_v54  ;;  %v14804_v31 = vld [vmem:[#allocation98_spill] sm:$0xff] }
 0x40c   :  { %v2833_v29 = vpop.f32.mrf.mxu1  ;;  %v2431_v18 = vpop.f32.mrf.mxu2  ;;  %v3252_v12 = vadd.f32 %v3251_v36, %v14801_v13  ;;  %v6470_v36 = vld [vmem:[%s14170_s0 + $0x728] sm:$0xf0]  ;;  %v14805_v13 = vld [vmem:[#allocation100_spill] sm:$0xff] }
 0x40d   :  { %v3080_v9 = vpop.f32.mrf.mxu3 }
 0x40e   :  { %v2179_v11 = vpop.f32.mrf.mxu0  ;;  %v9810_v19 = vadd.f32 %v3080_v9, %v2431_v18  ;;  %v3253_v32 = vadd.f32 %v3252_v12, %v14803_v45 }
 0x40f   :  { %6678 = vmatmul.msk.bf16.gmra.mxu1 %vm1503_vm2, %v6073_v24  ;;  %v9808_v63 = vadd.f32 %v2828_v62, %v2179_v11  ;;  %v6970_v24 = vld [vmem:[%s14170_s0 + $0x724] sm:$0xf]  ;;  %v6469_v62 = vor.u32 %v6971_v57, %v6468_v33 }
 0x410   :  { %v6473_v9 = vor.u32 %v6970_v24, %v6470_v36  ;;  %v3254_v11 = vadd.f32 %v3253_v32, %v14804_v31  ;;  %v14809_v24 = vld [vmem:[#allocation106_spill] sm:$0xff]  ;;  %v14810_v31 = vld [vmem:[#allocation108_spill] sm:$0xff] }
 0x411   :  { %14802 = vst [vmem:[#allocation187_spill] sm:$0xff] %v9808_v63  ;;  %2218 = vmatmul.bf16.gmra.mxu0 %v6061_v7  ;;  %2473 = vmatmul.bf16.gmra.mxu2 %v6469_v62  ;;  %v14808_v7 = vld [vmem:[#allocation104_spill] sm:$0xff] }
 0x412   :  { %6728 = vmatmul.msk.bf16.gmra.mxu3 %vm1503_vm2, %v6473_v9  ;;  %v3255_v54 = vadd.f32 %v3254_v11, %v14805_v13 }
 0x414   :  { %v2835_v18 = vpop.f32.mrf.mxu1  ;;  %v2434_v2 = vpop.f32.mrf.mxu2  ;;  %v3256_v41 = vadd.f32 %v3255_v54, %v14806_v58 }
 0x415   :  { %v3083_v33 = vpop.f32.mrf.mxu3 }
 0x416   :  { %v2181_v21 = vpop.f32.mrf.mxu0  ;;  %v3257_v57 = vadd.f32 %v3256_v41, %v14808_v7  ;;  %v9832_v45 = vadd.f32 %v3083_v33, %v2434_v2  ;;  %v6476_v41 = vld [vmem:[%s14170_s0 + $0x730] sm:$0xf]  ;;  %v6973_v2 = vld [vmem:[%s14170_s0 + $0x734] sm:$0xf0]  ;;  %v14816_v7 = vld [vmem:[#allocation118_spill] sm:$0xff] }
 0x417   :  { %v9829_v12 = vadd.f32 %v2830_v4, %v2181_v21  ;;  %v6972_v4 = vld [vmem:[%s14170_s0 + $0x734] sm:$0xf]  ;;  %v14813_v21 = vld [vmem:[#allocation112_spill] sm:$0xff] }
 0x418   :  { %v3258_v36 = vadd.f32 %v3257_v57, %v14809_v24  ;;  %v6477_v57 = vor.u32 %v6973_v2, %v6476_v41  ;;  %v14818_v41 = vld [vmem:[#allocation120_spill] sm:$0xff] }
 0x419   :  { %14807 = vst [vmem:[#allocation188_spill] sm:$0xff] %v9829_v12 }
 0x41a   :  { %v3259_v62 = vadd.f32 %v3258_v36, %v14810_v31 }
 0x41c   :  { %v2838_v32 = vpop.f32.mrf.mxu1  ;;  %v2436_v9 = vpop.f32.mrf.mxu2  ;;  %v3260_v11 = vadd.f32 %v3259_v62, %v14811_v44 }
 0x41d   :  { %v3085_v3 = vpop.f32.mrf.mxu3 }
 0x41e   :  { %v2184_v23 = vpop.f32.mrf.mxu0  ;;  %v9839_v54 = vadd.f32 %v3085_v3, %v2436_v9  ;;  %v3261_v33 = vadd.f32 %v3260_v11, %v14813_v21  ;;  %v6478_v3 = vld [vmem:[%s14170_s0 + $0x738] sm:$0xf0] }
 0x41f   :  { %v9837_v13 = vadd.f32 %v2833_v29, %v2184_v23  ;;  %v6481_v23 = vor.u32 %v6972_v4, %v6478_v3  ;;  %v14814_v29 = vld [vmem:[#allocation114_spill] sm:$0xff]  ;;  %v14815_v9 = vld [vmem:[#allocation116_spill] sm:$0xff] }
 0x420   :  { %v3262_v36 = vadd.f32 %v3261_v33, %v14814_v29  ;;  %v14819_v4 = vld [vmem:[#allocation122_spill] sm:$0xff]  ;;  %v14820_v29 = vld [vmem:[#allocation124_spill] sm:$0xff] }
 0x421   :  { %14812 = vst [vmem:[#allocation189_spill] sm:$0xff] %v9837_v13  ;;  %2478 = vmatmul.bf16.gmra.mxu2 %v6477_v57 }
 0x422   :  { %6729 = vmatmul.msk.bf16.gmra.mxu3 %vm1503_vm2, %v6481_v23  ;;  %v3263_v44 = vadd.f32 %v3262_v36, %v14815_v9 }
 0x424   :  { %v2840_v62 = vpop.f32.mrf.mxu1  ;;  %v2439_v24 = vpop.f32.mrf.mxu2  ;;  %v3264_v58 = vadd.f32 %v3263_v44, %v14816_v7 }
 0x425   :  { %v3088_v11 = vpop.f32.mrf.mxu3 }
 0x426   :  { %v2186_v31 = vpop.f32.mrf.mxu0  ;;  %v3265_v2 = vadd.f32 %v3264_v58, %v14818_v41  ;;  %v9861_v21 = vadd.f32 %v3088_v11, %v2439_v24  ;;  %v6484_v58 = vld [vmem:[%s14170_s0 + $0x740] sm:$0xf]  ;;  %v14823_v24 = vld [vmem:[#allocation128_spill] sm:$0xff]  ;;  %v14826_v41 = vld [vmem:[#allocation134_spill] sm:$0xff] }
 0x427   :  { %v9858_v55 = vadd.f32 %v2835_v18, %v2186_v31  ;;  %v6975_v31 = vld [vmem:[%s14170_s0 + $0x744] sm:$0xf0]  ;;  %v6974_v18 = vld [vmem:[%s14170_s0 + $0x744] sm:$0xf] }
 0x428   :  { %v3266_v3 = vadd.f32 %v3265_v2, %v14819_v4  ;;  %v6485_v2 = vor.u32 %v6975_v31, %v6484_v58  ;;  %v14828_v31 = vld [vmem:[#allocation136_spill] sm:$0xff] }
 0x429   :  { %14817 = vst [vmem:[#allocation190_spill] sm:$0xff] %v9858_v55 }
 0x42a   :  { %v3267_v57 = vadd.f32 %v3266_v3, %v14820_v29 }
 0x42c   :  { %v2843_v33 = vpop.f32.mrf.mxu1  ;;  %v2441_v23 = vpop.f32.mrf.mxu2  ;;  %v3268_v36 = vadd.f32 %v3267_v57, %v14821_v6 }
 0x42d   :  { %v3090_v38 = vpop.f32.mrf.mxu3 }
 0x42e   :  { %v2189_v43 = vpop.f32.mrf.mxu0  ;;  %v9868_v44 = vadd.f32 %v3090_v38, %v2441_v23  ;;  %v3269_v11 = vadd.f32 %v3268_v36, %v14823_v24  ;;  %v6486_v38 = vld [vmem:[%s14170_s0 + $0x748] sm:$0xf0]  ;;  %v14825_v23 = vld [vmem:[#allocation132_spill] sm:$0xff] }
 0x42f   :  { %v9866_v9 = vadd.f32 %v2838_v32, %v2189_v43  ;;  %v6489_v43 = vor.u32 %v6974_v18, %v6486_v38  ;;  %v14824_v32 = vld [vmem:[#allocation130_spill] sm:$0xff] }
 0x430   :  { %v3270_v3 = vadd.f32 %v3269_v11, %v14824_v32  ;;  %v14829_v18 = vld [vmem:[#allocation138_spill] sm:$0xff] }
 0x431   :  { %14822 = vst [vmem:[#allocation191_spill] sm:$0xff] %v9866_v9  ;;  %2483 = vmatmul.bf16.gmra.mxu2 %v6485_v2  ;;  %v14830_v2 = vld [vmem:[#allocation140_spill] sm:$0xff] }
 0x432   :  { %6730 = vmatmul.msk.bf16.gmra.mxu3 %vm1503_vm2, %v6489_v43  ;;  %v3271_v6 = vadd.f32 %v3270_v3, %v14825_v23  ;;  %v14831_v3 = vld [vmem:[#allocation142_spill] sm:$0xff] }
 0x434   :  { %v9884_v57 = vpop.f32.mrf.mxu1  ;;  %v2444_v4 = vpop.f32.mrf.mxu2  ;;  %v3272_v7 = vadd.f32 %v3271_v6, %v14826_v41  ;;  %v14837_v41 = vld [vmem:[#allocation150_spill] sm:$0xff] }
 0x435   :  { %v3093_v58 = vpop.f32.mrf.mxu3 }
 0x436   :  { %v2191_v29 = vpop.f32.mrf.mxu0  ;;  %v3273_v24 = vadd.f32 %v3272_v7, %v14828_v31  ;;  %v9892_v27 = vadd.f32 %v3093_v58, %v2444_v4  ;;  %v6492_v7 = vld [vmem:[%s14170_s0 + $0x750] sm:$0xf]  ;;  %v6976_v4 = vld [vmem:[%s14170_s0 + $0x754] sm:$0xf] }
 0x437   :  { %v9889_v36 = vadd.f32 %v2840_v62, %v2191_v29  ;;  %v6977_v62 = vld [vmem:[%s14170_s0 + $0x754] sm:$0xf0] }
 0x438   :  { %v3274_v11 = vadd.f32 %v3273_v24, %v14829_v18  ;;  %v14834_v24 = vld [vmem:[#allocation144_spill] sm:$0xff] }
 0x439   :  { %14827 = vst [vmem:[#allocation192_spill] sm:$0xff] %v9889_v36 }
 0x43a   :  { %v3275_v32 = vadd.f32 %v3274_v11, %v14830_v2  ;;  %v14835_v11 = vld [vmem:[#allocation146_spill] sm:$0xff] }
 0x43c   :  { %v9895_v38 = vpop.f32.mrf.mxu1  ;;  %v2446_v17 = vpop.f32.mrf.mxu2  ;;  %v3276_v23 = vadd.f32 %v3275_v32, %v14831_v3  ;;  %v6493_v32 = vor.u32 %v6977_v62, %v6492_v7  ;;  %v14836_v3 = vld [vmem:[#allocation148_spill] sm:$0xff] }
 0x43d   :  { %v3095_v6 = vpop.f32.mrf.mxu3  ;;  %v14838_v62 = vld [vmem:[#allocation152_spill] sm:$0xff] }
 0x43e   :  { %v2194_v43 = vpop.f32.mrf.mxu0  ;;  %v9901_v29 = vadd.f32 %v3095_v6, %v2446_v17  ;;  %v3277_v58 = vadd.f32 %v3276_v23, %v14834_v24  ;;  %v6494_v17 = vld [vmem:[%s14170_s0 + $0x758] sm:$0xf0] }
 0x43f   :  { %v9899_v61 = vadd.f32 %v2843_v33, %v2194_v43  ;;  %v6497_v33 = vor.u32 %v6976_v4, %v6494_v17  ;;  %v14840_v4 = vld [vmem:[#allocation154_spill] sm:$0xff] }
 0x440   :  { %14833 = vst [vmem:[#allocation194_spill] sm:$0xff] %v9901_v29  ;;  %v3278_v43 = vadd.f32 %v3277_v58, %v14835_v11  ;;  %v14841_v11 = vld [vmem:[#allocation156_spill] sm:$0xff] }
 0x441   :  { %14832 = vst [vmem:[#allocation193_spill] sm:$0xff] %v9899_v61  ;;  %2488 = vmatmul.bf16.gmra.mxu2 %v6493_v32 }
 0x442   :  { %6731 = vmatmul.msk.bf16.gmra.mxu3 %vm1503_vm2, %v6497_v33  ;;  %v3279_v2 = vadd.f32 %v3278_v43, %v14836_v3  ;;  %v14842_v43 = vld [vmem:[#allocation158_spill] sm:$0xff] }
 0x444   :  { %v9917_v6 = vpop.f32.mrf.mxu1  ;;  %v2449_v31 = vpop.f32.mrf.mxu2  ;;  %v3280_v23 = vadd.f32 %v3279_v2, %v14837_v41  ;;  %v6500_v2 = vld [vmem:[%s14170_s0 + $0x760] sm:$0xf] }
 0x445   :  { %v3098_v7 = vpop.f32.mrf.mxu3 }
 0x446   :  { %v9921_v18 = vpop.f32.mrf.mxu0  ;;  %v3281_v24 = vadd.f32 %v3280_v23, %v14838_v62  ;;  %v9925_v40 = vadd.f32 %v3098_v7, %v2449_v31  ;;  %v6979_v31 = vld [vmem:[%s14170_s0 + $0x764] sm:$0xf0]  ;;  %v14844_v23 = vld [vmem:[#allocation160_spill] sm:$0xff] }
 0x448   :  { %14839 = vst [vmem:[#allocation195_spill] sm:$0xff] %v9925_v40  ;;  %v3282_v17 = vadd.f32 %v3281_v24, %v14840_v4  ;;  %v6978_v24 = vld [vmem:[%s14170_s0 + $0x764] sm:$0xf]  ;;  %v14846_v4 = vld [vmem:[#allocation164_spill] sm:$0xff] }
 0x44a   :  { %v3283_v32 = vadd.f32 %v3282_v17, %v14841_v11  ;;  %v6501_v17 = vor.u32 %v6979_v31, %v6500_v2  ;;  %v14847_v31 = vld [vmem:[#allocation168_spill] sm:$0xff] }
 0x44c   :  { %v9928_v58 = vpop.f32.mrf.mxu1  ;;  %v2451_v33 = vpop.f32.mrf.mxu2  ;;  %v3284_v3 = vadd.f32 %v3283_v32, %v14842_v43 }
 0x44d   :  { %v3100_v28 = vpop.f32.mrf.mxu3 }
 0x44e   :  { %v9931_v37 = vpop.f32.mrf.mxu0  ;;  %v9934_v29 = vadd.f32 %v3100_v28, %v2451_v33  ;;  %v3285_v7 = vadd.f32 %v3284_v3, %v14844_v23  ;;  %v6502_v28 = vld [vmem:[%s14170_s0 + $0x768] sm:$0xf0] }
 0x44f   :  { %v6505_v32 = vor.u32 %v6978_v24, %v6502_v28  ;;  %v14845_v33 = vld [vmem:[#allocation162_spill] sm:$0xff] }
 0x450   :  { %14843 = vst [vmem:[#allocation196_spill] sm:$0xff] %v9934_v29  ;;  %v3286_v43 = vadd.f32 %v3285_v7, %v14845_v33 }
 0x451   :  { %2493 = vmatmul.bf16.gmra.mxu2 %v6501_v17 }
 0x452   :  { %6732 = vmatmul.msk.bf16.gmra.mxu3 %vm1503_vm2, %v6505_v32  ;;  %v3287_v62 = vadd.f32 %v3286_v43, %v14846_v4 }
 0x454   :  { %v9950_v11 = vpop.f32.mrf.mxu1  ;;  %v2454_v29 = vpop.f32.mrf.mxu2  ;;  %v3288_v3 = vadd.f32 %v3287_v62, %v9477_v47  ;;  %v6508_v62 = vld [vmem:[%s14170_s0 + $0x770] sm:$0xf] }
 0x455   :  { %v3103_v2 = vpop.f32.mrf.mxu3 }
 0x456   :  { %v9954_v41 = vpop.f32.mrf.mxu0  ;;  %v3289_v23 = vadd.f32 %v3288_v3, %v14847_v31  ;;  %v9958_v40 = vadd.f32 %v3103_v2, %v2454_v29  ;;  %v6981_v29 = vld [vmem:[%s14170_s0 + $0x774] sm:$0xf0] }
 0x457   :  { %v6509_v2 = vor.u32 %v6981_v29, %v6508_v62 }
 0x458   :  { %v3290_v24 = vadd.f32 %v3289_v23, %v9514_v34  ;;  %v6980_v23 = vld [vmem:[%s14170_s0 + $0x774] sm:$0xf] }
 0x45a   :  { %v3291_v17 = vadd.f32 %v3290_v24, %v9535_v51 }
 0x45c   :  { %v9961_v7 = vpop.f32.mrf.mxu1  ;;  %v2456_v32 = vpop.f32.mrf.mxu2  ;;  %v3292_v43 = vadd.f32 %v3291_v17, %v9556_v60 }
 0x45d   :  { %v3105_v4 = vpop.f32.mrf.mxu3 }
 0x45e   :  { %v9964_v28 = vpop.f32.mrf.mxu0  ;;  %v9967_v33 = vadd.f32 %v3105_v4, %v2456_v32  ;;  %v3293_v3 = vadd.f32 %v3292_v43, %v9577_v16  ;;  %v6510_v4 = vld [vmem:[%s14170_s0 + $0x778] sm:$0xf0]  ;;  %v14938_v16 = vld [vmem:[#allocation157_spill] sm:$0xff] }
 0x45f   :  { %v6513_v24 = vor.u32 %v6980_v23, %v6510_v4 }
 0x460   :  { %v3294_v17 = vadd.f32 %v3293_v3, %v9598_v26 }
 0x461   :  { %2498 = vmatmul.bf16.gmra.mxu2 %v6509_v2 }
 0x462   :  { %6733 = vmatmul.msk.bf16.gmra.mxu3 %vm1503_vm2, %v6513_v24  ;;  %v3295_v60 = vadd.f32 %v3294_v17, %v9619_v49 }
 0x464   :  { %v9983_v32 = vpop.f32.mrf.mxu1  ;;  %v2459_v34 = vpop.f32.mrf.mxu2  ;;  %v3296_v31 = vadd.f32 %v3295_v60, %v9640_v50  ;;  %v6516_v60 = vld [vmem:[%s14170_s0 + $0x780] sm:$0xf] }
 0x465   :  { %v3108_v43 = vpop.f32.mrf.mxu3 }
 0x466   :  { %v2206_v51 = vpop.f32.mrf.mxu0  ;;  %v3297_v62 = vadd.f32 %v3296_v31, %v9661_v48  ;;  %v9989_v29 = vadd.f32 %v3108_v43, %v2459_v34  ;;  %v6983_v34 = vld [vmem:[%s14170_s0 + $0x784] sm:$0xf0]  ;;  %v6982_v31 = vld [vmem:[%s14170_s0 + $0x784] sm:$0xf] }
 0x468   :  { %14848 = vst [vmem:[#allocation197_spill] sm:$0xff] %v9989_v29  ;;  %v3298_v23 = vadd.f32 %v3297_v62, %v9682_v22  ;;  %v6517_v62 = vor.u32 %v6983_v34, %v6516_v60 }
 0x46a   :  { %v3299_v3 = vadd.f32 %v3298_v23, %v9703_v15 }
 0x46c   :  { %v9992_v4 = vpop.f32.mrf.mxu1  ;;  %v2461_v26 = vpop.f32.mrf.mxu2  ;;  %v3300_v24 = vadd.f32 %v3299_v3, %v9724_v10 }
 0x46d   :  { %v3110_v17 = vpop.f32.mrf.mxu3 }
 0x46e   :  { %v2209_v2 = vpop.f32.mrf.mxu0  ;;  %v9996_v49 = vadd.f32 %v3110_v17, %v2461_v26  ;;  %v3301_v43 = vadd.f32 %v3300_v24, %v9745_v14  ;;  %v6518_v26 = vld [vmem:[%s14170_s0 + $0x788] sm:$0xf0] }
 0x46f   :  { %v6521_v23 = vor.u32 %v6982_v31, %v6518_v26 }
 0x470   :  { %v3302_v3 = vadd.f32 %v3301_v43, %v9766_v53 }
 0x471   :  { %2503 = vmatmul.bf16.gmra.mxu2 %v6517_v62 }
 0x472   :  { %6734 = vmatmul.msk.bf16.gmra.mxu3 %vm1503_vm2, %v6521_v23  ;;  %v3303_v10 = vadd.f32 %v3302_v3, %v9787_v35 }
 0x474   :  { %v2865_v17 = vpop.f32.mrf.mxu1  ;;  %v2464_v22 = vpop.f32.mrf.mxu2  ;;  %v3304_v48 = vadd.f32 %v3303_v10, %v9808_v63  ;;  %v6524_v10 = vld [vmem:[%s14170_s0 + $0x790] sm:$0xf] }
 0x475   :  { %v3113_v50 = vpop.f32.mrf.mxu3 }
 0x476   :  { %v2211_v15 = vpop.f32.mrf.mxu0  ;;  %v3305_v24 = vadd.f32 %v3304_v48, %v9829_v12  ;;  %v10019_v53 = vadd.f32 %v3113_v50, %v2464_v22  ;;  %v6985_v48 = vld [vmem:[%s14170_s0 + $0x794] sm:$0xf0]  ;;  %v10035_v50 = vadd.f32 %v9884_v57, %v9921_v18  ;;  %v10049_v57 = vadd.f32 %v9917_v6, %v9954_v41 }
 0x477   :  { %v6525_v22 = vor.u32 %v6985_v48, %v6524_v10  ;;  %v10066_v6 = vadd.f32 %v9983_v32, %v2211_v15  ;;  %v6987_v15 = vld [vmem:[%s14170_s0 + $0x7a4] sm:$0xf0]  ;;  %v6986_v32 = vld [vmem:[%s14170_s0 + $0x7a4] sm:$0xf] }
 0x478   :  { %v3306_v60 = vadd.f32 %v3305_v24, %v9837_v13  ;;  %v6984_v24 = vld [vmem:[%s14170_s0 + $0x794] sm:$0xf]  ;;  %14850 = vst [vmem:[#allocation199_spill] sm:$0xff] %v10035_v50  ;;  %v14914_v13 = vld [vmem:[#allocation117_spill] sm:$0xff] }
 0x479   :  { %14852 = vst [vmem:[#allocation201_spill] sm:$0xff] %v10049_v57 }
 0x47a   :  { %v3307_v31 = vadd.f32 %v3306_v60, %v9858_v55  ;;  %14856 = vst [vmem:[#allocation205_spill] sm:$0xff] %v10066_v6 }
 0x47c   :  { %v2868_v34 = vpop.f32.mrf.mxu1  ;;  %v2466_v43 = vpop.f32.mrf.mxu2  ;;  %v3308_v62 = vadd.f32 %v3307_v31, %v9866_v9  ;;  %v6526_v31 = vld [vmem:[%s14170_s0 + $0x798] sm:$0xf0]  ;;  %v10043_v9 = vadd.f32 %v9895_v38, %v9931_v37 }
 0x47d   :  { %v3115_v23 = vpop.f32.mrf.mxu3 }
 0x47e   :  { %v2214_v26 = vpop.f32.mrf.mxu0  ;;  %v10021_v3 = vadd.f32 %v3115_v23, %v2466_v43  ;;  %v3309_v60 = vadd.f32 %v3308_v62, %v9889_v36  ;;  %v6529_v43 = vor.u32 %v6984_v24, %v6526_v31  ;;  %14851 = vst [vmem:[#allocation200_spill] sm:$0xff] %v10043_v9  ;;  %v10054_v24 = vadd.f32 %v9928_v58, %v9964_v28 }
 0x47f   :  { %v10062_v31 = vadd.f32 %v9961_v7, %v2209_v2  ;;  %v6532_v7 = vld [vmem:[%s14170_s0 + $0x7a0] sm:$0xf] }
 0x480   :  { %14849 = vst [vmem:[#allocation198_spill] sm:$0xff] %v10021_v3  ;;  %v3310_v23 = vadd.f32 %v3309_v60, %v9899_v61  ;;  %v10058_v60 = vadd.f32 %v9950_v11, %v2206_v51  ;;  %v14904_v61 = vld [vmem:[#allocation101_spill] sm:$0xff] }
 0x481   :  { %2508 = vmatmul.bf16.gmra.mxu2 %v6525_v22  ;;  %14853 = vst [vmem:[#allocation202_spill] sm:$0xff] %v10054_v24 }
 0x482   :  { %6735 = vmatmul.msk.bf16.gmra.mxu3 %vm1503_vm2, %v6529_v43  ;;  %v3311_v62 = vadd.f32 %v3310_v23, %v10035_v50  ;;  %14854 = vst [vmem:[#allocation203_spill] sm:$0xff] %v10058_v60 }
 0x483   :  { %14855 = vst [vmem:[#allocation204_spill] sm:$0xff] %v10062_v31 }
 0x484   :  { %v2870_v55 = vpop.f32.mrf.mxu1  ;;  %v2469_v10 = vpop.f32.mrf.mxu2  ;;  %v3312_v48 = vadd.f32 %v3311_v62, %v10043_v9  ;;  %v10070_v62 = vadd.f32 %v9992_v4, %v2214_v26  ;;  %v6533_v26 = vor.u32 %v6987_v15, %v6532_v7  ;;  %v14862_v15 = vld [vmem:[#allocation32_spill] sm:$0xff]  ;;  %v14895_v9 = vld [vmem:[#allocation85_spill] sm:$0xff] }
 0x485   :  { %v3118_v37 = vpop.f32.mrf.mxu3 }
 0x486   :  { %v2216_v18 = vpop.f32.mrf.mxu0  ;;  %v3313_v38 = vadd.f32 %v3312_v48, %v10049_v57  ;;  %14857 = vst [vmem:[#allocation206_spill] sm:$0xff] %v10070_v62  ;;  %v10072_v51 = vadd.f32 %v3118_v37, %v2469_v10  ;;  %v6534_v10 = vld [vmem:[%s14170_s0 + $0x7a8] sm:$0xf0] }
 0x487   :  { %v10086_v2 = vadd.f32 %v2865_v17, %v2216_v18  ;;  %v6537_v37 = vor.u32 %v6986_v32, %v6534_v10 }
 0x488   :  { %v3314_v22 = vadd.f32 %v3313_v38, %v10054_v24  ;;  %v14885_v24 = vld [vmem:[#allocation69_spill] sm:$0xff] }
 0x489   :  { %14859 = vst [vmem:[#allocation208_spill] sm:$0xff] %v10086_v2 }
 0x48a   :  { %v3315_v41 = vadd.f32 %v3314_v22, %v10058_v60 }
 0x48c   :  { %v2873_v43 = vpop.f32.mrf.mxu1  ;;  %v2471_v58 = vpop.f32.mrf.mxu2  ;;  %v3316_v28 = vadd.f32 %v3315_v41, %v10062_v31  ;;  %v14875_v31 = vld [vmem:[#allocation53_spill] sm:$0xff] }
 0x48d   :  { %v3120_v11 = vpop.f32.mrf.mxu3 }
 0x48e   :  { %v2219_v23 = vpop.f32.mrf.mxu0  ;;  %v10074_v48 = vadd.f32 %v3120_v11, %v2471_v58  ;;  %v3317_v4 = vadd.f32 %v3316_v28, %v10066_v6  ;;  %v10100_v6 = vadd.f32 %v2873_v43, %v14862_v15  ;;  %v6540_v43 = vld [vmem:[%s14170_s0 + $0x7b0] sm:$0xf] }
 0x48f   :  { %v10092_v22 = vadd.f32 %v2868_v34, %v2219_v23  ;;  %v14864_v34 = vld [vmem:[#allocation34_spill] sm:$0xff]  ;;  %v14868_v15 = vld [vmem:[#allocation39_spill] sm:$0xff] }
 0x490   :  { %14858 = vst [vmem:[#allocation207_spill] sm:$0xff] %v10074_v48  ;;  %v3318_v38 = vadd.f32 %v3317_v4, %v10070_v62 }
 0x491   :  { %14860 = vst [vmem:[#allocation209_spill] sm:$0xff] %v10092_v22  ;;  %2513 = vmatmul.bf16.gmra.mxu2 %v6533_v26 }
 0x492   :  { %6736 = vmatmul.msk.bf16.gmra.mxu3 %vm1503_vm2, %v6537_v37  ;;  %v3319_v41 = vadd.f32 %v3318_v38, %v10086_v2  ;;  %14863 = vst [vmem:[#allocation32_spill] sm:$0xff] %v10100_v6  ;;  %v14866_v37 = vld [vmem:[#allocation37_spill] sm:$0xff] }
 0x494   :  { %v2474_v11 = vpop.f32.mrf.mxu2  ;;  %v3320_v17 = vadd.f32 %v3319_v41, %v10092_v22  ;;  %v2875_v7 = vpop.f32.mrf.mxu1  ;;  %v14872_v22 = vld [vmem:[#allocation47_spill] sm:$0xff] }
 0x495   :  { %v3123_v28 = vpop.f32.mrf.mxu3  ;;  %v10104_v23 = vadd.f32 %v2875_v7, %v14864_v34  ;;  %v6988_v7 = vld [vmem:[%s14170_s0 + $0x7b4] sm:$0xf] }
 0x496   :  { %v2221_v58 = vpop.f32.mrf.mxu0  ;;  %v10109_v41 = vadd.f32 %v3123_v28, %v2474_v11  ;;  %v6542_v11 = vld [vmem:[%s14170_s0 + $0x7b8] sm:$0xf0] }
 0x497   :  { %v10097_v18 = vadd.f32 %v2870_v55, %v2221_v58  ;;  %14865 = vst [vmem:[#allocation34_spill] sm:$0xff] %v10104_v23  ;;  %v6545_v28 = vor.u32 %v6988_v7, %v6542_v11 }
 0x498   :  { %14867 = vst [vmem:[#allocation211_spill] sm:$0xff] %v10109_v41 }
 0x499   :  { %14861 = vst [vmem:[#allocation210_spill] sm:$0xff] %v10097_v18  ;;  %v3321_v32 = vadd.f32 %v3320_v17, %v10097_v18  ;;  %v6989_v17 = vld [vmem:[%s14170_s0 + $0x7b4] sm:$0xf0] }
 0x49a   :  { %v6541_v34 = vor.u32 %v6989_v17, %v6540_v43  ;;  %v14874_v17 = vld [vmem:[#allocation51_spill] sm:$0xff] }
 0x49b   :  { %v3322_v4 = vadd.f32 %v3321_v32, %v10100_v6 }
 0x49c   :  { %v2476_v10 = vpop.f32.mrf.mxu2 }
 0x49d   :  { %v3323_v26 = vadd.f32 %v3322_v4, %v10104_v23  ;;  %v3125_v55 = vpop.f32.mrf.mxu3  ;;  %v14869_v4 = vld [vmem:[#allocation41_spill] sm:$0xff] }
 0x49e   :  { %v10111_v58 = vadd.f32 %v3125_v55, %v2476_v10  ;;  %v14870_v10 = vld [vmem:[#allocation43_spill] sm:$0xff]  ;;  %v14871_v23 = vld [vmem:[#allocation45_spill] sm:$0xff] }
 0x49f   :  { %v3324_v38 = vadd.f32 %v3323_v26, %v14866_v37 }
 0x4a1   :  { %v3325_v32 = vadd.f32 %v3324_v38, %v14868_v15  ;;  %2518 = vmatmul.bf16.gmra.mxu2 %v6541_v34  ;;  %v14873_v38 = vld [vmem:[#allocation49_spill] sm:$0xff] }
 0x4a2   :  { %6737 = vmatmul.msk.bf16.gmra.mxu3 %vm1503_vm2, %v6545_v28  ;;  %v6548_v28 = vld [vmem:[%s14170_s0 + $0x7c0] sm:$0xf] }
 0x4a3   :  { %v3326_v26 = vadd.f32 %v3325_v32, %v14869_v4 }
 0x4a4   :  { %v2479_v37 = vpop.f32.mrf.mxu2 }
 0x4a5   :  { %v3327_v55 = vadd.f32 %v3326_v26, %v14870_v10  ;;  %v3128_v18 = vpop.f32.mrf.mxu3  ;;  %v14878_v26 = vld [vmem:[#allocation55_spill] sm:$0xff] }
 0x4a6   :  { %v10134_v11 = vadd.f32 %v3128_v18, %v2479_v37  ;;  %v14879_v37 = vld [vmem:[#allocation57_spill] sm:$0xff]  ;;  %v14882_v10 = vld [vmem:[#allocation63_spill] sm:$0xff] }
 0x4a7   :  { %v3328_v6 = vadd.f32 %v3327_v55, %v14871_v23 }
 0x4a8   :  { %14876 = vst [vmem:[#allocation212_spill] sm:$0xff] %v10134_v11 }
 0x4a9   :  { %v3329_v2 = vadd.f32 %v3328_v6, %v14872_v22  ;;  %v6991_v6 = vld [vmem:[%s14170_s0 + $0x7c4] sm:$0xf0] }
 0x4ab   :  { %v3330_v43 = vadd.f32 %v3329_v2, %v14873_v38  ;;  %v6990_v2 = vld [vmem:[%s14170_s0 + $0x7c4] sm:$0xf] }
 0x4ac   :  { %v2481_v62 = vpop.f32.mrf.mxu2  ;;  %v14881_v38 = vld [vmem:[#allocation61_spill] sm:$0xff] }
 0x4ad   :  { %v3331_v15 = vadd.f32 %v3330_v43, %v14874_v17  ;;  %v3130_v32 = vpop.f32.mrf.mxu3 }
 0x4ae   :  { %v10136_v34 = vadd.f32 %v3130_v32, %v2481_v62  ;;  %v6550_v62 = vld [vmem:[%s14170_s0 + $0x7c8] sm:$0xf0]  ;;  %v14880_v32 = vld [vmem:[#allocation59_spill] sm:$0xff] }
 0x4af   :  { %v3332_v7 = vadd.f32 %v3331_v15, %v14875_v31  ;;  %v6549_v15 = vor.u32 %v6991_v6, %v6548_v28  ;;  %v6553_v18 = vor.u32 %v6990_v2, %v6550_v62  ;;  %v14884_v6 = vld [vmem:[#allocation67_spill] sm:$0xff] }
 0x4b0   :  { %14877 = vst [vmem:[#allocation213_spill] sm:$0xff] %v10136_v34 }
 0x4b1   :  { %v3333_v55 = vadd.f32 %v3332_v7, %v14878_v26  ;;  %2523 = vmatmul.bf16.gmra.mxu2 %v6549_v15  ;;  %v14883_v7 = vld [vmem:[#allocation65_spill] sm:$0xff] }
 0x4b2   :  { %6738 = vmatmul.msk.bf16.gmra.mxu3 %vm1503_vm2, %v6553_v18  ;;  %v6556_v18 = vld [vmem:[%s14170_s0 + $0x7d0] sm:$0xf] }
 0x4b3   :  { %v3334_v43 = vadd.f32 %v3333_v55, %v14879_v37 }
 0x4b4   :  { %v2484_v17 = vpop.f32.mrf.mxu2 }
 0x4b5   :  { %v3335_v31 = vadd.f32 %v3334_v43, %v14880_v32  ;;  %v3133_v23 = vpop.f32.mrf.mxu3  ;;  %v14892_v32 = vld [vmem:[#allocation79_spill] sm:$0xff] }
 0x4b6   :  { %v10159_v62 = vadd.f32 %v3133_v23, %v2484_v17  ;;  %v14889_v17 = vld [vmem:[#allocation73_spill] sm:$0xff] }
 0x4b7   :  { %v3336_v22 = vadd.f32 %v3335_v31, %v14881_v38  ;;  %v6993_v31 = vld [vmem:[%s14170_s0 + $0x7d4] sm:$0xf0] }
 0x4b8   :  { %14886 = vst [vmem:[#allocation214_spill] sm:$0xff] %v10159_v62 }
 0x4b9   :  { %v3337_v4 = vadd.f32 %v3336_v22, %v14882_v10  ;;  %v6992_v22 = vld [vmem:[%s14170_s0 + $0x7d4] sm:$0xf] }
 0x4bb   :  { %v3338_v28 = vadd.f32 %v3337_v4, %v14883_v7  ;;  %v14888_v4 = vld [vmem:[#allocation71_spill] sm:$0xff]  ;;  %v14891_v7 = vld [vmem:[#allocation77_spill] sm:$0xff] }
 0x4bc   :  { %v2486_v60 = vpop.f32.mrf.mxu2 }
 0x4bd   :  { %v3339_v26 = vadd.f32 %v3338_v28, %v14884_v6  ;;  %v3135_v55 = vpop.f32.mrf.mxu3 }
 0x4be   :  { %v10161_v15 = vadd.f32 %v3135_v55, %v2486_v60  ;;  %v6558_v60 = vld [vmem:[%s14170_s0 + $0x7d8] sm:$0xf0]  ;;  %v14890_v55 = vld [vmem:[#allocation75_spill] sm:$0xff] }
 0x4bf   :  { %v3340_v2 = vadd.f32 %v3339_v26, %v14885_v24  ;;  %v6557_v26 = vor.u32 %v6993_v31, %v6556_v18  ;;  %v6561_v23 = vor.u32 %v6992_v22, %v6558_v60  ;;  %v14894_v31 = vld [vmem:[#allocation83_spill] sm:$0xff] }
 0x4c0   :  { %14887 = vst [vmem:[#allocation215_spill] sm:$0xff] %v10161_v15 }
 0x4c1   :  { %v3341_v43 = vadd.f32 %v3340_v2, %v14888_v4  ;;  %2528 = vmatmul.bf16.gmra.mxu2 %v6557_v26  ;;  %v14893_v2 = vld [vmem:[#allocation81_spill] sm:$0xff] }
 0x4c2   :  { %6739 = vmatmul.msk.bf16.gmra.mxu3 %vm1503_vm2, %v6561_v23  ;;  %v6564_v23 = vld [vmem:[%s14170_s0 + $0x7e0] sm:$0xf] }
 0x4c3   :  { %v3342_v28 = vadd.f32 %v3341_v43, %v14889_v17 }
 0x4c4   :  { %v2489_v6 = vpop.f32.mrf.mxu2 }
 0x4c5   :  { %v3343_v24 = vadd.f32 %v3342_v28, %v14890_v55  ;;  %v3138_v38 = vpop.f32.mrf.mxu3  ;;  %v14901_v55 = vld [vmem:[#allocation95_spill] sm:$0xff] }
 0x4c6   :  { %v10184_v60 = vadd.f32 %v3138_v38, %v2489_v6  ;;  %v14898_v6 = vld [vmem:[#allocation89_spill] sm:$0xff] }
 0x4c7   :  { %v3344_v10 = vadd.f32 %v3343_v24, %v14891_v7  ;;  %v6995_v24 = vld [vmem:[%s14170_s0 + $0x7e4] sm:$0xf0] }
 0x4c9   :  { %v3345_v37 = vadd.f32 %v3344_v10, %v14892_v32  ;;  %v6994_v10 = vld [vmem:[%s14170_s0 + $0x7e4] sm:$0xf] }
 0x4cb   :  { %v3346_v18 = vadd.f32 %v3345_v37, %v14893_v2  ;;  %v14897_v37 = vld [vmem:[#allocation87_spill] sm:$0xff]  ;;  %v14900_v2 = vld [vmem:[#allocation93_spill] sm:$0xff] }
 0x4cc   :  { %v2491_v57 = vpop.f32.mrf.mxu2 }
 0x4cd   :  { %v3347_v4 = vadd.f32 %v3346_v18, %v14894_v31  ;;  %v3140_v43 = vpop.f32.mrf.mxu3 }
 0x4ce   :  { %v10186_v26 = vadd.f32 %v3140_v43, %v2491_v57  ;;  %v6566_v57 = vld [vmem:[%s14170_s0 + $0x7e8] sm:$0xf0]  ;;  %v14899_v43 = vld [vmem:[#allocation91_spill] sm:$0xff] }
 0x4cf   :  { %v3348_v22 = vadd.f32 %v3347_v4, %v14895_v9  ;;  %v6565_v4 = vor.u32 %v6995_v24, %v6564_v23  ;;  %v6569_v38 = vor.u32 %v6994_v10, %v6566_v57  ;;  %v14903_v24 = vld [vmem:[#allocation99_spill] sm:$0xff] }
 0x4d0   :  { %14896 = vst [vmem:[#allocation216_spill] sm:$0xff] %v10186_v26 }
 0x4d1   :  { %v3349_v28 = vadd.f32 %v3348_v22, %v14897_v37  ;;  %2533 = vmatmul.bf16.gmra.mxu2 %v6565_v4  ;;  %v14902_v22 = vld [vmem:[#allocation97_spill] sm:$0xff] }
 0x4d2   :  { %6740 = vmatmul.msk.bf16.gmra.mxu3 %vm1503_vm2, %v6569_v38  ;;  %v6572_v38 = vld [vmem:[%s14170_s0 + $0x7f0] sm:$0xf] }
 0x4d3   :  { %v3350_v18 = vadd.f32 %v3349_v28, %v14898_v6 }
 0x4d4   :  { %v2494_v31 = vpop.f32.mrf.mxu2 }
 0x4d5   :  { %v3351_v9 = vadd.f32 %v3350_v18, %v14899_v43  ;;  %v3143_v7 = vpop.f32.mrf.mxu3  ;;  %v14911_v43 = vld [vmem:[#allocation111_spill] sm:$0xff] }
 0x4d6   :  { %v10209_v57 = vadd.f32 %v3143_v7, %v2494_v31  ;;  %v14908_v31 = vld [vmem:[#allocation105_spill] sm:$0xff] }
 0x4d7   :  { %v3352_v32 = vadd.f32 %v3351_v9, %v14900_v2  ;;  %v6997_v9 = vld [vmem:[%s14170_s0 + $0x7f4] sm:$0xf0] }
 0x4d8   :  { %14905 = vst [vmem:[#allocation217_spill] sm:$0xff] %v10209_v57 }
 0x4d9   :  { %v3353_v17 = vadd.f32 %v3352_v32, %v14901_v55  ;;  %v6996_v32 = vld [vmem:[%s14170_s0 + $0x7f4] sm:$0xf] }
 0x4db   :  { %v3354_v23 = vadd.f32 %v3353_v17, %v14902_v22  ;;  %v14907_v17 = vld [vmem:[#allocation103_spill] sm:$0xff]  ;;  %v14910_v22 = vld [vmem:[#allocation109_spill] sm:$0xff] }
 0x4dc   :  { %v2496_v50 = vpop.f32.mrf.mxu2 }
 0x4dd   :  { %v3355_v37 = vadd.f32 %v3354_v23, %v14903_v24  ;;  %v3145_v28 = vpop.f32.mrf.mxu3 }
 0x4de   :  { %v10211_v4 = vadd.f32 %v3145_v28, %v2496_v50  ;;  %v6574_v50 = vld [vmem:[%s14170_s0 + $0x7f8] sm:$0xf0]  ;;  %v14909_v28 = vld [vmem:[#allocation107_spill] sm:$0xff] }
 0x4df   :  { %v3356_v10 = vadd.f32 %v3355_v37, %v14904_v61  ;;  %v6573_v37 = vor.u32 %v6997_v9, %v6572_v38  ;;  %v6577_v7 = vor.u32 %v6996_v32, %v6574_v50  ;;  %v14913_v9 = vld [vmem:[#allocation115_spill] sm:$0xff] }
 0x4e0   :  { %14906 = vst [vmem:[#allocation218_spill] sm:$0xff] %v10211_v4 }
 0x4e1   :  { %v3357_v18 = vadd.f32 %v3356_v10, %v14907_v17  ;;  %2538 = vmatmul.bf16.gmra.mxu2 %v6573_v37  ;;  %v14912_v10 = vld [vmem:[#allocation113_spill] sm:$0xff] }
 0x4e2   :  { %6741 = vmatmul.msk.bf16.gmra.mxu3 %vm1503_vm2, %v6577_v7  ;;  %v14916_v7 = vld [vmem:[#allocation119_spill] sm:$0xff] }
 0x4e3   :  { %v3358_v23 = vadd.f32 %v3357_v18, %v14908_v31 }
 0x4e4   :  { %v2499_v24 = vpop.f32.mrf.mxu2 }
 0x4e5   :  { %v3359_v61 = vadd.f32 %v3358_v23, %v14909_v28  ;;  %v3148_v2 = vpop.f32.mrf.mxu3  ;;  %v14917_v28 = vld [vmem:[#allocation121_spill] sm:$0xff] }
 0x4e6   :  { %v10234_v50 = vadd.f32 %v3148_v2, %v2499_v24 }
 0x4e7   :  { %v3360_v55 = vadd.f32 %v3359_v61, %v14910_v22  ;;  %v14918_v61 = vld [vmem:[#allocation123_spill] sm:$0xff] }
 0x4e8   :  { %14915 = vst [vmem:[#allocation219_spill] sm:$0xff] %v10234_v50 }
 0x4e9   :  { %v3361_v6 = vadd.f32 %v3360_v55, %v14911_v43  ;;  %v14919_v55 = vld [vmem:[#allocation125_spill] sm:$0xff] }
 0x4eb   :  { %v3362_v38 = vadd.f32 %v3361_v6, %v14912_v10  ;;  %v14920_v10 = vld [vmem:[#allocation127_spill] sm:$0xff] }
 0x4ec   :  { %v2501_v36 = vpop.f32.mrf.mxu2 }
 0x4ed   :  { %v3363_v17 = vadd.f32 %v3362_v38, %v14913_v9  ;;  %v3150_v18 = vpop.f32.mrf.mxu3  ;;  %v14921_v9 = vld [vmem:[#allocation129_spill] sm:$0xff] }
 0x4ee   :  { %v10236_v37 = vadd.f32 %v3150_v18, %v2501_v36 }
 0x4ef   :  { %v3364_v32 = vadd.f32 %v3363_v17, %v14914_v13  ;;  %v14922_v17 = vld [vmem:[#allocation131_spill] sm:$0xff]  ;;  %v14923_v13 = vld [vmem:[#allocation133_spill] sm:$0xff] }
 0x4f1   :  { %v3365_v23 = vadd.f32 %v3364_v32, %v14916_v7 }
 0x4f3   :  { %v3366_v31 = vadd.f32 %v3365_v23, %v14917_v28  ;;  %v14925_v23 = vld [vmem:[#allocation135_spill] sm:$0xff] }
 0x4f4   :  { %v2504_v12 = vpop.f32.mrf.mxu2 }
 0x4f5   :  { %v3367_v22 = vadd.f32 %v3366_v31, %v14918_v61  ;;  %v3153_v6 = vpop.f32.mrf.mxu3  ;;  %v14926_v61 = vld [vmem:[#allocation137_spill] sm:$0xff] }
 0x4f6   :  { %v10246_v18 = vadd.f32 %v3153_v6, %v2504_v12 }
 0x4f7   :  { %v3368_v43 = vadd.f32 %v3367_v22, %v14919_v55  ;;  %v14927_v22 = vld [vmem:[#allocation139_spill] sm:$0xff] }
 0x4f9   :  { %v3369_v38 = vadd.f32 %v3368_v43, %v14920_v10  ;;  %v14928_v43 = vld [vmem:[#allocation141_spill] sm:$0xff] }
 0x4fb   :  { %v3370_v63 = vadd.f32 %v3369_v38, %v14921_v9  ;;  %v14929_v9 = vld [vmem:[#allocation143_spill] sm:$0xff] }
 0x4fc   :  { %v2506_v24 = vpop.f32.mrf.mxu2 }
 0x4fd   :  { %v3371_v2 = vadd.f32 %v3370_v63, %v14922_v17  ;;  %v3155_v32 = vpop.f32.mrf.mxu3  ;;  %v14930_v17 = vld [vmem:[#allocation145_spill] sm:$0xff] }
 0x4fe   :  { %v10248_v7 = vadd.f32 %v3155_v32, %v2506_v24 }
 0x4ff   :  { %v3372_v36 = vadd.f32 %v3371_v2, %v14923_v13  ;;  %v14931_v2 = vld [vmem:[#allocation147_spill] sm:$0xff]  ;;  %v14932_v13 = vld [vmem:[#allocation149_spill] sm:$0xff] }
 0x500   :  { %14924 = vst [vmem:[#allocation220_spill] sm:$0xff] %v10248_v7 }
 0x501   :  { %v3373_v31 = vadd.f32 %v3372_v36, %v14925_v23 }
 0x503   :  { %v3374_v28 = vadd.f32 %v3373_v31, %v14926_v61  ;;  %v14935_v31 = vld [vmem:[#allocation151_spill] sm:$0xff] }
 0x504   :  { %v2509_v35 = vpop.f32.mrf.mxu2 }
 0x505   :  { %v3375_v55 = vadd.f32 %v3374_v28, %v14927_v22  ;;  %v3158_v38 = vpop.f32.mrf.mxu3  ;;  %v14936_v22 = vld [vmem:[#allocation153_spill] sm:$0xff] }
 0x506   :  { %v10258_v32 = vadd.f32 %v3158_v38, %v2509_v35  ;;  %v14942_v38 = vld [vmem:[#allocation165_spill] sm:$0xff] }
 0x507   :  { %v3376_v10 = vadd.f32 %v3375_v55, %v14928_v43  ;;  %v14937_v55 = vld [vmem:[#allocation155_spill] sm:$0xff] }
 0x508   :  { %14933 = vst [vmem:[#allocation221_spill] sm:$0xff] %v10258_v32 }
 0x509   :  { %v3377_v63 = vadd.f32 %v3376_v10, %v14929_v9  ;;  %v14939_v9 = vld [vmem:[#allocation159_spill] sm:$0xff] }
 0x50b   :  { %v3378_v14 = vadd.f32 %v3377_v63, %v14930_v17  ;;  %v14940_v17 = vld [vmem:[#allocation161_spill] sm:$0xff] }
 0x50c   :  { %v2511_v6 = vpop.f32.mrf.mxu2 }
 0x50d   :  { %v3379_v12 = vadd.f32 %v3378_v14, %v14931_v2  ;;  %v3160_v36 = vpop.f32.mrf.mxu3  ;;  %v14941_v2 = vld [vmem:[#allocation163_spill] sm:$0xff] }
 0x50e   :  { %v10260_v23 = vadd.f32 %v3160_v36, %v2511_v6  ;;  %v14943_v36 = vld [vmem:[#allocation167_spill] sm:$0xff] }
 0x50f   :  { %v3380_v24 = vadd.f32 %v3379_v12, %v14932_v13 }
 0x510   :  { %14934 = vst [vmem:[#allocation222_spill] sm:$0xff] %v10260_v23 }
 0x511   :  { %v3381_v28 = vadd.f32 %v3380_v24, %v14935_v31  ;;  %v14944_v31 = vld [vmem:[#allocation169_spill] sm:$0xff] }
 0x513   :  { %v3382_v61 = vadd.f32 %v3381_v28, %v14936_v22  ;;  %v14945_v22 = vld [vmem:[#allocation171_spill] sm:$0xff] }
 0x514   :  { %v2514_v12 = vpop.f32.mrf.mxu2 }
 0x515   :  { %v3383_v43 = vadd.f32 %v3382_v61, %v14937_v55  ;;  %v3163_v35 = vpop.f32.mrf.mxu3 }
 0x516   :  { %v10270_v6 = vadd.f32 %v3163_v35, %v2514_v12 }
 0x517   :  { %v3384_v10 = vadd.f32 %v3383_v43, %v14938_v16 }
 0x519   :  { %v3385_v63 = vadd.f32 %v3384_v10, %v14939_v9 }
 0x51b   :  { %v3386_v14 = vadd.f32 %v3385_v63, %v14940_v17 }
 0x51d   :  { %v3387_v47 = vadd.f32 %v3386_v14, %v14941_v2 }
 0x51f   :  { %v3388_v13 = vadd.f32 %v3387_v47, %v14942_v38 }
 0x521   :  { %v3389_v24 = vadd.f32 %v3388_v13, %v14943_v36 }
 0x523   :  { %v3390_v28 = vadd.f32 %v3389_v24, %v14944_v31 }
 0x525   :  { %v3391_v61 = vadd.f32 %v3390_v28, %v14945_v22 }
 0x527   :  { %v3392_v43 = vadd.f32 %v3391_v61, %v9544_v1 }
 0x529   :  { %v3393_v10 = vadd.f32 %v3392_v43, %v9558_v52 }
 0x52b   :  { %v3394_v63 = vadd.f32 %v3393_v10, %v9586_v8 }
 0x52d   :  { %v3395_v14 = vadd.f32 %v3394_v63, %v9600_v59 }
 0x52f   :  { %v3396_v2 = vadd.f32 %v3395_v14, %v9628_v25 }
 0x531   :  { %v3397_v47 = vadd.f32 %v3396_v2, %v9642_v30 }
 0x533   :  { %v3398_v12 = vadd.f32 %v3397_v47, %v9670_v56 }
 0x535   :  { %v3399_v13 = vadd.f32 %v3398_v12, %v9684_v42 }
 0x537   :  { %v3400_v35 = vadd.f32 %v3399_v13, %v9712_v39  ;;  %v14946_v13 = vld [vmem:[#allocation194_spill] sm:$0xff] }
 0x539   :  { %v3401_v24 = vadd.f32 %v3400_v35, %v9726_v46  ;;  %v14947_v46 = vld [vmem:[#allocation195_spill] sm:$0xff] }
 0x53b   :  { %v3402_v28 = vadd.f32 %v3401_v24, %v9754_v0  ;;  %v14948_v0 = vld [vmem:[#allocation196_spill] sm:$0xff] }
 0x53d   :  { %v3403_v61 = vadd.f32 %v3402_v28, %v9768_v5 }
 0x53f   :  { %v3404_v43 = vadd.f32 %v3403_v61, %v9796_v20 }
 0x541   :  { %v3405_v10 = vadd.f32 %v3404_v43, %v9810_v19 }
 0x543   :  { %v3406_v63 = vadd.f32 %v3405_v10, %v9832_v45 }
 0x545   :  { %v3407_v2 = vadd.f32 %v3406_v63, %v9839_v54 }
 0x547   :  { %v3408_v14 = vadd.f32 %v3407_v2, %v9861_v21 }
 0x549   :  { %v3409_v47 = vadd.f32 %v3408_v14, %v9868_v44 }
 0x54b   :  { %v3410_v12 = vadd.f32 %v3409_v47, %v9892_v27 }
 0x54d   :  { %v3411_v35 = vadd.f32 %v3410_v12, %v14946_v13 }
 0x54f   :  { %v3412_v24 = vadd.f32 %v3411_v35, %v14947_v46  ;;  %v2516_v46 = vpop.f32.mrf.mxu2 }
 0x551   :  { %v3413_v28 = vadd.f32 %v3412_v24, %v14948_v0  ;;  %v3165_v24 = vpop.f32.mrf.mxu3 }
 0x553   :  { %v3414_v61 = vadd.f32 %v3413_v28, %v9958_v40 }
 0x555   :  { %v3415_v43 = vadd.f32 %v3414_v61, %v9967_v33 }
 0x557   :  { %v3416_v10 = vadd.f32 %v3415_v43, %v9989_v29  ;;  %v2519_v29 = vpop.f32.mrf.mxu2 }
 0x559   :  { %v3417_v63 = vadd.f32 %v3416_v10, %v9996_v49  ;;  %v3168_v10 = vpop.f32.mrf.mxu3 }
 0x55b   :  { %v3418_v2 = vadd.f32 %v3417_v63, %v10019_v53 }
 0x55d   :  { %v3419_v14 = vadd.f32 %v3418_v2, %v10021_v3 }
 0x55f   :  { %v3420_v47 = vadd.f32 %v3419_v14, %v10072_v51  ;;  %v2521_v3 = vpop.f32.mrf.mxu2 }
 0x561   :  { %v3421_v12 = vadd.f32 %v3420_v47, %v10074_v48  ;;  %v3170_v14 = vpop.f32.mrf.mxu3 }
 0x563   :  { %v3422_v35 = vadd.f32 %v3421_v12, %v10109_v41 }
 0x565   :  { %v3423_v28 = vadd.f32 %v3422_v35, %v10111_v58 }
 0x567   :  { %v3424_v61 = vadd.f32 %v3423_v28, %v10134_v11  ;;  %v2524_v48 = vpop.f32.mrf.mxu2 }
 0x569   :  { %v3425_v43 = vadd.f32 %v3424_v61, %v10136_v34  ;;  %v3173_v35 = vpop.f32.mrf.mxu3 }
 0x56b   :  { %v3426_v63 = vadd.f32 %v3425_v43, %v10159_v62 }
 0x56d   :  { %v3427_v2 = vadd.f32 %v3426_v63, %v10161_v15 }
 0x56f   :  { %v3428_v47 = vadd.f32 %v3427_v2, %v10184_v60  ;;  %v2526_v34 = vpop.f32.mrf.mxu2 }
 0x571   :  { %v3429_v12 = vadd.f32 %v3428_v47, %v10186_v26  ;;  %v3175_v11 = vpop.f32.mrf.mxu3 }
 0x573   :  { %v3430_v41 = vadd.f32 %v3429_v12, %v10209_v57 }
 0x575   :  { %v3431_v28 = vadd.f32 %v3430_v41, %v10211_v4  ;;  %v10322_v4 = vadd.f32 %v3165_v24, %v2516_v46 }
 0x577   :  { %v3432_v61 = vadd.f32 %v3431_v28, %v10234_v50  ;;  %v2529_v62 = vpop.f32.mrf.mxu2  ;;  %v10325_v50 = vadd.f32 %v3168_v10, %v2519_v29 }
 0x579   :  { %v3433_v43 = vadd.f32 %v3432_v61, %v10236_v37  ;;  %v3178_v2 = vpop.f32.mrf.mxu3 }
 0x57a   :  { %v10337_v29 = vadd.f32 %v3178_v2, %v2529_v62 }
 0x57b   :  { %v3434_v63 = vadd.f32 %v3433_v43, %v10246_v18 }
 0x57d   :  { %v3435_v15 = vadd.f32 %v3434_v63, %v10248_v7  ;;  %v10328_v7 = vadd.f32 %v3170_v14, %v2521_v3 }
 0x57f   :  { %v3436_v47 = vadd.f32 %v3435_v15, %v10258_v32  ;;  %v2531_v57 = vpop.f32.mrf.mxu2  ;;  %v10331_v32 = vadd.f32 %v3173_v35, %v2524_v48 }
 0x581   :  { %v3437_v12 = vadd.f32 %v3436_v47, %v10260_v23  ;;  %v3180_v26 = vpop.f32.mrf.mxu3  ;;  %v10334_v23 = vadd.f32 %v3175_v11, %v2526_v34 }
 0x583   :  { %v3438_v41 = vadd.f32 %v3437_v12, %v10270_v6 }
 0x585   :  { %v3439_v28 = vadd.f32 %v3438_v41, %v10322_v4  ;;  %v10340_v41 = vadd.f32 %v3180_v26, %v2531_v57 }
 0x587   :  { %v3440_v61 = vadd.f32 %v3439_v28, %v10325_v50  ;;  %v2534_v43 = vpop.f32.mrf.mxu2 }
 0x589   :  { %v3183_v63 = vpop.f32.mrf.mxu3  ;;  %v3441_v15 = vadd.f32 %v3440_v61, %v10328_v7 }
 0x58a   :  { %v10343_v48 = vadd.f32 %v3183_v63, %v2534_v43 }
 0x58b   :  { %v3442_v47 = vadd.f32 %v3441_v15, %v10331_v32 }
 0x58c   :  { %14949 = vst [vmem:[#allocation155_spill] sm:$0xff] %v10343_v48 }
 0x58d   :  { %v3443_v12 = vadd.f32 %v3442_v47, %v10334_v23  ;;  %v7822_v47 = vmov 2048.0  }
 0x58e   :  { %7790 = vrcp.f32 %v7822_v47  ;;  %v14955_v47 = vld [vmem:[#allocation7_spill] sm:$0xff] }
 0x58f   :  { %v2536_v46 = vpop.f32.mrf.mxu2  ;;  %v3444_v10 = vadd.f32 %v3443_v12, %v10337_v29 }
 0x591   :  { %v3185_v24 = vpop.f32.mrf.mxu3  ;;  %v3445_v3 = vadd.f32 %v3444_v10, %v10340_v41 }
 0x592   :  { %v10346_v11 = vadd.f32 %v3185_v24, %v2536_v46 }
 0x593   :  { %v3446_v35 = vadd.f32 %v3445_v3, %v10343_v48 }
 0x594   :  { %14950 = vst [vmem:[#allocation157_spill] sm:$0xff] %v10346_v11  ;;  %v7791_v63 = vpop.eup %7790 }
 0x595   :  { %v3447_v34 = vadd.f32 %v3446_v35, %v10346_v11  ;;  %v3457_v10 = vmul.f32 2048.0, %v7791_v63  ;;  %vm3461_vm3 = vweird.f32 %v7791_v63 }
 0x597   :  { %v2539_v14 = vpop.f32.mrf.mxu2  ;;  %v3458_v24 = vsub.f32 1.0, %v3457_v10 }
 0x599   :  { %v3188_v28 = vpop.f32.mrf.mxu3  ;;  %v3459_v35 = vmul.f32 %v7791_v63, %v3458_v24 }
 0x59a   :  { %v10349_v61 = vadd.f32 %v3188_v28, %v2539_v14 }
 0x59b   :  { %v3460_v28 = vadd.f32 %v7791_v63, %v3459_v35 }
 0x59c   :  { %v3448_v15 = vadd.f32 %v3447_v34, %v10349_v61 }
 0x59d   :  { %v10355_v48 = vsel %vm3461_vm3, %v7791_v63, %v3460_v28 }
 0x59f   :  { %v2541_v62 = vpop.f32.mrf.mxu2 }
 0x5a1   :  { %v3190_v2 = vpop.f32.mrf.mxu3 }
 0x5a2   :  { %v10352_v26 = vadd.f32 %v3190_v2, %v2541_v62  ;;  %v14951_v62 = vld [vmem:[#allocation5_spill] sm:$0xff] }
 0x5a4   :  { %v3449_v57 = vadd.f32 %v3448_v15, %v10352_v26  ;;  %v14953_v15 = vld [vmem:[#allocation6_spill] sm:$0xff] }
 0x5a6   :  { %v3450_v43 = vrot.slane %v3449_v57, 4 }
 0x5a8   :  { %v3451_v12 = vadd.f32 %v3450_v43, %v3449_v57 }
 0x5aa   :  { %v3452_v46 = vrot.slane %v3451_v12, 2 }
 0x5ac   :  { %v3453_v3 = vadd.f32 %v3452_v46, %v3451_v12  ;;  %v14959_v46 = vld [vmem:[#allocation9_spill] sm:$0xff] }
 0x5ae   :  { %v3454_v14 = vrot.slane %v3453_v3, 1 }
 0x5b0   :  { %v3455_v11 = vadd.f32 %v3454_v14, %v3453_v3  ;;  %v14961_v14 = vld [vmem:[#allocation10_spill] sm:$0xff] }
 0x5b2   :  { %v10358_v34 = vmul.f32 %v10355_v48, %v3455_v11  ;;  %v14957_v11 = vld [vmem:[#allocation8_spill] sm:$0xff] }
 0x5b4   :  { %v10362_v2 = vsub.f32 %v14951_v62, %v10358_v34  ;;  %v10366_v57 = vsub.f32 %v14953_v15, %v10358_v34  ;;  %v10370_v43 = vsub.f32 %v14955_v47, %v10358_v34  ;;  %v10378_v10 = vsub.f32 %v14957_v11, %v10358_v34  ;;  %v14963_v47 = vld [vmem:[#allocation11_spill] sm:$0xff] }
 0x5b5   :  { %v10382_v24 = vsub.f32 %v14959_v46, %v10358_v34  ;;  %v10388_v28 = vsub.f32 %v14961_v14, %v10358_v34  ;;  %v10394_v11 = vsub.f32 %v14963_v47, %v10358_v34  ;;  %v14967_v14 = vld [vmem:[#allocation13_spill] sm:$0xff]  ;;  %v14969_v47 = vld [vmem:[#allocation14_spill] sm:$0xff] }
 0x5b6   :  { %14952 = vst [vmem:[#allocation159_spill] sm:$0xff] %v10362_v2  ;;  %v3720_v12 = vmul.f32 %v10362_v2, %v10362_v2  ;;  %v3721_v63 = vmul.f32 %v10366_v57, %v10366_v57  ;;  %v3722_v3 = vmul.f32 %v10370_v43, %v10370_v43  ;;  %v3723_v62 = vmul.f32 %v10378_v10, %v10378_v10  ;;  %v14965_v2 = vld [vmem:[#allocation12_spill] sm:$0xff] }
 0x5b7   :  { %14954 = vst [vmem:[#allocation161_spill] sm:$0xff] %v10366_v57  ;;  %v3724_v46 = vmul.f32 %v10382_v24, %v10382_v24 }
 0x5b8   :  { %14956 = vst [vmem:[#allocation165_spill] sm:$0xff] %v10370_v43  ;;  %v3976_v35 = vadd.f32 %v3721_v63, %v3720_v12  ;;  %v10400_v43 = vsub.f32 %v14965_v2, %v10358_v34  ;;  %v3725_v12 = vmul.f32 %v10388_v28, %v10388_v28 }
 0x5b9   :  { %14958 = vst [vmem:[#allocation167_spill] sm:$0xff] %v10378_v10  ;;  %v10406_v10 = vsub.f32 %v14967_v14, %v10358_v34  ;;  %v14973_v14 = vld [vmem:[#allocation16_spill] sm:$0xff] }
 0x5ba   :  { %14960 = vst [vmem:[#allocation169_spill] sm:$0xff] %v10382_v24  ;;  %v3977_v15 = vadd.f32 %v3976_v35, %v3722_v3  ;;  %v3726_v3 = vmul.f32 %v10394_v11, %v10394_v11  ;;  %v10412_v24 = vsub.f32 %v14969_v47, %v10358_v34  ;;  %v3727_v2 = vmul.f32 %v10400_v43, %v10400_v43  ;;  %v14975_v47 = vld [vmem:[#allocation17_spill] sm:$0xff] }
 0x5bb   :  { %14962 = vst [vmem:[#allocation171_spill] sm:$0xff] %v10388_v28 }
 0x5bc   :  { %14964 = vst [vmem:[#allocation194_spill] sm:$0xff] %v10394_v11  ;;  %v3978_v57 = vadd.f32 %v3977_v15, %v3723_v62  ;;  %v14971_v15 = vld [vmem:[#allocation15_spill] sm:$0xff]  ;;  %v10424_v11 = vsub.f32 %v14973_v14, %v10358_v34 }
 0x5bd   :  { %14966 = vst [vmem:[#allocation196_spill] sm:$0xff] %v10400_v43  ;;  %v10418_v28 = vsub.f32 %v14971_v15, %v10358_v34  ;;  %v10430_v43 = vsub.f32 %v14975_v47, %v10358_v34  ;;  %v14977_v15 = vld [vmem:[#allocation18_spill] sm:$0xff]  ;;  %v14979_v14 = vld [vmem:[#allocation19_spill] sm:$0xff]  ;;  %v14981_v47 = vld [vmem:[#allocation20_spill] sm:$0xff] }
 0x5be   :  { %v3979_v63 = vadd.f32 %v3978_v57, %v3724_v46  ;;  %14968 = vst [vmem:[#allocation5_spill] sm:$0xff] %v10406_v10  ;;  %v3728_v57 = vmul.f32 %v10406_v10, %v10406_v10  ;;  %v10436_v10 = vsub.f32 %v14977_v15, %v10358_v34  ;;  %v14983_v15 = vld [vmem:[#allocation21_spill] sm:$0xff] }
 0x5bf   :  { %14970 = vst [vmem:[#allocation6_spill] sm:$0xff] %v10412_v24 }
 0x5c0   :  { %v3980_v35 = vadd.f32 %v3979_v63, %v3725_v12  ;;  %14972 = vst [vmem:[#allocation7_spill] sm:$0xff] %v10418_v28  ;;  %v3729_v12 = vmul.f32 %v10412_v24, %v10412_v24  ;;  %v10442_v24 = vsub.f32 %v14979_v14, %v10358_v34  ;;  %v14985_v14 = vld [vmem:[#allocation22_spill] sm:$0xff] }
 0x5c1   :  { %14974 = vst [vmem:[#allocation8_spill] sm:$0xff] %v10424_v11 }
 0x5c2   :  { %v3981_v62 = vadd.f32 %v3980_v35, %v3726_v3  ;;  %14976 = vst [vmem:[#allocation9_spill] sm:$0xff] %v10430_v43  ;;  %v3730_v3 = vmul.f32 %v10418_v28, %v10418_v28  ;;  %v10448_v28 = vsub.f32 %v14981_v47, %v10358_v34  ;;  %v14987_v47 = vld [vmem:[#allocation23_spill] sm:$0xff] }
 0x5c3   :  { %14978 = vst [vmem:[#allocation10_spill] sm:$0xff] %v10436_v10 }
 0x5c4   :  { %v3982_v46 = vadd.f32 %v3981_v62, %v3727_v2  ;;  %v3731_v2 = vmul.f32 %v10424_v11, %v10424_v11  ;;  %14980 = vst [vmem:[#allocation11_spill] sm:$0xff] %v10442_v24  ;;  %v10454_v11 = vsub.f32 %v14983_v15, %v10358_v34  ;;  %v14989_v15 = vld [vmem:[#allocation24_spill] sm:$0xff] }
 0x5c5   :  { %14982 = vst [vmem:[#allocation12_spill] sm:$0xff] %v10448_v28 }
 0x5c6   :  { %v3983_v63 = vadd.f32 %v3982_v46, %v3728_v57  ;;  %v3732_v57 = vmul.f32 %v10430_v43, %v10430_v43  ;;  %14984 = vst [vmem:[#allocation13_spill] sm:$0xff] %v10454_v11  ;;  %v10460_v43 = vsub.f32 %v14985_v14, %v10358_v34  ;;  %v14991_v14 = vld [vmem:[#allocation25_spill] sm:$0xff] }
 0x5c8   :  { %v3984_v35 = vadd.f32 %v3983_v63, %v3729_v12  ;;  %v3733_v12 = vmul.f32 %v10436_v10, %v10436_v10  ;;  %14986 = vst [vmem:[#allocation14_spill] sm:$0xff] %v10460_v43  ;;  %v10466_v10 = vsub.f32 %v14987_v47, %v10358_v34  ;;  %v14993_v47 = vld [vmem:[#allocation26_spill] sm:$0xff] }
 0x5ca   :  { %v3985_v62 = vadd.f32 %v3984_v35, %v3730_v3  ;;  %v3734_v3 = vmul.f32 %v10442_v24, %v10442_v24  ;;  %14988 = vst [vmem:[#allocation15_spill] sm:$0xff] %v10466_v10  ;;  %v10472_v24 = vsub.f32 %v14989_v15, %v10358_v34  ;;  %v14995_v15 = vld [vmem:[#allocation27_spill] sm:$0xff] }
 0x5cc   :  { %v3986_v46 = vadd.f32 %v3985_v62, %v3731_v2  ;;  %v3735_v2 = vmul.f32 %v10448_v28, %v10448_v28  ;;  %14990 = vst [vmem:[#allocation16_spill] sm:$0xff] %v10472_v24  ;;  %v10478_v28 = vsub.f32 %v14991_v14, %v10358_v34  ;;  %v14997_v14 = vld [vmem:[#allocation28_spill] sm:$0xff] }
 0x5ce   :  { %v3987_v63 = vadd.f32 %v3986_v46, %v3732_v57  ;;  %v3736_v57 = vmul.f32 %v10454_v11, %v10454_v11  ;;  %14992 = vst [vmem:[#allocation17_spill] sm:$0xff] %v10478_v28  ;;  %v10484_v11 = vsub.f32 %v14993_v47, %v10358_v34  ;;  %v14999_v47 = vld [vmem:[#allocation29_spill] sm:$0xff] }
 0x5d0   :  { %v3988_v35 = vadd.f32 %v3987_v63, %v3733_v12  ;;  %v3737_v12 = vmul.f32 %v10460_v43, %v10460_v43  ;;  %14994 = vst [vmem:[#allocation18_spill] sm:$0xff] %v10484_v11  ;;  %v10490_v43 = vsub.f32 %v14995_v15, %v10358_v34  ;;  %v15001_v15 = vld [vmem:[#allocation30_spill] sm:$0xff] }
 0x5d2   :  { %v3989_v62 = vadd.f32 %v3988_v35, %v3734_v3  ;;  %v3738_v3 = vmul.f32 %v10466_v10, %v10466_v10  ;;  %14996 = vst [vmem:[#allocation19_spill] sm:$0xff] %v10490_v43  ;;  %v10496_v10 = vsub.f32 %v14997_v14, %v10358_v34  ;;  %v15003_v14 = vld [vmem:[#allocation31_spill] sm:$0xff] }
 0x5d4   :  { %v3990_v46 = vadd.f32 %v3989_v62, %v3735_v2  ;;  %v3739_v2 = vmul.f32 %v10472_v24, %v10472_v24  ;;  %14998 = vst [vmem:[#allocation20_spill] sm:$0xff] %v10496_v10  ;;  %v10502_v24 = vsub.f32 %v14999_v47, %v10358_v34  ;;  %v15005_v47 = vld [vmem:[#allocation33_spill] sm:$0xff] }
 0x5d6   :  { %v3991_v63 = vadd.f32 %v3990_v46, %v3736_v57  ;;  %v3740_v57 = vmul.f32 %v10478_v28, %v10478_v28  ;;  %15000 = vst [vmem:[#allocation21_spill] sm:$0xff] %v10502_v24  ;;  %v10508_v28 = vsub.f32 %v15001_v15, %v10358_v34  ;;  %v15007_v15 = vld [vmem:[#allocation35_spill] sm:$0xff] }
 0x5d8   :  { %v3992_v35 = vadd.f32 %v3991_v63, %v3737_v12  ;;  %v3741_v12 = vmul.f32 %v10484_v11, %v10484_v11  ;;  %15002 = vst [vmem:[#allocation22_spill] sm:$0xff] %v10508_v28  ;;  %v10514_v11 = vsub.f32 %v15003_v14, %v10358_v34  ;;  %v15009_v14 = vld [vmem:[#allocation36_spill] sm:$0xff] }
 0x5da   :  { %v3993_v62 = vadd.f32 %v3992_v35, %v3738_v3  ;;  %v3742_v3 = vmul.f32 %v10490_v43, %v10490_v43  ;;  %15004 = vst [vmem:[#allocation23_spill] sm:$0xff] %v10514_v11  ;;  %v10520_v43 = vsub.f32 %v15005_v47, %v10358_v34  ;;  %v15011_v47 = vld [vmem:[#allocation38_spill] sm:$0xff] }
 0x5dc   :  { %v3994_v46 = vadd.f32 %v3993_v62, %v3739_v2  ;;  %v3743_v2 = vmul.f32 %v10496_v10, %v10496_v10  ;;  %15006 = vst [vmem:[#allocation24_spill] sm:$0xff] %v10520_v43  ;;  %v10526_v10 = vsub.f32 %v15007_v15, %v10358_v34  ;;  %v15013_v15 = vld [vmem:[#allocation40_spill] sm:$0xff] }
 0x5de   :  { %v3995_v63 = vadd.f32 %v3994_v46, %v3740_v57  ;;  %v3744_v57 = vmul.f32 %v10502_v24, %v10502_v24  ;;  %15008 = vst [vmem:[#allocation25_spill] sm:$0xff] %v10526_v10  ;;  %v10532_v24 = vsub.f32 %v15009_v14, %v10358_v34  ;;  %v15015_v14 = vld [vmem:[#allocation42_spill] sm:$0xff] }
 0x5e0   :  { %v3996_v35 = vadd.f32 %v3995_v63, %v3741_v12  ;;  %v3745_v12 = vmul.f32 %v10508_v28, %v10508_v28  ;;  %15010 = vst [vmem:[#allocation26_spill] sm:$0xff] %v10532_v24  ;;  %v10538_v28 = vsub.f32 %v15011_v47, %v10358_v34  ;;  %v15017_v47 = vld [vmem:[#allocation44_spill] sm:$0xff] }
 0x5e2   :  { %v3997_v62 = vadd.f32 %v3996_v35, %v3742_v3  ;;  %v3746_v3 = vmul.f32 %v10514_v11, %v10514_v11  ;;  %15012 = vst [vmem:[#allocation27_spill] sm:$0xff] %v10538_v28  ;;  %v10544_v11 = vsub.f32 %v15013_v15, %v10358_v34  ;;  %v15019_v15 = vld [vmem:[#allocation46_spill] sm:$0xff] }
 0x5e4   :  { %v3998_v46 = vadd.f32 %v3997_v62, %v3743_v2  ;;  %v3747_v2 = vmul.f32 %v10520_v43, %v10520_v43  ;;  %15014 = vst [vmem:[#allocation28_spill] sm:$0xff] %v10544_v11  ;;  %v10550_v43 = vsub.f32 %v15015_v14, %v10358_v34  ;;  %v15021_v14 = vld [vmem:[#allocation48_spill] sm:$0xff] }
 0x5e6   :  { %v3999_v63 = vadd.f32 %v3998_v46, %v3744_v57  ;;  %v3748_v57 = vmul.f32 %v10526_v10, %v10526_v10  ;;  %15016 = vst [vmem:[#allocation29_spill] sm:$0xff] %v10550_v43  ;;  %v10556_v10 = vsub.f32 %v15017_v47, %v10358_v34  ;;  %v15023_v47 = vld [vmem:[#allocation50_spill] sm:$0xff] }
 0x5e8   :  { %v4000_v35 = vadd.f32 %v3999_v63, %v3745_v12  ;;  %v3749_v12 = vmul.f32 %v10532_v24, %v10532_v24  ;;  %15018 = vst [vmem:[#allocation30_spill] sm:$0xff] %v10556_v10  ;;  %v10562_v24 = vsub.f32 %v15019_v15, %v10358_v34  ;;  %v15025_v15 = vld [vmem:[#allocation52_spill] sm:$0xff] }
 0x5ea   :  { %v4001_v62 = vadd.f32 %v4000_v35, %v3746_v3  ;;  %v3750_v3 = vmul.f32 %v10538_v28, %v10538_v28  ;;  %15020 = vst [vmem:[#allocation31_spill] sm:$0xff] %v10562_v24  ;;  %v10568_v28 = vsub.f32 %v15021_v14, %v10358_v34  ;;  %v15027_v14 = vld [vmem:[#allocation54_spill] sm:$0xff] }
 0x5ec   :  { %v4002_v46 = vadd.f32 %v4001_v62, %v3747_v2  ;;  %v3751_v2 = vmul.f32 %v10544_v11, %v10544_v11  ;;  %15022 = vst [vmem:[#allocation33_spill] sm:$0xff] %v10568_v28  ;;  %v10574_v11 = vsub.f32 %v15023_v47, %v10358_v34  ;;  %v15029_v47 = vld [vmem:[#allocation56_spill] sm:$0xff] }
 0x5ee   :  { %v4003_v63 = vadd.f32 %v4002_v46, %v3748_v57  ;;  %v3752_v57 = vmul.f32 %v10550_v43, %v10550_v43  ;;  %15024 = vst [vmem:[#allocation35_spill] sm:$0xff] %v10574_v11  ;;  %v10580_v43 = vsub.f32 %v15025_v15, %v10358_v34  ;;  %v15031_v15 = vld [vmem:[#allocation58_spill] sm:$0xff] }
 0x5f0   :  { %v4004_v35 = vadd.f32 %v4003_v63, %v3749_v12  ;;  %v3753_v12 = vmul.f32 %v10556_v10, %v10556_v10  ;;  %15026 = vst [vmem:[#allocation36_spill] sm:$0xff] %v10580_v43  ;;  %v10586_v10 = vsub.f32 %v15027_v14, %v10358_v34  ;;  %v15033_v14 = vld [vmem:[#allocation60_spill] sm:$0xff] }
 0x5f2   :  { %v4005_v62 = vadd.f32 %v4004_v35, %v3750_v3  ;;  %v3754_v3 = vmul.f32 %v10562_v24, %v10562_v24  ;;  %15028 = vst [vmem:[#allocation38_spill] sm:$0xff] %v10586_v10  ;;  %v10592_v24 = vsub.f32 %v15029_v47, %v10358_v34  ;;  %v15035_v47 = vld [vmem:[#allocation62_spill] sm:$0xff] }
 0x5f4   :  { %v4006_v46 = vadd.f32 %v4005_v62, %v3751_v2  ;;  %v3755_v2 = vmul.f32 %v10568_v28, %v10568_v28  ;;  %15030 = vst [vmem:[#allocation40_spill] sm:$0xff] %v10592_v24  ;;  %v10598_v28 = vsub.f32 %v15031_v15, %v10358_v34  ;;  %v15037_v15 = vld [vmem:[#allocation64_spill] sm:$0xff] }
 0x5f6   :  { %v4007_v63 = vadd.f32 %v4006_v46, %v3752_v57  ;;  %v3756_v57 = vmul.f32 %v10574_v11, %v10574_v11  ;;  %15032 = vst [vmem:[#allocation42_spill] sm:$0xff] %v10598_v28  ;;  %v10604_v11 = vsub.f32 %v15033_v14, %v10358_v34  ;;  %v15039_v14 = vld [vmem:[#allocation66_spill] sm:$0xff] }
 0x5f8   :  { %v4008_v35 = vadd.f32 %v4007_v63, %v3753_v12  ;;  %v3757_v12 = vmul.f32 %v10580_v43, %v10580_v43  ;;  %15034 = vst [vmem:[#allocation44_spill] sm:$0xff] %v10604_v11  ;;  %v10610_v43 = vsub.f32 %v15035_v47, %v10358_v34  ;;  %v15041_v47 = vld [vmem:[#allocation68_spill] sm:$0xff] }
 0x5fa   :  { %v4009_v62 = vadd.f32 %v4008_v35, %v3754_v3  ;;  %v3758_v3 = vmul.f32 %v10586_v10, %v10586_v10  ;;  %15036 = vst [vmem:[#allocation46_spill] sm:$0xff] %v10610_v43  ;;  %v10616_v10 = vsub.f32 %v15037_v15, %v10358_v34  ;;  %v15043_v15 = vld [vmem:[#allocation70_spill] sm:$0xff] }
 0x5fc   :  { %v4010_v46 = vadd.f32 %v4009_v62, %v3755_v2  ;;  %v3759_v2 = vmul.f32 %v10592_v24, %v10592_v24  ;;  %15038 = vst [vmem:[#allocation48_spill] sm:$0xff] %v10616_v10  ;;  %v10622_v24 = vsub.f32 %v15039_v14, %v10358_v34  ;;  %v15045_v14 = vld [vmem:[#allocation72_spill] sm:$0xff] }
 0x5fe   :  { %v4011_v63 = vadd.f32 %v4010_v46, %v3756_v57  ;;  %v3760_v57 = vmul.f32 %v10598_v28, %v10598_v28  ;;  %15040 = vst [vmem:[#allocation50_spill] sm:$0xff] %v10622_v24  ;;  %v10628_v28 = vsub.f32 %v15041_v47, %v10358_v34  ;;  %v15047_v47 = vld [vmem:[#allocation74_spill] sm:$0xff] }
 0x600   :  { %v4012_v35 = vadd.f32 %v4011_v63, %v3757_v12  ;;  %v3761_v12 = vmul.f32 %v10604_v11, %v10604_v11  ;;  %15042 = vst [vmem:[#allocation52_spill] sm:$0xff] %v10628_v28  ;;  %v10634_v11 = vsub.f32 %v15043_v15, %v10358_v34  ;;  %v15049_v15 = vld [vmem:[#allocation76_spill] sm:$0xff] }
 0x602   :  { %v4013_v62 = vadd.f32 %v4012_v35, %v3758_v3  ;;  %v3762_v3 = vmul.f32 %v10610_v43, %v10610_v43  ;;  %15044 = vst [vmem:[#allocation54_spill] sm:$0xff] %v10634_v11  ;;  %v10640_v43 = vsub.f32 %v15045_v14, %v10358_v34  ;;  %v15051_v14 = vld [vmem:[#allocation78_spill] sm:$0xff] }
 0x604   :  { %v4014_v46 = vadd.f32 %v4013_v62, %v3759_v2  ;;  %v3763_v2 = vmul.f32 %v10616_v10, %v10616_v10  ;;  %15046 = vst [vmem:[#allocation56_spill] sm:$0xff] %v10640_v43  ;;  %v10646_v10 = vsub.f32 %v15047_v47, %v10358_v34  ;;  %v15053_v47 = vld [vmem:[#allocation80_spill] sm:$0xff] }
 0x606   :  { %v4015_v63 = vadd.f32 %v4014_v46, %v3760_v57  ;;  %v3764_v57 = vmul.f32 %v10622_v24, %v10622_v24  ;;  %15048 = vst [vmem:[#allocation58_spill] sm:$0xff] %v10646_v10  ;;  %v10652_v24 = vsub.f32 %v15049_v15, %v10358_v34  ;;  %v15055_v15 = vld [vmem:[#allocation82_spill] sm:$0xff] }
 0x608   :  { %v4016_v35 = vadd.f32 %v4015_v63, %v3761_v12  ;;  %v3765_v12 = vmul.f32 %v10628_v28, %v10628_v28  ;;  %15050 = vst [vmem:[#allocation60_spill] sm:$0xff] %v10652_v24  ;;  %v10658_v28 = vsub.f32 %v15051_v14, %v10358_v34  ;;  %v15057_v14 = vld [vmem:[#allocation84_spill] sm:$0xff] }
 0x60a   :  { %v4017_v62 = vadd.f32 %v4016_v35, %v3762_v3  ;;  %v3766_v3 = vmul.f32 %v10634_v11, %v10634_v11  ;;  %15052 = vst [vmem:[#allocation62_spill] sm:$0xff] %v10658_v28  ;;  %v10664_v11 = vsub.f32 %v15053_v47, %v10358_v34  ;;  %v15059_v47 = vld [vmem:[#allocation86_spill] sm:$0xff] }
 0x60c   :  { %v4018_v46 = vadd.f32 %v4017_v62, %v3763_v2  ;;  %v3767_v2 = vmul.f32 %v10640_v43, %v10640_v43  ;;  %15054 = vst [vmem:[#allocation64_spill] sm:$0xff] %v10664_v11  ;;  %v10670_v43 = vsub.f32 %v15055_v15, %v10358_v34  ;;  %v15061_v15 = vld [vmem:[#allocation88_spill] sm:$0xff] }
 0x60e   :  { %v4019_v63 = vadd.f32 %v4018_v46, %v3764_v57  ;;  %v3768_v57 = vmul.f32 %v10646_v10, %v10646_v10  ;;  %15056 = vst [vmem:[#allocation66_spill] sm:$0xff] %v10670_v43  ;;  %v10676_v10 = vsub.f32 %v15057_v14, %v10358_v34  ;;  %v15063_v14 = vld [vmem:[#allocation90_spill] sm:$0xff] }
 0x610   :  { %v4020_v35 = vadd.f32 %v4019_v63, %v3765_v12  ;;  %v3769_v12 = vmul.f32 %v10652_v24, %v10652_v24  ;;  %15058 = vst [vmem:[#allocation68_spill] sm:$0xff] %v10676_v10  ;;  %v10682_v24 = vsub.f32 %v15059_v47, %v10358_v34  ;;  %v15065_v47 = vld [vmem:[#allocation92_spill] sm:$0xff] }
 0x612   :  { %v4021_v62 = vadd.f32 %v4020_v35, %v3766_v3  ;;  %v3770_v3 = vmul.f32 %v10658_v28, %v10658_v28  ;;  %15060 = vst [vmem:[#allocation70_spill] sm:$0xff] %v10682_v24  ;;  %v10688_v28 = vsub.f32 %v15061_v15, %v10358_v34  ;;  %v15067_v15 = vld [vmem:[#allocation94_spill] sm:$0xff] }
 0x614   :  { %v4022_v46 = vadd.f32 %v4021_v62, %v3767_v2  ;;  %v3771_v2 = vmul.f32 %v10664_v11, %v10664_v11  ;;  %15062 = vst [vmem:[#allocation72_spill] sm:$0xff] %v10688_v28  ;;  %v10694_v11 = vsub.f32 %v15063_v14, %v10358_v34  ;;  %v15069_v14 = vld [vmem:[#allocation96_spill] sm:$0xff] }
 0x616   :  { %v4023_v63 = vadd.f32 %v4022_v46, %v3768_v57  ;;  %v3772_v57 = vmul.f32 %v10670_v43, %v10670_v43  ;;  %15064 = vst [vmem:[#allocation74_spill] sm:$0xff] %v10694_v11  ;;  %v10700_v43 = vsub.f32 %v15065_v47, %v10358_v34  ;;  %v15071_v47 = vld [vmem:[#allocation98_spill] sm:$0xff] }
 0x618   :  { %v4024_v35 = vadd.f32 %v4023_v63, %v3769_v12  ;;  %v3773_v12 = vmul.f32 %v10676_v10, %v10676_v10  ;;  %15066 = vst [vmem:[#allocation76_spill] sm:$0xff] %v10700_v43  ;;  %v10706_v10 = vsub.f32 %v15067_v15, %v10358_v34  ;;  %v15073_v15 = vld [vmem:[#allocation100_spill] sm:$0xff] }
 0x61a   :  { %v4025_v62 = vadd.f32 %v4024_v35, %v3770_v3  ;;  %v3774_v3 = vmul.f32 %v10682_v24, %v10682_v24  ;;  %15068 = vst [vmem:[#allocation78_spill] sm:$0xff] %v10706_v10  ;;  %v10712_v24 = vsub.f32 %v15069_v14, %v10358_v34  ;;  %v15075_v14 = vld [vmem:[#allocation102_spill] sm:$0xff] }
 0x61c   :  { %v4026_v46 = vadd.f32 %v4025_v62, %v3771_v2  ;;  %v3775_v2 = vmul.f32 %v10688_v28, %v10688_v28  ;;  %15070 = vst [vmem:[#allocation80_spill] sm:$0xff] %v10712_v24  ;;  %v10718_v28 = vsub.f32 %v15071_v47, %v10358_v34  ;;  %v15077_v47 = vld [vmem:[#allocation104_spill] sm:$0xff] }
 0x61e   :  { %v4027_v63 = vadd.f32 %v4026_v46, %v3772_v57  ;;  %v3776_v57 = vmul.f32 %v10694_v11, %v10694_v11  ;;  %15072 = vst [vmem:[#allocation82_spill] sm:$0xff] %v10718_v28  ;;  %v10724_v11 = vsub.f32 %v15073_v15, %v10358_v34  ;;  %v15079_v15 = vld [vmem:[#allocation106_spill] sm:$0xff] }
 0x620   :  { %v4028_v35 = vadd.f32 %v4027_v63, %v3773_v12  ;;  %v3777_v12 = vmul.f32 %v10700_v43, %v10700_v43  ;;  %15074 = vst [vmem:[#allocation84_spill] sm:$0xff] %v10724_v11  ;;  %v10730_v43 = vsub.f32 %v15075_v14, %v10358_v34  ;;  %v15081_v14 = vld [vmem:[#allocation108_spill] sm:$0xff] }
 0x622   :  { %v4029_v62 = vadd.f32 %v4028_v35, %v3774_v3  ;;  %v3778_v3 = vmul.f32 %v10706_v10, %v10706_v10  ;;  %15076 = vst [vmem:[#allocation86_spill] sm:$0xff] %v10730_v43  ;;  %v10736_v10 = vsub.f32 %v15077_v47, %v10358_v34  ;;  %v15083_v47 = vld [vmem:[#allocation110_spill] sm:$0xff] }
 0x624   :  { %v4030_v46 = vadd.f32 %v4029_v62, %v3775_v2  ;;  %v3779_v2 = vmul.f32 %v10712_v24, %v10712_v24  ;;  %15078 = vst [vmem:[#allocation88_spill] sm:$0xff] %v10736_v10  ;;  %v10742_v24 = vsub.f32 %v15079_v15, %v10358_v34  ;;  %v15085_v15 = vld [vmem:[#allocation112_spill] sm:$0xff] }
 0x626   :  { %v4031_v63 = vadd.f32 %v4030_v46, %v3776_v57  ;;  %v3780_v57 = vmul.f32 %v10718_v28, %v10718_v28  ;;  %15080 = vst [vmem:[#allocation90_spill] sm:$0xff] %v10742_v24  ;;  %v10748_v28 = vsub.f32 %v15081_v14, %v10358_v34  ;;  %v15087_v14 = vld [vmem:[#allocation114_spill] sm:$0xff] }
 0x628   :  { %v4032_v35 = vadd.f32 %v4031_v63, %v3777_v12  ;;  %v3781_v12 = vmul.f32 %v10724_v11, %v10724_v11  ;;  %15082 = vst [vmem:[#allocation92_spill] sm:$0xff] %v10748_v28  ;;  %v10754_v11 = vsub.f32 %v15083_v47, %v10358_v34  ;;  %v15089_v47 = vld [vmem:[#allocation116_spill] sm:$0xff] }
 0x62a   :  { %v4033_v62 = vadd.f32 %v4032_v35, %v3778_v3  ;;  %v3782_v3 = vmul.f32 %v10730_v43, %v10730_v43  ;;  %15084 = vst [vmem:[#allocation94_spill] sm:$0xff] %v10754_v11  ;;  %v10760_v43 = vsub.f32 %v15085_v15, %v10358_v34  ;;  %v15091_v15 = vld [vmem:[#allocation118_spill] sm:$0xff] }
 0x62c   :  { %v4034_v46 = vadd.f32 %v4033_v62, %v3779_v2  ;;  %v3783_v2 = vmul.f32 %v10736_v10, %v10736_v10  ;;  %15086 = vst [vmem:[#allocation96_spill] sm:$0xff] %v10760_v43  ;;  %v10766_v10 = vsub.f32 %v15087_v14, %v10358_v34  ;;  %v15093_v14 = vld [vmem:[#allocation120_spill] sm:$0xff] }
 0x62e   :  { %v4035_v63 = vadd.f32 %v4034_v46, %v3780_v57  ;;  %v3784_v57 = vmul.f32 %v10742_v24, %v10742_v24  ;;  %15088 = vst [vmem:[#allocation98_spill] sm:$0xff] %v10766_v10  ;;  %v10772_v24 = vsub.f32 %v15089_v47, %v10358_v34  ;;  %v15095_v47 = vld [vmem:[#allocation122_spill] sm:$0xff] }
 0x630   :  { %v4036_v35 = vadd.f32 %v4035_v63, %v3781_v12  ;;  %v3785_v12 = vmul.f32 %v10748_v28, %v10748_v28  ;;  %15090 = vst [vmem:[#allocation100_spill] sm:$0xff] %v10772_v24  ;;  %v10778_v28 = vsub.f32 %v15091_v15, %v10358_v34  ;;  %v15097_v15 = vld [vmem:[#allocation124_spill] sm:$0xff] }
 0x632   :  { %v4037_v62 = vadd.f32 %v4036_v35, %v3782_v3  ;;  %v3786_v3 = vmul.f32 %v10754_v11, %v10754_v11  ;;  %15092 = vst [vmem:[#allocation102_spill] sm:$0xff] %v10778_v28  ;;  %v10784_v11 = vsub.f32 %v15093_v14, %v10358_v34  ;;  %v15099_v14 = vld [vmem:[#allocation126_spill] sm:$0xff] }
 0x634   :  { %v4038_v46 = vadd.f32 %v4037_v62, %v3783_v2  ;;  %v3787_v2 = vmul.f32 %v10760_v43, %v10760_v43  ;;  %15094 = vst [vmem:[#allocation104_spill] sm:$0xff] %v10784_v11  ;;  %v10790_v43 = vsub.f32 %v15095_v47, %v10358_v34  ;;  %v15101_v47 = vld [vmem:[#allocation128_spill] sm:$0xff] }
 0x636   :  { %v4039_v63 = vadd.f32 %v4038_v46, %v3784_v57  ;;  %v3788_v57 = vmul.f32 %v10766_v10, %v10766_v10  ;;  %15096 = vst [vmem:[#allocation106_spill] sm:$0xff] %v10790_v43  ;;  %v10796_v10 = vsub.f32 %v15097_v15, %v10358_v34  ;;  %v15103_v15 = vld [vmem:[#allocation130_spill] sm:$0xff] }
 0x638   :  { %v4040_v35 = vadd.f32 %v4039_v63, %v3785_v12  ;;  %v3789_v12 = vmul.f32 %v10772_v24, %v10772_v24  ;;  %15098 = vst [vmem:[#allocation108_spill] sm:$0xff] %v10796_v10  ;;  %v10802_v24 = vsub.f32 %v15099_v14, %v10358_v34  ;;  %v15105_v14 = vld [vmem:[#allocation132_spill] sm:$0xff] }
 0x63a   :  { %v4041_v62 = vadd.f32 %v4040_v35, %v3786_v3  ;;  %v3790_v3 = vmul.f32 %v10778_v28, %v10778_v28  ;;  %15100 = vst [vmem:[#allocation110_spill] sm:$0xff] %v10802_v24  ;;  %v10808_v28 = vsub.f32 %v15101_v47, %v10358_v34  ;;  %v15107_v47 = vld [vmem:[#allocation134_spill] sm:$0xff] }
 0x63c   :  { %v4042_v46 = vadd.f32 %v4041_v62, %v3787_v2  ;;  %v3791_v2 = vmul.f32 %v10784_v11, %v10784_v11  ;;  %15102 = vst [vmem:[#allocation112_spill] sm:$0xff] %v10808_v28  ;;  %v10814_v11 = vsub.f32 %v15103_v15, %v10358_v34  ;;  %v15109_v15 = vld [vmem:[#allocation136_spill] sm:$0xff] }
 0x63e   :  { %v4043_v63 = vadd.f32 %v4042_v46, %v3788_v57  ;;  %v3792_v57 = vmul.f32 %v10790_v43, %v10790_v43  ;;  %15104 = vst [vmem:[#allocation114_spill] sm:$0xff] %v10814_v11  ;;  %v10820_v43 = vsub.f32 %v15105_v14, %v10358_v34  ;;  %v15111_v14 = vld [vmem:[#allocation138_spill] sm:$0xff] }
 0x640   :  { %v4044_v35 = vadd.f32 %v4043_v63, %v3789_v12  ;;  %v3793_v12 = vmul.f32 %v10796_v10, %v10796_v10  ;;  %15106 = vst [vmem:[#allocation116_spill] sm:$0xff] %v10820_v43  ;;  %v10826_v10 = vsub.f32 %v15107_v47, %v10358_v34  ;;  %v15113_v47 = vld [vmem:[#allocation140_spill] sm:$0xff] }
 0x642   :  { %v4045_v62 = vadd.f32 %v4044_v35, %v3790_v3  ;;  %v3794_v3 = vmul.f32 %v10802_v24, %v10802_v24  ;;  %15108 = vst [vmem:[#allocation118_spill] sm:$0xff] %v10826_v10  ;;  %v10832_v24 = vsub.f32 %v15109_v15, %v10358_v34  ;;  %v15115_v15 = vld [vmem:[#allocation142_spill] sm:$0xff] }
 0x644   :  { %v4046_v46 = vadd.f32 %v4045_v62, %v3791_v2  ;;  %v3795_v2 = vmul.f32 %v10808_v28, %v10808_v28  ;;  %15110 = vst [vmem:[#allocation120_spill] sm:$0xff] %v10832_v24  ;;  %v10838_v28 = vsub.f32 %v15111_v14, %v10358_v34  ;;  %v15117_v14 = vld [vmem:[#allocation144_spill] sm:$0xff] }
 0x646   :  { %v4047_v63 = vadd.f32 %v4046_v46, %v3792_v57  ;;  %v3796_v57 = vmul.f32 %v10814_v11, %v10814_v11  ;;  %15112 = vst [vmem:[#allocation122_spill] sm:$0xff] %v10838_v28  ;;  %v10844_v11 = vsub.f32 %v15113_v47, %v10358_v34  ;;  %v15119_v47 = vld [vmem:[#allocation146_spill] sm:$0xff] }
 0x648   :  { %v4048_v35 = vadd.f32 %v4047_v63, %v3793_v12  ;;  %v3797_v12 = vmul.f32 %v10820_v43, %v10820_v43  ;;  %15114 = vst [vmem:[#allocation124_spill] sm:$0xff] %v10844_v11  ;;  %v10850_v43 = vsub.f32 %v15115_v15, %v10358_v34  ;;  %v15121_v15 = vld [vmem:[#allocation148_spill] sm:$0xff] }
 0x64a   :  { %v4049_v62 = vadd.f32 %v4048_v35, %v3794_v3  ;;  %v3798_v3 = vmul.f32 %v10826_v10, %v10826_v10  ;;  %15116 = vst [vmem:[#allocation126_spill] sm:$0xff] %v10850_v43  ;;  %v10856_v10 = vsub.f32 %v15117_v14, %v10358_v34  ;;  %v15123_v14 = vld [vmem:[#allocation150_spill] sm:$0xff] }
 0x64c   :  { %v4050_v46 = vadd.f32 %v4049_v62, %v3795_v2  ;;  %v3799_v2 = vmul.f32 %v10832_v24, %v10832_v24  ;;  %15118 = vst [vmem:[#allocation128_spill] sm:$0xff] %v10856_v10  ;;  %v10862_v24 = vsub.f32 %v15119_v47, %v10358_v34  ;;  %v15125_v47 = vld [vmem:[#allocation152_spill] sm:$0xff] }
 0x64e   :  { %v4051_v63 = vadd.f32 %v4050_v46, %v3796_v57  ;;  %v3800_v57 = vmul.f32 %v10838_v28, %v10838_v28  ;;  %15120 = vst [vmem:[#allocation130_spill] sm:$0xff] %v10862_v24  ;;  %v10868_v28 = vsub.f32 %v15121_v15, %v10358_v34  ;;  %v15127_v15 = vld [vmem:[#allocation154_spill] sm:$0xff] }
 0x650   :  { %v4052_v35 = vadd.f32 %v4051_v63, %v3797_v12  ;;  %v3801_v12 = vmul.f32 %v10844_v11, %v10844_v11  ;;  %15122 = vst [vmem:[#allocation132_spill] sm:$0xff] %v10868_v28  ;;  %v10874_v11 = vsub.f32 %v15123_v14, %v10358_v34  ;;  %v15129_v14 = vld [vmem:[#allocation156_spill] sm:$0xff] }
 0x652   :  { %v4053_v62 = vadd.f32 %v4052_v35, %v3798_v3  ;;  %v3802_v3 = vmul.f32 %v10850_v43, %v10850_v43  ;;  %15124 = vst [vmem:[#allocation134_spill] sm:$0xff] %v10874_v11  ;;  %v10880_v43 = vsub.f32 %v15125_v47, %v10358_v34  ;;  %v15131_v47 = vld [vmem:[#allocation158_spill] sm:$0xff] }
 0x654   :  { %v4054_v46 = vadd.f32 %v4053_v62, %v3799_v2  ;;  %v3803_v2 = vmul.f32 %v10856_v10, %v10856_v10  ;;  %15126 = vst [vmem:[#allocation136_spill] sm:$0xff] %v10880_v43  ;;  %v10886_v10 = vsub.f32 %v15127_v15, %v10358_v34  ;;  %v15133_v15 = vld [vmem:[#allocation160_spill] sm:$0xff] }
 0x656   :  { %v4055_v63 = vadd.f32 %v4054_v46, %v3800_v57  ;;  %v3804_v57 = vmul.f32 %v10862_v24, %v10862_v24  ;;  %15128 = vst [vmem:[#allocation138_spill] sm:$0xff] %v10886_v10  ;;  %v10892_v24 = vsub.f32 %v15129_v14, %v10358_v34  ;;  %v15135_v14 = vld [vmem:[#allocation162_spill] sm:$0xff] }
 0x658   :  { %v4056_v35 = vadd.f32 %v4055_v63, %v3801_v12  ;;  %v3805_v12 = vmul.f32 %v10868_v28, %v10868_v28  ;;  %15130 = vst [vmem:[#allocation140_spill] sm:$0xff] %v10892_v24  ;;  %v10898_v28 = vsub.f32 %v15131_v47, %v10358_v34  ;;  %v15137_v47 = vld [vmem:[#allocation164_spill] sm:$0xff] }
 0x65a   :  { %v4057_v62 = vadd.f32 %v4056_v35, %v3802_v3  ;;  %v3806_v3 = vmul.f32 %v10874_v11, %v10874_v11  ;;  %15132 = vst [vmem:[#allocation142_spill] sm:$0xff] %v10898_v28  ;;  %v10904_v11 = vsub.f32 %v15133_v15, %v10358_v34  ;;  %v15139_v15 = vld [vmem:[#allocation166_spill] sm:$0xff] }
 0x65c   :  { %v4058_v46 = vadd.f32 %v4057_v62, %v3803_v2  ;;  %v3807_v2 = vmul.f32 %v10880_v43, %v10880_v43  ;;  %15134 = vst [vmem:[#allocation144_spill] sm:$0xff] %v10904_v11  ;;  %v10910_v43 = vsub.f32 %v15135_v14, %v10358_v34  ;;  %v15141_v14 = vld [vmem:[#allocation168_spill] sm:$0xff] }
 0x65e   :  { %v4059_v63 = vadd.f32 %v4058_v46, %v3804_v57  ;;  %v3808_v57 = vmul.f32 %v10886_v10, %v10886_v10  ;;  %15136 = vst [vmem:[#allocation146_spill] sm:$0xff] %v10910_v43  ;;  %v10916_v10 = vsub.f32 %v15137_v47, %v10358_v34  ;;  %v15143_v47 = vld [vmem:[#allocation170_spill] sm:$0xff] }
 0x660   :  { %v4060_v35 = vadd.f32 %v4059_v63, %v3805_v12  ;;  %v3809_v12 = vmul.f32 %v10892_v24, %v10892_v24  ;;  %15138 = vst [vmem:[#allocation148_spill] sm:$0xff] %v10916_v10  ;;  %v10922_v24 = vsub.f32 %v15139_v15, %v10358_v34  ;;  %v15145_v15 = vld [vmem:[#allocation172_spill] sm:$0xff] }
 0x662   :  { %v4061_v62 = vadd.f32 %v4060_v35, %v3806_v3  ;;  %v3810_v3 = vmul.f32 %v10898_v28, %v10898_v28  ;;  %15140 = vst [vmem:[#allocation150_spill] sm:$0xff] %v10922_v24  ;;  %v10928_v28 = vsub.f32 %v15141_v14, %v10358_v34  ;;  %v15147_v14 = vld [vmem:[#allocation173_spill] sm:$0xff] }
 0x664   :  { %v4062_v46 = vadd.f32 %v4061_v62, %v3807_v2  ;;  %v3811_v2 = vmul.f32 %v10904_v11, %v10904_v11  ;;  %15142 = vst [vmem:[#allocation152_spill] sm:$0xff] %v10928_v28  ;;  %v10934_v11 = vsub.f32 %v15143_v47, %v10358_v34  ;;  %v15149_v47 = vld [vmem:[#allocation174_spill] sm:$0xff] }
 0x666   :  { %v4063_v63 = vadd.f32 %v4062_v46, %v3808_v57  ;;  %v3812_v57 = vmul.f32 %v10910_v43, %v10910_v43  ;;  %15144 = vst [vmem:[#allocation154_spill] sm:$0xff] %v10934_v11  ;;  %v10940_v43 = vsub.f32 %v15145_v15, %v10358_v34  ;;  %v15151_v15 = vld [vmem:[#allocation175_spill] sm:$0xff] }
 0x668   :  { %v4064_v35 = vadd.f32 %v4063_v63, %v3809_v12  ;;  %v3813_v12 = vmul.f32 %v10916_v10, %v10916_v10  ;;  %15146 = vst [vmem:[#allocation156_spill] sm:$0xff] %v10940_v43  ;;  %v10946_v10 = vsub.f32 %v15147_v14, %v10358_v34  ;;  %v15153_v14 = vld [vmem:[#allocation176_spill] sm:$0xff] }
 0x66a   :  { %v4065_v62 = vadd.f32 %v4064_v35, %v3810_v3  ;;  %v3814_v3 = vmul.f32 %v10922_v24, %v10922_v24  ;;  %15148 = vst [vmem:[#allocation158_spill] sm:$0xff] %v10946_v10  ;;  %v10952_v24 = vsub.f32 %v15149_v47, %v10358_v34  ;;  %v15155_v47 = vld [vmem:[#allocation177_spill] sm:$0xff] }
 0x66c   :  { %v4066_v46 = vadd.f32 %v4065_v62, %v3811_v2  ;;  %v3815_v2 = vmul.f32 %v10928_v28, %v10928_v28  ;;  %15150 = vst [vmem:[#allocation160_spill] sm:$0xff] %v10952_v24  ;;  %v10958_v28 = vsub.f32 %v15151_v15, %v10358_v34  ;;  %v15157_v15 = vld [vmem:[#allocation178_spill] sm:$0xff] }
 0x66e   :  { %v4067_v63 = vadd.f32 %v4066_v46, %v3812_v57  ;;  %v3816_v57 = vmul.f32 %v10934_v11, %v10934_v11  ;;  %15152 = vst [vmem:[#allocation162_spill] sm:$0xff] %v10958_v28  ;;  %v10964_v11 = vsub.f32 %v15153_v14, %v10358_v34  ;;  %v15159_v14 = vld [vmem:[#allocation179_spill] sm:$0xff] }
 0x670   :  { %v4068_v35 = vadd.f32 %v4067_v63, %v3813_v12  ;;  %v3817_v12 = vmul.f32 %v10940_v43, %v10940_v43  ;;  %15154 = vst [vmem:[#allocation164_spill] sm:$0xff] %v10964_v11  ;;  %v10970_v43 = vsub.f32 %v15155_v47, %v10358_v34  ;;  %v15161_v47 = vld [vmem:[#allocation180_spill] sm:$0xff] }
 0x672   :  { %v4069_v62 = vadd.f32 %v4068_v35, %v3814_v3  ;;  %v3818_v3 = vmul.f32 %v10946_v10, %v10946_v10  ;;  %15156 = vst [vmem:[#allocation166_spill] sm:$0xff] %v10970_v43  ;;  %v10976_v10 = vsub.f32 %v15157_v15, %v10358_v34  ;;  %v15163_v15 = vld [vmem:[#allocation181_spill] sm:$0xff] }
 0x674   :  { %v4070_v46 = vadd.f32 %v4069_v62, %v3815_v2  ;;  %v3819_v2 = vmul.f32 %v10952_v24, %v10952_v24  ;;  %15158 = vst [vmem:[#allocation168_spill] sm:$0xff] %v10976_v10  ;;  %v10982_v24 = vsub.f32 %v15159_v14, %v10358_v34  ;;  %v15165_v14 = vld [vmem:[#allocation183_spill] sm:$0xff] }
 0x676   :  { %v4071_v63 = vadd.f32 %v4070_v46, %v3816_v57  ;;  %v3820_v57 = vmul.f32 %v10958_v28, %v10958_v28  ;;  %15160 = vst [vmem:[#allocation170_spill] sm:$0xff] %v10982_v24  ;;  %v10988_v28 = vsub.f32 %v15161_v47, %v10358_v34  ;;  %v15167_v47 = vld [vmem:[#allocation185_spill] sm:$0xff] }
 0x678   :  { %v4072_v35 = vadd.f32 %v4071_v63, %v3817_v12  ;;  %v3821_v12 = vmul.f32 %v10964_v11, %v10964_v11  ;;  %15162 = vst [vmem:[#allocation172_spill] sm:$0xff] %v10988_v28  ;;  %v10994_v11 = vsub.f32 %v15163_v15, %v10358_v34  ;;  %v15169_v15 = vld [vmem:[#allocation186_spill] sm:$0xff] }
 0x67a   :  { %v4073_v62 = vadd.f32 %v4072_v35, %v3818_v3  ;;  %v3822_v3 = vmul.f32 %v10970_v43, %v10970_v43  ;;  %15164 = vst [vmem:[#allocation173_spill] sm:$0xff] %v10994_v11  ;;  %v11000_v43 = vsub.f32 %v15165_v14, %v10358_v34  ;;  %v15171_v14 = vld [vmem:[#allocation187_spill] sm:$0xff] }
 0x67c   :  { %v4074_v46 = vadd.f32 %v4073_v62, %v3819_v2  ;;  %v3823_v2 = vmul.f32 %v10976_v10, %v10976_v10  ;;  %15166 = vst [vmem:[#allocation174_spill] sm:$0xff] %v11000_v43  ;;  %v11006_v10 = vsub.f32 %v15167_v47, %v10358_v34  ;;  %v15173_v47 = vld [vmem:[#allocation188_spill] sm:$0xff] }
 0x67e   :  { %v4075_v63 = vadd.f32 %v4074_v46, %v3820_v57  ;;  %v3824_v57 = vmul.f32 %v10982_v24, %v10982_v24  ;;  %15168 = vst [vmem:[#allocation175_spill] sm:$0xff] %v11006_v10  ;;  %v11012_v24 = vsub.f32 %v15169_v15, %v10358_v34  ;;  %v15175_v15 = vld [vmem:[#allocation189_spill] sm:$0xff] }
 0x680   :  { %v4076_v35 = vadd.f32 %v4075_v63, %v3821_v12  ;;  %v3825_v12 = vmul.f32 %v10988_v28, %v10988_v28  ;;  %15170 = vst [vmem:[#allocation176_spill] sm:$0xff] %v11012_v24  ;;  %v11018_v28 = vsub.f32 %v15171_v14, %v10358_v34  ;;  %v15177_v14 = vld [vmem:[#allocation190_spill] sm:$0xff] }
 0x682   :  { %v4077_v62 = vadd.f32 %v4076_v35, %v3822_v3  ;;  %v3826_v3 = vmul.f32 %v10994_v11, %v10994_v11  ;;  %15172 = vst [vmem:[#allocation177_spill] sm:$0xff] %v11018_v28  ;;  %v11024_v11 = vsub.f32 %v15173_v47, %v10358_v34  ;;  %v15179_v47 = vld [vmem:[#allocation191_spill] sm:$0xff] }
 0x684   :  { %v4078_v46 = vadd.f32 %v4077_v62, %v3823_v2  ;;  %v3827_v2 = vmul.f32 %v11000_v43, %v11000_v43  ;;  %15174 = vst [vmem:[#allocation178_spill] sm:$0xff] %v11024_v11  ;;  %v11030_v43 = vsub.f32 %v15175_v15, %v10358_v34  ;;  %v15181_v15 = vld [vmem:[#allocation192_spill] sm:$0xff] }
 0x686   :  { %v4079_v63 = vadd.f32 %v4078_v46, %v3824_v57  ;;  %v3828_v57 = vmul.f32 %v11006_v10, %v11006_v10  ;;  %15176 = vst [vmem:[#allocation179_spill] sm:$0xff] %v11030_v43  ;;  %v11036_v10 = vsub.f32 %v15177_v14, %v10358_v34  ;;  %v15183_v14 = vld [vmem:[#allocation193_spill] sm:$0xff] }
 0x688   :  { %v4080_v35 = vadd.f32 %v4079_v63, %v3825_v12  ;;  %v3829_v12 = vmul.f32 %v11012_v24, %v11012_v24  ;;  %15178 = vst [vmem:[#allocation180_spill] sm:$0xff] %v11036_v10  ;;  %v11042_v24 = vsub.f32 %v15179_v47, %v10358_v34  ;;  %v15185_v47 = vld [vmem:[#allocation199_spill] sm:$0xff] }
 0x68a   :  { %v4081_v62 = vadd.f32 %v4080_v35, %v3826_v3  ;;  %v3830_v3 = vmul.f32 %v11018_v28, %v11018_v28  ;;  %15180 = vst [vmem:[#allocation181_spill] sm:$0xff] %v11042_v24  ;;  %v11048_v28 = vsub.f32 %v15181_v15, %v10358_v34  ;;  %v15187_v15 = vld [vmem:[#allocation200_spill] sm:$0xff] }
 0x68c   :  { %v4082_v46 = vadd.f32 %v4081_v62, %v3827_v2  ;;  %v3831_v2 = vmul.f32 %v11024_v11, %v11024_v11  ;;  %15182 = vst [vmem:[#allocation183_spill] sm:$0xff] %v11048_v28  ;;  %v11054_v11 = vsub.f32 %v15183_v14, %v10358_v34  ;;  %v15189_v14 = vld [vmem:[#allocation201_spill] sm:$0xff] }
 0x68e   :  { %v4083_v63 = vadd.f32 %v4082_v46, %v3828_v57  ;;  %v3832_v57 = vmul.f32 %v11030_v43, %v11030_v43  ;;  %15184 = vst [vmem:[#allocation185_spill] sm:$0xff] %v11054_v11  ;;  %v11060_v43 = vsub.f32 %v15185_v47, %v10358_v34  ;;  %v15191_v47 = vld [vmem:[#allocation202_spill] sm:$0xff] }
 0x690   :  { %v4084_v35 = vadd.f32 %v4083_v63, %v3829_v12  ;;  %v3833_v12 = vmul.f32 %v11036_v10, %v11036_v10  ;;  %15186 = vst [vmem:[#allocation186_spill] sm:$0xff] %v11060_v43  ;;  %v11066_v10 = vsub.f32 %v15187_v15, %v10358_v34  ;;  %v15193_v15 = vld [vmem:[#allocation203_spill] sm:$0xff] }
 0x692   :  { %v4085_v62 = vadd.f32 %v4084_v35, %v3830_v3  ;;  %v3834_v3 = vmul.f32 %v11042_v24, %v11042_v24  ;;  %15188 = vst [vmem:[#allocation187_spill] sm:$0xff] %v11066_v10  ;;  %v11072_v24 = vsub.f32 %v15189_v14, %v10358_v34  ;;  %v15195_v14 = vld [vmem:[#allocation204_spill] sm:$0xff] }
 0x694   :  { %v4086_v46 = vadd.f32 %v4085_v62, %v3831_v2  ;;  %v3835_v2 = vmul.f32 %v11048_v28, %v11048_v28  ;;  %15190 = vst [vmem:[#allocation188_spill] sm:$0xff] %v11072_v24  ;;  %v11078_v28 = vsub.f32 %v15191_v47, %v10358_v34  ;;  %v15197_v47 = vld [vmem:[#allocation205_spill] sm:$0xff] }
 0x696   :  { %v4087_v63 = vadd.f32 %v4086_v46, %v3832_v57  ;;  %v3836_v57 = vmul.f32 %v11054_v11, %v11054_v11  ;;  %15192 = vst [vmem:[#allocation189_spill] sm:$0xff] %v11078_v28  ;;  %v11084_v11 = vsub.f32 %v15193_v15, %v10358_v34  ;;  %v15199_v15 = vld [vmem:[#allocation206_spill] sm:$0xff] }
 0x698   :  { %v4088_v35 = vadd.f32 %v4087_v63, %v3833_v12  ;;  %v3837_v12 = vmul.f32 %v11060_v43, %v11060_v43  ;;  %15194 = vst [vmem:[#allocation190_spill] sm:$0xff] %v11084_v11  ;;  %v11090_v43 = vsub.f32 %v15195_v14, %v10358_v34  ;;  %v15201_v14 = vld [vmem:[#allocation208_spill] sm:$0xff] }
 0x69a   :  { %v4089_v62 = vadd.f32 %v4088_v35, %v3834_v3  ;;  %v3838_v3 = vmul.f32 %v11066_v10, %v11066_v10  ;;  %15196 = vst [vmem:[#allocation191_spill] sm:$0xff] %v11090_v43  ;;  %v11096_v10 = vsub.f32 %v15197_v47, %v10358_v34  ;;  %v15203_v47 = vld [vmem:[#allocation209_spill] sm:$0xff] }
 0x69c   :  { %v4090_v46 = vadd.f32 %v4089_v62, %v3835_v2  ;;  %v3839_v2 = vmul.f32 %v11072_v24, %v11072_v24  ;;  %15198 = vst [vmem:[#allocation192_spill] sm:$0xff] %v11096_v10  ;;  %v11102_v24 = vsub.f32 %v15199_v15, %v10358_v34  ;;  %v15205_v15 = vld [vmem:[#allocation210_spill] sm:$0xff] }
 0x69e   :  { %v4091_v63 = vadd.f32 %v4090_v46, %v3836_v57  ;;  %v3840_v57 = vmul.f32 %v11078_v28, %v11078_v28  ;;  %15200 = vst [vmem:[#allocation193_spill] sm:$0xff] %v11102_v24  ;;  %v11108_v28 = vsub.f32 %v15201_v14, %v10358_v34  ;;  %v15207_v14 = vld [vmem:[#allocation32_spill] sm:$0xff] }
 0x6a0   :  { %v4092_v35 = vadd.f32 %v4091_v63, %v3837_v12  ;;  %v3841_v12 = vmul.f32 %v11084_v11, %v11084_v11  ;;  %15202 = vst [vmem:[#allocation199_spill] sm:$0xff] %v11108_v28  ;;  %v11114_v11 = vsub.f32 %v15203_v47, %v10358_v34  ;;  %v15209_v47 = vld [vmem:[#allocation34_spill] sm:$0xff] }
 0x6a2   :  { %v4093_v62 = vadd.f32 %v4092_v35, %v3838_v3  ;;  %v3842_v3 = vmul.f32 %v11090_v43, %v11090_v43  ;;  %15204 = vst [vmem:[#allocation200_spill] sm:$0xff] %v11114_v11  ;;  %v11120_v43 = vsub.f32 %v15205_v15, %v10358_v34  ;;  %v15211_v15 = vld [vmem:[#allocation37_spill] sm:$0xff] }
 0x6a4   :  { %v4094_v46 = vadd.f32 %v4093_v62, %v3839_v2  ;;  %v3843_v2 = vmul.f32 %v11096_v10, %v11096_v10  ;;  %15206 = vst [vmem:[#allocation201_spill] sm:$0xff] %v11120_v43  ;;  %v11126_v10 = vsub.f32 %v15207_v14, %v10358_v34  ;;  %v15213_v14 = vld [vmem:[#allocation39_spill] sm:$0xff] }
 0x6a6   :  { %v4095_v63 = vadd.f32 %v4094_v46, %v3840_v57  ;;  %v3844_v57 = vmul.f32 %v11102_v24, %v11102_v24  ;;  %15208 = vst [vmem:[#allocation202_spill] sm:$0xff] %v11126_v10  ;;  %v11132_v24 = vsub.f32 %v15209_v47, %v10358_v34  ;;  %v15215_v47 = vld [vmem:[#allocation41_spill] sm:$0xff] }
 0x6a8   :  { %v4096_v35 = vadd.f32 %v4095_v63, %v3841_v12  ;;  %v3845_v12 = vmul.f32 %v11108_v28, %v11108_v28  ;;  %15210 = vst [vmem:[#allocation203_spill] sm:$0xff] %v11132_v24  ;;  %v11138_v28 = vsub.f32 %v15211_v15, %v10358_v34  ;;  %v15217_v15 = vld [vmem:[#allocation43_spill] sm:$0xff] }
 0x6aa   :  { %v4097_v62 = vadd.f32 %v4096_v35, %v3842_v3  ;;  %v3846_v3 = vmul.f32 %v11114_v11, %v11114_v11  ;;  %15212 = vst [vmem:[#allocation204_spill] sm:$0xff] %v11138_v28  ;;  %v11144_v11 = vsub.f32 %v15213_v14, %v10358_v34  ;;  %v15219_v14 = vld [vmem:[#allocation45_spill] sm:$0xff] }
 0x6ac   :  { %v4098_v46 = vadd.f32 %v4097_v62, %v3843_v2  ;;  %v3847_v2 = vmul.f32 %v11120_v43, %v11120_v43  ;;  %15214 = vst [vmem:[#allocation205_spill] sm:$0xff] %v11144_v11  ;;  %v11150_v43 = vsub.f32 %v15215_v47, %v10358_v34  ;;  %v15221_v47 = vld [vmem:[#allocation47_spill] sm:$0xff] }
 0x6ae   :  { %v4099_v63 = vadd.f32 %v4098_v46, %v3844_v57  ;;  %v3848_v57 = vmul.f32 %v11126_v10, %v11126_v10  ;;  %15216 = vst [vmem:[#allocation206_spill] sm:$0xff] %v11150_v43  ;;  %v11156_v10 = vsub.f32 %v15217_v15, %v10358_v34  ;;  %v15223_v15 = vld [vmem:[#allocation49_spill] sm:$0xff] }
 0x6b0   :  { %v4100_v35 = vadd.f32 %v4099_v63, %v3845_v12  ;;  %v3849_v12 = vmul.f32 %v11132_v24, %v11132_v24  ;;  %15218 = vst [vmem:[#allocation208_spill] sm:$0xff] %v11156_v10  ;;  %v11162_v24 = vsub.f32 %v15219_v14, %v10358_v34  ;;  %v15225_v14 = vld [vmem:[#allocation51_spill] sm:$0xff] }
 0x6b2   :  { %v4101_v62 = vadd.f32 %v4100_v35, %v3846_v3  ;;  %v3850_v3 = vmul.f32 %v11138_v28, %v11138_v28  ;;  %15220 = vst [vmem:[#allocation209_spill] sm:$0xff] %v11162_v24  ;;  %v11168_v28 = vsub.f32 %v15221_v47, %v10358_v34  ;;  %v15227_v47 = vld [vmem:[#allocation53_spill] sm:$0xff] }
 0x6b4   :  { %v4102_v46 = vadd.f32 %v4101_v62, %v3847_v2  ;;  %v3851_v2 = vmul.f32 %v11144_v11, %v11144_v11  ;;  %15222 = vst [vmem:[#allocation210_spill] sm:$0xff] %v11168_v28  ;;  %v11174_v11 = vsub.f32 %v15223_v15, %v10358_v34  ;;  %v15229_v15 = vld [vmem:[#allocation55_spill] sm:$0xff] }
 0x6b6   :  { %v4103_v63 = vadd.f32 %v4102_v46, %v3848_v57  ;;  %v3852_v57 = vmul.f32 %v11150_v43, %v11150_v43  ;;  %15224 = vst [vmem:[#allocation32_spill] sm:$0xff] %v11174_v11  ;;  %v11180_v43 = vsub.f32 %v15225_v14, %v10358_v34  ;;  %v15231_v14 = vld [vmem:[#allocation57_spill] sm:$0xff] }
 0x6b8   :  { %v4104_v35 = vadd.f32 %v4103_v63, %v3849_v12  ;;  %v3853_v12 = vmul.f32 %v11156_v10, %v11156_v10  ;;  %15226 = vst [vmem:[#allocation34_spill] sm:$0xff] %v11180_v43  ;;  %v11186_v10 = vsub.f32 %v15227_v47, %v10358_v34  ;;  %v15233_v47 = vld [vmem:[#allocation59_spill] sm:$0xff] }
 0x6ba   :  { %v4105_v62 = vadd.f32 %v4104_v35, %v3850_v3  ;;  %v3854_v3 = vmul.f32 %v11162_v24, %v11162_v24  ;;  %15228 = vst [vmem:[#allocation37_spill] sm:$0xff] %v11186_v10  ;;  %v11192_v24 = vsub.f32 %v15229_v15, %v10358_v34  ;;  %v15235_v15 = vld [vmem:[#allocation61_spill] sm:$0xff] }
 0x6bc   :  { %v4106_v46 = vadd.f32 %v4105_v62, %v3851_v2  ;;  %v3855_v2 = vmul.f32 %v11168_v28, %v11168_v28  ;;  %15230 = vst [vmem:[#allocation39_spill] sm:$0xff] %v11192_v24  ;;  %v11198_v28 = vsub.f32 %v15231_v14, %v10358_v34  ;;  %v15237_v14 = vld [vmem:[#allocation63_spill] sm:$0xff] }
 0x6be   :  { %v4107_v63 = vadd.f32 %v4106_v46, %v3852_v57  ;;  %v3856_v57 = vmul.f32 %v11174_v11, %v11174_v11  ;;  %15232 = vst [vmem:[#allocation41_spill] sm:$0xff] %v11198_v28  ;;  %v11204_v11 = vsub.f32 %v15233_v47, %v10358_v34  ;;  %v15239_v47 = vld [vmem:[#allocation65_spill] sm:$0xff] }
 0x6c0   :  { %v4108_v35 = vadd.f32 %v4107_v63, %v3853_v12  ;;  %v3857_v12 = vmul.f32 %v11180_v43, %v11180_v43  ;;  %15234 = vst [vmem:[#allocation43_spill] sm:$0xff] %v11204_v11  ;;  %v11210_v43 = vsub.f32 %v15235_v15, %v10358_v34  ;;  %v15241_v15 = vld [vmem:[#allocation67_spill] sm:$0xff] }
 0x6c2   :  { %v4109_v62 = vadd.f32 %v4108_v35, %v3854_v3  ;;  %v3858_v3 = vmul.f32 %v11186_v10, %v11186_v10  ;;  %15236 = vst [vmem:[#allocation45_spill] sm:$0xff] %v11210_v43  ;;  %v11216_v10 = vsub.f32 %v15237_v14, %v10358_v34  ;;  %v15243_v14 = vld [vmem:[#allocation69_spill] sm:$0xff] }
 0x6c4   :  { %v4110_v46 = vadd.f32 %v4109_v62, %v3855_v2  ;;  %v3859_v2 = vmul.f32 %v11192_v24, %v11192_v24  ;;  %15238 = vst [vmem:[#allocation47_spill] sm:$0xff] %v11216_v10  ;;  %v11222_v24 = vsub.f32 %v15239_v47, %v10358_v34  ;;  %v15245_v47 = vld [vmem:[#allocation71_spill] sm:$0xff] }
 0x6c6   :  { %v4111_v63 = vadd.f32 %v4110_v46, %v3856_v57  ;;  %v3860_v57 = vmul.f32 %v11198_v28, %v11198_v28  ;;  %15240 = vst [vmem:[#allocation49_spill] sm:$0xff] %v11222_v24  ;;  %v11228_v28 = vsub.f32 %v15241_v15, %v10358_v34  ;;  %v15247_v15 = vld [vmem:[#allocation73_spill] sm:$0xff] }
 0x6c8   :  { %v4112_v35 = vadd.f32 %v4111_v63, %v3857_v12  ;;  %v3861_v12 = vmul.f32 %v11204_v11, %v11204_v11  ;;  %15242 = vst [vmem:[#allocation51_spill] sm:$0xff] %v11228_v28  ;;  %v11234_v11 = vsub.f32 %v15243_v14, %v10358_v34  ;;  %v15249_v14 = vld [vmem:[#allocation75_spill] sm:$0xff] }
 0x6ca   :  { %v4113_v62 = vadd.f32 %v4112_v35, %v3858_v3  ;;  %v3862_v3 = vmul.f32 %v11210_v43, %v11210_v43  ;;  %15244 = vst [vmem:[#allocation53_spill] sm:$0xff] %v11234_v11  ;;  %v11240_v43 = vsub.f32 %v15245_v47, %v10358_v34  ;;  %v15251_v47 = vld [vmem:[#allocation77_spill] sm:$0xff] }
 0x6cc   :  { %v4114_v46 = vadd.f32 %v4113_v62, %v3859_v2  ;;  %v3863_v2 = vmul.f32 %v11216_v10, %v11216_v10  ;;  %15246 = vst [vmem:[#allocation55_spill] sm:$0xff] %v11240_v43  ;;  %v11246_v10 = vsub.f32 %v15247_v15, %v10358_v34  ;;  %v15253_v15 = vld [vmem:[#allocation79_spill] sm:$0xff] }
 0x6ce   :  { %v4115_v63 = vadd.f32 %v4114_v46, %v3860_v57  ;;  %v3864_v57 = vmul.f32 %v11222_v24, %v11222_v24  ;;  %15248 = vst [vmem:[#allocation57_spill] sm:$0xff] %v11246_v10  ;;  %v11252_v24 = vsub.f32 %v15249_v14, %v10358_v34  ;;  %v15255_v14 = vld [vmem:[#allocation81_spill] sm:$0xff] }
 0x6d0   :  { %v4116_v35 = vadd.f32 %v4115_v63, %v3861_v12  ;;  %v3865_v12 = vmul.f32 %v11228_v28, %v11228_v28  ;;  %15250 = vst [vmem:[#allocation59_spill] sm:$0xff] %v11252_v24  ;;  %v11258_v28 = vsub.f32 %v15251_v47, %v10358_v34  ;;  %v15257_v47 = vld [vmem:[#allocation83_spill] sm:$0xff] }
 0x6d2   :  { %v4117_v62 = vadd.f32 %v4116_v35, %v3862_v3  ;;  %v3866_v3 = vmul.f32 %v11234_v11, %v11234_v11  ;;  %15252 = vst [vmem:[#allocation61_spill] sm:$0xff] %v11258_v28  ;;  %v11264_v11 = vsub.f32 %v15253_v15, %v10358_v34  ;;  %v15259_v15 = vld [vmem:[#allocation85_spill] sm:$0xff] }
 0x6d4   :  { %v4118_v46 = vadd.f32 %v4117_v62, %v3863_v2  ;;  %v3867_v2 = vmul.f32 %v11240_v43, %v11240_v43  ;;  %15254 = vst [vmem:[#allocation63_spill] sm:$0xff] %v11264_v11  ;;  %v11270_v43 = vsub.f32 %v15255_v14, %v10358_v34  ;;  %v15261_v14 = vld [vmem:[#allocation87_spill] sm:$0xff] }
 0x6d6   :  { %v4119_v63 = vadd.f32 %v4118_v46, %v3864_v57  ;;  %v3868_v57 = vmul.f32 %v11246_v10, %v11246_v10  ;;  %15256 = vst [vmem:[#allocation65_spill] sm:$0xff] %v11270_v43  ;;  %v11276_v10 = vsub.f32 %v15257_v47, %v10358_v34  ;;  %v15263_v47 = vld [vmem:[#allocation89_spill] sm:$0xff] }
 0x6d8   :  { %v4120_v35 = vadd.f32 %v4119_v63, %v3865_v12  ;;  %v3869_v12 = vmul.f32 %v11252_v24, %v11252_v24  ;;  %15258 = vst [vmem:[#allocation67_spill] sm:$0xff] %v11276_v10  ;;  %v11282_v24 = vsub.f32 %v15259_v15, %v10358_v34  ;;  %v15265_v15 = vld [vmem:[#allocation91_spill] sm:$0xff] }
 0x6da   :  { %v4121_v62 = vadd.f32 %v4120_v35, %v3866_v3  ;;  %v3870_v3 = vmul.f32 %v11258_v28, %v11258_v28  ;;  %15260 = vst [vmem:[#allocation69_spill] sm:$0xff] %v11282_v24  ;;  %v11288_v28 = vsub.f32 %v15261_v14, %v10358_v34  ;;  %v15267_v14 = vld [vmem:[#allocation93_spill] sm:$0xff] }
 0x6dc   :  { %v4122_v46 = vadd.f32 %v4121_v62, %v3867_v2  ;;  %v3871_v2 = vmul.f32 %v11264_v11, %v11264_v11  ;;  %15262 = vst [vmem:[#allocation71_spill] sm:$0xff] %v11288_v28  ;;  %v11294_v11 = vsub.f32 %v15263_v47, %v10358_v34  ;;  %v15269_v47 = vld [vmem:[#allocation95_spill] sm:$0xff] }
 0x6de   :  { %v4123_v63 = vadd.f32 %v4122_v46, %v3868_v57  ;;  %v3872_v57 = vmul.f32 %v11270_v43, %v11270_v43  ;;  %15264 = vst [vmem:[#allocation73_spill] sm:$0xff] %v11294_v11  ;;  %v11300_v43 = vsub.f32 %v15265_v15, %v10358_v34  ;;  %v15271_v15 = vld [vmem:[#allocation97_spill] sm:$0xff] }
 0x6e0   :  { %v4124_v35 = vadd.f32 %v4123_v63, %v3869_v12  ;;  %v3873_v12 = vmul.f32 %v11276_v10, %v11276_v10  ;;  %15266 = vst [vmem:[#allocation75_spill] sm:$0xff] %v11300_v43  ;;  %v11306_v10 = vsub.f32 %v15267_v14, %v10358_v34  ;;  %v15273_v14 = vld [vmem:[#allocation99_spill] sm:$0xff] }
 0x6e2   :  { %v4125_v62 = vadd.f32 %v4124_v35, %v3870_v3  ;;  %v3874_v3 = vmul.f32 %v11282_v24, %v11282_v24  ;;  %15268 = vst [vmem:[#allocation77_spill] sm:$0xff] %v11306_v10  ;;  %v11312_v24 = vsub.f32 %v15269_v47, %v10358_v34  ;;  %v15275_v47 = vld [vmem:[#allocation101_spill] sm:$0xff] }
 0x6e4   :  { %v4126_v46 = vadd.f32 %v4125_v62, %v3871_v2  ;;  %v3875_v2 = vmul.f32 %v11288_v28, %v11288_v28  ;;  %15270 = vst [vmem:[#allocation79_spill] sm:$0xff] %v11312_v24  ;;  %v11318_v28 = vsub.f32 %v15271_v15, %v10358_v34  ;;  %v15277_v15 = vld [vmem:[#allocation103_spill] sm:$0xff] }
 0x6e6   :  { %v4127_v63 = vadd.f32 %v4126_v46, %v3872_v57  ;;  %v3876_v57 = vmul.f32 %v11294_v11, %v11294_v11  ;;  %15272 = vst [vmem:[#allocation81_spill] sm:$0xff] %v11318_v28  ;;  %v11324_v11 = vsub.f32 %v15273_v14, %v10358_v34  ;;  %v15279_v14 = vld [vmem:[#allocation105_spill] sm:$0xff] }
 0x6e8   :  { %v4128_v35 = vadd.f32 %v4127_v63, %v3873_v12  ;;  %v3877_v12 = vmul.f32 %v11300_v43, %v11300_v43  ;;  %15274 = vst [vmem:[#allocation83_spill] sm:$0xff] %v11324_v11  ;;  %v11330_v43 = vsub.f32 %v15275_v47, %v10358_v34  ;;  %v15281_v47 = vld [vmem:[#allocation107_spill] sm:$0xff] }
 0x6ea   :  { %v4129_v62 = vadd.f32 %v4128_v35, %v3874_v3  ;;  %v3878_v3 = vmul.f32 %v11306_v10, %v11306_v10  ;;  %15276 = vst [vmem:[#allocation85_spill] sm:$0xff] %v11330_v43  ;;  %v11336_v10 = vsub.f32 %v15277_v15, %v10358_v34  ;;  %v15283_v15 = vld [vmem:[#allocation109_spill] sm:$0xff] }
 0x6ec   :  { %v4130_v46 = vadd.f32 %v4129_v62, %v3875_v2  ;;  %v3879_v2 = vmul.f32 %v11312_v24, %v11312_v24  ;;  %15278 = vst [vmem:[#allocation87_spill] sm:$0xff] %v11336_v10  ;;  %v11342_v24 = vsub.f32 %v15279_v14, %v10358_v34  ;;  %v15285_v14 = vld [vmem:[#allocation111_spill] sm:$0xff] }
 0x6ee   :  { %v4131_v63 = vadd.f32 %v4130_v46, %v3876_v57  ;;  %v3880_v57 = vmul.f32 %v11318_v28, %v11318_v28  ;;  %15280 = vst [vmem:[#allocation89_spill] sm:$0xff] %v11342_v24  ;;  %v11348_v28 = vsub.f32 %v15281_v47, %v10358_v34  ;;  %v15287_v47 = vld [vmem:[#allocation113_spill] sm:$0xff] }
 0x6f0   :  { %v4132_v35 = vadd.f32 %v4131_v63, %v3877_v12  ;;  %v3881_v12 = vmul.f32 %v11324_v11, %v11324_v11  ;;  %15282 = vst [vmem:[#allocation91_spill] sm:$0xff] %v11348_v28  ;;  %v11354_v11 = vsub.f32 %v15283_v15, %v10358_v34  ;;  %v15289_v15 = vld [vmem:[#allocation115_spill] sm:$0xff] }
 0x6f2   :  { %v4133_v62 = vadd.f32 %v4132_v35, %v3878_v3  ;;  %v3882_v3 = vmul.f32 %v11330_v43, %v11330_v43  ;;  %15284 = vst [vmem:[#allocation93_spill] sm:$0xff] %v11354_v11  ;;  %v11360_v43 = vsub.f32 %v15285_v14, %v10358_v34  ;;  %v15291_v14 = vld [vmem:[#allocation117_spill] sm:$0xff] }
 0x6f4   :  { %v4134_v46 = vadd.f32 %v4133_v62, %v3879_v2  ;;  %v3883_v2 = vmul.f32 %v11336_v10, %v11336_v10  ;;  %15286 = vst [vmem:[#allocation95_spill] sm:$0xff] %v11360_v43  ;;  %v11366_v10 = vsub.f32 %v15287_v47, %v10358_v34  ;;  %v15293_v47 = vld [vmem:[#allocation119_spill] sm:$0xff] }
 0x6f6   :  { %v4135_v63 = vadd.f32 %v4134_v46, %v3880_v57  ;;  %v3884_v57 = vmul.f32 %v11342_v24, %v11342_v24  ;;  %15288 = vst [vmem:[#allocation97_spill] sm:$0xff] %v11366_v10  ;;  %v11372_v24 = vsub.f32 %v15289_v15, %v10358_v34  ;;  %v15295_v15 = vld [vmem:[#allocation121_spill] sm:$0xff] }
 0x6f8   :  { %v4136_v35 = vadd.f32 %v4135_v63, %v3881_v12  ;;  %v3885_v12 = vmul.f32 %v11348_v28, %v11348_v28  ;;  %15290 = vst [vmem:[#allocation99_spill] sm:$0xff] %v11372_v24  ;;  %v11378_v28 = vsub.f32 %v15291_v14, %v10358_v34  ;;  %v15297_v14 = vld [vmem:[#allocation123_spill] sm:$0xff] }
 0x6fa   :  { %v4137_v62 = vadd.f32 %v4136_v35, %v3882_v3  ;;  %v3886_v3 = vmul.f32 %v11354_v11, %v11354_v11  ;;  %15292 = vst [vmem:[#allocation101_spill] sm:$0xff] %v11378_v28  ;;  %v11384_v11 = vsub.f32 %v15293_v47, %v10358_v34  ;;  %v15299_v47 = vld [vmem:[#allocation125_spill] sm:$0xff] }
 0x6fc   :  { %v4138_v46 = vadd.f32 %v4137_v62, %v3883_v2  ;;  %v3887_v2 = vmul.f32 %v11360_v43, %v11360_v43  ;;  %15294 = vst [vmem:[#allocation103_spill] sm:$0xff] %v11384_v11  ;;  %v11390_v43 = vsub.f32 %v15295_v15, %v10358_v34  ;;  %v15301_v15 = vld [vmem:[#allocation127_spill] sm:$0xff] }
 0x6fe   :  { %v4139_v63 = vadd.f32 %v4138_v46, %v3884_v57  ;;  %v3888_v57 = vmul.f32 %v11366_v10, %v11366_v10  ;;  %15296 = vst [vmem:[#allocation105_spill] sm:$0xff] %v11390_v43  ;;  %v11396_v10 = vsub.f32 %v15297_v14, %v10358_v34  ;;  %v15303_v14 = vld [vmem:[#allocation129_spill] sm:$0xff] }
 0x700   :  { %v4140_v35 = vadd.f32 %v4139_v63, %v3885_v12  ;;  %v3889_v12 = vmul.f32 %v11372_v24, %v11372_v24  ;;  %15298 = vst [vmem:[#allocation107_spill] sm:$0xff] %v11396_v10  ;;  %v11402_v24 = vsub.f32 %v15299_v47, %v10358_v34  ;;  %v15305_v47 = vld [vmem:[#allocation131_spill] sm:$0xff] }
 0x702   :  { %v4141_v62 = vadd.f32 %v4140_v35, %v3886_v3  ;;  %v3890_v3 = vmul.f32 %v11378_v28, %v11378_v28  ;;  %15300 = vst [vmem:[#allocation109_spill] sm:$0xff] %v11402_v24  ;;  %v11408_v28 = vsub.f32 %v15301_v15, %v10358_v34  ;;  %v15307_v15 = vld [vmem:[#allocation133_spill] sm:$0xff] }
 0x704   :  { %v4142_v46 = vadd.f32 %v4141_v62, %v3887_v2  ;;  %v3891_v2 = vmul.f32 %v11384_v11, %v11384_v11  ;;  %15302 = vst [vmem:[#allocation111_spill] sm:$0xff] %v11408_v28  ;;  %v11414_v11 = vsub.f32 %v15303_v14, %v10358_v34  ;;  %v15309_v14 = vld [vmem:[#allocation135_spill] sm:$0xff] }
 0x706   :  { %v4143_v63 = vadd.f32 %v4142_v46, %v3888_v57  ;;  %v3892_v57 = vmul.f32 %v11390_v43, %v11390_v43  ;;  %15304 = vst [vmem:[#allocation113_spill] sm:$0xff] %v11414_v11  ;;  %v11420_v43 = vsub.f32 %v15305_v47, %v10358_v34  ;;  %v15311_v47 = vld [vmem:[#allocation137_spill] sm:$0xff] }
 0x708   :  { %v4144_v35 = vadd.f32 %v4143_v63, %v3889_v12  ;;  %v3893_v12 = vmul.f32 %v11396_v10, %v11396_v10  ;;  %15306 = vst [vmem:[#allocation115_spill] sm:$0xff] %v11420_v43  ;;  %v11426_v10 = vsub.f32 %v15307_v15, %v10358_v34  ;;  %v15313_v15 = vld [vmem:[#allocation139_spill] sm:$0xff] }
 0x70a   :  { %v4145_v62 = vadd.f32 %v4144_v35, %v3890_v3  ;;  %v3894_v3 = vmul.f32 %v11402_v24, %v11402_v24  ;;  %15308 = vst [vmem:[#allocation117_spill] sm:$0xff] %v11426_v10  ;;  %v11432_v24 = vsub.f32 %v15309_v14, %v10358_v34  ;;  %v15315_v14 = vld [vmem:[#allocation141_spill] sm:$0xff] }
 0x70c   :  { %v4146_v46 = vadd.f32 %v4145_v62, %v3891_v2  ;;  %v3895_v2 = vmul.f32 %v11408_v28, %v11408_v28  ;;  %15310 = vst [vmem:[#allocation119_spill] sm:$0xff] %v11432_v24  ;;  %v11438_v28 = vsub.f32 %v15311_v47, %v10358_v34  ;;  %v15317_v47 = vld [vmem:[#allocation143_spill] sm:$0xff] }
 0x70e   :  { %v4147_v63 = vadd.f32 %v4146_v46, %v3892_v57  ;;  %v3896_v57 = vmul.f32 %v11414_v11, %v11414_v11  ;;  %15312 = vst [vmem:[#allocation121_spill] sm:$0xff] %v11438_v28  ;;  %v11444_v11 = vsub.f32 %v15313_v15, %v10358_v34  ;;  %v15319_v15 = vld [vmem:[#allocation145_spill] sm:$0xff] }
 0x710   :  { %v4148_v35 = vadd.f32 %v4147_v63, %v3893_v12  ;;  %v3897_v12 = vmul.f32 %v11420_v43, %v11420_v43  ;;  %15314 = vst [vmem:[#allocation123_spill] sm:$0xff] %v11444_v11  ;;  %v11450_v43 = vsub.f32 %v15315_v14, %v10358_v34  ;;  %v15320_v14 = vld [vmem:[#allocation147_spill] sm:$0xff] }
 0x712   :  { %v4149_v62 = vadd.f32 %v4148_v35, %v3894_v3  ;;  %v3898_v3 = vmul.f32 %v11426_v10, %v11426_v10  ;;  %15316 = vst [vmem:[#allocation125_spill] sm:$0xff] %v11450_v43  ;;  %v11456_v10 = vsub.f32 %v15317_v47, %v10358_v34  ;;  %v15321_v47 = vld [vmem:[#allocation149_spill] sm:$0xff] }
 0x714   :  { %v4150_v46 = vadd.f32 %v4149_v62, %v3895_v2  ;;  %v3899_v2 = vmul.f32 %v11432_v24, %v11432_v24  ;;  %15318 = vst [vmem:[#allocation127_spill] sm:$0xff] %v11456_v10  ;;  %v11462_v24 = vsub.f32 %v15319_v15, %v10358_v34  ;;  %v15322_v15 = vld [vmem:[#allocation151_spill] sm:$0xff] }
 0x716   :  { %v4151_v63 = vadd.f32 %v4150_v46, %v3896_v57  ;;  %v3900_v57 = vmul.f32 %v11438_v28, %v11438_v28  ;;  %v11468_v28 = vsub.f32 %v15320_v14, %v10358_v34  ;;  %v15323_v14 = vld [vmem:[#allocation153_spill] sm:$0xff] }
 0x718   :  { %v4152_v35 = vadd.f32 %v4151_v63, %v3897_v12  ;;  %v3901_v12 = vmul.f32 %v11444_v11, %v11444_v11  ;;  %v11474_v11 = vsub.f32 %v15321_v47, %v10358_v34  ;;  %v11492_v47 = vsub.f32 %v14937_v55, %v10358_v34 }
 0x71a   :  { %v4153_v62 = vadd.f32 %v4152_v35, %v3898_v3  ;;  %v3902_v3 = vmul.f32 %v11450_v43, %v11450_v43  ;;  %v11480_v43 = vsub.f32 %v15322_v15, %v10358_v34  ;;  %v11498_v15 = vsub.f32 %v14938_v16, %v10358_v34 }
 0x71b   :  { %v3909_v55 = vmul.f32 %v11492_v47, %v11492_v47 }
 0x71c   :  { %v4154_v46 = vadd.f32 %v4153_v62, %v3899_v2  ;;  %v3903_v2 = vmul.f32 %v11456_v10, %v11456_v10  ;;  %v11486_v10 = vsub.f32 %v15323_v14, %v10358_v34  ;;  %v11504_v14 = vsub.f32 %v14939_v9, %v10358_v34 }
 0x71d   :  { %v3910_v16 = vmul.f32 %v11498_v15, %v11498_v15 }
 0x71e   :  { %v4155_v63 = vadd.f32 %v4154_v46, %v3900_v57  ;;  %v3904_v57 = vmul.f32 %v11462_v24, %v11462_v24  ;;  %15324 = vst [vmem:[#allocation129_spill] sm:$0xff] %v11486_v10  ;;  %v3911_v9 = vmul.f32 %v11504_v14, %v11504_v14 }
 0x720   :  { %v4156_v35 = vadd.f32 %v4155_v63, %v3901_v12  ;;  %v3905_v12 = vmul.f32 %v11468_v28, %v11468_v28 }
 0x722   :  { %v4157_v62 = vadd.f32 %v4156_v35, %v3902_v3  ;;  %v3906_v3 = vmul.f32 %v11474_v11, %v11474_v11 }
 0x724   :  { %v4158_v46 = vadd.f32 %v4157_v62, %v3903_v2  ;;  %v3907_v2 = vmul.f32 %v11480_v43, %v11480_v43 }
 0x726   :  { %v4159_v63 = vadd.f32 %v4158_v46, %v3904_v57  ;;  %v3908_v57 = vmul.f32 %v11486_v10, %v11486_v10 }
 0x728   :  { %v4160_v35 = vadd.f32 %v4159_v63, %v3905_v12  ;;  %v11510_v63 = vsub.f32 %v14940_v17, %v10358_v34 }
 0x72a   :  { %v4161_v62 = vadd.f32 %v4160_v35, %v3906_v3  ;;  %v15325_v35 = vld [vmem:[#allocation163_spill] sm:$0xff]  ;;  %v3912_v17 = vmul.f32 %v11510_v63, %v11510_v63 }
 0x72b   :  { %v11516_v10 = vsub.f32 %v15325_v35, %v10358_v34  ;;  %v11534_v35 = vsub.f32 %v14944_v31, %v10358_v34 }
 0x72c   :  { %v4162_v46 = vadd.f32 %v4161_v62, %v3907_v2  ;;  %v11522_v62 = vsub.f32 %v14942_v38, %v10358_v34 }
 0x72d   :  { %v3916_v31 = vmul.f32 %v11534_v35, %v11534_v35 }
 0x72e   :  { %v4163_v12 = vadd.f32 %v4162_v46, %v3908_v57  ;;  %v11528_v46 = vsub.f32 %v14943_v36, %v10358_v34  ;;  %v3914_v38 = vmul.f32 %v11522_v62, %v11522_v62 }
 0x730   :  { %v4164_v3 = vadd.f32 %v4163_v12, %v3909_v55  ;;  %v3913_v55 = vmul.f32 %v11516_v10, %v11516_v10  ;;  %v3915_v36 = vmul.f32 %v11528_v46, %v11528_v46 }
 0x732   :  { %v4165_v2 = vadd.f32 %v4164_v3, %v3910_v16  ;;  %v11540_v3 = vsub.f32 %v14945_v22, %v10358_v34 }
 0x734   :  { %v4166_v57 = vadd.f32 %v4165_v2, %v3911_v9  ;;  %v11546_v2 = vsub.f32 %v9544_v1, %v10358_v34  ;;  %v3917_v22 = vmul.f32 %v11540_v3, %v11540_v3 }
 0x736   :  { %v4167_v12 = vadd.f32 %v4166_v57, %v3912_v17  ;;  %v11552_v57 = vsub.f32 %v9558_v52, %v10358_v34  ;;  %v3918_v1 = vmul.f32 %v11546_v2, %v11546_v2 }
 0x738   :  { %v4168_v16 = vadd.f32 %v4167_v12, %v3913_v55  ;;  %v11558_v12 = vsub.f32 %v9586_v8, %v10358_v34  ;;  %v3919_v52 = vmul.f32 %v11552_v57, %v11552_v57 }
 0x73a   :  { %v4169_v9 = vadd.f32 %v4168_v16, %v3914_v38  ;;  %v11564_v16 = vsub.f32 %v9600_v59, %v10358_v34  ;;  %v3920_v8 = vmul.f32 %v11558_v12, %v11558_v12 }
 0x73c   :  { %v4170_v17 = vadd.f32 %v4169_v9, %v3915_v36  ;;  %v11570_v9 = vsub.f32 %v9628_v25, %v10358_v34  ;;  %v3921_v59 = vmul.f32 %v11564_v16, %v11564_v16 }
 0x73e   :  { %v4171_v55 = vadd.f32 %v4170_v17, %v3916_v31  ;;  %15326 = vst [vmem:[#allocation131_spill] sm:$0xff] %v11570_v9  ;;  %v11576_v17 = vsub.f32 %v9642_v30, %v10358_v34  ;;  %v3922_v25 = vmul.f32 %v11570_v9, %v11570_v9 }
 0x740   :  { %v4172_v38 = vadd.f32 %v4171_v55, %v3917_v22  ;;  %15327 = vst [vmem:[#allocation133_spill] sm:$0xff] %v11576_v17  ;;  %v11582_v55 = vsub.f32 %v9670_v56, %v10358_v34  ;;  %v3923_v30 = vmul.f32 %v11576_v17, %v11576_v17 }
 0x742   :  { %v4173_v36 = vadd.f32 %v4172_v38, %v3918_v1  ;;  %v11588_v38 = vsub.f32 %v9684_v42, %v10358_v34  ;;  %v3924_v56 = vmul.f32 %v11582_v55, %v11582_v55 }
 0x744   :  { %v4174_v31 = vadd.f32 %v4173_v36, %v3919_v52  ;;  %v11594_v36 = vsub.f32 %v9712_v39, %v10358_v34  ;;  %v3925_v42 = vmul.f32 %v11588_v38, %v11588_v38 }
 0x746   :  { %v4175_v22 = vadd.f32 %v4174_v31, %v3920_v8  ;;  %v15328_v31 = vld [vmem:[#allocation182_spill] sm:$0xff]  ;;  %v3926_v39 = vmul.f32 %v11594_v36, %v11594_v36 }
 0x747   :  { %v11600_v9 = vsub.f32 %v15328_v31, %v10358_v34  ;;  %v11618_v31 = vsub.f32 %v9796_v20, %v10358_v34 }
 0x748   :  { %v4176_v1 = vadd.f32 %v4175_v22, %v3921_v59  ;;  %v15329_v22 = vld [vmem:[#allocation184_spill] sm:$0xff] }
 0x749   :  { %v11606_v17 = vsub.f32 %v15329_v22, %v10358_v34  ;;  %v11624_v22 = vsub.f32 %v9810_v19, %v10358_v34  ;;  %v3930_v20 = vmul.f32 %v11618_v31, %v11618_v31 }
 0x74a   :  { %v4177_v52 = vadd.f32 %v4176_v1, %v3922_v25  ;;  %v11612_v1 = vsub.f32 %v9768_v5, %v10358_v34 }
 0x74b   :  { %v3931_v19 = vmul.f32 %v11624_v22, %v11624_v22 }
 0x74c   :  { %v4178_v8 = vadd.f32 %v4177_v52, %v3923_v30  ;;  %v3927_v30 = vmul.f32 %v11600_v9, %v11600_v9  ;;  %v3929_v5 = vmul.f32 %v11612_v1, %v11612_v1 }
 0x74e   :  { %v4179_v59 = vadd.f32 %v4178_v8, %v3924_v56  ;;  %v3928_v56 = vmul.f32 %v11606_v17, %v11606_v17 }
 0x750   :  { %v4180_v25 = vadd.f32 %v4179_v59, %v3925_v42  ;;  %v11630_v59 = vsub.f32 %v9832_v45, %v10358_v34 }
 0x752   :  { %v4181_v52 = vadd.f32 %v4180_v25, %v3926_v39  ;;  %v11636_v25 = vsub.f32 %v9839_v54, %v10358_v34  ;;  %v3932_v45 = vmul.f32 %v11630_v59, %v11630_v59 }
 0x754   :  { %v4182_v8 = vadd.f32 %v4181_v52, %v3927_v30  ;;  %15330 = vst [vmem:[#allocation135_spill] sm:$0xff] %v11636_v25  ;;  %v11642_v52 = vsub.f32 %v9861_v21, %v10358_v34  ;;  %v3933_v54 = vmul.f32 %v11636_v25, %v11636_v25 }
 0x756   :  { %v4183_v42 = vadd.f32 %v4182_v8, %v3928_v56  ;;  %v11648_v8 = vsub.f32 %v9868_v44, %v10358_v34  ;;  %v3934_v21 = vmul.f32 %v11642_v52, %v11642_v52 }
 0x758   :  { %v4184_v39 = vadd.f32 %v4183_v42, %v3929_v5  ;;  %v11654_v42 = vsub.f32 %v9892_v27, %v10358_v34  ;;  %v3935_v44 = vmul.f32 %v11648_v8, %v11648_v8 }
 0x75a   :  { %v4185_v30 = vadd.f32 %v4184_v39, %v3930_v20  ;;  %v11660_v39 = vsub.f32 %v14946_v13, %v10358_v34  ;;  %v3936_v27 = vmul.f32 %v11654_v42, %v11654_v42 }
 0x75c   :  { %v4186_v56 = vadd.f32 %v4185_v30, %v3931_v19  ;;  %15331 = vst [vmem:[#allocation137_spill] sm:$0xff] %v11660_v39  ;;  %v15332_v30 = vld [vmem:[#allocation195_spill] sm:$0xff]  ;;  %v3937_v13 = vmul.f32 %v11660_v39, %v11660_v39 }
 0x75d   :  { %v11666_v25 = vsub.f32 %v15332_v30, %v10358_v34  ;;  %v11684_v30 = vsub.f32 %v9967_v33, %v10358_v34 }
 0x75e   :  { %v4187_v5 = vadd.f32 %v4186_v56, %v3932_v45  ;;  %v11672_v56 = vsub.f32 %v14948_v0, %v10358_v34 }
 0x75f   :  { %v3941_v33 = vmul.f32 %v11684_v30, %v11684_v30 }
 0x760   :  { %v4188_v20 = vadd.f32 %v4187_v5, %v3933_v54  ;;  %v11678_v5 = vsub.f32 %v9958_v40, %v10358_v34  ;;  %v3939_v0 = vmul.f32 %v11672_v56, %v11672_v56 }
 0x762   :  { %v4189_v19 = vadd.f32 %v4188_v20, %v3934_v21  ;;  %15333 = vst [vmem:[#allocation139_spill] sm:$0xff] %v11678_v5  ;;  %v3938_v21 = vmul.f32 %v11666_v25, %v11666_v25  ;;  %v3940_v40 = vmul.f32 %v11678_v5, %v11678_v5 }
 0x764   :  { %v4190_v45 = vadd.f32 %v4189_v19, %v3935_v44  ;;  %v15334_v19 = vld [vmem:[#allocation197_spill] sm:$0xff] }
 0x765   :  { %v11690_v39 = vsub.f32 %v15334_v19, %v10358_v34  ;;  %v15337_v19 = vld [vmem:[#allocation198_spill] sm:$0xff] }
 0x766   :  { %v4191_v54 = vadd.f32 %v4190_v45, %v3936_v27  ;;  %v11696_v45 = vsub.f32 %v9996_v49, %v10358_v34  ;;  %v11708_v5 = vsub.f32 %v15337_v19, %v10358_v34  ;;  %v15342_v19 = vld [vmem:[#allocation211_spill] sm:$0xff] }
 0x767   :  { %15335 = vst [vmem:[#allocation141_spill] sm:$0xff] %v11690_v39 }
 0x768   :  { %v4192_v20 = vadd.f32 %v4191_v54, %v3937_v13  ;;  %15336 = vst [vmem:[#allocation143_spill] sm:$0xff] %v11696_v45  ;;  %v11702_v54 = vsub.f32 %v10019_v53, %v10358_v34  ;;  %v3943_v49 = vmul.f32 %v11696_v45, %v11696_v45  ;;  %v11726_v45 = vsub.f32 %v15342_v19, %v10358_v34  ;;  %v15346_v19 = vld [vmem:[#allocation213_spill] sm:$0xff] }
 0x769   :  { %15338 = vst [vmem:[#allocation145_spill] sm:$0xff] %v11708_v5 }
 0x76a   :  { %v4193_v44 = vadd.f32 %v4192_v20, %v3938_v21  ;;  %v3942_v21 = vmul.f32 %v11690_v39, %v11690_v39  ;;  %v3944_v53 = vmul.f32 %v11702_v54, %v11702_v54  ;;  %15343 = vst [vmem:[#allocation151_spill] sm:$0xff] %v11726_v45 }
 0x76c   :  { %v4194_v27 = vadd.f32 %v4193_v44, %v3939_v0  ;;  %v11714_v44 = vsub.f32 %v10072_v51, %v10358_v34 }
 0x76e   :  { %v4195_v13 = vadd.f32 %v4194_v27, %v3940_v40  ;;  %15339 = vst [vmem:[#allocation147_spill] sm:$0xff] %v11714_v44  ;;  %v15340_v27 = vld [vmem:[#allocation207_spill] sm:$0xff]  ;;  %v3946_v51 = vmul.f32 %v11714_v44, %v11714_v44  ;;  %v11744_v44 = vsub.f32 %v15346_v19, %v10358_v34  ;;  %v11762_v19 = vsub.f32 %v10184_v60, %v10358_v34 }
 0x76f   :  { %v11720_v39 = vsub.f32 %v15340_v27, %v10358_v34  ;;  %v15344_v27 = vld [vmem:[#allocation212_spill] sm:$0xff] }
 0x770   :  { %v4196_v20 = vadd.f32 %v4195_v13, %v3941_v33  ;;  %v3945_v33 = vmul.f32 %v11708_v5, %v11708_v5  ;;  %v11738_v5 = vsub.f32 %v15344_v27, %v10358_v34  ;;  %15347 = vst [vmem:[#allocation163_spill] sm:$0xff] %v11744_v44  ;;  %v15350_v27 = vld [vmem:[#allocation215_spill] sm:$0xff]  ;;  %v3954_v60 = vmul.f32 %v11762_v19, %v11762_v19 }
 0x771   :  { %15341 = vst [vmem:[#allocation149_spill] sm:$0xff] %v11720_v39 }
 0x772   :  { %v4197_v0 = vadd.f32 %v4196_v20, %v3942_v21  ;;  %v11732_v20 = vsub.f32 %v10111_v58, %v10358_v34  ;;  %15345 = vst [vmem:[#allocation153_spill] sm:$0xff] %v11738_v5 }
 0x774   :  { %v4198_v40 = vadd.f32 %v4197_v0, %v3943_v49  ;;  %v3947_v49 = vmul.f32 %v11720_v39, %v11720_v39  ;;  %v3949_v58 = vmul.f32 %v11732_v20, %v11732_v20 }
 0x776   :  { %v4199_v13 = vadd.f32 %v4198_v40, %v3944_v53  ;;  %v3948_v53 = vmul.f32 %v11726_v45, %v11726_v45  ;;  %v11756_v45 = vsub.f32 %v15350_v27, %v10358_v34  ;;  %v15353_v27 = vld [vmem:[#allocation217_spill] sm:$0xff] }
 0x778   :  { %v4200_v21 = vadd.f32 %v4199_v13, %v3945_v33  ;;  %v15348_v13 = vld [vmem:[#allocation214_spill] sm:$0xff]  ;;  %15351 = vst [vmem:[#allocation184_spill] sm:$0xff] %v11756_v45 }
 0x779   :  { %v11750_v39 = vsub.f32 %v15348_v13, %v10358_v34  ;;  %v15352_v13 = vld [vmem:[#allocation216_spill] sm:$0xff] }
 0x77a   :  { %v4201_v0 = vadd.f32 %v4200_v21, %v3946_v51  ;;  %v3950_v51 = vmul.f32 %v11738_v5, %v11738_v5  ;;  %v11768_v5 = vsub.f32 %v15352_v13, %v10358_v34  ;;  %v15357_v13 = vld [vmem:[#allocation219_spill] sm:$0xff] }
 0x77b   :  { %15349 = vst [vmem:[#allocation182_spill] sm:$0xff] %v11750_v39 }
 0x77c   :  { %v4202_v40 = vadd.f32 %v4201_v0, %v3947_v49  ;;  %v3951_v49 = vmul.f32 %v11744_v44, %v11744_v44  ;;  %v11774_v44 = vsub.f32 %v15353_v27, %v10358_v34  ;;  %v11792_v27 = vsub.f32 %v10236_v37, %v10358_v34 }
 0x77e   :  { %v4203_v33 = vadd.f32 %v4202_v40, %v3948_v53  ;;  %v3952_v53 = vmul.f32 %v11750_v39, %v11750_v39  ;;  %15354 = vst [vmem:[#allocation195_spill] sm:$0xff] %v11774_v44  ;;  %v3959_v37 = vmul.f32 %v11792_v27, %v11792_v27 }
 0x780   :  { %v4204_v21 = vadd.f32 %v4203_v33, %v3949_v58  ;;  %v3953_v58 = vmul.f32 %v11756_v45, %v11756_v45  ;;  %v11786_v45 = vsub.f32 %v15357_v13, %v10358_v34  ;;  %v15359_v13 = vld [vmem:[#allocation220_spill] sm:$0xff] }
 0x782   :  { %v4205_v0 = vadd.f32 %v4204_v21, %v3950_v51  ;;  %v15355_v21 = vld [vmem:[#allocation218_spill] sm:$0xff]  ;;  %15358 = vst [vmem:[#allocation198_spill] sm:$0xff] %v11786_v45 }
 0x783   :  { %v11780_v39 = vsub.f32 %v15355_v21, %v10358_v34  ;;  %v11798_v21 = vsub.f32 %v10246_v18, %v10358_v34 }
 0x784   :  { %v4206_v40 = vadd.f32 %v4205_v0, %v3951_v49  ;;  %v3955_v49 = vmul.f32 %v11768_v5, %v11768_v5 }
 0x785   :  { %15356 = vst [vmem:[#allocation197_spill] sm:$0xff] %v11780_v39  ;;  %v3960_v18 = vmul.f32 %v11798_v21, %v11798_v21 }
 0x786   :  { %v4207_v33 = vadd.f32 %v4206_v40, %v3952_v53  ;;  %v3956_v53 = vmul.f32 %v11774_v44, %v11774_v44  ;;  %v11804_v44 = vsub.f32 %v15359_v13, %v10358_v34  ;;  %v11822_v13 = vsub.f32 %v10270_v6, %v10358_v34 }
 0x788   :  { %v4208_v51 = vadd.f32 %v4207_v33, %v3953_v58  ;;  %v3957_v58 = vmul.f32 %v11780_v39, %v11780_v39  ;;  %15363 = vst [vmem:[#allocation211_spill] sm:$0xff] %v11822_v13  ;;  %v3964_v6 = vmul.f32 %v11822_v13, %v11822_v13 }
 0x78a   :  { %v4209_v0 = vadd.f32 %v4208_v51, %v3954_v60  ;;  %v3958_v60 = vmul.f32 %v11786_v45, %v11786_v45 }
 0x78c   :  { %v4210_v40 = vadd.f32 %v4209_v0, %v3955_v49  ;;  %v15360_v0 = vld [vmem:[#allocation221_spill] sm:$0xff] }
 0x78d   :  { %v11810_v39 = vsub.f32 %v15360_v0, %v10358_v34  ;;  %v11828_v0 = vsub.f32 %v10322_v4, %v10358_v34 }
 0x78e   :  { %v4211_v33 = vadd.f32 %v4210_v40, %v3956_v53  ;;  %v15361_v40 = vld [vmem:[#allocation222_spill] sm:$0xff] }
 0x78f   :  { %v11816_v45 = vsub.f32 %v15361_v40, %v10358_v34  ;;  %15364 = vst [vmem:[#allocation212_spill] sm:$0xff] %v11828_v0  ;;  %v11834_v40 = vsub.f32 %v10325_v50, %v10358_v34  ;;  %v3965_v4 = vmul.f32 %v11828_v0, %v11828_v0 }
 0x790   :  { %v4212_v51 = vadd.f32 %v4211_v33, %v3957_v58  ;;  %v3961_v58 = vmul.f32 %v11804_v44, %v11804_v44 }
 0x791   :  { %15362 = vst [vmem:[#allocation207_spill] sm:$0xff] %v11816_v45  ;;  %v3966_v50 = vmul.f32 %v11834_v40, %v11834_v40 }
 0x792   :  { %v4213_v49 = vadd.f32 %v4212_v51, %v3958_v60  ;;  %v3962_v60 = vmul.f32 %v11810_v39, %v11810_v39  ;;  %15365 = vst [vmem:[#allocation213_spill] sm:$0xff] %v11834_v40 }
 0x794   :  { %v4214_v53 = vadd.f32 %v4213_v49, %v3959_v37  ;;  %v3963_v37 = vmul.f32 %v11816_v45, %v11816_v45 }
 0x796   :  { %v4215_v33 = vadd.f32 %v4214_v53, %v3960_v18  ;;  %v11840_v53 = vsub.f32 %v10328_v7, %v10358_v34 }
 0x798   :  { %v4216_v51 = vadd.f32 %v4215_v33, %v3961_v58  ;;  %15366 = vst [vmem:[#allocation214_spill] sm:$0xff] %v11840_v53  ;;  %v11846_v33 = vsub.f32 %v10331_v32, %v10358_v34  ;;  %v3967_v7 = vmul.f32 %v11840_v53, %v11840_v53 }
 0x79a   :  { %v4217_v49 = vadd.f32 %v4216_v51, %v3962_v60  ;;  %15367 = vst [vmem:[#allocation215_spill] sm:$0xff] %v11846_v33  ;;  %v11852_v51 = vsub.f32 %v10334_v23, %v10358_v34  ;;  %v3968_v32 = vmul.f32 %v11846_v33, %v11846_v33 }
 0x79c   :  { %v4218_v18 = vadd.f32 %v4217_v49, %v3963_v37  ;;  %15368 = vst [vmem:[#allocation216_spill] sm:$0xff] %v11852_v51  ;;  %v11858_v49 = vsub.f32 %v10337_v29, %v10358_v34  ;;  %v3969_v23 = vmul.f32 %v11852_v51, %v11852_v51 }
 0x79e   :  { %v4219_v58 = vadd.f32 %v4218_v18, %v3964_v6  ;;  %15369 = vst [vmem:[#allocation217_spill] sm:$0xff] %v11858_v49  ;;  %v11864_v18 = vsub.f32 %v10340_v41, %v10358_v34  ;;  %v3970_v29 = vmul.f32 %v11858_v49, %v11858_v49 }
 0x7a0   :  { %v4220_v60 = vadd.f32 %v4219_v58, %v3965_v4  ;;  %15370 = vst [vmem:[#allocation218_spill] sm:$0xff] %v11864_v18  ;;  %v15371_v58 = vld [vmem:[#allocation155_spill] sm:$0xff]  ;;  %v3971_v41 = vmul.f32 %v11864_v18, %v11864_v18 }
 0x7a1   :  { %v11870_v53 = vsub.f32 %v15371_v58, %v10358_v34  ;;  %v3719_v58 = vsub.f32 %v10352_v26, %v10358_v34 }
 0x7a2   :  { %v4221_v37 = vadd.f32 %v4220_v60, %v3966_v50  ;;  %v15373_v60 = vld [vmem:[#allocation157_spill] sm:$0xff] }
 0x7a3   :  { %15372 = vst [vmem:[#allocation219_spill] sm:$0xff] %v11870_v53  ;;  %v11876_v33 = vsub.f32 %v15373_v60, %v10358_v34  ;;  %v3975_v51 = vmul.f32 %v3719_v58, %v3719_v58 }
 0x7a4   :  { %v4222_v6 = vadd.f32 %v4221_v37, %v3967_v7  ;;  %v3718_v37 = vsub.f32 %v10349_v61, %v10358_v34 }
 0x7a5   :  { %15374 = vst [vmem:[#allocation220_spill] sm:$0xff] %v11876_v33 }
 0x7a6   :  { %v4223_v4 = vadd.f32 %v4222_v6, %v3968_v32  ;;  %v3972_v32 = vmul.f32 %v11870_v53, %v11870_v53  ;;  %v3974_v60 = vmul.f32 %v3718_v37, %v3718_v37 }
 0x7a8   :  { %v4224_v50 = vadd.f32 %v4223_v4, %v3969_v23  ;;  %v3973_v23 = vmul.f32 %v11876_v33, %v11876_v33 }
 0x7aa   :  { %v4225_v7 = vadd.f32 %v4224_v50, %v3970_v29 }
 0x7ac   :  { %v4226_v6 = vadd.f32 %v4225_v7, %v3971_v41 }
 0x7ae   :  { %v4227_v4 = vadd.f32 %v4226_v6, %v3972_v32 }
 0x7b0   :  { %v4228_v49 = vadd.f32 %v4227_v4, %v3973_v23 }
 0x7b2   :  { %v4229_v40 = vadd.f32 %v4228_v49, %v3974_v60  ;;  %v15375_v60 = vld [vmem:[#allocation159_spill] sm:$0xff] }
 0x7b4   :  { %v4230_v18 = vadd.f32 %v4229_v40, %v3975_v51  ;;  %v3193_v40 = vld [vmem:[%s14172_s2] sm:$0x1] }
 0x7b6   :  { %v4231_v29 = vrot.slane %v4230_v18, 4 }
 0x7b8   :  { %v4232_v50 = vadd.f32 %v4231_v29, %v4230_v18 }
 0x7ba   :  { %v4233_v0 = vrot.slane %v4232_v50, 2 }
 0x7bc   :  { %v4234_v61 = vadd.f32 %v4233_v0, %v4232_v50  ;;  %v15376_v50 = vld [vmem:[#allocation161_spill] sm:$0xff] }
 0x7be   :  { %v4235_v13 = vrot.slane %v4234_v61, 1 }
 0x7c0   :  { %v4236_v45 = vadd.f32 %v4235_v13, %v4234_v61 }
 0x7c2   :  { %v4237_v41 = vmul.f32 %v4236_v45, %v10355_v48  ;;  %v11895_v48 = vld [vmem:[%s14173_s3] ss:$0 sm:$0xff] }
 0x7c4   :  { %v4238_v7 = vadd.f32 1e-05, %v4237_v41  ;;  %v15377_v41 = vld [vmem:[#allocation165_spill] sm:$0xff] }
 0x7c6   :  { %7792 = vrsqrt.f32 %v4238_v7  ;;  %vm4245_vm5 = vweird.f32 %v4238_v7 }
 0x7cc   :  { %v7793_v26 = vpop.eup %7792 }
 0x7cd   :  { %v4240_v34 = vmul.f32 %v7793_v26, %v4238_v7  ;;  %vm4246_vm4 = vweird.f32 %v7793_v26 }
 0x7ce   :  { %vm4247_vm6 = vmor %vm4245_vm5, %vm4246_vm4 }
 0x7cf   :  { %v4241_v53 = vmul.f32 %v7793_v26, %v4240_v34 }
 0x7d1   :  { %v4242_v33 = vmul.f32 0.5, %v4241_v53 }
 0x7d3   :  { %v4243_v32 = vsub.f32 1.5, %v4242_v33 }
 0x7d5   :  { %v4244_v51 = vmul.f32 %v7793_v26, %v4243_v32  ;;  %v15380_v32 = vld [vmem:[#allocation171_spill] sm:$0xff] }
 0x7d7   :  { %v4248_v0 = vsel %vm4247_vm6, %v7793_v26, %v4244_v51  ;;  %v15379_v26 = vld [vmem:[#allocation169_spill] sm:$0xff]  ;;  %v15381_v51 = vld [vmem:[#allocation194_spill] sm:$0xff] }
 0x7d8   :  { %v4249_v49 = vmul.f32 %v4248_v0, %v3193_v40 }
 0x7da   :  { %v11897_v45 = vperm.slane %v4249_v49, 0  ;;  %v15382_v49 = vld [vmem:[#allocation196_spill] sm:$0xff] }
 0x7dc   :  { %v4507_v13 = vmul.f32 %v11897_v45, %v3718_v37  ;;  %v4508_v53 = vmul.f32 %v11897_v45, %v3719_v58  ;;  %v11905_v29 = vmul.f32 %v11897_v45, %v15375_v60  ;;  %v11909_v61 = vmul.f32 %v11897_v45, %v15376_v50  ;;  %v15378_v58 = vld [vmem:[#allocation167_spill] sm:$0xff]  ;;  %v15386_v60 = vld [vmem:[#allocation8_spill] sm:$0xff] }
 0x7dd   :  { %v11913_v37 = vmul.f32 %v11897_v45, %v15377_v41  ;;  %v11917_v7 = vmul.f32 %v11897_v45, %v15378_v58  ;;  %v11921_v34 = vmul.f32 %v11897_v45, %v15379_v26  ;;  %v11925_v40 = vmul.f32 %v11897_v45, %v15380_v32  ;;  %v15388_v41 = vld [vmem:[#allocation9_spill] sm:$0xff]  ;;  %v15390_v26 = vld [vmem:[#allocation10_spill] sm:$0xff] }
 0x7de   :  { %v4766_v33 = vadd.f32 %v11895_v48, %v4507_v13  ;;  %v4767_v18 = vadd.f32 %v11895_v48, %v4508_v53  ;;  %v11929_v0 = vmul.f32 %v11897_v45, %v15381_v51  ;;  %v11933_v13 = vmul.f32 %v11897_v45, %v15382_v49  ;;  %v15383_v53 = vld [vmem:[#allocation5_spill] sm:$0xff]  ;;  %v15392_v51 = vld [vmem:[#allocation11_spill] sm:$0xff] }
 0x7df   :  { %v11949_v50 = vmul.f32 %v11897_v45, %v15386_v60  ;;  %v11953_v58 = vmul.f32 %v11897_v45, %v15388_v41  ;;  %v11957_v32 = vmul.f32 %v11897_v45, %v15390_v26  ;;  %v11961_v49 = vmul.f32 %v11897_v45, %v15392_v51 }
 0x7e0   :  { %v5022_v6 = vmax.f32 %v4766_v33, 0.0  ;;  %v5023_v23 = vmax.f32 %v4767_v18, 0.0  ;;  %v11937_v33 = vmul.f32 %v11897_v45, %v15383_v53  ;;  %v15384_v18 = vld [vmem:[#allocation6_spill] sm:$0xff]  ;;  %v15394_v53 = vld [vmem:[#allocation12_spill] sm:$0xff] }
 0x7e1   :  { %15387 = vst [vmem:[#allocation221_spill] sm:$0xff] %v11949_v50  ;;  %v15398_v50 = vld [vmem:[#allocation14_spill] sm:$0xff] }
 0x7e2   :  { %v7645_v4 = vpack.c.bf16 %v5023_v23, %v5022_v6  ;;  %v11941_v6 = vmul.f32 %v11897_v45, %v15384_v18  ;;  %v15385_v23 = vld [vmem:[#allocation7_spill] sm:$0xff]  ;;  %15389 = vst [vmem:[#allocation222_spill] sm:$0xff] %v11953_v58  ;;  %v11965_v18 = vmul.f32 %v11897_v45, %v15394_v53  ;;  %v11973_v41 = vmul.f32 %v11897_v45, %v15398_v50 }
 0x7e3   :  { %15391 = vst [vmem:[#allocation155_spill] sm:$0xff] %v11957_v32  ;;  %v15400_v58 = vld [vmem:[#allocation15_spill] sm:$0xff]  ;;  %v15402_v32 = vld [vmem:[#allocation16_spill] sm:$0xff] }
 0x7e4   :  { %7773 = vst [vmem:[#allocation2 + $0x3f8] sm:$0xff] %v7645_v4   ;;  %v11945_v4 = vmul.f32 %v11897_v45, %v15385_v23  ;;  %v15396_v23 = vld [vmem:[#allocation13_spill] sm:$0xff]  ;;  %v11977_v26 = vmul.f32 %v11897_v45, %v15400_v58  ;;  %v11981_v51 = vmul.f32 %v11897_v45, %v15402_v32 }
 0x7e5   :  { %15393 = vst [vmem:[#allocation157_spill] sm:$0xff] %v11961_v49  ;;  %v11969_v60 = vmul.f32 %v11897_v45, %v15396_v23  ;;  %v15404_v49 = vld [vmem:[#allocation17_spill] sm:$0xff] }
 0x7e6   :  { %15395 = vst [vmem:[#allocation159_spill] sm:$0xff] %v11965_v18  ;;  %v11985_v53 = vmul.f32 %v11897_v45, %v15404_v49  ;;  %v15406_v18 = vld [vmem:[#allocation18_spill] sm:$0xff] }
 0x7e7   :  { %15397 = vst [vmem:[#allocation161_spill] sm:$0xff] %v11969_v60  ;;  %v11989_v23 = vmul.f32 %v11897_v45, %v15406_v18  ;;  %v15408_v60 = vld [vmem:[#allocation19_spill] sm:$0xff] }
 0x7e8   :  { %15399 = vst [vmem:[#allocation165_spill] sm:$0xff] %v11973_v41  ;;  %v11993_v50 = vmul.f32 %v11897_v45, %v15408_v60  ;;  %v15410_v41 = vld [vmem:[#allocation20_spill] sm:$0xff] }
 0x7e9   :  { %15401 = vst [vmem:[#allocation167_spill] sm:$0xff] %v11977_v26  ;;  %v11997_v58 = vmul.f32 %v11897_v45, %v15410_v41  ;;  %v15412_v26 = vld [vmem:[#allocation21_spill] sm:$0xff] }
 0x7ea   :  { %15403 = vst [vmem:[#allocation169_spill] sm:$0xff] %v11981_v51  ;;  %v12001_v32 = vmul.f32 %v11897_v45, %v15412_v26  ;;  %v15414_v51 = vld [vmem:[#allocation22_spill] sm:$0xff] }
 0x7eb   :  { %15405 = vst [vmem:[#allocation171_spill] sm:$0xff] %v11985_v53  ;;  %v12005_v49 = vmul.f32 %v11897_v45, %v15414_v51  ;;  %v15416_v53 = vld [vmem:[#allocation23_spill] sm:$0xff] }
 0x7ec   :  { %15407 = vst [vmem:[#allocation194_spill] sm:$0xff] %v11989_v23  ;;  %v12009_v18 = vmul.f32 %v11897_v45, %v15416_v53  ;;  %v15418_v23 = vld [vmem:[#allocation24_spill] sm:$0xff] }
 0x7ed   :  { %15409 = vst [vmem:[#allocation196_spill] sm:$0xff] %v11993_v50  ;;  %v12013_v60 = vmul.f32 %v11897_v45, %v15418_v23  ;;  %v15420_v50 = vld [vmem:[#allocation25_spill] sm:$0xff] }
 0x7ee   :  { %15411 = vst [vmem:[#allocation5_spill] sm:$0xff] %v11997_v58  ;;  %v12017_v41 = vmul.f32 %v11897_v45, %v15420_v50  ;;  %v15422_v58 = vld [vmem:[#allocation26_spill] sm:$0xff] }
 0x7ef   :  { %15413 = vst [vmem:[#allocation6_spill] sm:$0xff] %v12001_v32  ;;  %v12021_v26 = vmul.f32 %v11897_v45, %v15422_v58  ;;  %v15424_v32 = vld [vmem:[#allocation27_spill] sm:$0xff] }
 0x7f0   :  { %15415 = vst [vmem:[#allocation7_spill] sm:$0xff] %v12005_v49  ;;  %v12025_v51 = vmul.f32 %v11897_v45, %v15424_v32  ;;  %v15426_v49 = vld [vmem:[#allocation28_spill] sm:$0xff] }
 0x7f1   :  { %15417 = vst [vmem:[#allocation8_spill] sm:$0xff] %v12009_v18  ;;  %v12029_v53 = vmul.f32 %v11897_v45, %v15426_v49  ;;  %v15428_v18 = vld [vmem:[#allocation29_spill] sm:$0xff] }
 0x7f2   :  { %15419 = vst [vmem:[#allocation9_spill] sm:$0xff] %v12013_v60  ;;  %v12033_v23 = vmul.f32 %v11897_v45, %v15428_v18  ;;  %v15430_v60 = vld [vmem:[#allocation30_spill] sm:$0xff] }
 0x7f3   :  { %15421 = vst [vmem:[#allocation10_spill] sm:$0xff] %v12017_v41  ;;  %v12037_v50 = vmul.f32 %v11897_v45, %v15430_v60  ;;  %v15432_v41 = vld [vmem:[#allocation31_spill] sm:$0xff] }
 0x7f4   :  { %15423 = vst [vmem:[#allocation11_spill] sm:$0xff] %v12021_v26  ;;  %v12041_v58 = vmul.f32 %v11897_v45, %v15432_v41  ;;  %v15434_v26 = vld [vmem:[#allocation33_spill] sm:$0xff] }
 0x7f5   :  { %15425 = vst [vmem:[#allocation12_spill] sm:$0xff] %v12025_v51  ;;  %v12045_v32 = vmul.f32 %v11897_v45, %v15434_v26  ;;  %v15436_v51 = vld [vmem:[#allocation35_spill] sm:$0xff] }
 0x7f6   :  { %15427 = vst [vmem:[#allocation13_spill] sm:$0xff] %v12029_v53  ;;  %v12049_v49 = vmul.f32 %v11897_v45, %v15436_v51  ;;  %v15438_v53 = vld [vmem:[#allocation36_spill] sm:$0xff] }
 0x7f7   :  { %15429 = vst [vmem:[#allocation14_spill] sm:$0xff] %v12033_v23  ;;  %v12053_v18 = vmul.f32 %v11897_v45, %v15438_v53  ;;  %v15440_v23 = vld [vmem:[#allocation38_spill] sm:$0xff] }
 0x7f8   :  { %15431 = vst [vmem:[#allocation15_spill] sm:$0xff] %v12037_v50  ;;  %v12057_v60 = vmul.f32 %v11897_v45, %v15440_v23  ;;  %v15442_v50 = vld [vmem:[#allocation40_spill] sm:$0xff] }
 0x7f9   :  { %15433 = vst [vmem:[#allocation16_spill] sm:$0xff] %v12041_v58  ;;  %v12061_v41 = vmul.f32 %v11897_v45, %v15442_v50  ;;  %v15444_v58 = vld [vmem:[#allocation42_spill] sm:$0xff] }
 0x7fa   :  { %15435 = vst [vmem:[#allocation17_spill] sm:$0xff] %v12045_v32  ;;  %v12065_v26 = vmul.f32 %v11897_v45, %v15444_v58  ;;  %v15446_v32 = vld [vmem:[#allocation44_spill] sm:$0xff] }
 0x7fb   :  { %15437 = vst [vmem:[#allocation18_spill] sm:$0xff] %v12049_v49  ;;  %v12069_v51 = vmul.f32 %v11897_v45, %v15446_v32  ;;  %v15448_v49 = vld [vmem:[#allocation46_spill] sm:$0xff] }
 0x7fc   :  { %15439 = vst [vmem:[#allocation19_spill] sm:$0xff] %v12053_v18  ;;  %v12073_v53 = vmul.f32 %v11897_v45, %v15448_v49  ;;  %v15450_v18 = vld [vmem:[#allocation48_spill] sm:$0xff] }
 0x7fd   :  { %15441 = vst [vmem:[#allocation20_spill] sm:$0xff] %v12057_v60  ;;  %v12077_v23 = vmul.f32 %v11897_v45, %v15450_v18  ;;  %v15452_v60 = vld [vmem:[#allocation50_spill] sm:$0xff] }
 0x7fe   :  { %15443 = vst [vmem:[#allocation21_spill] sm:$0xff] %v12061_v41  ;;  %v12081_v50 = vmul.f32 %v11897_v45, %v15452_v60  ;;  %v15454_v41 = vld [vmem:[#allocation52_spill] sm:$0xff] }
 0x7ff   :  { %15445 = vst [vmem:[#allocation22_spill] sm:$0xff] %v12065_v26  ;;  %v12085_v58 = vmul.f32 %v11897_v45, %v15454_v41  ;;  %v15456_v26 = vld [vmem:[#allocation54_spill] sm:$0xff] }
 0x800   :  { %15447 = vst [vmem:[#allocation23_spill] sm:$0xff] %v12069_v51  ;;  %v12089_v32 = vmul.f32 %v11897_v45, %v15456_v26  ;;  %v15458_v51 = vld [vmem:[#allocation56_spill] sm:$0xff] }
 0x801   :  { %15449 = vst [vmem:[#allocation24_spill] sm:$0xff] %v12073_v53  ;;  %v12093_v49 = vmul.f32 %v11897_v45, %v15458_v51  ;;  %v15460_v53 = vld [vmem:[#allocation58_spill] sm:$0xff] }
 0x802   :  { %15451 = vst [vmem:[#allocation25_spill] sm:$0xff] %v12077_v23  ;;  %v12097_v18 = vmul.f32 %v11897_v45, %v15460_v53  ;;  %v15462_v23 = vld [vmem:[#allocation60_spill] sm:$0xff] }
 0x803   :  { %15453 = vst [vmem:[#allocation26_spill] sm:$0xff] %v12081_v50  ;;  %v12101_v60 = vmul.f32 %v11897_v45, %v15462_v23  ;;  %v15464_v50 = vld [vmem:[#allocation62_spill] sm:$0xff] }
 0x804   :  { %15455 = vst [vmem:[#allocation27_spill] sm:$0xff] %v12085_v58  ;;  %v12105_v41 = vmul.f32 %v11897_v45, %v15464_v50  ;;  %v15466_v58 = vld [vmem:[#allocation64_spill] sm:$0xff] }
 0x805   :  { %15457 = vst [vmem:[#allocation28_spill] sm:$0xff] %v12089_v32  ;;  %v12109_v26 = vmul.f32 %v11897_v45, %v15466_v58  ;;  %v15468_v32 = vld [vmem:[#allocation66_spill] sm:$0xff] }
 0x806   :  { %15459 = vst [vmem:[#allocation29_spill] sm:$0xff] %v12093_v49  ;;  %v12113_v51 = vmul.f32 %v11897_v45, %v15468_v32  ;;  %v15470_v49 = vld [vmem:[#allocation68_spill] sm:$0xff] }
 0x807   :  { %15461 = vst [vmem:[#allocation30_spill] sm:$0xff] %v12097_v18  ;;  %v12117_v53 = vmul.f32 %v11897_v45, %v15470_v49  ;;  %v15472_v18 = vld [vmem:[#allocation70_spill] sm:$0xff] }
 0x808   :  { %15463 = vst [vmem:[#allocation31_spill] sm:$0xff] %v12101_v60  ;;  %v12121_v23 = vmul.f32 %v11897_v45, %v15472_v18  ;;  %v15474_v60 = vld [vmem:[#allocation72_spill] sm:$0xff] }
 0x809   :  { %15465 = vst [vmem:[#allocation33_spill] sm:$0xff] %v12105_v41  ;;  %v12125_v50 = vmul.f32 %v11897_v45, %v15474_v60  ;;  %v15476_v41 = vld [vmem:[#allocation74_spill] sm:$0xff] }
 0x80a   :  { %15467 = vst [vmem:[#allocation35_spill] sm:$0xff] %v12109_v26  ;;  %v12129_v58 = vmul.f32 %v11897_v45, %v15476_v41  ;;  %v15478_v26 = vld [vmem:[#allocation76_spill] sm:$0xff] }
 0x80b   :  { %15469 = vst [vmem:[#allocation36_spill] sm:$0xff] %v12113_v51  ;;  %v12133_v32 = vmul.f32 %v11897_v45, %v15478_v26  ;;  %v15480_v51 = vld [vmem:[#allocation78_spill] sm:$0xff] }
 0x80c   :  { %15471 = vst [vmem:[#allocation38_spill] sm:$0xff] %v12117_v53  ;;  %v12137_v49 = vmul.f32 %v11897_v45, %v15480_v51  ;;  %v15482_v53 = vld [vmem:[#allocation80_spill] sm:$0xff] }
 0x80d   :  { %15473 = vst [vmem:[#allocation40_spill] sm:$0xff] %v12121_v23  ;;  %v12141_v18 = vmul.f32 %v11897_v45, %v15482_v53  ;;  %v15484_v23 = vld [vmem:[#allocation82_spill] sm:$0xff] }
 0x80e   :  { %15475 = vst [vmem:[#allocation42_spill] sm:$0xff] %v12125_v50  ;;  %v12145_v60 = vmul.f32 %v11897_v45, %v15484_v23  ;;  %v15486_v50 = vld [vmem:[#allocation84_spill] sm:$0xff] }
 0x80f   :  { %15477 = vst [vmem:[#allocation44_spill] sm:$0xff] %v12129_v58  ;;  %v12149_v41 = vmul.f32 %v11897_v45, %v15486_v50  ;;  %v15488_v58 = vld [vmem:[#allocation86_spill] sm:$0xff] }
 0x810   :  { %15479 = vst [vmem:[#allocation46_spill] sm:$0xff] %v12133_v32  ;;  %v12153_v26 = vmul.f32 %v11897_v45, %v15488_v58  ;;  %v15490_v32 = vld [vmem:[#allocation88_spill] sm:$0xff] }
 0x811   :  { %15481 = vst [vmem:[#allocation48_spill] sm:$0xff] %v12137_v49  ;;  %v12157_v51 = vmul.f32 %v11897_v45, %v15490_v32  ;;  %v15492_v49 = vld [vmem:[#allocation90_spill] sm:$0xff] }
 0x812   :  { %15483 = vst [vmem:[#allocation50_spill] sm:$0xff] %v12141_v18  ;;  %v12161_v53 = vmul.f32 %v11897_v45, %v15492_v49  ;;  %v15494_v18 = vld [vmem:[#allocation92_spill] sm:$0xff] }
 0x813   :  { %15485 = vst [vmem:[#allocation52_spill] sm:$0xff] %v12145_v60  ;;  %v12165_v23 = vmul.f32 %v11897_v45, %v15494_v18  ;;  %v15496_v60 = vld [vmem:[#allocation94_spill] sm:$0xff] }
 0x814   :  { %15487 = vst [vmem:[#allocation54_spill] sm:$0xff] %v12149_v41  ;;  %v12169_v50 = vmul.f32 %v11897_v45, %v15496_v60  ;;  %v15498_v41 = vld [vmem:[#allocation96_spill] sm:$0xff] }
 0x815   :  { %15489 = vst [vmem:[#allocation56_spill] sm:$0xff] %v12153_v26  ;;  %v12173_v58 = vmul.f32 %v11897_v45, %v15498_v41  ;;  %v15500_v26 = vld [vmem:[#allocation98_spill] sm:$0xff] }
 0x816   :  { %15491 = vst [vmem:[#allocation58_spill] sm:$0xff] %v12157_v51  ;;  %v12177_v32 = vmul.f32 %v11897_v45, %v15500_v26  ;;  %v15502_v51 = vld [vmem:[#allocation100_spill] sm:$0xff] }
 0x817   :  { %15493 = vst [vmem:[#allocation60_spill] sm:$0xff] %v12161_v53  ;;  %v12181_v49 = vmul.f32 %v11897_v45, %v15502_v51  ;;  %v15504_v53 = vld [vmem:[#allocation102_spill] sm:$0xff] }
 0x818   :  { %15495 = vst [vmem:[#allocation62_spill] sm:$0xff] %v12165_v23  ;;  %v12185_v18 = vmul.f32 %v11897_v45, %v15504_v53  ;;  %v15506_v23 = vld [vmem:[#allocation104_spill] sm:$0xff] }
 0x819   :  { %15497 = vst [vmem:[#allocation64_spill] sm:$0xff] %v12169_v50  ;;  %v12189_v60 = vmul.f32 %v11897_v45, %v15506_v23  ;;  %v15508_v50 = vld [vmem:[#allocation106_spill] sm:$0xff] }
 0x81a   :  { %15499 = vst [vmem:[#allocation66_spill] sm:$0xff] %v12173_v58  ;;  %v12193_v41 = vmul.f32 %v11897_v45, %v15508_v50  ;;  %v15510_v58 = vld [vmem:[#allocation108_spill] sm:$0xff] }
 0x81b   :  { %15501 = vst [vmem:[#allocation68_spill] sm:$0xff] %v12177_v32  ;;  %v12197_v26 = vmul.f32 %v11897_v45, %v15510_v58  ;;  %v15512_v32 = vld [vmem:[#allocation110_spill] sm:$0xff] }
 0x81c   :  { %15503 = vst [vmem:[#allocation70_spill] sm:$0xff] %v12181_v49  ;;  %v12201_v51 = vmul.f32 %v11897_v45, %v15512_v32  ;;  %v15514_v49 = vld [vmem:[#allocation112_spill] sm:$0xff] }
 0x81d   :  { %15505 = vst [vmem:[#allocation72_spill] sm:$0xff] %v12185_v18  ;;  %v12205_v53 = vmul.f32 %v11897_v45, %v15514_v49  ;;  %v15516_v18 = vld [vmem:[#allocation114_spill] sm:$0xff] }
 0x81e   :  { %15507 = vst [vmem:[#allocation74_spill] sm:$0xff] %v12189_v60  ;;  %v12209_v23 = vmul.f32 %v11897_v45, %v15516_v18  ;;  %v15518_v60 = vld [vmem:[#allocation116_spill] sm:$0xff] }
 0x81f   :  { %15509 = vst [vmem:[#allocation76_spill] sm:$0xff] %v12193_v41  ;;  %v12213_v50 = vmul.f32 %v11897_v45, %v15518_v60  ;;  %v15520_v41 = vld [vmem:[#allocation118_spill] sm:$0xff] }
 0x820   :  { %15511 = vst [vmem:[#allocation78_spill] sm:$0xff] %v12197_v26  ;;  %v12217_v58 = vmul.f32 %v11897_v45, %v15520_v41  ;;  %v15522_v26 = vld [vmem:[#allocation120_spill] sm:$0xff] }
 0x821   :  { %15513 = vst [vmem:[#allocation80_spill] sm:$0xff] %v12201_v51  ;;  %v12221_v32 = vmul.f32 %v11897_v45, %v15522_v26  ;;  %v15524_v51 = vld [vmem:[#allocation122_spill] sm:$0xff] }
 0x822   :  { %15515 = vst [vmem:[#allocation82_spill] sm:$0xff] %v12205_v53  ;;  %v12225_v49 = vmul.f32 %v11897_v45, %v15524_v51  ;;  %v15526_v53 = vld [vmem:[#allocation124_spill] sm:$0xff] }
 0x823   :  { %15517 = vst [vmem:[#allocation84_spill] sm:$0xff] %v12209_v23  ;;  %v12229_v18 = vmul.f32 %v11897_v45, %v15526_v53  ;;  %v15528_v23 = vld [vmem:[#allocation126_spill] sm:$0xff] }
 0x824   :  { %15519 = vst [vmem:[#allocation86_spill] sm:$0xff] %v12213_v50  ;;  %v12233_v60 = vmul.f32 %v11897_v45, %v15528_v23  ;;  %v15530_v50 = vld [vmem:[#allocation128_spill] sm:$0xff] }
 0x825   :  { %15521 = vst [vmem:[#allocation88_spill] sm:$0xff] %v12217_v58  ;;  %v12237_v41 = vmul.f32 %v11897_v45, %v15530_v50  ;;  %v15532_v58 = vld [vmem:[#allocation130_spill] sm:$0xff] }
 0x826   :  { %15523 = vst [vmem:[#allocation90_spill] sm:$0xff] %v12221_v32  ;;  %v12241_v26 = vmul.f32 %v11897_v45, %v15532_v58  ;;  %v15534_v32 = vld [vmem:[#allocation132_spill] sm:$0xff] }
 0x827   :  { %15525 = vst [vmem:[#allocation92_spill] sm:$0xff] %v12225_v49  ;;  %v12245_v51 = vmul.f32 %v11897_v45, %v15534_v32  ;;  %v15536_v49 = vld [vmem:[#allocation134_spill] sm:$0xff] }
 0x828   :  { %15527 = vst [vmem:[#allocation94_spill] sm:$0xff] %v12229_v18  ;;  %v12249_v53 = vmul.f32 %v11897_v45, %v15536_v49  ;;  %v15538_v18 = vld [vmem:[#allocation136_spill] sm:$0xff] }
 0x829   :  { %15529 = vst [vmem:[#allocation96_spill] sm:$0xff] %v12233_v60  ;;  %v12253_v23 = vmul.f32 %v11897_v45, %v15538_v18  ;;  %v15540_v60 = vld [vmem:[#allocation138_spill] sm:$0xff] }
 0x82a   :  { %15531 = vst [vmem:[#allocation98_spill] sm:$0xff] %v12237_v41  ;;  %v12257_v50 = vmul.f32 %v11897_v45, %v15540_v60  ;;  %v15542_v41 = vld [vmem:[#allocation140_spill] sm:$0xff] }
 0x82b   :  { %15533 = vst [vmem:[#allocation100_spill] sm:$0xff] %v12241_v26  ;;  %v12261_v58 = vmul.f32 %v11897_v45, %v15542_v41  ;;  %v15544_v26 = vld [vmem:[#allocation142_spill] sm:$0xff] }
 0x82c   :  { %15535 = vst [vmem:[#allocation102_spill] sm:$0xff] %v12245_v51  ;;  %v12265_v32 = vmul.f32 %v11897_v45, %v15544_v26  ;;  %v15546_v51 = vld [vmem:[#allocation144_spill] sm:$0xff] }
 0x82d   :  { %15537 = vst [vmem:[#allocation104_spill] sm:$0xff] %v12249_v53  ;;  %v12269_v49 = vmul.f32 %v11897_v45, %v15546_v51  ;;  %v15548_v53 = vld [vmem:[#allocation146_spill] sm:$0xff] }
 0x82e   :  { %15539 = vst [vmem:[#allocation106_spill] sm:$0xff] %v12253_v23  ;;  %v12273_v18 = vmul.f32 %v11897_v45, %v15548_v53  ;;  %v15550_v23 = vld [vmem:[#allocation148_spill] sm:$0xff] }
 0x82f   :  { %15541 = vst [vmem:[#allocation108_spill] sm:$0xff] %v12257_v50  ;;  %v12277_v60 = vmul.f32 %v11897_v45, %v15550_v23  ;;  %v15552_v50 = vld [vmem:[#allocation150_spill] sm:$0xff] }
 0x830   :  { %15543 = vst [vmem:[#allocation110_spill] sm:$0xff] %v12261_v58  ;;  %v12281_v41 = vmul.f32 %v11897_v45, %v15552_v50  ;;  %v15554_v58 = vld [vmem:[#allocation152_spill] sm:$0xff] }
 0x831   :  { %15545 = vst [vmem:[#allocation112_spill] sm:$0xff] %v12265_v32  ;;  %v12285_v26 = vmul.f32 %v11897_v45, %v15554_v58  ;;  %v15556_v32 = vld [vmem:[#allocation154_spill] sm:$0xff] }
 0x832   :  { %15547 = vst [vmem:[#allocation114_spill] sm:$0xff] %v12269_v49  ;;  %v12289_v51 = vmul.f32 %v11897_v45, %v15556_v32  ;;  %v15558_v49 = vld [vmem:[#allocation156_spill] sm:$0xff] }
 0x833   :  { %15549 = vst [vmem:[#allocation116_spill] sm:$0xff] %v12273_v18  ;;  %v12293_v53 = vmul.f32 %v11897_v45, %v15558_v49  ;;  %v15560_v18 = vld [vmem:[#allocation158_spill] sm:$0xff] }
 0x834   :  { %15551 = vst [vmem:[#allocation118_spill] sm:$0xff] %v12277_v60  ;;  %v12297_v23 = vmul.f32 %v11897_v45, %v15560_v18  ;;  %v15562_v60 = vld [vmem:[#allocation160_spill] sm:$0xff] }
 0x835   :  { %15553 = vst [vmem:[#allocation120_spill] sm:$0xff] %v12281_v41  ;;  %v12301_v50 = vmul.f32 %v11897_v45, %v15562_v60  ;;  %v15564_v41 = vld [vmem:[#allocation162_spill] sm:$0xff] }
 0x836   :  { %15555 = vst [vmem:[#allocation122_spill] sm:$0xff] %v12285_v26  ;;  %v12305_v58 = vmul.f32 %v11897_v45, %v15564_v41  ;;  %v15566_v26 = vld [vmem:[#allocation164_spill] sm:$0xff] }
 0x837   :  { %15557 = vst [vmem:[#allocation124_spill] sm:$0xff] %v12289_v51  ;;  %v12309_v32 = vmul.f32 %v11897_v45, %v15566_v26  ;;  %v15568_v51 = vld [vmem:[#allocation166_spill] sm:$0xff] }
 0x838   :  { %15559 = vst [vmem:[#allocation126_spill] sm:$0xff] %v12293_v53  ;;  %v12313_v49 = vmul.f32 %v11897_v45, %v15568_v51  ;;  %v15570_v53 = vld [vmem:[#allocation168_spill] sm:$0xff] }
 0x839   :  { %15561 = vst [vmem:[#allocation128_spill] sm:$0xff] %v12297_v23  ;;  %v12317_v18 = vmul.f32 %v11897_v45, %v15570_v53  ;;  %v15572_v23 = vld [vmem:[#allocation170_spill] sm:$0xff] }
 0x83a   :  { %15563 = vst [vmem:[#allocation130_spill] sm:$0xff] %v12301_v50  ;;  %v12321_v60 = vmul.f32 %v11897_v45, %v15572_v23  ;;  %v15574_v50 = vld [vmem:[#allocation172_spill] sm:$0xff] }
 0x83b   :  { %15565 = vst [vmem:[#allocation132_spill] sm:$0xff] %v12305_v58  ;;  %v12325_v41 = vmul.f32 %v11897_v45, %v15574_v50  ;;  %v15576_v58 = vld [vmem:[#allocation173_spill] sm:$0xff] }
 0x83c   :  { %15567 = vst [vmem:[#allocation134_spill] sm:$0xff] %v12309_v32  ;;  %v12329_v26 = vmul.f32 %v11897_v45, %v15576_v58  ;;  %v15578_v32 = vld [vmem:[#allocation174_spill] sm:$0xff] }
 0x83d   :  { %15569 = vst [vmem:[#allocation136_spill] sm:$0xff] %v12313_v49  ;;  %v12333_v51 = vmul.f32 %v11897_v45, %v15578_v32  ;;  %v15580_v49 = vld [vmem:[#allocation175_spill] sm:$0xff] }
 0x83e   :  { %15571 = vst [vmem:[#allocation138_spill] sm:$0xff] %v12317_v18  ;;  %v12337_v53 = vmul.f32 %v11897_v45, %v15580_v49  ;;  %v15582_v18 = vld [vmem:[#allocation176_spill] sm:$0xff] }
 0x83f   :  { %15573 = vst [vmem:[#allocation140_spill] sm:$0xff] %v12321_v60  ;;  %v12341_v23 = vmul.f32 %v11897_v45, %v15582_v18  ;;  %v15584_v60 = vld [vmem:[#allocation177_spill] sm:$0xff] }
 0x840   :  { %15575 = vst [vmem:[#allocation142_spill] sm:$0xff] %v12325_v41  ;;  %v12345_v50 = vmul.f32 %v11897_v45, %v15584_v60  ;;  %v15586_v41 = vld [vmem:[#allocation178_spill] sm:$0xff] }
 0x841   :  { %15577 = vst [vmem:[#allocation144_spill] sm:$0xff] %v12329_v26  ;;  %v12349_v58 = vmul.f32 %v11897_v45, %v15586_v41  ;;  %v15588_v26 = vld [vmem:[#allocation179_spill] sm:$0xff] }
 0x842   :  { %15579 = vst [vmem:[#allocation146_spill] sm:$0xff] %v12333_v51  ;;  %v12353_v32 = vmul.f32 %v11897_v45, %v15588_v26  ;;  %v15590_v51 = vld [vmem:[#allocation180_spill] sm:$0xff] }
 0x843   :  { %15581 = vst [vmem:[#allocation148_spill] sm:$0xff] %v12337_v53  ;;  %v12357_v49 = vmul.f32 %v11897_v45, %v15590_v51  ;;  %v15592_v53 = vld [vmem:[#allocation181_spill] sm:$0xff] }
 0x844   :  { %15583 = vst [vmem:[#allocation150_spill] sm:$0xff] %v12341_v23  ;;  %v12361_v18 = vmul.f32 %v11897_v45, %v15592_v53  ;;  %v15594_v23 = vld [vmem:[#allocation183_spill] sm:$0xff] }
 0x845   :  { %15585 = vst [vmem:[#allocation152_spill] sm:$0xff] %v12345_v50  ;;  %v12365_v60 = vmul.f32 %v11897_v45, %v15594_v23  ;;  %v15596_v50 = vld [vmem:[#allocation185_spill] sm:$0xff] }
 0x846   :  { %15587 = vst [vmem:[#allocation154_spill] sm:$0xff] %v12349_v58  ;;  %v12369_v41 = vmul.f32 %v11897_v45, %v15596_v50  ;;  %v15598_v58 = vld [vmem:[#allocation186_spill] sm:$0xff] }
 0x847   :  { %15589 = vst [vmem:[#allocation156_spill] sm:$0xff] %v12353_v32  ;;  %v12373_v26 = vmul.f32 %v11897_v45, %v15598_v58  ;;  %v15600_v32 = vld [vmem:[#allocation187_spill] sm:$0xff] }
 0x848   :  { %15591 = vst [vmem:[#allocation158_spill] sm:$0xff] %v12357_v49  ;;  %v12377_v51 = vmul.f32 %v11897_v45, %v15600_v32  ;;  %v15602_v49 = vld [vmem:[#allocation188_spill] sm:$0xff] }
 0x849   :  { %15593 = vst [vmem:[#allocation160_spill] sm:$0xff] %v12361_v18  ;;  %v12381_v53 = vmul.f32 %v11897_v45, %v15602_v49  ;;  %v15604_v18 = vld [vmem:[#allocation189_spill] sm:$0xff] }
 0x84a   :  { %15595 = vst [vmem:[#allocation162_spill] sm:$0xff] %v12365_v60  ;;  %v12385_v23 = vmul.f32 %v11897_v45, %v15604_v18  ;;  %v15606_v60 = vld [vmem:[#allocation190_spill] sm:$0xff] }
 0x84b   :  { %15597 = vst [vmem:[#allocation164_spill] sm:$0xff] %v12369_v41  ;;  %v12389_v50 = vmul.f32 %v11897_v45, %v15606_v60  ;;  %v15608_v41 = vld [vmem:[#allocation191_spill] sm:$0xff] }
 0x84c   :  { %15599 = vst [vmem:[#allocation166_spill] sm:$0xff] %v12373_v26  ;;  %v12393_v58 = vmul.f32 %v11897_v45, %v15608_v41  ;;  %v15610_v26 = vld [vmem:[#allocation192_spill] sm:$0xff] }
 0x84d   :  { %15601 = vst [vmem:[#allocation168_spill] sm:$0xff] %v12377_v51  ;;  %v12397_v32 = vmul.f32 %v11897_v45, %v15610_v26  ;;  %v15612_v51 = vld [vmem:[#allocation193_spill] sm:$0xff] }
 0x84e   :  { %15603 = vst [vmem:[#allocation170_spill] sm:$0xff] %v12381_v53  ;;  %v12401_v49 = vmul.f32 %v11897_v45, %v15612_v51  ;;  %v15614_v53 = vld [vmem:[#allocation199_spill] sm:$0xff] }
 0x84f   :  { %15605 = vst [vmem:[#allocation172_spill] sm:$0xff] %v12385_v23  ;;  %v12405_v18 = vmul.f32 %v11897_v45, %v15614_v53  ;;  %v15616_v23 = vld [vmem:[#allocation200_spill] sm:$0xff] }
 0x850   :  { %15607 = vst [vmem:[#allocation173_spill] sm:$0xff] %v12389_v50  ;;  %v12409_v60 = vmul.f32 %v11897_v45, %v15616_v23  ;;  %v15618_v50 = vld [vmem:[#allocation201_spill] sm:$0xff] }
 0x851   :  { %15609 = vst [vmem:[#allocation174_spill] sm:$0xff] %v12393_v58  ;;  %v12413_v41 = vmul.f32 %v11897_v45, %v15618_v50  ;;  %v15620_v58 = vld [vmem:[#allocation202_spill] sm:$0xff] }
 0x852   :  { %15611 = vst [vmem:[#allocation175_spill] sm:$0xff] %v12397_v32  ;;  %v12417_v26 = vmul.f32 %v11897_v45, %v15620_v58  ;;  %v15622_v32 = vld [vmem:[#allocation203_spill] sm:$0xff] }
 0x853   :  { %15613 = vst [vmem:[#allocation176_spill] sm:$0xff] %v12401_v49  ;;  %v12421_v51 = vmul.f32 %v11897_v45, %v15622_v32  ;;  %v15624_v49 = vld [vmem:[#allocation204_spill] sm:$0xff] }
 0x854   :  { %15615 = vst [vmem:[#allocation177_spill] sm:$0xff] %v12405_v18  ;;  %v12425_v53 = vmul.f32 %v11897_v45, %v15624_v49  ;;  %v15626_v18 = vld [vmem:[#allocation205_spill] sm:$0xff] }
 0x855   :  { %15617 = vst [vmem:[#allocation178_spill] sm:$0xff] %v12409_v60  ;;  %v12429_v23 = vmul.f32 %v11897_v45, %v15626_v18  ;;  %v15628_v60 = vld [vmem:[#allocation206_spill] sm:$0xff] }
 0x856   :  { %15619 = vst [vmem:[#allocation179_spill] sm:$0xff] %v12413_v41  ;;  %v12433_v50 = vmul.f32 %v11897_v45, %v15628_v60  ;;  %v15630_v41 = vld [vmem:[#allocation208_spill] sm:$0xff] }
 0x857   :  { %15621 = vst [vmem:[#allocation180_spill] sm:$0xff] %v12417_v26  ;;  %v12437_v58 = vmul.f32 %v11897_v45, %v15630_v41  ;;  %v15632_v26 = vld [vmem:[#allocation209_spill] sm:$0xff] }
 0x858   :  { %15623 = vst [vmem:[#allocation181_spill] sm:$0xff] %v12421_v51  ;;  %v12441_v32 = vmul.f32 %v11897_v45, %v15632_v26  ;;  %v15634_v51 = vld [vmem:[#allocation210_spill] sm:$0xff] }
 0x859   :  { %15625 = vst [vmem:[#allocation183_spill] sm:$0xff] %v12425_v53  ;;  %v12445_v49 = vmul.f32 %v11897_v45, %v15634_v51  ;;  %v15636_v53 = vld [vmem:[#allocation32_spill] sm:$0xff] }
 0x85a   :  { %15627 = vst [vmem:[#allocation185_spill] sm:$0xff] %v12429_v23  ;;  %v12449_v18 = vmul.f32 %v11897_v45, %v15636_v53  ;;  %v15638_v23 = vld [vmem:[#allocation34_spill] sm:$0xff] }
 0x85b   :  { %15629 = vst [vmem:[#allocation186_spill] sm:$0xff] %v12433_v50  ;;  %v12453_v60 = vmul.f32 %v11897_v45, %v15638_v23  ;;  %v15640_v50 = vld [vmem:[#allocation37_spill] sm:$0xff] }
 0x85c   :  { %15631 = vst [vmem:[#allocation187_spill] sm:$0xff] %v12437_v58  ;;  %v12457_v41 = vmul.f32 %v11897_v45, %v15640_v50  ;;  %v15642_v58 = vld [vmem:[#allocation39_spill] sm:$0xff] }
 0x85d   :  { %15633 = vst [vmem:[#allocation188_spill] sm:$0xff] %v12441_v32  ;;  %v12461_v26 = vmul.f32 %v11897_v45, %v15642_v58  ;;  %v15644_v32 = vld [vmem:[#allocation41_spill] sm:$0xff] }
 0x85e   :  { %15635 = vst [vmem:[#allocation189_spill] sm:$0xff] %v12445_v49  ;;  %v12465_v51 = vmul.f32 %v11897_v45, %v15644_v32  ;;  %v15646_v49 = vld [vmem:[#allocation43_spill] sm:$0xff] }
 0x85f   :  { %15637 = vst [vmem:[#allocation190_spill] sm:$0xff] %v12449_v18  ;;  %v12469_v53 = vmul.f32 %v11897_v45, %v15646_v49  ;;  %v15648_v18 = vld [vmem:[#allocation45_spill] sm:$0xff] }
 0x860   :  { %15639 = vst [vmem:[#allocation191_spill] sm:$0xff] %v12453_v60  ;;  %v12473_v23 = vmul.f32 %v11897_v45, %v15648_v18  ;;  %v15650_v60 = vld [vmem:[#allocation47_spill] sm:$0xff] }
 0x861   :  { %15641 = vst [vmem:[#allocation192_spill] sm:$0xff] %v12457_v41  ;;  %v12477_v50 = vmul.f32 %v11897_v45, %v15650_v60  ;;  %v15652_v41 = vld [vmem:[#allocation49_spill] sm:$0xff] }
 0x862   :  { %15643 = vst [vmem:[#allocation193_spill] sm:$0xff] %v12461_v26  ;;  %v12481_v58 = vmul.f32 %v11897_v45, %v15652_v41  ;;  %v15654_v26 = vld [vmem:[#allocation51_spill] sm:$0xff] }
 0x863   :  { %15645 = vst [vmem:[#allocation199_spill] sm:$0xff] %v12465_v51  ;;  %v12485_v32 = vmul.f32 %v11897_v45, %v15654_v26  ;;  %v15656_v51 = vld [vmem:[#allocation53_spill] sm:$0xff] }
 0x864   :  { %15647 = vst [vmem:[#allocation200_spill] sm:$0xff] %v12469_v53  ;;  %v12489_v49 = vmul.f32 %v11897_v45, %v15656_v51  ;;  %v15658_v53 = vld [vmem:[#allocation55_spill] sm:$0xff] }
 0x865   :  { %15649 = vst [vmem:[#allocation201_spill] sm:$0xff] %v12473_v23  ;;  %v12493_v18 = vmul.f32 %v11897_v45, %v15658_v53  ;;  %v15660_v23 = vld [vmem:[#allocation57_spill] sm:$0xff] }
 0x866   :  { %15651 = vst [vmem:[#allocation202_spill] sm:$0xff] %v12477_v50  ;;  %v12497_v60 = vmul.f32 %v11897_v45, %v15660_v23  ;;  %v15662_v50 = vld [vmem:[#allocation59_spill] sm:$0xff] }
 0x867   :  { %15653 = vst [vmem:[#allocation203_spill] sm:$0xff] %v12481_v58  ;;  %v12501_v41 = vmul.f32 %v11897_v45, %v15662_v50  ;;  %v15664_v58 = vld [vmem:[#allocation61_spill] sm:$0xff] }
 0x868   :  { %15655 = vst [vmem:[#allocation204_spill] sm:$0xff] %v12485_v32  ;;  %v12505_v26 = vmul.f32 %v11897_v45, %v15664_v58  ;;  %v15666_v32 = vld [vmem:[#allocation63_spill] sm:$0xff] }
 0x869   :  { %15657 = vst [vmem:[#allocation205_spill] sm:$0xff] %v12489_v49  ;;  %v12509_v51 = vmul.f32 %v11897_v45, %v15666_v32  ;;  %v15668_v49 = vld [vmem:[#allocation65_spill] sm:$0xff] }
 0x86a   :  { %15659 = vst [vmem:[#allocation206_spill] sm:$0xff] %v12493_v18  ;;  %v12513_v53 = vmul.f32 %v11897_v45, %v15668_v49  ;;  %v15670_v18 = vld [vmem:[#allocation67_spill] sm:$0xff] }
 0x86b   :  { %15661 = vst [vmem:[#allocation208_spill] sm:$0xff] %v12497_v60  ;;  %v12517_v23 = vmul.f32 %v11897_v45, %v15670_v18  ;;  %v15672_v60 = vld [vmem:[#allocation69_spill] sm:$0xff] }
 0x86c   :  { %15663 = vst [vmem:[#allocation209_spill] sm:$0xff] %v12501_v41  ;;  %v12521_v50 = vmul.f32 %v11897_v45, %v15672_v60  ;;  %v15674_v41 = vld [vmem:[#allocation71_spill] sm:$0xff] }
 0x86d   :  { %15665 = vst [vmem:[#allocation210_spill] sm:$0xff] %v12505_v26  ;;  %v12525_v58 = vmul.f32 %v11897_v45, %v15674_v41  ;;  %v15676_v26 = vld [vmem:[#allocation73_spill] sm:$0xff] }
 0x86e   :  { %15667 = vst [vmem:[#allocation32_spill] sm:$0xff] %v12509_v51  ;;  %v12529_v32 = vmul.f32 %v11897_v45, %v15676_v26  ;;  %v15678_v51 = vld [vmem:[#allocation75_spill] sm:$0xff] }
 0x86f   :  { %15669 = vst [vmem:[#allocation34_spill] sm:$0xff] %v12513_v53  ;;  %v12533_v49 = vmul.f32 %v11897_v45, %v15678_v51  ;;  %v15680_v53 = vld [vmem:[#allocation77_spill] sm:$0xff] }
 0x870   :  { %15671 = vst [vmem:[#allocation37_spill] sm:$0xff] %v12517_v23  ;;  %v12537_v18 = vmul.f32 %v11897_v45, %v15680_v53  ;;  %v15682_v23 = vld [vmem:[#allocation79_spill] sm:$0xff] }
 0x871   :  { %15673 = vst [vmem:[#allocation39_spill] sm:$0xff] %v12521_v50  ;;  %v12541_v60 = vmul.f32 %v11897_v45, %v15682_v23  ;;  %v15684_v50 = vld [vmem:[#allocation81_spill] sm:$0xff] }
 0x872   :  { %15675 = vst [vmem:[#allocation41_spill] sm:$0xff] %v12525_v58  ;;  %v12545_v41 = vmul.f32 %v11897_v45, %v15684_v50  ;;  %v15686_v58 = vld [vmem:[#allocation83_spill] sm:$0xff] }
 0x873   :  { %15677 = vst [vmem:[#allocation43_spill] sm:$0xff] %v12529_v32  ;;  %v12549_v26 = vmul.f32 %v11897_v45, %v15686_v58  ;;  %v15688_v32 = vld [vmem:[#allocation85_spill] sm:$0xff] }
 0x874   :  { %15679 = vst [vmem:[#allocation45_spill] sm:$0xff] %v12533_v49  ;;  %v12553_v51 = vmul.f32 %v11897_v45, %v15688_v32  ;;  %v15690_v49 = vld [vmem:[#allocation87_spill] sm:$0xff] }
 0x875   :  { %15681 = vst [vmem:[#allocation47_spill] sm:$0xff] %v12537_v18  ;;  %v12557_v53 = vmul.f32 %v11897_v45, %v15690_v49  ;;  %v15692_v18 = vld [vmem:[#allocation89_spill] sm:$0xff] }
 0x876   :  { %15683 = vst [vmem:[#allocation49_spill] sm:$0xff] %v12541_v60  ;;  %v12561_v23 = vmul.f32 %v11897_v45, %v15692_v18  ;;  %v15694_v60 = vld [vmem:[#allocation91_spill] sm:$0xff] }
 0x877   :  { %15685 = vst [vmem:[#allocation51_spill] sm:$0xff] %v12545_v41  ;;  %v12565_v50 = vmul.f32 %v11897_v45, %v15694_v60  ;;  %v15696_v41 = vld [vmem:[#allocation93_spill] sm:$0xff] }
 0x878   :  { %15687 = vst [vmem:[#allocation53_spill] sm:$0xff] %v12549_v26  ;;  %v12569_v58 = vmul.f32 %v11897_v45, %v15696_v41  ;;  %v15698_v26 = vld [vmem:[#allocation95_spill] sm:$0xff] }
 0x879   :  { %15689 = vst [vmem:[#allocation55_spill] sm:$0xff] %v12553_v51  ;;  %v12573_v32 = vmul.f32 %v11897_v45, %v15698_v26  ;;  %v15700_v51 = vld [vmem:[#allocation97_spill] sm:$0xff] }
 0x87a   :  { %15691 = vst [vmem:[#allocation57_spill] sm:$0xff] %v12557_v53  ;;  %v12577_v49 = vmul.f32 %v11897_v45, %v15700_v51  ;;  %v15702_v53 = vld [vmem:[#allocation99_spill] sm:$0xff] }
 0x87b   :  { %15693 = vst [vmem:[#allocation59_spill] sm:$0xff] %v12561_v23  ;;  %v12581_v18 = vmul.f32 %v11897_v45, %v15702_v53  ;;  %v15704_v23 = vld [vmem:[#allocation101_spill] sm:$0xff] }
 0x87c   :  { %15695 = vst [vmem:[#allocation61_spill] sm:$0xff] %v12565_v50  ;;  %v12585_v60 = vmul.f32 %v11897_v45, %v15704_v23  ;;  %v15706_v50 = vld [vmem:[#allocation103_spill] sm:$0xff] }
 0x87d   :  { %15697 = vst [vmem:[#allocation63_spill] sm:$0xff] %v12569_v58  ;;  %v12589_v41 = vmul.f32 %v11897_v45, %v15706_v50  ;;  %v15708_v58 = vld [vmem:[#allocation105_spill] sm:$0xff] }
 0x87e   :  { %15699 = vst [vmem:[#allocation65_spill] sm:$0xff] %v12573_v32  ;;  %v12593_v26 = vmul.f32 %v11897_v45, %v15708_v58  ;;  %v15710_v32 = vld [vmem:[#allocation107_spill] sm:$0xff] }
 0x87f   :  { %15701 = vst [vmem:[#allocation67_spill] sm:$0xff] %v12577_v49  ;;  %v12597_v51 = vmul.f32 %v11897_v45, %v15710_v32  ;;  %v15712_v49 = vld [vmem:[#allocation109_spill] sm:$0xff] }
 0x880   :  { %15703 = vst [vmem:[#allocation69_spill] sm:$0xff] %v12581_v18  ;;  %v12601_v53 = vmul.f32 %v11897_v45, %v15712_v49  ;;  %v15714_v18 = vld [vmem:[#allocation111_spill] sm:$0xff] }
 0x881   :  { %15705 = vst [vmem:[#allocation71_spill] sm:$0xff] %v12585_v60  ;;  %v12605_v23 = vmul.f32 %v11897_v45, %v15714_v18  ;;  %v15716_v60 = vld [vmem:[#allocation113_spill] sm:$0xff] }
 0x882   :  { %15707 = vst [vmem:[#allocation73_spill] sm:$0xff] %v12589_v41  ;;  %v12609_v50 = vmul.f32 %v11897_v45, %v15716_v60  ;;  %v15718_v41 = vld [vmem:[#allocation115_spill] sm:$0xff] }
 0x883   :  { %15709 = vst [vmem:[#allocation75_spill] sm:$0xff] %v12593_v26  ;;  %v12613_v58 = vmul.f32 %v11897_v45, %v15718_v41  ;;  %v15720_v26 = vld [vmem:[#allocation117_spill] sm:$0xff] }
 0x884   :  { %15711 = vst [vmem:[#allocation77_spill] sm:$0xff] %v12597_v51  ;;  %v12617_v32 = vmul.f32 %v11897_v45, %v15720_v26  ;;  %v15722_v51 = vld [vmem:[#allocation119_spill] sm:$0xff] }
 0x885   :  { %15713 = vst [vmem:[#allocation79_spill] sm:$0xff] %v12601_v53  ;;  %v12621_v49 = vmul.f32 %v11897_v45, %v15722_v51  ;;  %v15724_v53 = vld [vmem:[#allocation121_spill] sm:$0xff]  ;;  %v12641_v51 = vmul.f32 %v11897_v45, %v11462_v24  ;;  %v12661_v24 = vmul.f32 %v11897_v45, %v11492_v47  ;;  %v12681_v47 = vmul.f32 %v11897_v45, %v11522_v62 }
 0x886   :  { %15715 = vst [vmem:[#allocation81_spill] sm:$0xff] %v12605_v23  ;;  %v12625_v18 = vmul.f32 %v11897_v45, %v15724_v53  ;;  %v15726_v23 = vld [vmem:[#allocation123_spill] sm:$0xff]  ;;  %v12645_v53 = vmul.f32 %v11897_v45, %v11468_v28  ;;  %v12665_v28 = vmul.f32 %v11897_v45, %v11498_v15  ;;  %v12685_v15 = vmul.f32 %v11897_v45, %v11528_v46 }
 0x887   :  { %15717 = vst [vmem:[#allocation83_spill] sm:$0xff] %v12609_v50  ;;  %v12629_v60 = vmul.f32 %v11897_v45, %v15726_v23  ;;  %v15728_v50 = vld [vmem:[#allocation125_spill] sm:$0xff]  ;;  %v12649_v23 = vmul.f32 %v11897_v45, %v11474_v11  ;;  %v12669_v11 = vmul.f32 %v11897_v45, %v11504_v14  ;;  %v12689_v14 = vmul.f32 %v11897_v45, %v11534_v35 }
 0x888   :  { %15719 = vst [vmem:[#allocation85_spill] sm:$0xff] %v12613_v58  ;;  %v12633_v41 = vmul.f32 %v11897_v45, %v15728_v50  ;;  %v15730_v58 = vld [vmem:[#allocation127_spill] sm:$0xff]  ;;  %v12653_v50 = vmul.f32 %v11897_v45, %v11480_v43  ;;  %v12673_v43 = vmul.f32 %v11897_v45, %v11510_v63  ;;  %v12693_v63 = vmul.f32 %v11897_v45, %v11540_v3 }
 0x889   :  { %15721 = vst [vmem:[#allocation87_spill] sm:$0xff] %v12617_v32  ;;  %v12637_v26 = vmul.f32 %v11897_v45, %v15730_v58  ;;  %v12701_v62 = vmul.f32 %v11897_v45, %v11552_v57  ;;  %v12705_v46 = vmul.f32 %v11897_v45, %v11558_v12  ;;  %v12709_v35 = vmul.f32 %v11897_v45, %v11564_v16  ;;  %v15885_v32 = vld [vmem:[#allocation46_spill] sm:$0xff] }
 0x88a   :  { %15723 = vst [vmem:[#allocation89_spill] sm:$0xff] %v12621_v49  ;;  %v12721_v57 = vmul.f32 %v11897_v45, %v11582_v55  ;;  %v12725_v12 = vmul.f32 %v11897_v45, %v11588_v38  ;;  %v12729_v16 = vmul.f32 %v11897_v45, %v11594_v36  ;;  %v12741_v55 = vmul.f32 %v11897_v45, %v11612_v1  ;;  %v15883_v49 = vld [vmem:[#allocation44_spill] sm:$0xff] }
 0x88b   :  { %15725 = vst [vmem:[#allocation91_spill] sm:$0xff] %v12625_v18  ;;  %v12745_v38 = vmul.f32 %v11897_v45, %v11618_v31  ;;  %v12749_v36 = vmul.f32 %v11897_v45, %v11624_v22  ;;  %v12761_v1 = vmul.f32 %v11897_v45, %v11642_v52  ;;  %v12765_v31 = vmul.f32 %v11897_v45, %v11648_v8  ;;  %v15881_v18 = vld [vmem:[#allocation42_spill] sm:$0xff] }
 0x88c   :  { %15727 = vst [vmem:[#allocation93_spill] sm:$0xff] %v12629_v60  ;;  %v12769_v22 = vmul.f32 %v11897_v45, %v11654_v42  ;;  %v12781_v52 = vmul.f32 %v11897_v45, %v11672_v56  ;;  %v12789_v42 = vmul.f32 %v11897_v45, %v11684_v30  ;;  %v12801_v56 = vmul.f32 %v11897_v45, %v11702_v54  ;;  %v15879_v60 = vld [vmem:[#allocation40_spill] sm:$0xff] }
 0x88d   :  { %15729 = vst [vmem:[#allocation95_spill] sm:$0xff] %v12633_v41  ;;  %v15736_v41 = vld [vmem:[#allocation129_spill] sm:$0xff]  ;;  %v12821_v54 = vmul.f32 %v11897_v45, %v11732_v20  ;;  %v12841_v20 = vmul.f32 %v11897_v45, %v11762_v19  ;;  %v12861_v19 = vmul.f32 %v11897_v45, %v11792_v27 }
 0x88e   :  { %15731 = vst [vmem:[#allocation97_spill] sm:$0xff] %v12637_v26  ;;  %v12657_v58 = vmul.f32 %v11897_v45, %v15736_v41  ;;  %v12677_v41 = vmul.f32 %v11897_v45, %v11516_v10  ;;  %v12697_v10 = vmul.f32 %v11897_v45, %v11546_v2  ;;  %v15877_v26 = vld [vmem:[#allocation38_spill] sm:$0xff] }
 0x88f   :  { %15732 = vst [vmem:[#allocation99_spill] sm:$0xff] %v12641_v51  ;;  %v15875_v51 = vld [vmem:[#allocation36_spill] sm:$0xff] }
 0x890   :  { %15733 = vst [vmem:[#allocation101_spill] sm:$0xff] %v12645_v53  ;;  %v15873_v53 = vld [vmem:[#allocation35_spill] sm:$0xff] }
 0x891   :  { %15734 = vst [vmem:[#allocation103_spill] sm:$0xff] %v12649_v23  ;;  %v15871_v23 = vld [vmem:[#allocation33_spill] sm:$0xff] }
 0x892   :  { %15735 = vst [vmem:[#allocation105_spill] sm:$0xff] %v12653_v50  ;;  %v15870_v50 = vld [vmem:[#allocation31_spill] sm:$0xff] }
 0x893   :  { %15737 = vst [vmem:[#allocation107_spill] sm:$0xff] %v12657_v58  ;;  %v15869_v58 = vld [vmem:[#allocation30_spill] sm:$0xff] }
 0x894   :  { %15738 = vst [vmem:[#allocation109_spill] sm:$0xff] %v12661_v24  ;;  %v15868_v24 = vld [vmem:[#allocation29_spill] sm:$0xff] }
 0x895   :  { %15739 = vst [vmem:[#allocation111_spill] sm:$0xff] %v12665_v28  ;;  %v15867_v28 = vld [vmem:[#allocation28_spill] sm:$0xff] }
 0x896   :  { %15740 = vst [vmem:[#allocation113_spill] sm:$0xff] %v12669_v11  ;;  %v15866_v11 = vld [vmem:[#allocation27_spill] sm:$0xff] }
 0x897   :  { %15741 = vst [vmem:[#allocation115_spill] sm:$0xff] %v12673_v43  ;;  %v15865_v43 = vld [vmem:[#allocation26_spill] sm:$0xff] }
 0x898   :  { %15742 = vst [vmem:[#allocation117_spill] sm:$0xff] %v12677_v41  ;;  %v15864_v41 = vld [vmem:[#allocation25_spill] sm:$0xff] }
 0x899   :  { %15743 = vst [vmem:[#allocation119_spill] sm:$0xff] %v12681_v47  ;;  %v15863_v47 = vld [vmem:[#allocation24_spill] sm:$0xff] }
 0x89a   :  { %15744 = vst [vmem:[#allocation121_spill] sm:$0xff] %v12685_v15  ;;  %v15862_v15 = vld [vmem:[#allocation23_spill] sm:$0xff] }
 0x89b   :  { %15745 = vst [vmem:[#allocation123_spill] sm:$0xff] %v12689_v14  ;;  %v15751_v14 = vld [vmem:[#allocation131_spill] sm:$0xff] }
 0x89c   :  { %15746 = vst [vmem:[#allocation125_spill] sm:$0xff] %v12693_v63  ;;  %v12713_v3 = vmul.f32 %v11897_v45, %v15751_v14  ;;  %v15753_v63 = vld [vmem:[#allocation133_spill] sm:$0xff]  ;;  %v12733_v14 = vmul.f32 %v11897_v45, %v11600_v9  ;;  %v12753_v9 = vmul.f32 %v11897_v45, %v11630_v59 }
 0x89d   :  { %15747 = vst [vmem:[#allocation127_spill] sm:$0xff] %v12697_v10  ;;  %v12717_v2 = vmul.f32 %v11897_v45, %v15753_v63  ;;  %v12737_v63 = vmul.f32 %v11897_v45, %v11606_v17  ;;  %v15861_v10 = vld [vmem:[#allocation22_spill] sm:$0xff] }
 0x89e   :  { %15748 = vst [vmem:[#allocation129_spill] sm:$0xff] %v12701_v62  ;;  %v15860_v62 = vld [vmem:[#allocation21_spill] sm:$0xff] }
 0x89f   :  { %15749 = vst [vmem:[#allocation223_spill] sm:$0xff] %v12705_v46  ;;  %v15859_v46 = vld [vmem:[#allocation20_spill] sm:$0xff] }
 0x8a0   :  { %15750 = vst [vmem:[#allocation224_spill] sm:$0xff] %v12709_v35  ;;  %v15858_v35 = vld [vmem:[#allocation19_spill] sm:$0xff] }
 0x8a1   :  { %15752 = vst [vmem:[#allocation131_spill] sm:$0xff] %v12713_v3  ;;  %v15857_v3 = vld [vmem:[#allocation18_spill] sm:$0xff] }
 0x8a2   :  { %15754 = vst [vmem:[#allocation133_spill] sm:$0xff] %v12717_v2  ;;  %v15856_v2 = vld [vmem:[#allocation17_spill] sm:$0xff] }
 0x8a3   :  { %15755 = vst [vmem:[#allocation225_spill] sm:$0xff] %v12721_v57  ;;  %v15855_v57 = vld [vmem:[#allocation16_spill] sm:$0xff] }
 0x8a4   :  { %15756 = vst [vmem:[#allocation226_spill] sm:$0xff] %v12725_v12  ;;  %v15854_v12 = vld [vmem:[#allocation15_spill] sm:$0xff] }
 0x8a5   :  { %15757 = vst [vmem:[#allocation227_spill] sm:$0xff] %v12729_v16  ;;  %v15853_v16 = vld [vmem:[#allocation14_spill] sm:$0xff] }
 0x8a6   :  { %15758 = vst [vmem:[#allocation228_spill] sm:$0xff] %v12733_v14  ;;  %v15764_v14 = vld [vmem:[#allocation135_spill] sm:$0xff] }
 0x8a7   :  { %15759 = vst [vmem:[#allocation229_spill] sm:$0xff] %v12737_v63  ;;  %v12757_v17 = vmul.f32 %v11897_v45, %v15764_v14  ;;  %v12777_v14 = vmul.f32 %v11897_v45, %v11666_v25  ;;  %v15852_v63 = vld [vmem:[#allocation13_spill] sm:$0xff] }
 0x8a8   :  { %15760 = vst [vmem:[#allocation230_spill] sm:$0xff] %v12741_v55  ;;  %v15851_v55 = vld [vmem:[#allocation12_spill] sm:$0xff] }
 0x8a9   :  { %15761 = vst [vmem:[#allocation231_spill] sm:$0xff] %v12745_v38  ;;  %v15850_v38 = vld [vmem:[#allocation11_spill] sm:$0xff] }
 0x8aa   :  { %15762 = vst [vmem:[#allocation232_spill] sm:$0xff] %v12749_v36  ;;  %v15769_v36 = vld [vmem:[#allocation137_spill] sm:$0xff] }
 0x8ab   :  { %15763 = vst [vmem:[#allocation233_spill] sm:$0xff] %v12753_v9  ;;  %v12773_v59 = vmul.f32 %v11897_v45, %v15769_v36  ;;  %v15849_v9 = vld [vmem:[#allocation10_spill] sm:$0xff] }
 0x8ac   :  { %15765 = vst [vmem:[#allocation135_spill] sm:$0xff] %v12757_v17  ;;  %v15848_v17 = vld [vmem:[#allocation9_spill] sm:$0xff] }
 0x8ad   :  { %15766 = vst [vmem:[#allocation234_spill] sm:$0xff] %v12761_v1  ;;  %v15773_v1 = vld [vmem:[#allocation139_spill] sm:$0xff] }
 0x8ae   :  { %15767 = vst [vmem:[#allocation235_spill] sm:$0xff] %v12765_v31  ;;  %v12785_v8 = vmul.f32 %v11897_v45, %v15773_v1  ;;  %v15847_v31 = vld [vmem:[#allocation8_spill] sm:$0xff] }
 0x8af   :  { %15768 = vst [vmem:[#allocation236_spill] sm:$0xff] %v12769_v22  ;;  %v15776_v22 = vld [vmem:[#allocation141_spill] sm:$0xff] }
 0x8b0   :  { %15770 = vst [vmem:[#allocation137_spill] sm:$0xff] %v12773_v59  ;;  %v12793_v36 = vmul.f32 %v11897_v45, %v15776_v22  ;;  %v15778_v59 = vld [vmem:[#allocation143_spill] sm:$0xff] }
 0x8b1   :  { %15771 = vst [vmem:[#allocation237_spill] sm:$0xff] %v12777_v14  ;;  %v12797_v25 = vmul.f32 %v11897_v45, %v15778_v59  ;;  %v15846_v14 = vld [vmem:[#allocation7_spill] sm:$0xff] }
 0x8b2   :  { %15772 = vst [vmem:[#allocation238_spill] sm:$0xff] %v12781_v52  ;;  %v15781_v52 = vld [vmem:[#allocation145_spill] sm:$0xff] }
 0x8b3   :  { %15774 = vst [vmem:[#allocation139_spill] sm:$0xff] %v12785_v8  ;;  %v12805_v1 = vmul.f32 %v11897_v45, %v15781_v52  ;;  %v15783_v8 = vld [vmem:[#allocation147_spill] sm:$0xff] }
 0x8b4   :  { %15775 = vst [vmem:[#allocation239_spill] sm:$0xff] %v12789_v42  ;;  %v12809_v30 = vmul.f32 %v11897_v45, %v15783_v8  ;;  %v15785_v42 = vld [vmem:[#allocation149_spill] sm:$0xff] }
 0x8b5   :  { %15777 = vst [vmem:[#allocation141_spill] sm:$0xff] %v12793_v36  ;;  %v12813_v22 = vmul.f32 %v11897_v45, %v15785_v42  ;;  %v15787_v36 = vld [vmem:[#allocation151_spill] sm:$0xff] }
 0x8b6   :  { %15779 = vst [vmem:[#allocation143_spill] sm:$0xff] %v12797_v25  ;;  %v12817_v59 = vmul.f32 %v11897_v45, %v15787_v36  ;;  %v15845_v25 = vld [vmem:[#allocation6_spill] sm:$0xff] }
 0x8b7   :  { %15780 = vst [vmem:[#allocation240_spill] sm:$0xff] %v12801_v56  ;;  %v15790_v56 = vld [vmem:[#allocation153_spill] sm:$0xff] }
 0x8b8   :  { %15782 = vst [vmem:[#allocation145_spill] sm:$0xff] %v12805_v1  ;;  %v12825_v52 = vmul.f32 %v11897_v45, %v15790_v56  ;;  %v15792_v1 = vld [vmem:[#allocation163_spill] sm:$0xff]  ;;  %v12845_v56 = vmul.f32 %v11897_v45, %v11768_v5  ;;  %v12865_v5 = vmul.f32 %v11897_v45, %v11798_v21 }
 0x8b9   :  { %15784 = vst [vmem:[#allocation147_spill] sm:$0xff] %v12809_v30  ;;  %v12829_v8 = vmul.f32 %v11897_v45, %v15792_v1  ;;  %v15794_v30 = vld [vmem:[#allocation182_spill] sm:$0xff] }
 0x8ba   :  { %15786 = vst [vmem:[#allocation149_spill] sm:$0xff] %v12813_v22  ;;  %v12833_v42 = vmul.f32 %v11897_v45, %v15794_v30  ;;  %v15796_v22 = vld [vmem:[#allocation184_spill] sm:$0xff] }
 0x8bb   :  { %15788 = vst [vmem:[#allocation151_spill] sm:$0xff] %v12817_v59  ;;  %v12837_v36 = vmul.f32 %v11897_v45, %v15796_v22  ;;  %v15844_v59 = vld [vmem:[#allocation5_spill] sm:$0xff] }
 0x8bc   :  { %15789 = vst [vmem:[#allocation241_spill] sm:$0xff] %v12821_v54  ;;  %v15843_v54 = vld [vmem:[#allocation196_spill] sm:$0xff] }
 0x8bd   :  { %15791 = vst [vmem:[#allocation153_spill] sm:$0xff] %v12825_v52  ;;  %v15800_v52 = vld [vmem:[#allocation195_spill] sm:$0xff] }
 0x8be   :  { %15793 = vst [vmem:[#allocation163_spill] sm:$0xff] %v12829_v8  ;;  %v12849_v1 = vmul.f32 %v11897_v45, %v15800_v52  ;;  %v15802_v8 = vld [vmem:[#allocation197_spill] sm:$0xff]  ;;  %v12869_v52 = vmul.f32 %v11897_v45, %v11804_v44 }
 0x8bf   :  { %15795 = vst [vmem:[#allocation182_spill] sm:$0xff] %v12833_v42  ;;  %v12853_v30 = vmul.f32 %v11897_v45, %v15802_v8  ;;  %v15804_v42 = vld [vmem:[#allocation198_spill] sm:$0xff]  ;;  %v12873_v8 = vmul.f32 %v11897_v45, %v11810_v39 }
 0x8c0   :  { %15797 = vst [vmem:[#allocation184_spill] sm:$0xff] %v12837_v36  ;;  %v12857_v22 = vmul.f32 %v11897_v45, %v15804_v42  ;;  %v15842_v36 = vld [vmem:[#allocation194_spill] sm:$0xff] }
 0x8c1   :  { %15798 = vst [vmem:[#allocation242_spill] sm:$0xff] %v12841_v20  ;;  %v15841_v20 = vld [vmem:[#allocation171_spill] sm:$0xff] }
 0x8c2   :  { %15799 = vst [vmem:[#allocation243_spill] sm:$0xff] %v12845_v56  ;;  %v15840_v56 = vld [vmem:[#allocation169_spill] sm:$0xff] }
 0x8c3   :  { %15801 = vst [vmem:[#allocation195_spill] sm:$0xff] %v12849_v1  ;;  %v15839_v1 = vld [vmem:[#allocation167_spill] sm:$0xff] }
 0x8c4   :  { %15803 = vst [vmem:[#allocation197_spill] sm:$0xff] %v12853_v30  ;;  %v15810_v30 = vld [vmem:[#allocation207_spill] sm:$0xff] }
 0x8c5   :  { %15805 = vst [vmem:[#allocation198_spill] sm:$0xff] %v12857_v22  ;;  %v12877_v42 = vmul.f32 %v11897_v45, %v15810_v30  ;;  %v15812_v22 = vld [vmem:[#allocation211_spill] sm:$0xff] }
 0x8c6   :  { %15806 = vst [vmem:[#allocation244_spill] sm:$0xff] %v12861_v19  ;;  %v12881_v27 = vmul.f32 %v11897_v45, %v15812_v22  ;;  %v15814_v19 = vld [vmem:[#allocation212_spill] sm:$0xff] }
 0x8c7   :  { %15807 = vst [vmem:[#allocation245_spill] sm:$0xff] %v12865_v5  ;;  %v12885_v21 = vmul.f32 %v11897_v45, %v15814_v19  ;;  %v15816_v5 = vld [vmem:[#allocation213_spill] sm:$0xff] }
 0x8c8   :  { %15808 = vst [vmem:[#allocation246_spill] sm:$0xff] %v12869_v52  ;;  %v12889_v44 = vmul.f32 %v11897_v45, %v15816_v5  ;;  %v15818_v52 = vld [vmem:[#allocation214_spill] sm:$0xff] }
 0x8c9   :  { %15809 = vst [vmem:[#allocation247_spill] sm:$0xff] %v12873_v8  ;;  %v12893_v39 = vmul.f32 %v11897_v45, %v15818_v52  ;;  %v15820_v8 = vld [vmem:[#allocation215_spill] sm:$0xff] }
 0x8ca   :  { %15811 = vst [vmem:[#allocation207_spill] sm:$0xff] %v12877_v42  ;;  %v12897_v30 = vmul.f32 %v11897_v45, %v15820_v8  ;;  %v15822_v42 = vld [vmem:[#allocation216_spill] sm:$0xff] }
 0x8cb   :  { %15813 = vst [vmem:[#allocation211_spill] sm:$0xff] %v12881_v27  ;;  %v12901_v22 = vmul.f32 %v11897_v45, %v15822_v42  ;;  %v15824_v27 = vld [vmem:[#allocation217_spill] sm:$0xff]  ;;  %v12921_v42 = vadd.f32 %v11895_v48, %v11905_v29  ;;  %v12941_v29 = vadd.f32 %v11895_v48, %v11925_v40  ;;  %v12961_v40 = vadd.f32 %v11895_v48, %v11945_v4 }
 0x8cc   :  { %15815 = vst [vmem:[#allocation212_spill] sm:$0xff] %v12885_v21  ;;  %v12905_v19 = vmul.f32 %v11897_v45, %v15824_v27  ;;  %v15826_v21 = vld [vmem:[#allocation218_spill] sm:$0xff]  ;;  %v12925_v27 = vadd.f32 %v11895_v48, %v11909_v61  ;;  %v12945_v61 = vadd.f32 %v11895_v48, %v11929_v0 }
 0x8cd   :  { %15817 = vst [vmem:[#allocation213_spill] sm:$0xff] %v12889_v44  ;;  %v12909_v5 = vmul.f32 %v11897_v45, %v15826_v21  ;;  %v15828_v44 = vld [vmem:[#allocation219_spill] sm:$0xff]  ;;  %v12929_v21 = vadd.f32 %v11895_v48, %v11913_v37  ;;  %v12949_v37 = vadd.f32 %v11895_v48, %v11933_v13 }
 0x8ce   :  { %15819 = vst [vmem:[#allocation214_spill] sm:$0xff] %v12893_v39  ;;  %v12913_v52 = vmul.f32 %v11897_v45, %v15828_v44  ;;  %v15830_v39 = vld [vmem:[#allocation220_spill] sm:$0xff]  ;;  %v12933_v44 = vadd.f32 %v11895_v48, %v11917_v7  ;;  %v12953_v7 = vadd.f32 %v11895_v48, %v11937_v33 }
 0x8cf   :  { %15821 = vst [vmem:[#allocation215_spill] sm:$0xff] %v12897_v30  ;;  %v12917_v8 = vmul.f32 %v11897_v45, %v15830_v39  ;;  %v12937_v45 = vadd.f32 %v11895_v48, %v11921_v34  ;;  %v12957_v34 = vadd.f32 %v11895_v48, %v11941_v6  ;;  %v15832_v39 = vld [vmem:[#allocation221_spill] sm:$0xff] }
 0x8d0   :  { %15823 = vst [vmem:[#allocation216_spill] sm:$0xff] %v12901_v22  ;;  %v12965_v0 = vadd.f32 %v11895_v48, %v15832_v39  ;;  %v15837_v22 = vld [vmem:[#allocation161_spill] sm:$0xff] }
 0x8d1   :  { %15825 = vst [vmem:[#allocation217_spill] sm:$0xff] %v12905_v19  ;;  %v15836_v19 = vld [vmem:[#allocation159_spill] sm:$0xff]  ;;  %v12985_v39 = vadd.f32 %v11895_v48, %v15837_v22  ;;  %v15838_v30 = vld [vmem:[#allocation165_spill] sm:$0xff]  ;;  %v13005_v22 = vadd.f32 %v11895_v48, %v15842_v36  ;;  %v13025_v36 = vadd.f32 %v11895_v48, %v15847_v31  ;;  %v13045_v31 = vadd.f32 %v11895_v48, %v15852_v63 }
 0x8d2   :  { %15827 = vst [vmem:[#allocation218_spill] sm:$0xff] %v12909_v5  ;;  %v15835_v5 = vld [vmem:[#allocation157_spill] sm:$0xff]  ;;  %v12981_v4 = vadd.f32 %v11895_v48, %v15836_v19  ;;  %v13001_v19 = vadd.f32 %v11895_v48, %v15841_v20  ;;  %v13021_v20 = vadd.f32 %v11895_v48, %v15846_v14  ;;  %v13041_v14 = vadd.f32 %v11895_v48, %v15851_v55 }
 0x8d3   :  { %15829 = vst [vmem:[#allocation219_spill] sm:$0xff] %v12913_v52  ;;  %v15834_v52 = vld [vmem:[#allocation155_spill] sm:$0xff]  ;;  %v12977_v6 = vadd.f32 %v11895_v48, %v15835_v5  ;;  %v12997_v5 = vadd.f32 %v11895_v48, %v15840_v56  ;;  %v13017_v56 = vadd.f32 %v11895_v48, %v15845_v25  ;;  %v13037_v25 = vadd.f32 %v11895_v48, %v15850_v38 }
 0x8d4   :  { %15831 = vst [vmem:[#allocation220_spill] sm:$0xff] %v12917_v8  ;;  %v15833_v8 = vld [vmem:[#allocation222_spill] sm:$0xff]  ;;  %v12973_v33 = vadd.f32 %v11895_v48, %v15834_v52  ;;  %v12993_v52 = vadd.f32 %v11895_v48, %v15839_v1  ;;  %v13013_v1 = vadd.f32 %v11895_v48, %v15844_v59  ;;  %v13033_v59 = vadd.f32 %v11895_v48, %v15849_v9 }
 0x8d5   :  { %v12969_v13 = vadd.f32 %v11895_v48, %v15833_v8  ;;  %v12989_v8 = vadd.f32 %v11895_v48, %v15838_v30  ;;  %v13009_v30 = vadd.f32 %v11895_v48, %v15843_v54  ;;  %v13029_v54 = vadd.f32 %v11895_v48, %v15848_v17 }
 0x8d6   :  { %v13049_v17 = vadd.f32 %v11895_v48, %v15853_v16  ;;  %v13053_v9 = vadd.f32 %v11895_v48, %v15854_v12  ;;  %v13057_v38 = vadd.f32 %v11895_v48, %v15855_v57  ;;  %v13061_v55 = vadd.f32 %v11895_v48, %v15856_v2 }
 0x8d7   :  { %v13065_v63 = vadd.f32 %v11895_v48, %v15857_v3  ;;  %v13069_v16 = vadd.f32 %v11895_v48, %v15858_v35  ;;  %v13073_v12 = vadd.f32 %v11895_v48, %v15859_v46  ;;  %v13077_v57 = vadd.f32 %v11895_v48, %v15860_v62 }
 0x8d8   :  { %v13081_v2 = vadd.f32 %v11895_v48, %v15861_v10  ;;  %v13085_v3 = vadd.f32 %v11895_v48, %v15862_v15  ;;  %v13089_v35 = vadd.f32 %v11895_v48, %v15863_v47  ;;  %v13093_v46 = vadd.f32 %v11895_v48, %v15864_v41 }
 0x8d9   :  { %v13097_v62 = vadd.f32 %v11895_v48, %v15865_v43  ;;  %v13101_v10 = vadd.f32 %v11895_v48, %v15866_v11  ;;  %v13105_v15 = vadd.f32 %v11895_v48, %v15867_v28  ;;  %v13109_v47 = vadd.f32 %v11895_v48, %v15868_v24 }
 0x8da   :  { %v13113_v41 = vadd.f32 %v11895_v48, %v15869_v58  ;;  %v13117_v43 = vadd.f32 %v11895_v48, %v15870_v50  ;;  %v13121_v11 = vadd.f32 %v11895_v48, %v15871_v23  ;;  %v13125_v28 = vadd.f32 %v11895_v48, %v15873_v53 }
 0x8db   :  { %v13129_v24 = vadd.f32 %v11895_v48, %v15875_v51  ;;  %v13133_v58 = vadd.f32 %v11895_v48, %v15877_v26  ;;  %v13137_v50 = vadd.f32 %v11895_v48, %v15879_v60  ;;  %v13141_v23 = vadd.f32 %v11895_v48, %v15881_v18 }
 0x8dc   :  { %15872 = vst [vmem:[#allocation221_spill] sm:$0xff] %v13121_v11  ;;  %v13145_v53 = vadd.f32 %v11895_v48, %v15883_v49  ;;  %v13149_v51 = vadd.f32 %v11895_v48, %v15885_v32  ;;  %v16048_v11 = vld [vmem:[#allocation193_spill] sm:$0xff] }
 0x8dd   :  { %15874 = vst [vmem:[#allocation222_spill] sm:$0xff] %v13125_v28 }
 0x8de   :  { %15876 = vst [vmem:[#allocation155_spill] sm:$0xff] %v13129_v24  ;;  %v15887_v24 = vld [vmem:[#allocation48_spill] sm:$0xff] }
 0x8df   :  { %15878 = vst [vmem:[#allocation157_spill] sm:$0xff] %v13133_v58  ;;  %v13153_v26 = vadd.f32 %v11895_v48, %v15887_v24  ;;  %v15889_v58 = vld [vmem:[#allocation50_spill] sm:$0xff] }
 0x8e0   :  { %15880 = vst [vmem:[#allocation159_spill] sm:$0xff] %v13137_v50  ;;  %v13157_v60 = vadd.f32 %v11895_v48, %v15889_v58  ;;  %v15891_v50 = vld [vmem:[#allocation52_spill] sm:$0xff] }
 0x8e1   :  { %15882 = vst [vmem:[#allocation161_spill] sm:$0xff] %v13141_v23  ;;  %v13161_v18 = vadd.f32 %v11895_v48, %v15891_v50  ;;  %v15893_v23 = vld [vmem:[#allocation54_spill] sm:$0xff] }
 0x8e2   :  { %15884 = vst [vmem:[#allocation165_spill] sm:$0xff] %v13145_v53  ;;  %v13165_v49 = vadd.f32 %v11895_v48, %v15893_v23  ;;  %v15895_v53 = vld [vmem:[#allocation56_spill] sm:$0xff] }
 0x8e3   :  { %15886 = vst [vmem:[#allocation167_spill] sm:$0xff] %v13149_v51  ;;  %v13169_v32 = vadd.f32 %v11895_v48, %v15895_v53  ;;  %v15897_v51 = vld [vmem:[#allocation58_spill] sm:$0xff] }
 0x8e4   :  { %15888 = vst [vmem:[#allocation169_spill] sm:$0xff] %v13153_v26  ;;  %v13173_v24 = vadd.f32 %v11895_v48, %v15897_v51  ;;  %v15899_v26 = vld [vmem:[#allocation60_spill] sm:$0xff] }
 0x8e5   :  { %15890 = vst [vmem:[#allocation171_spill] sm:$0xff] %v13157_v60  ;;  %v13177_v58 = vadd.f32 %v11895_v48, %v15899_v26  ;;  %v15901_v60 = vld [vmem:[#allocation62_spill] sm:$0xff] }
 0x8e6   :  { %15892 = vst [vmem:[#allocation194_spill] sm:$0xff] %v13161_v18  ;;  %v13181_v50 = vadd.f32 %v11895_v48, %v15901_v60  ;;  %v15903_v18 = vld [vmem:[#allocation64_spill] sm:$0xff] }
 0x8e7   :  { %15894 = vst [vmem:[#allocation196_spill] sm:$0xff] %v13165_v49  ;;  %v13185_v23 = vadd.f32 %v11895_v48, %v15903_v18  ;;  %v15905_v49 = vld [vmem:[#allocation66_spill] sm:$0xff] }
 0x8e8   :  { %15896 = vst [vmem:[#allocation5_spill] sm:$0xff] %v13169_v32  ;;  %v13189_v53 = vadd.f32 %v11895_v48, %v15905_v49  ;;  %v15907_v32 = vld [vmem:[#allocation68_spill] sm:$0xff] }
 0x8e9   :  { %15898 = vst [vmem:[#allocation6_spill] sm:$0xff] %v13173_v24  ;;  %v13193_v51 = vadd.f32 %v11895_v48, %v15907_v32  ;;  %v15909_v24 = vld [vmem:[#allocation70_spill] sm:$0xff] }
 0x8ea   :  { %15900 = vst [vmem:[#allocation7_spill] sm:$0xff] %v13177_v58  ;;  %v13197_v26 = vadd.f32 %v11895_v48, %v15909_v24  ;;  %v15911_v58 = vld [vmem:[#allocation72_spill] sm:$0xff] }
 0x8eb   :  { %15902 = vst [vmem:[#allocation8_spill] sm:$0xff] %v13181_v50  ;;  %v13201_v60 = vadd.f32 %v11895_v48, %v15911_v58  ;;  %v15913_v50 = vld [vmem:[#allocation74_spill] sm:$0xff] }
 0x8ec   :  { %15904 = vst [vmem:[#allocation9_spill] sm:$0xff] %v13185_v23  ;;  %v13205_v18 = vadd.f32 %v11895_v48, %v15913_v50  ;;  %v15915_v23 = vld [vmem:[#allocation76_spill] sm:$0xff] }
 0x8ed   :  { %15906 = vst [vmem:[#allocation10_spill] sm:$0xff] %v13189_v53  ;;  %v13209_v49 = vadd.f32 %v11895_v48, %v15915_v23  ;;  %v15917_v53 = vld [vmem:[#allocation78_spill] sm:$0xff] }
 0x8ee   :  { %15908 = vst [vmem:[#allocation11_spill] sm:$0xff] %v13193_v51  ;;  %v13213_v32 = vadd.f32 %v11895_v48, %v15917_v53  ;;  %v15919_v51 = vld [vmem:[#allocation80_spill] sm:$0xff] }
 0x8ef   :  { %15910 = vst [vmem:[#allocation12_spill] sm:$0xff] %v13197_v26  ;;  %v13217_v24 = vadd.f32 %v11895_v48, %v15919_v51  ;;  %v15921_v26 = vld [vmem:[#allocation82_spill] sm:$0xff] }
 0x8f0   :  { %15912 = vst [vmem:[#allocation13_spill] sm:$0xff] %v13201_v60  ;;  %v13221_v58 = vadd.f32 %v11895_v48, %v15921_v26  ;;  %v15923_v60 = vld [vmem:[#allocation84_spill] sm:$0xff] }
 0x8f1   :  { %15914 = vst [vmem:[#allocation14_spill] sm:$0xff] %v13205_v18  ;;  %v13225_v50 = vadd.f32 %v11895_v48, %v15923_v60  ;;  %v15925_v18 = vld [vmem:[#allocation86_spill] sm:$0xff] }
 0x8f2   :  { %15916 = vst [vmem:[#allocation15_spill] sm:$0xff] %v13209_v49  ;;  %v13229_v23 = vadd.f32 %v11895_v48, %v15925_v18  ;;  %v15927_v49 = vld [vmem:[#allocation88_spill] sm:$0xff] }
 0x8f3   :  { %15918 = vst [vmem:[#allocation16_spill] sm:$0xff] %v13213_v32  ;;  %v13233_v53 = vadd.f32 %v11895_v48, %v15927_v49  ;;  %v15929_v32 = vld [vmem:[#allocation90_spill] sm:$0xff] }
 0x8f4   :  { %15920 = vst [vmem:[#allocation17_spill] sm:$0xff] %v13217_v24  ;;  %v13237_v51 = vadd.f32 %v11895_v48, %v15929_v32  ;;  %v15931_v24 = vld [vmem:[#allocation92_spill] sm:$0xff] }
 0x8f5   :  { %15922 = vst [vmem:[#allocation18_spill] sm:$0xff] %v13221_v58  ;;  %v13241_v26 = vadd.f32 %v11895_v48, %v15931_v24  ;;  %v15933_v58 = vld [vmem:[#allocation94_spill] sm:$0xff] }
 0x8f6   :  { %15924 = vst [vmem:[#allocation19_spill] sm:$0xff] %v13225_v50  ;;  %v13245_v60 = vadd.f32 %v11895_v48, %v15933_v58  ;;  %v15935_v50 = vld [vmem:[#allocation96_spill] sm:$0xff] }
 0x8f7   :  { %15926 = vst [vmem:[#allocation20_spill] sm:$0xff] %v13229_v23  ;;  %v13249_v18 = vadd.f32 %v11895_v48, %v15935_v50  ;;  %v15937_v23 = vld [vmem:[#allocation98_spill] sm:$0xff] }
 0x8f8   :  { %15928 = vst [vmem:[#allocation21_spill] sm:$0xff] %v13233_v53  ;;  %v13253_v49 = vadd.f32 %v11895_v48, %v15937_v23  ;;  %v15939_v53 = vld [vmem:[#allocation100_spill] sm:$0xff] }
 0x8f9   :  { %15930 = vst [vmem:[#allocation22_spill] sm:$0xff] %v13237_v51  ;;  %v13257_v32 = vadd.f32 %v11895_v48, %v15939_v53  ;;  %v15941_v51 = vld [vmem:[#allocation102_spill] sm:$0xff] }
 0x8fa   :  { %15932 = vst [vmem:[#allocation23_spill] sm:$0xff] %v13241_v26  ;;  %v13261_v24 = vadd.f32 %v11895_v48, %v15941_v51  ;;  %v15943_v26 = vld [vmem:[#allocation104_spill] sm:$0xff] }
 0x8fb   :  { %15934 = vst [vmem:[#allocation24_spill] sm:$0xff] %v13245_v60  ;;  %v13265_v58 = vadd.f32 %v11895_v48, %v15943_v26  ;;  %v15945_v60 = vld [vmem:[#allocation106_spill] sm:$0xff] }
 0x8fc   :  { %15936 = vst [vmem:[#allocation25_spill] sm:$0xff] %v13249_v18  ;;  %v13269_v50 = vadd.f32 %v11895_v48, %v15945_v60  ;;  %v15947_v18 = vld [vmem:[#allocation108_spill] sm:$0xff] }
 0x8fd   :  { %15938 = vst [vmem:[#allocation26_spill] sm:$0xff] %v13253_v49  ;;  %v13273_v23 = vadd.f32 %v11895_v48, %v15947_v18  ;;  %v15949_v49 = vld [vmem:[#allocation110_spill] sm:$0xff] }
 0x8fe   :  { %15940 = vst [vmem:[#allocation27_spill] sm:$0xff] %v13257_v32  ;;  %v13277_v53 = vadd.f32 %v11895_v48, %v15949_v49  ;;  %v15951_v32 = vld [vmem:[#allocation112_spill] sm:$0xff] }
 0x8ff   :  { %15942 = vst [vmem:[#allocation28_spill] sm:$0xff] %v13261_v24  ;;  %v13281_v51 = vadd.f32 %v11895_v48, %v15951_v32  ;;  %v15953_v24 = vld [vmem:[#allocation114_spill] sm:$0xff] }
 0x900   :  { %15944 = vst [vmem:[#allocation29_spill] sm:$0xff] %v13265_v58  ;;  %v13285_v26 = vadd.f32 %v11895_v48, %v15953_v24  ;;  %v15955_v58 = vld [vmem:[#allocation116_spill] sm:$0xff] }
 0x901   :  { %15946 = vst [vmem:[#allocation30_spill] sm:$0xff] %v13269_v50  ;;  %v13289_v60 = vadd.f32 %v11895_v48, %v15955_v58  ;;  %v15957_v50 = vld [vmem:[#allocation118_spill] sm:$0xff] }
 0x902   :  { %15948 = vst [vmem:[#allocation31_spill] sm:$0xff] %v13273_v23  ;;  %v13293_v18 = vadd.f32 %v11895_v48, %v15957_v50  ;;  %v15959_v23 = vld [vmem:[#allocation120_spill] sm:$0xff] }
 0x903   :  { %15950 = vst [vmem:[#allocation33_spill] sm:$0xff] %v13277_v53  ;;  %v13297_v49 = vadd.f32 %v11895_v48, %v15959_v23  ;;  %v15961_v53 = vld [vmem:[#allocation122_spill] sm:$0xff] }
 0x904   :  { %15952 = vst [vmem:[#allocation35_spill] sm:$0xff] %v13281_v51  ;;  %v13301_v32 = vadd.f32 %v11895_v48, %v15961_v53  ;;  %v15963_v51 = vld [vmem:[#allocation124_spill] sm:$0xff] }
 0x905   :  { %15954 = vst [vmem:[#allocation36_spill] sm:$0xff] %v13285_v26  ;;  %v13305_v24 = vadd.f32 %v11895_v48, %v15963_v51  ;;  %v15965_v26 = vld [vmem:[#allocation126_spill] sm:$0xff] }
 0x906   :  { %15956 = vst [vmem:[#allocation38_spill] sm:$0xff] %v13289_v60  ;;  %v13309_v58 = vadd.f32 %v11895_v48, %v15965_v26  ;;  %v15967_v60 = vld [vmem:[#allocation128_spill] sm:$0xff] }
 0x907   :  { %15958 = vst [vmem:[#allocation40_spill] sm:$0xff] %v13293_v18  ;;  %v13313_v50 = vadd.f32 %v11895_v48, %v15967_v60  ;;  %v15969_v18 = vld [vmem:[#allocation130_spill] sm:$0xff] }
 0x908   :  { %15960 = vst [vmem:[#allocation42_spill] sm:$0xff] %v13297_v49  ;;  %v13317_v23 = vadd.f32 %v11895_v48, %v15969_v18  ;;  %v15971_v49 = vld [vmem:[#allocation132_spill] sm:$0xff] }
 0x909   :  { %15962 = vst [vmem:[#allocation44_spill] sm:$0xff] %v13301_v32  ;;  %v13321_v53 = vadd.f32 %v11895_v48, %v15971_v49  ;;  %v15973_v32 = vld [vmem:[#allocation134_spill] sm:$0xff] }
 0x90a   :  { %15964 = vst [vmem:[#allocation46_spill] sm:$0xff] %v13305_v24  ;;  %v13325_v51 = vadd.f32 %v11895_v48, %v15973_v32  ;;  %v15975_v24 = vld [vmem:[#allocation136_spill] sm:$0xff] }
 0x90b   :  { %15966 = vst [vmem:[#allocation48_spill] sm:$0xff] %v13309_v58  ;;  %v13329_v26 = vadd.f32 %v11895_v48, %v15975_v24  ;;  %v15977_v58 = vld [vmem:[#allocation138_spill] sm:$0xff] }
 0x90c   :  { %15968 = vst [vmem:[#allocation50_spill] sm:$0xff] %v13313_v50  ;;  %v13333_v60 = vadd.f32 %v11895_v48, %v15977_v58  ;;  %v15979_v50 = vld [vmem:[#allocation140_spill] sm:$0xff] }
 0x90d   :  { %15970 = vst [vmem:[#allocation52_spill] sm:$0xff] %v13317_v23  ;;  %v13337_v18 = vadd.f32 %v11895_v48, %v15979_v50  ;;  %v15981_v23 = vld [vmem:[#allocation142_spill] sm:$0xff] }
 0x90e   :  { %15972 = vst [vmem:[#allocation54_spill] sm:$0xff] %v13321_v53  ;;  %v13341_v49 = vadd.f32 %v11895_v48, %v15981_v23  ;;  %v15983_v53 = vld [vmem:[#allocation144_spill] sm:$0xff] }
 0x90f   :  { %15974 = vst [vmem:[#allocation56_spill] sm:$0xff] %v13325_v51  ;;  %v13345_v32 = vadd.f32 %v11895_v48, %v15983_v53  ;;  %v15985_v51 = vld [vmem:[#allocation146_spill] sm:$0xff] }
 0x910   :  { %15976 = vst [vmem:[#allocation58_spill] sm:$0xff] %v13329_v26  ;;  %v13349_v24 = vadd.f32 %v11895_v48, %v15985_v51  ;;  %v15987_v26 = vld [vmem:[#allocation148_spill] sm:$0xff] }
 0x911   :  { %15978 = vst [vmem:[#allocation60_spill] sm:$0xff] %v13333_v60  ;;  %v13353_v58 = vadd.f32 %v11895_v48, %v15987_v26  ;;  %v15989_v60 = vld [vmem:[#allocation150_spill] sm:$0xff] }
 0x912   :  { %15980 = vst [vmem:[#allocation62_spill] sm:$0xff] %v13337_v18  ;;  %v13357_v50 = vadd.f32 %v11895_v48, %v15989_v60  ;;  %v15991_v18 = vld [vmem:[#allocation152_spill] sm:$0xff] }
 0x913   :  { %15982 = vst [vmem:[#allocation64_spill] sm:$0xff] %v13341_v49  ;;  %v13361_v23 = vadd.f32 %v11895_v48, %v15991_v18  ;;  %v15993_v49 = vld [vmem:[#allocation154_spill] sm:$0xff] }
 0x914   :  { %15984 = vst [vmem:[#allocation66_spill] sm:$0xff] %v13345_v32  ;;  %v13365_v53 = vadd.f32 %v11895_v48, %v15993_v49  ;;  %v15995_v32 = vld [vmem:[#allocation156_spill] sm:$0xff] }
 0x915   :  { %15986 = vst [vmem:[#allocation68_spill] sm:$0xff] %v13349_v24  ;;  %v13369_v51 = vadd.f32 %v11895_v48, %v15995_v32  ;;  %v15997_v24 = vld [vmem:[#allocation158_spill] sm:$0xff] }
 0x916   :  { %15988 = vst [vmem:[#allocation70_spill] sm:$0xff] %v13353_v58  ;;  %v13373_v26 = vadd.f32 %v11895_v48, %v15997_v24  ;;  %v15999_v58 = vld [vmem:[#allocation160_spill] sm:$0xff] }
 0x917   :  { %15990 = vst [vmem:[#allocation72_spill] sm:$0xff] %v13357_v50  ;;  %v13377_v60 = vadd.f32 %v11895_v48, %v15999_v58  ;;  %v16001_v50 = vld [vmem:[#allocation162_spill] sm:$0xff] }
 0x918   :  { %15992 = vst [vmem:[#allocation74_spill] sm:$0xff] %v13361_v23  ;;  %v13381_v18 = vadd.f32 %v11895_v48, %v16001_v50  ;;  %v16003_v23 = vld [vmem:[#allocation164_spill] sm:$0xff] }
 0x919   :  { %15994 = vst [vmem:[#allocation76_spill] sm:$0xff] %v13365_v53  ;;  %v13385_v49 = vadd.f32 %v11895_v48, %v16003_v23  ;;  %v16005_v53 = vld [vmem:[#allocation166_spill] sm:$0xff] }
 0x91a   :  { %15996 = vst [vmem:[#allocation78_spill] sm:$0xff] %v13369_v51  ;;  %v13389_v32 = vadd.f32 %v11895_v48, %v16005_v53  ;;  %v16007_v51 = vld [vmem:[#allocation168_spill] sm:$0xff] }
 0x91b   :  { %15998 = vst [vmem:[#allocation80_spill] sm:$0xff] %v13373_v26  ;;  %v13393_v24 = vadd.f32 %v11895_v48, %v16007_v51  ;;  %v16009_v26 = vld [vmem:[#allocation170_spill] sm:$0xff] }
 0x91c   :  { %16000 = vst [vmem:[#allocation82_spill] sm:$0xff] %v13377_v60  ;;  %v13397_v58 = vadd.f32 %v11895_v48, %v16009_v26  ;;  %v16011_v60 = vld [vmem:[#allocation172_spill] sm:$0xff] }
 0x91d   :  { %16002 = vst [vmem:[#allocation84_spill] sm:$0xff] %v13381_v18  ;;  %v13401_v50 = vadd.f32 %v11895_v48, %v16011_v60  ;;  %v16013_v18 = vld [vmem:[#allocation173_spill] sm:$0xff] }
 0x91e   :  { %16004 = vst [vmem:[#allocation86_spill] sm:$0xff] %v13385_v49  ;;  %v13405_v23 = vadd.f32 %v11895_v48, %v16013_v18  ;;  %v16015_v49 = vld [vmem:[#allocation174_spill] sm:$0xff] }
 0x91f   :  { %16006 = vst [vmem:[#allocation88_spill] sm:$0xff] %v13389_v32  ;;  %v13409_v53 = vadd.f32 %v11895_v48, %v16015_v49  ;;  %v16017_v32 = vld [vmem:[#allocation175_spill] sm:$0xff] }
 0x920   :  { %16008 = vst [vmem:[#allocation90_spill] sm:$0xff] %v13393_v24  ;;  %v13413_v51 = vadd.f32 %v11895_v48, %v16017_v32  ;;  %v16019_v24 = vld [vmem:[#allocation176_spill] sm:$0xff] }
 0x921   :  { %16010 = vst [vmem:[#allocation92_spill] sm:$0xff] %v13397_v58  ;;  %v13417_v26 = vadd.f32 %v11895_v48, %v16019_v24  ;;  %v16021_v58 = vld [vmem:[#allocation177_spill] sm:$0xff] }
 0x922   :  { %16012 = vst [vmem:[#allocation94_spill] sm:$0xff] %v13401_v50  ;;  %v13421_v60 = vadd.f32 %v11895_v48, %v16021_v58  ;;  %v16023_v50 = vld [vmem:[#allocation178_spill] sm:$0xff] }
 0x923   :  { %16014 = vst [vmem:[#allocation96_spill] sm:$0xff] %v13405_v23  ;;  %v13425_v18 = vadd.f32 %v11895_v48, %v16023_v50  ;;  %v16025_v23 = vld [vmem:[#allocation179_spill] sm:$0xff] }
 0x924   :  { %16016 = vst [vmem:[#allocation98_spill] sm:$0xff] %v13409_v53  ;;  %v13429_v49 = vadd.f32 %v11895_v48, %v16025_v23  ;;  %v16027_v53 = vld [vmem:[#allocation180_spill] sm:$0xff] }
 0x925   :  { %16018 = vst [vmem:[#allocation100_spill] sm:$0xff] %v13413_v51  ;;  %v13433_v32 = vadd.f32 %v11895_v48, %v16027_v53  ;;  %v16029_v51 = vld [vmem:[#allocation181_spill] sm:$0xff]  ;;  %v4769_v53 = vmax.f32 %v12925_v27, 0.0  ;;  %v4775_v27 = vmax.f32 %v12949_v37, 0.0  ;;  %v4779_v37 = vmax.f32 %v12965_v0, 0.0 }
 0x926   :  { %16020 = vst [vmem:[#allocation102_spill] sm:$0xff] %v13417_v26  ;;  %v13437_v24 = vadd.f32 %v11895_v48, %v16029_v51  ;;  %v16031_v26 = vld [vmem:[#allocation183_spill] sm:$0xff]  ;;  %v4771_v51 = vmax.f32 %v12933_v44, 0.0  ;;  %v16043_v44 = vld [vmem:[#allocation190_spill] sm:$0xff]  ;;  %v4784_v0 = vmax.f32 %v12985_v39, 0.0  ;;  %v4788_v39 = vmax.f32 %v13001_v19, 0.0 }
 0x927   :  { %16022 = vst [vmem:[#allocation104_spill] sm:$0xff] %v13421_v60  ;;  %v13441_v58 = vadd.f32 %v11895_v48, %v16031_v26  ;;  %v16033_v60 = vld [vmem:[#allocation185_spill] sm:$0xff]  ;;  %v4773_v26 = vmax.f32 %v12941_v29, 0.0  ;;  %v4776_v29 = vmax.f32 %v12953_v7, 0.0  ;;  %v4792_v19 = vmax.f32 %v13017_v56, 0.0 }
 0x928   :  { %16024 = vst [vmem:[#allocation106_spill] sm:$0xff] %v13425_v18  ;;  %v13445_v50 = vadd.f32 %v11895_v48, %v16033_v60  ;;  %v16035_v18 = vld [vmem:[#allocation186_spill] sm:$0xff]  ;;  %v4796_v56 = vmax.f32 %v13033_v59, 0.0  ;;  %v4800_v59 = vmax.f32 %v13049_v17, 0.0  ;;  %v4804_v17 = vmax.f32 %v13065_v63, 0.0 }
 0x929   :  { %16026 = vst [vmem:[#allocation108_spill] sm:$0xff] %v13429_v49  ;;  %v13449_v23 = vadd.f32 %v11895_v48, %v16035_v18  ;;  %v4768_v49 = vmax.f32 %v12921_v42, 0.0  ;;  %v4774_v42 = vmax.f32 %v12945_v61, 0.0  ;;  %v4778_v61 = vmax.f32 %v12961_v40, 0.0 }
 0x92a   :  { %16028 = vst [vmem:[#allocation110_spill] sm:$0xff] %v13433_v32  ;;  %v4770_v32 = vmax.f32 %v12929_v21, 0.0  ;;  %v13493_v40 = vadd.f32 %v11895_v48, %v16048_v11  ;;  %v4808_v63 = vmax.f32 %v13081_v2, 0.0  ;;  %v4812_v2 = vmax.f32 %v13097_v62, 0.0 }
 0x92b   :  { %16030 = vst [vmem:[#allocation112_spill] sm:$0xff] %v13437_v24  ;;  %v4772_v24 = vmax.f32 %v12937_v45, 0.0  ;;  %v13473_v45 = vadd.f32 %v11895_v48, %v16043_v44  ;;  %v4816_v62 = vmax.f32 %v13113_v41, 0.0  ;;  %v16068_v41 = vld [vmem:[#allocation45_spill] sm:$0xff] }
 0x92c   :  { %16032 = vst [vmem:[#allocation114_spill] sm:$0xff] %v13441_v58  ;;  %v16037_v58 = vld [vmem:[#allocation187_spill] sm:$0xff]  ;;  %v7015_v28 = vpack.c.bf16 %v4771_v51, %v4770_v32 }
 0x92d   :  { %16034 = vst [vmem:[#allocation116_spill] sm:$0xff] %v13445_v50  ;;  %v13459_v60 = vadd.f32 %v11895_v48, %v16037_v58  ;;  %v16039_v50 = vld [vmem:[#allocation188_spill] sm:$0xff]  ;;  %v4777_v58 = vmax.f32 %v12957_v34, 0.0  ;;  %v7020_v44 = vpack.c.bf16 %v4773_v26, %v4772_v24  ;;  %v4782_v34 = vmax.f32 %v12977_v6, 0.0  ;;  %v16051_v26 = vld [vmem:[#allocation201_spill] sm:$0xff] }
 0x92e   :  { %16036 = vst [vmem:[#allocation118_spill] sm:$0xff] %v13449_v23  ;;  %v13463_v18 = vadd.f32 %v11895_v48, %v16039_v50  ;;  %v16041_v23 = vld [vmem:[#allocation189_spill] sm:$0xff]  ;;  %v4786_v24 = vmax.f32 %v12993_v52, 0.0  ;;  %v4787_v6 = vmax.f32 %v12997_v5, 0.0  ;;  %v4790_v52 = vmax.f32 %v13009_v30, 0.0 }
 0x92f   :  { %16038 = vst [vmem:[#allocation120_spill] sm:$0xff] %v13459_v60  ;;  %v13469_v21 = vadd.f32 %v11895_v48, %v16041_v23  ;;  %v16045_v60 = vld [vmem:[#allocation191_spill] sm:$0xff]  ;;  %v4781_v23 = vmax.f32 %v12973_v33, 0.0  ;;  %v7030_v33 = vpack.c.bf16 %v4777_v58, %v4776_v29  ;;  %v4791_v5 = vmax.f32 %v13013_v1, 0.0 }
 0x930   :  { %16040 = vst [vmem:[#allocation122_spill] sm:$0xff] %v13463_v18  ;;  %v13479_v50 = vadd.f32 %v11895_v48, %v16045_v60  ;;  %v4780_v18 = vmax.f32 %v12969_v13, 0.0  ;;  %v4783_v60 = vmax.f32 %v12981_v4, 0.0  ;;  %v4785_v13 = vmax.f32 %v12989_v8, 0.0 }
 0x931   :  { %16042 = vst [vmem:[#allocation124_spill] sm:$0xff] %v13469_v21  ;;  %v7010_v21 = vpack.c.bf16 %v4769_v53, %v4768_v49  ;;  %v16049_v49 = vld [vmem:[#allocation199_spill] sm:$0xff]  ;;  %v7035_v4 = vpack.c.bf16 %v4779_v37, %v4778_v61  ;;  %v16050_v53 = vld [vmem:[#allocation200_spill] sm:$0xff]  ;;  %v4789_v8 = vmax.f32 %v13005_v22, 0.0  ;;  %v4793_v22 = vmax.f32 %v13021_v20, 0.0 }
 0x932   :  { %16044 = vst [vmem:[#allocation126_spill] sm:$0xff] %v13473_v45  ;;  %v16047_v45 = vld [vmem:[#allocation192_spill] sm:$0xff]  ;;  %v13499_v32 = vadd.f32 %v11895_v48, %v16049_v49  ;;  %v13505_v11 = vadd.f32 %v11895_v48, %v16050_v53  ;;  %v7040_v51 = vpack.c.bf16 %v4781_v23, %v4780_v18  ;;  %v7050_v18 = vpack.c.bf16 %v4785_v13, %v4784_v0  ;;  %v16055_v23 = vld [vmem:[#allocation205_spill] sm:$0xff] }
 0x933   :  { %16046 = vst [vmem:[#allocation128_spill] sm:$0xff] %v13479_v50  ;;  %v13487_v7 = vadd.f32 %v11895_v48, %v16047_v45  ;;  %v7025_v50 = vpack.c.bf16 %v4775_v27, %v4774_v42  ;;  %v13511_v42 = vadd.f32 %v11895_v48, %v16051_v26  ;;  %v16052_v27 = vld [vmem:[#allocation202_spill] sm:$0xff]  ;;  %v16053_v45 = vld [vmem:[#allocation203_spill] sm:$0xff]  ;;  %v4794_v30 = vmax.f32 %v13025_v36, 0.0  ;;  %v16060_v26 = vld [vmem:[#allocation32_spill] sm:$0xff] }
 0x934   :  { %7011 = vst [vmem:[#allocation2] sm:$0xff] %v7010_v21   ;;  %v13517_v21 = vadd.f32 %v11895_v48, %v16052_v27  ;;  %v13523_v29 = vadd.f32 %v11895_v48, %v16053_v45  ;;  %v4795_v1 = vmax.f32 %v13029_v54, 0.0  ;;  %v7055_v58 = vpack.c.bf16 %v4787_v6, %v4786_v24  ;;  %v16058_v6 = vld [vmem:[#allocation209_spill] sm:$0xff] }
 0x935   :  { %7647 = vst [vmem:[#allocation2 + $0x8] sm:$0xff] %v7015_v28   ;;  %v7045_v28 = vpack.c.bf16 %v4783_v60, %v4782_v34  ;;  %v4797_v20 = vmax.f32 %v13037_v25, 0.0  ;;  %v7060_v37 = vpack.c.bf16 %v4789_v8, %v4788_v39  ;;  %v4798_v36 = vmax.f32 %v13041_v14, 0.0  ;;  %v16056_v60 = vld [vmem:[#allocation206_spill] sm:$0xff] }
 0x936   :  { %7648 = vst [vmem:[#allocation2 + $0x10] sm:$0xff] %v7020_v44   ;;  %v13535_v44 = vadd.f32 %v11895_v48, %v16055_v23  ;;  %v4799_v54 = vmax.f32 %v13045_v31, 0.0  ;;  %v7065_v34 = vpack.c.bf16 %v4791_v5, %v4790_v52  ;;  %v13541_v0 = vadd.f32 %v11895_v48, %v16056_v60  ;;  %v16059_v39 = vld [vmem:[#allocation210_spill] sm:$0xff]  ;;  %v13602_v60 = vld [vmem:[%s14173_s3] ss:$0 sm:$0xff]  ;;  %s7823_s3 = smov [#allocation2]  }
 0x937   :  { %7649 = vst [vmem:[#allocation2 + $0x18] sm:$0xff] %v7025_v50   ;;  %v16054_v50 = vld [vmem:[#allocation204_spill] sm:$0xff]  ;;  %v4801_v25 = vmax.f32 %v13053_v9, 0.0  ;;  %v7070_v13 = vpack.c.bf16 %v4793_v22, %v4792_v19  ;;  %v4802_v14 = vmax.f32 %v13057_v38, 0.0  ;;  %v4803_v31 = vmax.f32 %v13061_v55, 0.0  ;;  %v16062_v22 = vld [vmem:[#allocation37_spill] sm:$0xff] }
 0x938   :  { %7650 = vst [vmem:[#allocation2 + $0x20] sm:$0xff] %v7030_v33   ;;  %v13529_v61 = vadd.f32 %v11895_v48, %v16054_v50  ;;  %v16057_v33 = vld [vmem:[#allocation208_spill] sm:$0xff]  ;;  %v7075_v24 = vpack.c.bf16 %v4795_v1, %v4794_v30  ;;  %v4805_v9 = vmax.f32 %v13069_v16, 0.0  ;;  %v7080_v53 = vpack.c.bf16 %v4797_v20, %v4796_v56  ;;  %v16063_v30 = vld [vmem:[#allocation39_spill] sm:$0xff]  ;;  %v16064_v50 = vld [vmem:[#allocation41_spill] sm:$0xff]  ;;  %s5540_s11 = sshll.u32 %s7823_s3, 4  ;;  %s5541_s11 = int_to_ptr.vmem [resolvable:$true] %s5540_s11 }
 0x939   :  { %7651 = vst [vmem:[#allocation2 + $0x28] sm:$0xff] %v7035_v4   ;;  %v13547_v49 = vadd.f32 %v11895_v48, %v16057_v33  ;;  %v13553_v4 = vadd.f32 %v11895_v48, %v16058_v6  ;;  %v13559_v8 = vadd.f32 %v11895_v48, %v16059_v39  ;;  %v4806_v38 = vmax.f32 %v13073_v12, 0.0  ;;  %v16074_v39 = vld [vmem:[#allocation49_spill] sm:$0xff] }
 0x93a   :  { %7652 = vst [vmem:[#allocation2 + $0x30] sm:$0xff] %v7040_v51   ;;  %v4807_v55 = vmax.f32 %v13077_v57, 0.0  ;;  %v7085_v51 = vpack.c.bf16 %v4799_v54, %v4798_v36  ;;  %v13565_v52 = vadd.f32 %v11895_v48, %v16060_v26  ;;  %v4809_v16 = vmax.f32 %v13085_v3, 0.0  ;;  %v16066_v36 = vld [vmem:[#allocation221_spill] sm:$0xff]  ;;  %v16067_v54 = vld [vmem:[#allocation222_spill] sm:$0xff]  ;;  %v16076_v26 = vld [vmem:[#allocation167_spill] sm:$0xff] }
 0x93b   :  { %7653 = vst [vmem:[#allocation2 + $0x38] sm:$0xff] %v7045_v28   ;;  %v7090_v5 = vpack.c.bf16 %v4801_v25, %v4800_v59  ;;  %v16061_v28 = vld [vmem:[#allocation34_spill] sm:$0xff]  ;;  %v4810_v12 = vmax.f32 %v13089_v35, 0.0  ;;  %v4811_v57 = vmax.f32 %v13093_v46, 0.0  ;;  %v7095_v19 = vpack.c.bf16 %v4803_v31, %v4802_v14  ;;  %v16069_v59 = vld [vmem:[#allocation155_spill] sm:$0xff] }
 0x93c   :  { %7654 = vst [vmem:[#allocation2 + $0x40] sm:$0xff] %v7050_v18   ;;  %v13571_v27 = vadd.f32 %v11895_v48, %v16061_v28  ;;  %v13577_v18 = vadd.f32 %v11895_v48, %v16062_v22  ;;  %v4813_v3 = vmax.f32 %v13101_v10, 0.0  ;;  %v7100_v45 = vpack.c.bf16 %v4805_v9, %v4804_v17  ;;  %v16071_v14 = vld [vmem:[#allocation47_spill] sm:$0xff]  ;;  %v16073_v17 = vld [vmem:[#allocation161_spill] sm:$0xff] }
 0x93d   :  { %7655 = vst [vmem:[#allocation2 + $0x48] sm:$0xff] %v7055_v58   ;;  %v13583_v1 = vadd.f32 %v11895_v48, %v16063_v30  ;;  %v4814_v35 = vmax.f32 %v13105_v15, 0.0  ;;  %v4815_v46 = vmax.f32 %v13109_v47, 0.0  ;;  %v7105_v58 = vpack.c.bf16 %v4807_v55, %v4806_v38  ;;  %v16075_v55 = vld [vmem:[#allocation165_spill] sm:$0xff]  ;;  %v16081_v30 = vld [vmem:[#allocation194_spill] sm:$0xff] }
 0x93e   :  { %7656 = vst [vmem:[#allocation2 + $0x50] sm:$0xff] %v7060_v37   ;;  %v13589_v56 = vadd.f32 %v11895_v48, %v16064_v50  ;;  %v4817_v10 = vmax.f32 %v13117_v43, 0.0  ;;  %v7110_v20 = vpack.c.bf16 %v4809_v16, %v4808_v63  ;;  %v16065_v37 = vld [vmem:[#allocation43_spill] sm:$0xff]  ;;  %v4818_v15 = vmax.f32 %v16066_v36, 0.0  ;;  %v16085_v36 = vld [vmem:[#allocation6_spill] sm:$0xff] }
 0x93f   :  { %7657 = vst [vmem:[#allocation2 + $0x58] sm:$0xff] %v7065_v34   ;;  %v13595_v23 = vadd.f32 %v11895_v48, %v16065_v37  ;;  %v4819_v47 = vmax.f32 %v16067_v54, 0.0  ;;  %v7115_v34 = vpack.c.bf16 %v4811_v57, %v4810_v12  ;;  %v13606_v43 = vadd.f32 %v13602_v60, %v16068_v41  ;;  %v16078_v12 = vld [vmem:[#allocation169_spill] sm:$0xff]  ;;  %v16087_v41 = vld [vmem:[#allocation7_spill] sm:$0xff] }
 0x940   :  { %7658 = vst [vmem:[#allocation2 + $0x60] sm:$0xff] %v7070_v13   ;;  %v4820_v25 = vmax.f32 %v16069_v59, 0.0  ;;  %v16070_v13 = vld [vmem:[#allocation157_spill] sm:$0xff]  ;;  %v7120_v33 = vpack.c.bf16 %v4813_v3, %v4812_v2  ;;  %v13612_v31 = vadd.f32 %v13602_v60, %v16071_v14  ;;  %v4823_v9 = vmax.f32 %v16073_v17, 0.0 }
 0x941   :  { %7659 = vst [vmem:[#allocation2 + $0x68] sm:$0xff] %v7075_v24   ;;  %v4821_v48 = vmax.f32 %v16070_v13, 0.0  ;;  %v16072_v24 = vld [vmem:[#allocation159_spill] sm:$0xff]  ;;  %v13618_v38 = vadd.f32 %v13602_v60, %v16074_v39  ;;  %v4825_v63 = vmax.f32 %v16076_v26, 0.0  ;;  %v7130_v16 = vpack.c.bf16 %v4817_v10, %v4816_v62  ;;  %v16080_v3 = vld [vmem:[#allocation53_spill] sm:$0xff]  ;;  %v16088_v13 = vld [vmem:[#allocation8_spill] sm:$0xff] }
 0x942   :  { %7660 = vst [vmem:[#allocation2 + $0x70] sm:$0xff] %v7080_v53   ;;  %v4822_v6 = vmax.f32 %v16072_v24, 0.0  ;;  %v7125_v53 = vpack.c.bf16 %v4815_v46, %v4814_v35  ;;  %v4826_v57 = vmax.f32 %v16078_v12, 0.0  ;;  %v7135_v2 = vpack.c.bf16 %v4819_v47, %v4818_v15  ;;  %v16082_v46 = vld [vmem:[#allocation196_spill] sm:$0xff]  ;;  %v16083_v62 = vld [vmem:[#allocation55_spill] sm:$0xff]  ;;  %v16086_v47 = vld [vmem:[#allocation57_spill] sm:$0xff] }
 0x943   :  { %7661 = vst [vmem:[#allocation2 + $0x78] sm:$0xff] %v7085_v51   ;;  %v4824_v51 = vmax.f32 %v16075_v55, 0.0  ;;  %v4828_v35 = vmax.f32 %v16081_v30, 0.0  ;;  %v7140_v50 = vpack.c.bf16 %v4821_v48, %v4820_v25  ;;  %v13636_v10 = vadd.f32 %v13602_v60, %v16083_v62  ;;  %v16089_v48 = vld [vmem:[#allocation59_spill] sm:$0xff]  ;;  %v16090_v24 = vld [vmem:[#allocation9_spill] sm:$0xff]  ;;  %v16091_v39 = vld [vmem:[#allocation10_spill] sm:$0xff] }
 0x944   :  { %7662 = vst [vmem:[#allocation2 + $0x80] sm:$0xff] %v7090_v5   ;;  %v16077_v5 = vld [vmem:[#allocation51_spill] sm:$0xff]  ;;  %v4831_v54 = vmax.f32 %v16085_v36, 0.0  ;;  %v7145_v15 = vpack.c.bf16 %v4823_v9, %v4822_v6  ;;  %v4832_v59 = vmax.f32 %v16087_v41, 0.0  ;;  %v4833_v14 = vmax.f32 %v16088_v13, 0.0  ;;  %v16092_v9 = vld [vmem:[#allocation61_spill] sm:$0xff] }
 0x945   :  { %7663 = vst [vmem:[#allocation2 + $0x88] sm:$0xff] %v7095_v19   ;;  %v13624_v28 = vadd.f32 %v13602_v60, %v16077_v5  ;;  %v16079_v19 = vld [vmem:[#allocation171_spill] sm:$0xff]  ;;  %v7150_v25 = vpack.c.bf16 %v4825_v63, %v4824_v51  ;;  %v4834_v17 = vmax.f32 %v16090_v24, 0.0  ;;  %v4835_v55 = vmax.f32 %v16091_v39, 0.0  ;;  %v16094_v12 = vld [vmem:[#allocation12_spill] sm:$0xff]  ;;  %v16102_v13 = vld [vmem:[#allocation17_spill] sm:$0xff] }
 0x946   :  { %7664 = vst [vmem:[#allocation2 + $0x90] sm:$0xff] %v7100_v45   ;;  %v4827_v22 = vmax.f32 %v16079_v19, 0.0  ;;  %v13630_v45 = vadd.f32 %v13602_v60, %v16080_v3  ;;  %v16093_v26 = vld [vmem:[#allocation11_spill] sm:$0xff]  ;;  %v4837_v19 = vmax.f32 %v16094_v12, 0.0  ;;  %v16096_v3 = vld [vmem:[#allocation13_spill] sm:$0xff]  ;;  %v16103_v24 = vld [vmem:[#allocation18_spill] sm:$0xff] }
 0x947   :  { %7665 = vst [vmem:[#allocation2 + $0x98] sm:$0xff] %v7105_v58   ;;  %v4829_v58 = vmax.f32 %v16082_v46, 0.0  ;;  %v4836_v5 = vmax.f32 %v16093_v26, 0.0  ;;  %v16095_v63 = vld [vmem:[#allocation63_spill] sm:$0xff]  ;;  %v4838_v30 = vmax.f32 %v16096_v3, 0.0  ;;  %v16097_v46 = vld [vmem:[#allocation14_spill] sm:$0xff] }
 0x948   :  { %7666 = vst [vmem:[#allocation2 + $0xa0] sm:$0xff] %v7110_v20   ;;  %v16084_v20 = vld [vmem:[#allocation5_spill] sm:$0xff]  ;;  %v7155_v6 = vpack.c.bf16 %v4827_v22, %v4826_v57  ;;  %v4839_v62 = vmax.f32 %v16097_v46, 0.0  ;;  %v4843_v39 = vmax.f32 %v16103_v24, 0.0  ;;  %v16106_v12 = vld [vmem:[#allocation20_spill] sm:$0xff] }
 0x949   :  { %7667 = vst [vmem:[#allocation2 + $0xa8] sm:$0xff] %v7115_v34   ;;  %v4830_v37 = vmax.f32 %v16084_v20, 0.0  ;;  %v13642_v34 = vadd.f32 %v13602_v60, %v16086_v47  ;;  %v7160_v51 = vpack.c.bf16 %v4829_v58, %v4828_v35  ;;  %v16098_v22 = vld [vmem:[#allocation65_spill] sm:$0xff]  ;;  %v16099_v20 = vld [vmem:[#allocation15_spill] sm:$0xff]  ;;  %v16100_v47 = vld [vmem:[#allocation16_spill] sm:$0xff]  ;;  %v7170_v35 = vpack.c.bf16 %v4833_v14, %v4832_v59 }
 0x94a   :  { %7668 = vst [vmem:[#allocation2 + $0xb0] sm:$0xff] %v7120_v33   ;;  %v13648_v33 = vadd.f32 %v13602_v60, %v16089_v48  ;;  %v4840_v36 = vmax.f32 %v16099_v20, 0.0  ;;  %v4841_v41 = vmax.f32 %v16100_v47, 0.0  ;;  %v16101_v58 = vld [vmem:[#allocation67_spill] sm:$0xff]  ;;  %v4842_v48 = vmax.f32 %v16102_v13, 0.0  ;;  %v16108_v3 = vld [vmem:[#allocation21_spill] sm:$0xff] }
 0x94b   :  { %7669 = vst [vmem:[#allocation2 + $0xb8] sm:$0xff] %v7125_v53   ;;  %v13654_v53 = vadd.f32 %v13602_v60, %v16092_v9  ;;  %v7165_v57 = vpack.c.bf16 %v4831_v54, %v4830_v37  ;;  %v7175_v37 = vpack.c.bf16 %v4835_v55, %v4834_v17  ;;  %v16104_v54 = vld [vmem:[#allocation69_spill] sm:$0xff]  ;;  %v16105_v9 = vld [vmem:[#allocation19_spill] sm:$0xff]  ;;  %v7180_v59 = vpack.c.bf16 %v4837_v19, %v4836_v5  ;;  %v16112_v13 = vld [vmem:[#allocation24_spill] sm:$0xff] }
 0x94c   :  { %7670 = vst [vmem:[#allocation2 + $0xc0] sm:$0xff] %v7130_v16   ;;  %v13660_v16 = vadd.f32 %v13602_v60, %v16095_v63  ;;  %v4844_v26 = vmax.f32 %v16105_v9, 0.0  ;;  %v4845_v63 = vmax.f32 %v16106_v12, 0.0  ;;  %v16107_v14 = vld [vmem:[#allocation71_spill] sm:$0xff]  ;;  %v4846_v46 = vmax.f32 %v16108_v3, 0.0  ;;  %v16110_v55 = vld [vmem:[#allocation73_spill] sm:$0xff] }
 0x94d   :  { %7671 = vst [vmem:[#allocation2 + $0xc8] sm:$0xff] %v7135_v2   ;;  %v13666_v2 = vadd.f32 %v13602_v60, %v16098_v22  ;;  %v16109_v22 = vld [vmem:[#allocation22_spill] sm:$0xff]  ;;  %v7185_v17 = vpack.c.bf16 %v4839_v62, %v4838_v30  ;;  %v16111_v47 = vld [vmem:[#allocation23_spill] sm:$0xff]  ;;  %v4849_v24 = vmax.f32 %v16112_v13, 0.0  ;;  %v7190_v5 = vpack.c.bf16 %v4841_v41, %v4840_v36  ;;  %v16116_v62 = vld [vmem:[#allocation77_spill] sm:$0xff] }
 0x94e   :  { %7672 = vst [vmem:[#allocation2 + $0xd0] sm:$0xff] %v7140_v50   ;;  %v13672_v50 = vadd.f32 %v13602_v60, %v16101_v58  ;;  %v4847_v20 = vmax.f32 %v16109_v22, 0.0  ;;  %v4848_v58 = vmax.f32 %v16111_v47, 0.0  ;;  %v16113_v19 = vld [vmem:[#allocation75_spill] sm:$0xff]  ;;  %v16115_v12 = vld [vmem:[#allocation26_spill] sm:$0xff]  ;;  %v7195_v30 = vpack.c.bf16 %v4843_v39, %v4842_v48  ;;  %v16122_v13 = vld [vmem:[#allocation29_spill] sm:$0xff] }
 0x94f   :  { %7673 = vst [vmem:[#allocation2 + $0xd8] sm:$0xff] %v7145_v15   ;;  %v13678_v15 = vadd.f32 %v13602_v60, %v16104_v54  ;;  %v16114_v54 = vld [vmem:[#allocation25_spill] sm:$0xff]  ;;  %v16118_v3 = vld [vmem:[#allocation27_spill] sm:$0xff]  ;;  %v7200_v36 = vpack.c.bf16 %v4845_v63, %v4844_v26 }
 0x950   :  { %7674 = vst [vmem:[#allocation2 + $0xe0] sm:$0xff] %v7150_v25   ;;  %v13684_v25 = vadd.f32 %v13602_v60, %v16107_v14  ;;  %v4850_v9 = vmax.f32 %v16114_v54, 0.0  ;;  %v4851_v14 = vmax.f32 %v16115_v12, 0.0  ;;  %v4852_v22 = vmax.f32 %v16118_v3, 0.0  ;;  %v16120_v41 = vld [vmem:[#allocation79_spill] sm:$0xff]  ;;  %v16123_v54 = vld [vmem:[#allocation30_spill] sm:$0xff] }
 0x951   :  { %7675 = vst [vmem:[#allocation2 + $0xe8] sm:$0xff] %v7155_v6   ;;  %v13690_v6 = vadd.f32 %v13602_v60, %v16110_v55  ;;  %v16119_v55 = vld [vmem:[#allocation28_spill] sm:$0xff]  ;;  %v4855_v12 = vmax.f32 %v16123_v54, 0.0  ;;  %v7205_v48 = vpack.c.bf16 %v4847_v20, %v4846_v46  ;;  %v16124_v39 = vld [vmem:[#allocation81_spill] sm:$0xff]  ;;  %v7210_v26 = vpack.c.bf16 %v4849_v24, %v4848_v58  ;;  %v16128_v63 = vld [vmem:[#allocation83_spill] sm:$0xff] }
 0x952   :  { %7676 = vst [vmem:[#allocation2 + $0xf0] sm:$0xff] %v7160_v51   ;;  %v13696_v51 = vadd.f32 %v13602_v60, %v16113_v19  ;;  %v4853_v47 = vmax.f32 %v16119_v55, 0.0  ;;  %v4854_v19 = vmax.f32 %v16122_v13, 0.0  ;;  %v7215_v46 = vpack.c.bf16 %v4851_v14, %v4850_v9  ;;  %v16132_v20 = vld [vmem:[#allocation85_spill] sm:$0xff]  ;;  %v16136_v24 = vld [vmem:[#allocation87_spill] sm:$0xff] }
 0x953   :  { %7677 = vst [vmem:[#allocation2 + $0xf8] sm:$0xff] %v7165_v57   ;;  %v13702_v57 = vadd.f32 %v13602_v60, %v16116_v62  ;;  %v16126_v62 = vld [vmem:[#allocation31_spill] sm:$0xff]  ;;  %v16140_v14 = vld [vmem:[#allocation89_spill] sm:$0xff] }
 0x954   :  { %7678 = vst [vmem:[#allocation2 + $0x100] sm:$0xff] %v7170_v35   ;;  %v13708_v35 = vadd.f32 %v13602_v60, %v16120_v41  ;;  %v4856_v3 = vmax.f32 %v16126_v62, 0.0  ;;  %v16130_v41 = vld [vmem:[#allocation35_spill] sm:$0xff]  ;;  %v7220_v58 = vpack.c.bf16 %v4853_v47, %v4852_v22  ;;  %v7225_v9 = vpack.c.bf16 %v4855_v12, %v4854_v19  ;;  %v16148_v12 = vld [vmem:[#allocation93_spill] sm:$0xff] }
 0x955   :  { %7679 = vst [vmem:[#allocation2 + $0x108] sm:$0xff] %v7175_v37   ;;  %v13714_v37 = vadd.f32 %v13602_v60, %v16124_v39  ;;  %v4858_v13 = vmax.f32 %v16130_v41, 0.0  ;;  %v16134_v39 = vld [vmem:[#allocation38_spill] sm:$0xff]  ;;  %v16144_v47 = vld [vmem:[#allocation91_spill] sm:$0xff] }
 0x956   :  { %16117 = vst [vmem:[#allocation130_spill] sm:$0xff] %v13702_v57  ;;  %v16127_v57 = vld [vmem:[#allocation33_spill] sm:$0xff]  ;;  %v4860_v62 = vmax.f32 %v16134_v39, 0.0 }
 0x957   :  { %7680 = vst [vmem:[#allocation2 + $0x110] sm:$0xff] %v7180_v59   ;;  %v4857_v55 = vmax.f32 %v16127_v57, 0.0  ;;  %v13720_v59 = vadd.f32 %v13602_v60, %v16128_v63  ;;  %v16138_v63 = vld [vmem:[#allocation42_spill] sm:$0xff] }
 0x958   :  { %16121 = vst [vmem:[#allocation132_spill] sm:$0xff] %v13708_v35  ;;  %v16131_v35 = vld [vmem:[#allocation36_spill] sm:$0xff]  ;;  %v4862_v41 = vmax.f32 %v16138_v63, 0.0 }
 0x959   :  { %7681 = vst [vmem:[#allocation2 + $0x118] sm:$0xff] %v7185_v17   ;;  %v4859_v54 = vmax.f32 %v16131_v35, 0.0  ;;  %v13726_v17 = vadd.f32 %v13602_v60, %v16132_v20  ;;  %v16142_v20 = vld [vmem:[#allocation46_spill] sm:$0xff]  ;;  %v7230_v22 = vpack.c.bf16 %v4857_v55, %v4856_v3  ;;  %v16152_v55 = vld [vmem:[#allocation95_spill] sm:$0xff] }
 0x95a   :  { %16125 = vst [vmem:[#allocation134_spill] sm:$0xff] %v13714_v37  ;;  %v16135_v37 = vld [vmem:[#allocation40_spill] sm:$0xff]  ;;  %v4864_v39 = vmax.f32 %v16142_v20, 0.0 }
 0x95b   :  { %7682 = vst [vmem:[#allocation2 + $0x120] sm:$0xff] %v7190_v5   ;;  %v4861_v57 = vmax.f32 %v16135_v37, 0.0  ;;  %v13732_v5 = vadd.f32 %v13602_v60, %v16136_v24  ;;  %v16146_v24 = vld [vmem:[#allocation50_spill] sm:$0xff]  ;;  %v7235_v19 = vpack.c.bf16 %v4859_v54, %v4858_v13  ;;  %v16156_v54 = vld [vmem:[#allocation97_spill] sm:$0xff] }
 0x95c   :  { %16129 = vst [vmem:[#allocation136_spill] sm:$0xff] %v13720_v59  ;;  %v16139_v59 = vld [vmem:[#allocation44_spill] sm:$0xff]  ;;  %v4866_v63 = vmax.f32 %v16146_v24, 0.0 }
 0x95d   :  { %7683 = vst [vmem:[#allocation2 + $0x128] sm:$0xff] %v7195_v30   ;;  %v4863_v35 = vmax.f32 %v16139_v59, 0.0  ;;  %v13738_v30 = vadd.f32 %v13602_v60, %v16140_v14  ;;  %v16150_v14 = vld [vmem:[#allocation54_spill] sm:$0xff]  ;;  %v7240_v3 = vpack.c.bf16 %v4861_v57, %v4860_v62  ;;  %v16160_v57 = vld [vmem:[#allocation99_spill] sm:$0xff] }
 0x95e   :  { %16133 = vst [vmem:[#allocation138_spill] sm:$0xff] %v13726_v17  ;;  %v16143_v17 = vld [vmem:[#allocation48_spill] sm:$0xff]  ;;  %v4868_v20 = vmax.f32 %v16150_v14, 0.0 }
 0x95f   :  { %7684 = vst [vmem:[#allocation2 + $0x130] sm:$0xff] %v7200_v36   ;;  %v4865_v37 = vmax.f32 %v16143_v17, 0.0  ;;  %v13744_v36 = vadd.f32 %v13602_v60, %v16144_v47  ;;  %v16154_v47 = vld [vmem:[#allocation58_spill] sm:$0xff]  ;;  %v7245_v13 = vpack.c.bf16 %v4863_v35, %v4862_v41  ;;  %v16164_v35 = vld [vmem:[#allocation101_spill] sm:$0xff] }
 0x960   :  { %16137 = vst [vmem:[#allocation140_spill] sm:$0xff] %v13732_v5  ;;  %v16147_v5 = vld [vmem:[#allocation52_spill] sm:$0xff]  ;;  %v4870_v24 = vmax.f32 %v16154_v47, 0.0 }
 0x961   :  { %7685 = vst [vmem:[#allocation2 + $0x138] sm:$0xff] %v7205_v48   ;;  %v4867_v59 = vmax.f32 %v16147_v5, 0.0  ;;  %v13750_v48 = vadd.f32 %v13602_v60, %v16148_v12  ;;  %v16158_v12 = vld [vmem:[#allocation62_spill] sm:$0xff]  ;;  %v7250_v62 = vpack.c.bf16 %v4865_v37, %v4864_v39  ;;  %v16168_v37 = vld [vmem:[#allocation103_spill] sm:$0xff] }
 0x962   :  { %16141 = vst [vmem:[#allocation142_spill] sm:$0xff] %v13738_v30  ;;  %v16151_v30 = vld [vmem:[#allocation56_spill] sm:$0xff]  ;;  %v4872_v14 = vmax.f32 %v16158_v12, 0.0 }
 0x963   :  { %7686 = vst [vmem:[#allocation2 + $0x140] sm:$0xff] %v7210_v26   ;;  %v4869_v17 = vmax.f32 %v16151_v30, 0.0  ;;  %v13756_v26 = vadd.f32 %v13602_v60, %v16152_v55  ;;  %v16162_v55 = vld [vmem:[#allocation66_spill] sm:$0xff]  ;;  %v7255_v41 = vpack.c.bf16 %v4867_v59, %v4866_v63  ;;  %v16172_v59 = vld [vmem:[#allocation105_spill] sm:$0xff] }
 0x964   :  { %16145 = vst [vmem:[#allocation144_spill] sm:$0xff] %v13744_v36  ;;  %v16155_v36 = vld [vmem:[#allocation60_spill] sm:$0xff]  ;;  %v4874_v47 = vmax.f32 %v16162_v55, 0.0 }
 0x965   :  { %7687 = vst [vmem:[#allocation2 + $0x148] sm:$0xff] %v7215_v46   ;;  %v4871_v5 = vmax.f32 %v16155_v36, 0.0  ;;  %v13762_v46 = vadd.f32 %v13602_v60, %v16156_v54  ;;  %v16166_v54 = vld [vmem:[#allocation70_spill] sm:$0xff]  ;;  %v7260_v39 = vpack.c.bf16 %v4869_v17, %v4868_v20  ;;  %v16176_v17 = vld [vmem:[#allocation107_spill] sm:$0xff] }
 0x966   :  { %16149 = vst [vmem:[#allocation146_spill] sm:$0xff] %v13750_v48  ;;  %v16159_v48 = vld [vmem:[#allocation64_spill] sm:$0xff]  ;;  %v4876_v12 = vmax.f32 %v16166_v54, 0.0 }
 0x967   :  { %7688 = vst [vmem:[#allocation2 + $0x150] sm:$0xff] %v7220_v58   ;;  %v4873_v30 = vmax.f32 %v16159_v48, 0.0  ;;  %v13768_v58 = vadd.f32 %v13602_v60, %v16160_v57  ;;  %v16170_v57 = vld [vmem:[#allocation74_spill] sm:$0xff]  ;;  %v7265_v63 = vpack.c.bf16 %v4871_v5, %v4870_v24  ;;  %v16180_v5 = vld [vmem:[#allocation109_spill] sm:$0xff] }
 0x968   :  { %16153 = vst [vmem:[#allocation148_spill] sm:$0xff] %v13756_v26  ;;  %v16163_v26 = vld [vmem:[#allocation68_spill] sm:$0xff]  ;;  %v4878_v55 = vmax.f32 %v16170_v57, 0.0 }
 0x969   :  { %7689 = vst [vmem:[#allocation2 + $0x158] sm:$0xff] %v7225_v9   ;;  %v4875_v36 = vmax.f32 %v16163_v26, 0.0  ;;  %v13774_v9 = vadd.f32 %v13602_v60, %v16164_v35  ;;  %v16174_v35 = vld [vmem:[#allocation78_spill] sm:$0xff]  ;;  %v7270_v20 = vpack.c.bf16 %v4873_v30, %v4872_v14  ;;  %v16184_v30 = vld [vmem:[#allocation111_spill] sm:$0xff] }
 0x96a   :  { %16157 = vst [vmem:[#allocation150_spill] sm:$0xff] %v13762_v46  ;;  %v16167_v46 = vld [vmem:[#allocation72_spill] sm:$0xff]  ;;  %v4880_v54 = vmax.f32 %v16174_v35, 0.0 }
 0x96b   :  { %7690 = vst [vmem:[#allocation2 + $0x160] sm:$0xff] %v7230_v22   ;;  %v4877_v48 = vmax.f32 %v16167_v46, 0.0  ;;  %v13780_v22 = vadd.f32 %v13602_v60, %v16168_v37  ;;  %v16178_v37 = vld [vmem:[#allocation82_spill] sm:$0xff]  ;;  %v7275_v24 = vpack.c.bf16 %v4875_v36, %v4874_v47  ;;  %v16188_v36 = vld [vmem:[#allocation113_spill] sm:$0xff] }
 0x96c   :  { %16161 = vst [vmem:[#allocation152_spill] sm:$0xff] %v13768_v58  ;;  %v16171_v58 = vld [vmem:[#allocation76_spill] sm:$0xff]  ;;  %v4882_v57 = vmax.f32 %v16178_v37, 0.0 }
 0x96d   :  { %7691 = vst [vmem:[#allocation2 + $0x168] sm:$0xff] %v7235_v19   ;;  %v4879_v26 = vmax.f32 %v16171_v58, 0.0  ;;  %v13786_v19 = vadd.f32 %v13602_v60, %v16172_v59  ;;  %v16182_v59 = vld [vmem:[#allocation86_spill] sm:$0xff]  ;;  %v7280_v14 = vpack.c.bf16 %v4877_v48, %v4876_v12  ;;  %v16192_v48 = vld [vmem:[#allocation115_spill] sm:$0xff] }
 0x96e   :  { %16165 = vst [vmem:[#allocation154_spill] sm:$0xff] %v13774_v9  ;;  %v16175_v9 = vld [vmem:[#allocation80_spill] sm:$0xff]  ;;  %v4884_v35 = vmax.f32 %v16182_v59, 0.0 }
 0x96f   :  { %7692 = vst [vmem:[#allocation2 + $0x170] sm:$0xff] %v7240_v3   ;;  %v4881_v46 = vmax.f32 %v16175_v9, 0.0  ;;  %v13792_v3 = vadd.f32 %v13602_v60, %v16176_v17  ;;  %v16186_v17 = vld [vmem:[#allocation90_spill] sm:$0xff]  ;;  %v7285_v47 = vpack.c.bf16 %v4879_v26, %v4878_v55  ;;  %v16196_v26 = vld [vmem:[#allocation117_spill] sm:$0xff] }
 0x970   :  { %16169 = vst [vmem:[#allocation156_spill] sm:$0xff] %v13780_v22  ;;  %v16179_v22 = vld [vmem:[#allocation84_spill] sm:$0xff]  ;;  %v4886_v37 = vmax.f32 %v16186_v17, 0.0 }
 0x971   :  { %7693 = vst [vmem:[#allocation2 + $0x178] sm:$0xff] %v7245_v13   ;;  %v4883_v58 = vmax.f32 %v16179_v22, 0.0  ;;  %v13798_v13 = vadd.f32 %v13602_v60, %v16180_v5  ;;  %v16190_v5 = vld [vmem:[#allocation94_spill] sm:$0xff]  ;;  %v7290_v12 = vpack.c.bf16 %v4881_v46, %v4880_v54  ;;  %v16200_v46 = vld [vmem:[#allocation119_spill] sm:$0xff] }
 0x972   :  { %16173 = vst [vmem:[#allocation158_spill] sm:$0xff] %v13786_v19  ;;  %v16183_v19 = vld [vmem:[#allocation88_spill] sm:$0xff]  ;;  %v4888_v59 = vmax.f32 %v16190_v5, 0.0 }
 0x973   :  { %7694 = vst [vmem:[#allocation2 + $0x180] sm:$0xff] %v7250_v62   ;;  %v4885_v9 = vmax.f32 %v16183_v19, 0.0  ;;  %v13804_v62 = vadd.f32 %v13602_v60, %v16184_v30  ;;  %v16194_v30 = vld [vmem:[#allocation98_spill] sm:$0xff]  ;;  %v7295_v55 = vpack.c.bf16 %v4883_v58, %v4882_v57  ;;  %v16204_v58 = vld [vmem:[#allocation121_spill] sm:$0xff] }
 0x974   :  { %16177 = vst [vmem:[#allocation160_spill] sm:$0xff] %v13792_v3  ;;  %v16187_v3 = vld [vmem:[#allocation92_spill] sm:$0xff]  ;;  %v4890_v17 = vmax.f32 %v16194_v30, 0.0 }
 0x975   :  { %7695 = vst [vmem:[#allocation2 + $0x188] sm:$0xff] %v7255_v41   ;;  %v4887_v22 = vmax.f32 %v16187_v3, 0.0  ;;  %v13810_v41 = vadd.f32 %v13602_v60, %v16188_v36  ;;  %v16198_v36 = vld [vmem:[#allocation102_spill] sm:$0xff]  ;;  %v7300_v54 = vpack.c.bf16 %v4885_v9, %v4884_v35  ;;  %v16208_v9 = vld [vmem:[#allocation123_spill] sm:$0xff] }
 0x976   :  { %16181 = vst [vmem:[#allocation162_spill] sm:$0xff] %v13798_v13  ;;  %v16191_v13 = vld [vmem:[#allocation96_spill] sm:$0xff]  ;;  %v4892_v5 = vmax.f32 %v16198_v36, 0.0 }
 0x977   :  { %7696 = vst [vmem:[#allocation2 + $0x190] sm:$0xff] %v7260_v39   ;;  %v4889_v19 = vmax.f32 %v16191_v13, 0.0  ;;  %v13816_v39 = vadd.f32 %v13602_v60, %v16192_v48  ;;  %v16202_v48 = vld [vmem:[#allocation106_spill] sm:$0xff]  ;;  %v7305_v57 = vpack.c.bf16 %v4887_v22, %v4886_v37  ;;  %v16212_v22 = vld [vmem:[#allocation125_spill] sm:$0xff] }
 0x978   :  { %16185 = vst [vmem:[#allocation164_spill] sm:$0xff] %v13804_v62  ;;  %v16195_v62 = vld [vmem:[#allocation100_spill] sm:$0xff]  ;;  %v4894_v30 = vmax.f32 %v16202_v48, 0.0 }
 0x979   :  { %7697 = vst [vmem:[#allocation2 + $0x198] sm:$0xff] %v7265_v63   ;;  %v4891_v3 = vmax.f32 %v16195_v62, 0.0  ;;  %v13822_v63 = vadd.f32 %v13602_v60, %v16196_v26  ;;  %v16206_v26 = vld [vmem:[#allocation110_spill] sm:$0xff]  ;;  %v7310_v35 = vpack.c.bf16 %v4889_v19, %v4888_v59  ;;  %v16216_v19 = vld [vmem:[#allocation127_spill] sm:$0xff] }
 0x97a   :  { %16189 = vst [vmem:[#allocation166_spill] sm:$0xff] %v13810_v41  ;;  %v16199_v41 = vld [vmem:[#allocation104_spill] sm:$0xff]  ;;  %v4896_v36 = vmax.f32 %v16206_v26, 0.0 }
 0x97b   :  { %7698 = vst [vmem:[#allocation2 + $0x1a0] sm:$0xff] %v7270_v20   ;;  %v4893_v13 = vmax.f32 %v16199_v41, 0.0  ;;  %v13828_v20 = vadd.f32 %v13602_v60, %v16200_v46  ;;  %v16210_v46 = vld [vmem:[#allocation114_spill] sm:$0xff]  ;;  %v7315_v37 = vpack.c.bf16 %v4891_v3, %v4890_v17  ;;  %v16219_v3 = vld [vmem:[#allocation129_spill] sm:$0xff] }
 0x97c   :  { %16193 = vst [vmem:[#allocation168_spill] sm:$0xff] %v13816_v39  ;;  %v16203_v39 = vld [vmem:[#allocation108_spill] sm:$0xff]  ;;  %v4898_v48 = vmax.f32 %v16210_v46, 0.0 }
 0x97d   :  { %7699 = vst [vmem:[#allocation2 + $0x1a8] sm:$0xff] %v7275_v24   ;;  %v4895_v62 = vmax.f32 %v16203_v39, 0.0  ;;  %v13834_v24 = vadd.f32 %v13602_v60, %v16204_v58  ;;  %v16214_v58 = vld [vmem:[#allocation118_spill] sm:$0xff]  ;;  %v7320_v59 = vpack.c.bf16 %v4893_v13, %v4892_v5  ;;  %v16222_v13 = vld [vmem:[#allocation223_spill] sm:$0xff] }
 0x97e   :  { %16197 = vst [vmem:[#allocation170_spill] sm:$0xff] %v13822_v63  ;;  %v16207_v63 = vld [vmem:[#allocation112_spill] sm:$0xff]  ;;  %v4900_v26 = vmax.f32 %v16214_v58, 0.0 }
 0x97f   :  { %7700 = vst [vmem:[#allocation2 + $0x1b0] sm:$0xff] %v7280_v14   ;;  %v4897_v41 = vmax.f32 %v16207_v63, 0.0  ;;  %v13840_v14 = vadd.f32 %v13602_v60, %v16208_v9  ;;  %v16217_v9 = vld [vmem:[#allocation122_spill] sm:$0xff]  ;;  %v7325_v17 = vpack.c.bf16 %v4895_v62, %v4894_v30  ;;  %v16223_v62 = vld [vmem:[#allocation224_spill] sm:$0xff] }
 0x980   :  { %16201 = vst [vmem:[#allocation172_spill] sm:$0xff] %v13828_v20  ;;  %v16211_v20 = vld [vmem:[#allocation116_spill] sm:$0xff]  ;;  %v4902_v46 = vmax.f32 %v16217_v9, 0.0  ;;  %v4908_v9 = vmax.f32 %v13499_v32, 0.0  ;;  %v4912_v32 = vmax.f32 %v13523_v29, 0.0  ;;  %v4916_v29 = vmax.f32 %v13547_v49, 0.0 }
 0x981   :  { %7701 = vst [vmem:[#allocation2 + $0x1b8] sm:$0xff] %v7285_v47   ;;  %v4899_v39 = vmax.f32 %v16211_v20, 0.0  ;;  %v13846_v47 = vadd.f32 %v13602_v60, %v16212_v22  ;;  %v16220_v22 = vld [vmem:[#allocation126_spill] sm:$0xff]  ;;  %v7330_v5 = vpack.c.bf16 %v4897_v41, %v4896_v36  ;;  %v16224_v41 = vld [vmem:[#allocation131_spill] sm:$0xff]  ;;  %v4920_v49 = vmax.f32 %v13571_v27, 0.0 }
 0x982   :  { %16205 = vst [vmem:[#allocation173_spill] sm:$0xff] %v13834_v24  ;;  %v16215_v24 = vld [vmem:[#allocation120_spill] sm:$0xff]  ;;  %v4904_v58 = vmax.f32 %v16220_v22, 0.0  ;;  %v16228_v22 = vld [vmem:[#allocation227_spill] sm:$0xff]  ;;  %v4924_v27 = vmax.f32 %v13595_v23, 0.0  ;;  %v4928_v23 = vmax.f32 %v13624_v28, 0.0 }
 0x983   :  { %7702 = vst [vmem:[#allocation2 + $0x1c0] sm:$0xff] %v7290_v12   ;;  %v4901_v63 = vmax.f32 %v16215_v24, 0.0  ;;  %v13852_v12 = vadd.f32 %v13602_v60, %v16216_v19  ;;  %v4906_v19 = vmax.f32 %v13487_v7, 0.0  ;;  %v7335_v30 = vpack.c.bf16 %v4899_v39, %v4898_v48  ;;  %v16225_v39 = vld [vmem:[#allocation133_spill] sm:$0xff] }
 0x984   :  { %16209 = vst [vmem:[#allocation174_spill] sm:$0xff] %v13840_v14  ;;  %v16218_v14 = vld [vmem:[#allocation124_spill] sm:$0xff]  ;;  %v4910_v7 = vmax.f32 %v13511_v42, 0.0  ;;  %v4914_v42 = vmax.f32 %v13535_v44, 0.0  ;;  %v4918_v44 = vmax.f32 %v13559_v8, 0.0  ;;  %v4922_v8 = vmax.f32 %v13583_v1, 0.0 }
 0x985   :  { %7703 = vst [vmem:[#allocation2 + $0x1c8] sm:$0xff] %v7295_v55   ;;  %v4903_v20 = vmax.f32 %v16218_v14, 0.0  ;;  %v13858_v55 = vadd.f32 %v13602_v60, %v16219_v3  ;;  %v4907_v14 = vmax.f32 %v13493_v40, 0.0  ;;  %v7340_v36 = vpack.c.bf16 %v4901_v63, %v4900_v26  ;;  %v16226_v63 = vld [vmem:[#allocation225_spill] sm:$0xff] }
 0x986   :  { %16213 = vst [vmem:[#allocation175_spill] sm:$0xff] %v13846_v47  ;;  %v16221_v47 = vld [vmem:[#allocation128_spill] sm:$0xff]  ;;  %v4911_v40 = vmax.f32 %v13517_v21, 0.0  ;;  %v4915_v21 = vmax.f32 %v13541_v0, 0.0  ;;  %v4919_v0 = vmax.f32 %v13565_v52, 0.0  ;;  %v4923_v52 = vmax.f32 %v13589_v56, 0.0 }
 0x987   :  { %7704 = vst [vmem:[#allocation2 + $0x1d0] sm:$0xff] %v7300_v54   ;;  %v4905_v24 = vmax.f32 %v16221_v47, 0.0  ;;  %v13864_v54 = vadd.f32 %v13602_v60, %v16222_v13  ;;  %v4909_v47 = vmax.f32 %v13505_v11, 0.0  ;;  %v7345_v48 = vpack.c.bf16 %v4903_v20, %v4902_v46  ;;  %v16227_v20 = vld [vmem:[#allocation226_spill] sm:$0xff] }
 0x988   :  { %7705 = vst [vmem:[#allocation2 + $0x1d8] sm:$0xff] %v7305_v57   ;;  %v13870_v57 = vadd.f32 %v13602_v60, %v16223_v62  ;;  %v4913_v11 = vmax.f32 %v13529_v61, 0.0  ;;  %v7355_v46 = vpack.c.bf16 %v4907_v14, %v4906_v19  ;;  %v4917_v61 = vmax.f32 %v13553_v4, 0.0  ;;  %v16230_v14 = vld [vmem:[#allocation229_spill] sm:$0xff] }
 0x989   :  { %7706 = vst [vmem:[#allocation2 + $0x1e0] sm:$0xff] %v7310_v35   ;;  %v13876_v35 = vadd.f32 %v13602_v60, %v16224_v41  ;;  %v7350_v26 = vpack.c.bf16 %v4905_v24, %v4904_v58  ;;  %v7360_v3 = vpack.c.bf16 %v4909_v47, %v4908_v9  ;;  %v13900_v58 = vadd.f32 %v13602_v60, %v16228_v22  ;;  %v16231_v9 = vld [vmem:[#allocation230_spill] sm:$0xff]  ;;  %v16232_v41 = vld [vmem:[#allocation231_spill] sm:$0xff] }
 0x98a   :  { %7707 = vst [vmem:[#allocation2 + $0x1e8] sm:$0xff] %v7315_v37   ;;  %v13882_v37 = vadd.f32 %v13602_v60, %v16225_v39  ;;  %v7365_v24 = vpack.c.bf16 %v4911_v40, %v4910_v7  ;;  %v4921_v4 = vmax.f32 %v13577_v18, 0.0  ;;  %v7370_v19 = vpack.c.bf16 %v4913_v11, %v4912_v32  ;;  %v16234_v11 = vld [vmem:[#allocation233_spill] sm:$0xff] }
 0x98b   :  { %7708 = vst [vmem:[#allocation2 + $0x1f0] sm:$0xff] %v7320_v59   ;;  %v13888_v59 = vadd.f32 %v13602_v60, %v16226_v63  ;;  %v7375_v62 = vpack.c.bf16 %v4915_v21, %v4914_v42  ;;  %v13918_v47 = vadd.f32 %v13602_v60, %v16231_v9  ;;  %v4925_v18 = vmax.f32 %v13606_v43, 0.0  ;;  %v16235_v42 = vld [vmem:[#allocation135_spill] sm:$0xff]  ;;  %v16243_v9 = vld [vmem:[#allocation134_spill] sm:$0xff] }
 0x98c   :  { %7709 = vst [vmem:[#allocation2 + $0x1f8] sm:$0xff] %v7325_v17   ;;  %v13894_v17 = vadd.f32 %v13602_v60, %v16227_v20  ;;  %v13924_v7 = vadd.f32 %v13602_v60, %v16232_v41  ;;  %v4926_v1 = vmax.f32 %v13612_v31, 0.0  ;;  %v4927_v56 = vmax.f32 %v13618_v38, 0.0  ;;  %v16236_v20 = vld [vmem:[#allocation234_spill] sm:$0xff]  ;;  %v16245_v41 = vld [vmem:[#allocation136_spill] sm:$0xff] }
 0x98d   :  { %7710 = vst [vmem:[#allocation2 + $0x200] sm:$0xff] %v7330_v5   ;;  %v16229_v5 = vld [vmem:[#allocation228_spill] sm:$0xff]  ;;  %v7385_v40 = vpack.c.bf16 %v4919_v0, %v4918_v44  ;;  %v4929_v43 = vmax.f32 %v13630_v45, 0.0  ;;  %v7390_v32 = vpack.c.bf16 %v4921_v4, %v4920_v49  ;;  %v4930_v31 = vmax.f32 %v13636_v10, 0.0  ;;  %v16239_v49 = vld [vmem:[#allocation137_spill] sm:$0xff] }
 0x98e   :  { %7711 = vst [vmem:[#allocation2 + $0x208] sm:$0xff] %v7335_v30   ;;  %v13906_v13 = vadd.f32 %v13602_v60, %v16229_v5  ;;  %v13912_v30 = vadd.f32 %v13602_v60, %v16230_v14  ;;  %v4931_v38 = vmax.f32 %v13642_v34, 0.0  ;;  %v7395_v63 = vpack.c.bf16 %v4923_v52, %v4922_v8  ;;  %v16238_v0 = vld [vmem:[#allocation236_spill] sm:$0xff]  ;;  %v16241_v8 = vld [vmem:[#allocation237_spill] sm:$0xff] }
 0x98f   :  { %7712 = vst [vmem:[#allocation2 + $0x210] sm:$0xff] %v7340_v36   ;;  %v7380_v36 = vpack.c.bf16 %v4917_v61, %v4916_v29  ;;  %v13942_v21 = vadd.f32 %v13602_v60, %v16235_v42  ;;  %v4932_v28 = vmax.f32 %v13648_v33, 0.0  ;;  %v4933_v45 = vmax.f32 %v13654_v53, 0.0 }
 0x990   :  { %7713 = vst [vmem:[#allocation2 + $0x218] sm:$0xff] %v7345_v48   ;;  %v16233_v48 = vld [vmem:[#allocation232_spill] sm:$0xff]  ;;  %v13948_v29 = vadd.f32 %v13602_v60, %v16236_v20  ;;  %v4934_v10 = vmax.f32 %v13660_v16, 0.0  ;;  %v4935_v34 = vmax.f32 %v13666_v2, 0.0  ;;  %v7405_v61 = vpack.c.bf16 %v4927_v56, %v4926_v1  ;;  %v16246_v1 = vld [vmem:[#allocation138_spill] sm:$0xff] }
 0x991   :  { %7714 = vst [vmem:[#allocation2 + $0x220] sm:$0xff] %v7350_v26   ;;  %v13930_v39 = vadd.f32 %v13602_v60, %v16233_v48  ;;  %v13936_v26 = vadd.f32 %v13602_v60, %v16234_v11  ;;  %v4936_v33 = vmax.f32 %v13672_v50, 0.0  ;;  %v4937_v53 = vmax.f32 %v13678_v15, 0.0  ;;  %v16247_v48 = vld [vmem:[#allocation139_spill] sm:$0xff]  ;;  %v16249_v11 = vld [vmem:[#allocation142_spill] sm:$0xff] }
 0x992   :  { %7715 = vst [vmem:[#allocation2 + $0x228] sm:$0xff] %v7355_v46   ;;  %v7400_v46 = vpack.c.bf16 %v4925_v18, %v4924_v27  ;;  %v7410_v44 = vpack.c.bf16 %v4929_v43, %v4928_v23  ;;  %v4938_v16 = vmax.f32 %v13684_v25, 0.0  ;;  %v4939_v2 = vmax.f32 %v13690_v6, 0.0  ;;  %v16244_v18 = vld [vmem:[#allocation238_spill] sm:$0xff]  ;;  %v16248_v43 = vld [vmem:[#allocation140_spill] sm:$0xff] }
 0x993   :  { %7716 = vst [vmem:[#allocation2 + $0x230] sm:$0xff] %v7360_v3   ;;  %v16237_v3 = vld [vmem:[#allocation235_spill] sm:$0xff]  ;;  %v7415_v5 = vpack.c.bf16 %v4931_v38, %v4930_v31  ;;  %v13966_v4 = vadd.f32 %v13602_v60, %v16239_v49  ;;  %v4940_v50 = vmax.f32 %v13696_v51, 0.0  ;;  %v7420_v14 = vpack.c.bf16 %v4933_v45, %v4932_v28  ;;  %v16251_v28 = vld [vmem:[#allocation144_spill] sm:$0xff] }
 0x994   :  { %7717 = vst [vmem:[#allocation2 + $0x238] sm:$0xff] %v7365_v24   ;;  %v13954_v22 = vadd.f32 %v13602_v60, %v16237_v3  ;;  %v13960_v24 = vadd.f32 %v13602_v60, %v16238_v0  ;;  %v13972_v52 = vadd.f32 %v13602_v60, %v16241_v8  ;;  %v4943_v6 = vmax.f32 %v16243_v9, 0.0  ;;  %v16254_v3 = vld [vmem:[#allocation148_spill] sm:$0xff] }
 0x995   :  { %7718 = vst [vmem:[#allocation2 + $0x240] sm:$0xff] %v7370_v19   ;;  %v16240_v19 = vld [vmem:[#allocation130_spill] sm:$0xff]  ;;  %v7425_v27 = vpack.c.bf16 %v4935_v34, %v4934_v10  ;;  %v4944_v51 = vmax.f32 %v16245_v41, 0.0  ;;  %v4945_v56 = vmax.f32 %v16246_v1, 0.0  ;;  %v13984_v23 = vadd.f32 %v13602_v60, %v16247_v48  ;;  %v16253_v34 = vld [vmem:[#allocation141_spill] sm:$0xff]  ;;  %v16263_v1 = vld [vmem:[#allocation160_spill] sm:$0xff] }
 0x996   :  { %7719 = vst [vmem:[#allocation2 + $0x248] sm:$0xff] %v7375_v62   ;;  %v4941_v15 = vmax.f32 %v16240_v19, 0.0  ;;  %v16242_v62 = vld [vmem:[#allocation132_spill] sm:$0xff]  ;;  %v4947_v31 = vmax.f32 %v16249_v11, 0.0  ;;  %v7435_v38 = vpack.c.bf16 %v4939_v2, %v4938_v16  ;;  %v4948_v45 = vmax.f32 %v16251_v28, 0.0  ;;  %v16256_v16 = vld [vmem:[#allocation143_spill] sm:$0xff] }
 0x997   :  { %7720 = vst [vmem:[#allocation2 + $0x250] sm:$0xff] %v7380_v36   ;;  %v4942_v25 = vmax.f32 %v16242_v62, 0.0  ;;  %v13978_v36 = vadd.f32 %v13602_v60, %v16244_v18  ;;  %v14002_v2 = vadd.f32 %v13602_v60, %v16256_v16  ;;  %v16258_v19 = vld [vmem:[#allocation154_spill] sm:$0xff]  ;;  %v16260_v62 = vld [vmem:[#allocation156_spill] sm:$0xff]  ;;  %v4956_v48 = vmax.f32 %v16263_v1, 0.0 }
 0x998   :  { %7721 = vst [vmem:[#allocation2 + $0x258] sm:$0xff] %v7385_v40   ;;  %v7430_v40 = vpack.c.bf16 %v4937_v53, %v4936_v33  ;;  %v7440_v10 = vpack.c.bf16 %v4941_v15, %v4940_v50  ;;  %v4950_v33 = vmax.f32 %v16254_v3, 0.0  ;;  %v16255_v53 = vld [vmem:[#allocation150_spill] sm:$0xff]  ;;  %v4953_v8 = vmax.f32 %v16258_v19, 0.0  ;;  %v16259_v15 = vld [vmem:[#allocation240_spill] sm:$0xff] }
 0x999   :  { %7722 = vst [vmem:[#allocation2 + $0x260] sm:$0xff] %v7390_v32   ;;  %v4946_v32 = vmax.f32 %v16248_v43, 0.0  ;;  %v7445_v0 = vpack.c.bf16 %v4943_v6, %v4942_v25  ;;  %v7450_v50 = vpack.c.bf16 %v4945_v56, %v4944_v51  ;;  %v4954_v9 = vmax.f32 %v16260_v62, 0.0  ;;  %v16261_v18 = vld [vmem:[#allocation158_spill] sm:$0xff]  ;;  %v16262_v6 = vld [vmem:[#allocation145_spill] sm:$0xff]  ;;  %v16265_v56 = vld [vmem:[#allocation147_spill] sm:$0xff] }
 0x99a   :  { %7723 = vst [vmem:[#allocation2 + $0x268] sm:$0xff] %v7395_v63   ;;  %v16250_v63 = vld [vmem:[#allocation239_spill] sm:$0xff]  ;;  %v4955_v41 = vmax.f32 %v16261_v18, 0.0  ;;  %v16264_v43 = vld [vmem:[#allocation162_spill] sm:$0xff]  ;;  %v16269_v3 = vld [vmem:[#allocation168_spill] sm:$0xff] }
 0x99b   :  { %7724 = vst [vmem:[#allocation2 + $0x270] sm:$0xff] %v7400_v46   ;;  %v13990_v42 = vadd.f32 %v13602_v60, %v16250_v63  ;;  %v16252_v46 = vld [vmem:[#allocation146_spill] sm:$0xff]  ;;  %v7455_v25 = vpack.c.bf16 %v4947_v31, %v4946_v32  ;;  %v4957_v11 = vmax.f32 %v16264_v43, 0.0  ;;  %v16266_v63 = vld [vmem:[#allocation164_spill] sm:$0xff]  ;;  %v16268_v31 = vld [vmem:[#allocation149_spill] sm:$0xff] }
 0x99c   :  { %7725 = vst [vmem:[#allocation2 + $0x278] sm:$0xff] %v7405_v61   ;;  %v4949_v20 = vmax.f32 %v16252_v46, 0.0  ;;  %v13996_v61 = vadd.f32 %v13602_v60, %v16253_v34  ;;  %v4958_v28 = vmax.f32 %v16266_v63, 0.0  ;;  %v16267_v46 = vld [vmem:[#allocation166_spill] sm:$0xff]  ;;  %v16272_v19 = vld [vmem:[#allocation172_spill] sm:$0xff]  ;;  %v16273_v62 = vld [vmem:[#allocation173_spill] sm:$0xff] }
 0x99d   :  { %7726 = vst [vmem:[#allocation2 + $0x280] sm:$0xff] %v7410_v44   ;;  %v4951_v44 = vmax.f32 %v16255_v53, 0.0  ;;  %v4959_v34 = vmax.f32 %v16267_v46, 0.0  ;;  %v4960_v53 = vmax.f32 %v16269_v3, 0.0  ;;  %v16270_v16 = vld [vmem:[#allocation170_spill] sm:$0xff]  ;;  %v4963_v18 = vmax.f32 %v16273_v62, 0.0 }
 0x99e   :  { %7727 = vst [vmem:[#allocation2 + $0x288] sm:$0xff] %v7415_v5   ;;  %v16257_v5 = vld [vmem:[#allocation152_spill] sm:$0xff]  ;;  %v7460_v51 = vpack.c.bf16 %v4949_v20, %v4948_v45  ;;  %v16271_v20 = vld [vmem:[#allocation151_spill] sm:$0xff]  ;;  %v4966_v63 = vmax.f32 %v13852_v12, 0.0  ;;  %v4967_v46 = vmax.f32 %v13858_v55, 0.0  ;;  %v4969_v3 = vmax.f32 %v13870_v57, 0.0 }
 0x99f   :  { %7728 = vst [vmem:[#allocation2 + $0x290] sm:$0xff] %v7420_v14   ;;  %v4952_v49 = vmax.f32 %v16257_v5, 0.0  ;;  %v14008_v14 = vadd.f32 %v13602_v60, %v16259_v15  ;;  %v7465_v32 = vpack.c.bf16 %v4951_v44, %v4950_v33  ;;  %v4961_v5 = vmax.f32 %v16270_v16, 0.0  ;;  %v16274_v44 = vld [vmem:[#allocation241_spill] sm:$0xff]  ;;  %v16276_v43 = vld [vmem:[#allocation175_spill] sm:$0xff]  ;;  %v16281_v16 = vld [vmem:[#allocation242_spill] sm:$0xff] }
 0x9a0   :  { %7729 = vst [vmem:[#allocation2 + $0x298] sm:$0xff] %v7425_v27   ;;  %v14014_v27 = vadd.f32 %v13602_v60, %v16262_v6  ;;  %v4962_v15 = vmax.f32 %v16272_v19, 0.0  ;;  %v7475_v33 = vpack.c.bf16 %v4955_v41, %v4954_v9  ;;  %v16275_v6 = vld [vmem:[#allocation174_spill] sm:$0xff]  ;;  %v7485_v9 = vpack.c.bf16 %v4959_v34, %v4958_v28  ;;  %v16278_v41 = vld [vmem:[#allocation163_spill] sm:$0xff]  ;;  %v16280_v34 = vld [vmem:[#allocation184_spill] sm:$0xff] }
 0x9a1   :  { %7730 = vst [vmem:[#allocation2 + $0x2a0] sm:$0xff] %v7430_v40   ;;  %v14020_v40 = vadd.f32 %v13602_v60, %v16265_v56  ;;  %v7470_v45 = vpack.c.bf16 %v4953_v8, %v4952_v49  ;;  %v4964_v1 = vmax.f32 %v16275_v6, 0.0  ;;  %v4965_v56 = vmax.f32 %v16276_v43, 0.0  ;;  %v16277_v8 = vld [vmem:[#allocation153_spill] sm:$0xff]  ;;  %v16283_v62 = vld [vmem:[#allocation195_spill] sm:$0xff]  ;;  %v16285_v43 = vld [vmem:[#allocation198_spill] sm:$0xff] }
 0x9a2   :  { %7731 = vst [vmem:[#allocation2 + $0x2a8] sm:$0xff] %v7435_v38   ;;  %v14026_v38 = vadd.f32 %v13602_v60, %v16268_v31  ;;  %v7480_v49 = vpack.c.bf16 %v4957_v11, %v4956_v48  ;;  %v4968_v31 = vmax.f32 %v13864_v54, 0.0  ;;  %v7490_v48 = vpack.c.bf16 %v4961_v5, %v4960_v53  ;;  %v16279_v11 = vld [vmem:[#allocation182_spill] sm:$0xff] }
 0x9a3   :  { %7732 = vst [vmem:[#allocation2 + $0x2b0] sm:$0xff] %v7440_v10   ;;  %v14032_v10 = vadd.f32 %v13602_v60, %v16271_v20  ;;  %v4970_v12 = vmax.f32 %v13876_v35, 0.0  ;;  %v4971_v55 = vmax.f32 %v13882_v37, 0.0  ;;  %v7495_v28 = vpack.c.bf16 %v4963_v18, %v4962_v15  ;;  %v16282_v20 = vld [vmem:[#allocation243_spill] sm:$0xff] }
 0x9a4   :  { %7733 = vst [vmem:[#allocation2 + $0x2b8] sm:$0xff] %v7445_v0   ;;  %v14038_v0 = vadd.f32 %v13602_v60, %v16274_v44  ;;  %v4972_v54 = vmax.f32 %v13888_v59, 0.0  ;;  %v4973_v57 = vmax.f32 %v13894_v17, 0.0  ;;  %v7500_v53 = vpack.c.bf16 %v4965_v56, %v4964_v1  ;;  %v16284_v44 = vld [vmem:[#allocation197_spill] sm:$0xff] }
 0x9a5   :  { %7734 = vst [vmem:[#allocation2 + $0x2c0] sm:$0xff] %v7450_v50   ;;  %v14044_v50 = vadd.f32 %v13602_v60, %v16277_v8  ;;  %v14068_v5 = vadd.f32 %v13602_v60, %v16281_v16  ;;  %v4974_v35 = vmax.f32 %v13900_v58, 0.0  ;;  %v4975_v37 = vmax.f32 %v13906_v13, 0.0  ;;  %v16286_v8 = vld [vmem:[#allocation244_spill] sm:$0xff] }
 0x9a6   :  { %7735 = vst [vmem:[#allocation2 + $0x2c8] sm:$0xff] %v7455_v25   ;;  %v14050_v25 = vadd.f32 %v13602_v60, %v16278_v41  ;;  %v14074_v19 = vadd.f32 %v13602_v60, %v16282_v20  ;;  %v4976_v59 = vmax.f32 %v13912_v30, 0.0  ;;  %v4977_v17 = vmax.f32 %v13918_v47, 0.0 }
 0x9a7   :  { %7736 = vst [vmem:[#allocation2 + $0x2d0] sm:$0xff] %v7460_v51   ;;  %v14056_v51 = vadd.f32 %v13602_v60, %v16279_v11  ;;  %v7510_v15 = vpack.c.bf16 %v4969_v3, %v4968_v31  ;;  %v14080_v18 = vadd.f32 %v13602_v60, %v16283_v62  ;;  %v4978_v58 = vmax.f32 %v13924_v7, 0.0  ;;  %v16288_v3 = vld [vmem:[#allocation246_spill] sm:$0xff] }
 0x9a8   :  { %7737 = vst [vmem:[#allocation2 + $0x2d8] sm:$0xff] %v7465_v32   ;;  %v14062_v32 = vadd.f32 %v13602_v60, %v16280_v34  ;;  %v4979_v13 = vmax.f32 %v13930_v39, 0.0  ;;  %v14086_v6 = vadd.f32 %v13602_v60, %v16284_v44  ;;  %v4980_v30 = vmax.f32 %v13936_v26, 0.0  ;;  %v16290_v34 = vld [vmem:[#allocation207_spill] sm:$0xff]  ;;  %v16294_v62 = vld [vmem:[#allocation214_spill] sm:$0xff] }
 0x9a9   :  { %7738 = vst [vmem:[#allocation2 + $0x2e0] sm:$0xff] %v7470_v45   ;;  %v7505_v45 = vpack.c.bf16 %v4967_v46, %v4966_v63  ;;  %v4981_v47 = vmax.f32 %v13942_v21, 0.0  ;;  %v7520_v1 = vpack.c.bf16 %v4973_v57, %v4972_v54  ;;  %v14092_v56 = vadd.f32 %v13602_v60, %v16285_v43 }
 0x9aa   :  { %7739 = vst [vmem:[#allocation2 + $0x2e8] sm:$0xff] %v7475_v33   ;;  %v7515_v33 = vpack.c.bf16 %v4971_v55, %v4970_v12  ;;  %v4982_v7 = vmax.f32 %v13948_v29, 0.0  ;;  %v4983_v39 = vmax.f32 %v13954_v22, 0.0  ;;  %v14098_v63 = vadd.f32 %v13602_v60, %v16286_v8  ;;  %v16289_v12 = vld [vmem:[#allocation247_spill] sm:$0xff]  ;;  %v16298_v8 = vld [vmem:[#allocation218_spill] sm:$0xff] }
 0x9ab   :  { %7740 = vst [vmem:[#allocation2 + $0x2f0] sm:$0xff] %v7480_v49   ;;  %v7525_v49 = vpack.c.bf16 %v4975_v37, %v4974_v35  ;;  %v4984_v26 = vmax.f32 %v13960_v24, 0.0  ;;  %v4985_v21 = vmax.f32 %v13966_v4, 0.0  ;;  %v7530_v46 = vpack.c.bf16 %v4977_v17, %v4976_v59  ;;  %v16292_v37 = vld [vmem:[#allocation212_spill] sm:$0xff]  ;;  %v16293_v59 = vld [vmem:[#allocation213_spill] sm:$0xff] }
 0x9ac   :  { %7741 = vst [vmem:[#allocation2 + $0x2f8] sm:$0xff] %v7485_v9   ;;  %v16287_v9 = vld [vmem:[#allocation245_spill] sm:$0xff]  ;;  %v4986_v29 = vmax.f32 %v13972_v52, 0.0  ;;  %v4987_v22 = vmax.f32 %v13978_v36, 0.0  ;;  %v7535_v31 = vpack.c.bf16 %v4979_v13, %v4978_v58  ;;  %v4988_v24 = vmax.f32 %v13984_v23, 0.0 }
 0x9ad   :  { %7742 = vst [vmem:[#allocation2 + $0x300] sm:$0xff] %v7490_v48   ;;  %v14104_v41 = vadd.f32 %v13602_v60, %v16287_v9  ;;  %v14110_v48 = vadd.f32 %v13602_v60, %v16288_v3  ;;  %v4989_v4 = vmax.f32 %v13990_v42, 0.0  ;;  %v7540_v11 = vpack.c.bf16 %v4981_v47, %v4980_v30  ;;  %v16296_v47 = vld [vmem:[#allocation216_spill] sm:$0xff] }
 0x9ae   :  { %7743 = vst [vmem:[#allocation2 + $0x308] sm:$0xff] %v7495_v28   ;;  %v14116_v55 = vadd.f32 %v13602_v60, %v16289_v12  ;;  %v4990_v52 = vmax.f32 %v13996_v61, 0.0  ;;  %v4991_v36 = vmax.f32 %v14002_v2, 0.0  ;;  %v7545_v28 = vpack.c.bf16 %v4983_v39, %v4982_v7  ;;  %v16297_v7 = vld [vmem:[#allocation217_spill] sm:$0xff] }
 0x9af   :  { %7744 = vst [vmem:[#allocation2 + $0x310] sm:$0xff] %v7500_v53   ;;  %v14122_v54 = vadd.f32 %v13602_v60, %v16290_v34  ;;  %v4992_v23 = vmax.f32 %v14008_v14, 0.0  ;;  %v4993_v42 = vmax.f32 %v14014_v27, 0.0  ;;  %v7550_v57 = vpack.c.bf16 %v4985_v21, %v4984_v26  ;;  %v16291_v53 = vld [vmem:[#allocation211_spill] sm:$0xff] }
 0x9b0   :  { %7745 = vst [vmem:[#allocation2 + $0x318] sm:$0xff] %v7505_v45   ;;  %v14128_v16 = vadd.f32 %v13602_v60, %v16291_v53  ;;  %v4994_v61 = vmax.f32 %v14020_v40, 0.0  ;;  %v4995_v2 = vmax.f32 %v14026_v38, 0.0  ;;  %v7555_v35 = vpack.c.bf16 %v4987_v22, %v4986_v29  ;;  %v16300_v22 = vld [vmem:[#allocation220_spill] sm:$0xff] }
 0x9b1   :  { %7746 = vst [vmem:[#allocation2 + $0x320] sm:$0xff] %v7510_v15   ;;  %v4757_v45 = vadd.f32 %v13602_v60, %v16292_v37  ;;  %v4996_v20 = vmax.f32 %v14032_v10, 0.0  ;;  %v4997_v14 = vmax.f32 %v14038_v0, 0.0  ;;  %v7560_v27 = vpack.c.bf16 %v4989_v4, %v4988_v24 }
 0x9b2   :  { %7747 = vst [vmem:[#allocation2 + $0x328] sm:$0xff] %v7515_v33   ;;  %v4758_v17 = vadd.f32 %v13602_v60, %v16293_v59  ;;  %v4998_v15 = vmax.f32 %v14044_v50, 0.0  ;;  %v4999_v40 = vmax.f32 %v14050_v25, 0.0  ;;  %v7565_v38 = vpack.c.bf16 %v4991_v36, %v4990_v52  ;;  %v16295_v33 = vld [vmem:[#allocation215_spill] sm:$0xff] }
 0x9b3   :  { %7748 = vst [vmem:[#allocation2 + $0x330] sm:$0xff] %v7520_v1   ;;  %v4759_v58 = vadd.f32 %v13602_v60, %v16294_v62  ;;  %v5000_v13 = vmax.f32 %v14056_v51, 0.0  ;;  %v5001_v10 = vmax.f32 %v14062_v32, 0.0  ;;  %v7570_v0 = vpack.c.bf16 %v4993_v42, %v4992_v23 }
 0x9b4   :  { %7749 = vst [vmem:[#allocation2 + $0x338] sm:$0xff] %v7525_v49   ;;  %v4760_v44 = vadd.f32 %v13602_v60, %v16295_v33  ;;  %v5002_v30 = vmax.f32 %v14068_v5, 0.0  ;;  %v5003_v50 = vmax.f32 %v14074_v19, 0.0  ;;  %v7575_v25 = vpack.c.bf16 %v4995_v2, %v4994_v61 }
 0x9b5   :  { %7750 = vst [vmem:[#allocation2 + $0x340] sm:$0xff] %v7530_v46   ;;  %v4761_v1 = vadd.f32 %v13602_v60, %v16296_v47  ;;  %v5004_v43 = vmax.f32 %v14080_v18, 0.0  ;;  %v5005_v51 = vmax.f32 %v14086_v6, 0.0  ;;  %v7580_v32 = vpack.c.bf16 %v4997_v14, %v4996_v20  ;;  %v16299_v46 = vld [vmem:[#allocation219_spill] sm:$0xff] }
 0x9b6   :  { %7751 = vst [vmem:[#allocation2 + $0x348] sm:$0xff] %v7535_v31   ;;  %v4762_v39 = vadd.f32 %v13602_v60, %v16297_v7  ;;  %v5006_v49 = vmax.f32 %v14092_v56, 0.0  ;;  %v5007_v5 = vmax.f32 %v14098_v63, 0.0  ;;  %v7585_v19 = vpack.c.bf16 %v4999_v40, %v4998_v15 }
 0x9b7   :  { %7752 = vst [vmem:[#allocation2 + $0x350] sm:$0xff] %v7540_v11   ;;  %v4763_v26 = vadd.f32 %v13602_v60, %v16298_v8  ;;  %v5008_v21 = vmax.f32 %v14104_v41, 0.0  ;;  %v5009_v18 = vmax.f32 %v14110_v48, 0.0  ;;  %v7590_v6 = vpack.c.bf16 %v5001_v10, %v5000_v13 }
 0x9b8   :  { %7753 = vst [vmem:[#allocation2 + $0x358] sm:$0xff] %v7545_v28   ;;  %v4764_v9 = vadd.f32 %v13602_v60, %v16299_v46  ;;  %v5010_v29 = vmax.f32 %v14116_v55, 0.0  ;;  %v5011_v56 = vmax.f32 %v14122_v54, 0.0  ;;  %v7595_v63 = vpack.c.bf16 %v5003_v50, %v5002_v30 }
 0x9b9   :  { %7754 = vst [vmem:[#allocation2 + $0x360] sm:$0xff] %v7550_v57   ;;  %v4765_v31 = vadd.f32 %v13602_v60, %v16300_v22  ;;  %v5012_v3 = vmax.f32 %v14128_v16, 0.0  ;;  %v5013_v24 = vmax.f32 %v4757_v45, 0.0  ;;  %v7600_v41 = vpack.c.bf16 %v5005_v51, %v5004_v43 }
 0x9ba   :  { %7755 = vst [vmem:[#allocation2 + $0x368] sm:$0xff] %v7555_v35   ;;  %v5014_v48 = vmax.f32 %v4758_v17, 0.0  ;;  %v5015_v4 = vmax.f32 %v4759_v58, 0.0  ;;  %v7605_v11 = vpack.c.bf16 %v5007_v5, %v5006_v49  ;;  %v5016_v12 = vmax.f32 %v4760_v44, 0.0 }
 0x9bb   :  { %7756 = vst [vmem:[#allocation2 + $0x370] sm:$0xff] %v7560_v27   ;;  %v5017_v52 = vmax.f32 %v4761_v1, 0.0  ;;  %v7610_v55 = vpack.c.bf16 %v5009_v18, %v5008_v21  ;;  %v5018_v36 = vmax.f32 %v4762_v39, 0.0  ;;  %v5019_v28 = vmax.f32 %v4763_v26, 0.0 }
 0x9bc   :  { %7757 = vst [vmem:[#allocation2 + $0x378] sm:$0xff] %v7565_v38   ;;  %v7615_v34 = vpack.c.bf16 %v5011_v56, %v5010_v29  ;;  %v5020_v54 = vmax.f32 %v4764_v9, 0.0  ;;  %v5021_v23 = vmax.f32 %v4765_v31, 0.0  ;;  %v7620_v60 = vpack.c.bf16 %v5013_v24, %v5012_v3 }
 0x9bd   :  { %7758 = vst [vmem:[#allocation2 + $0x380] sm:$0xff] %v7570_v0   ;;  %v7625_v42 = vpack.c.bf16 %v5015_v4, %v5014_v48  ;;  %v7630_v57 = vpack.c.bf16 %v5017_v52, %v5016_v12  ;;  %v7635_v53 = vpack.c.bf16 %v5019_v28, %v5018_v36 }
 0x9be   :  { %7759 = vst [vmem:[#allocation2 + $0x388] sm:$0xff] %v7575_v25   ;;  %v7640_v16 = vpack.c.bf16 %v5021_v23, %v5020_v54 }
 0x9bf   :  { %7760 = vst [vmem:[#allocation2 + $0x390] sm:$0xff] %v7580_v32  }
 0x9c0   :  { %7761 = vst [vmem:[#allocation2 + $0x398] sm:$0xff] %v7585_v19  }
 0x9c1   :  { %7762 = vst [vmem:[#allocation2 + $0x3a0] sm:$0xff] %v7590_v6  }
 0x9c2   :  { %7763 = vst [vmem:[#allocation2 + $0x3a8] sm:$0xff] %v7595_v63  }
 0x9c3   :  { %7764 = vst [vmem:[#allocation2 + $0x3b0] sm:$0xff] %v7600_v41  }
 0x9c4   :  { %7765 = vst [vmem:[#allocation2 + $0x3b8] sm:$0xff] %v7605_v11  }
 0x9c5   :  { %7766 = vst [vmem:[#allocation2 + $0x3c0] sm:$0xff] %v7610_v55  }
 0x9c6   :  { %7767 = vst [vmem:[#allocation2 + $0x3c8] sm:$0xff] %v7615_v34  }
 0x9c7   :  { %7768 = vst [vmem:[#allocation2 + $0x3d0] sm:$0xff] %v7620_v60  }
 0x9c8   :  { %7769 = vst [vmem:[#allocation2 + $0x3d8] sm:$0xff] %v7625_v42  }
 0x9c9   :  { %7770 = vst [vmem:[#allocation2 + $0x3e0] sm:$0xff] %v7630_v57  }
 0x9ca   :  { %7771 = vst [vmem:[#allocation2 + $0x3e8] sm:$0xff] %v7635_v53  }
 0x9cb   :  { %7772 = vst [vmem:[#allocation2 + $0x3f0] sm:$0xff] %v7640_v16  }
 0x9cc   :  { %5548 = dma.vmem_to_hbm [thread:$0]  %s5541_s11, 16384, %s5543_s14, [#allocation3], %s7824_s15, %s7824_s15, %s7825_s16  }
 0x9cd   :  { %7819 = dma.done.wait [#allocation3], 16384  }
 0x9ce   :  { %7820 = vsyncadd [#allocation3], 4294950912 }
 0x9cf   :  { %5553 = vsyncpa [#allocation3], 1 }

</bundles_post_ra>
